<compile_context>
chip_gen: v5e
topology: v5e:2x2
jax: 0.10.0
libtpu: 0.0.40
codegen_flags: <defaults>
</compile_context>

<pallas_src>
import functools
import math

import jax
import jax.numpy as jnp
from jax.experimental import pallas as pl
from jax.experimental.pallas import tpu as pltpu


_W_NAMES = ("wqkv", "bqkv", "wo", "bo",
            "w1", "b1", "w2", "b2",
            "g1", "be1", "g2", "be2")


# ----------------------------------------------------------------------------
# in-kernel helpers
# ----------------------------------------------------------------------------
def _layer_norm(y, g, b, eps=1e-5):
    mu = jnp.mean(y, axis=-1, keepdims=True)
    var = jnp.mean((y - mu) ** 2, axis=-1, keepdims=True)
    return (y - mu) * jax.lax.rsqrt(var + eps) * g + b


def _encoder_layer(x, nhead, wqkv, bqkv, wo, bo,
                   w1, b1, w2, b2, g1, be1, g2, be2):
    """One post-LN nn.TransformerEncoderLayer (relu FFN, eval mode) on (B,S,D)."""
    B, S, D = x.shape
    hd = D // nhead
    scale = 1.0 / math.sqrt(hd)
    BS = B * S
    HB = nhead * B

    x2 = x.reshape(BS, D)

    # --- fused QKV projection: bf16 MXU operands, f32 accumulation ---
    qkv = jnp.dot(x2.astype(jnp.bfloat16), wqkv,
                  preferred_element_type=jnp.float32) + bqkv           # (BS, 3D)

    # --- head-batched q/k/v: (nhead*B, S, hd), batch index = h*B + b ---
    def split_heads(base):
        parts = [qkv[:, base + h * hd: base + (h + 1) * hd].reshape(1, B, S, hd)
                 for h in range(nhead)]
        return jnp.concatenate(parts, axis=0).reshape(HB, S, hd)

    q = split_heads(0)
    k = split_heads(D)
    v = split_heads(2 * D)

    # --- one batched score einsum + ONE fused softmax over all heads ---
    s = jnp.einsum('bqd,bkd->bqk',
                   q.astype(jnp.bfloat16), k.astype(jnp.bfloat16),
                   preferred_element_type=jnp.float32) * scale         # (HB, S, S)
    s = s - jnp.max(s, axis=-1, keepdims=True)
    p = jnp.exp(s)
    # approx reciprocal runs on the otherwise-idle EUP slot (eval-only tolerance)
    p = p * pl.reciprocal(jnp.sum(p, axis=-1, keepdims=True), approx=True)

    ctx = jnp.einsum('bqk,bkd->bqd',
                     p.astype(jnp.bfloat16), v.astype(jnp.bfloat16),
                     preferred_element_type=jnp.float32)               # (HB, S, hd)

    # --- reassemble heads along lanes, single output-projection matmul ---
    ctx2 = jnp.concatenate(
        [ctx[h * B:(h + 1) * B].reshape(BS, hd) for h in range(nhead)], axis=-1)
    attn = jnp.dot(ctx2.astype(jnp.bfloat16), wo,
                   preferred_element_type=jnp.float32) + bo            # (BS, D)

    # --- add & norm 1 ---
    y = _layer_norm(x2 + attn, g1, be1)

    # --- feed forward (relu), bf16 weights / f32 accumulation ---
    h1 = jnp.maximum(
        jnp.dot(y.astype(jnp.bfloat16), w1, preferred_element_type=jnp.float32) + b1,
        0.0)
    ff = jnp.dot(h1.astype(jnp.bfloat16), w2,
                 preferred_element_type=jnp.float32) + b2

    # --- add & norm 2 ---
    return _layer_norm(y + ff, g2, be2).reshape(B, S, D)


# ----------------------------------------------------------------------------
# fused kernel: cat layer -> numeric-row insert -> joint stack, no grid,
# all weights resident in VMEM.
# ----------------------------------------------------------------------------
def _fused_encoder_kernel(nhead, n_joint, s_cat, has_num, *refs):
    x_cat_ref = refs[0]
    off = 1
    if has_num:
        x_num_ref = refs[1]
        off = 2
    cat_refs = refs[off: off + 12]
    joint_refs = refs[off + 12: off + 24]
    o_ref = refs[off + 24]

    # --- cat transformer (single layer; weights stacked with leading dim 1) ---
    x = _encoder_layer(x_cat_ref[...], nhead, *(r[0] for r in cat_refs))

    # --- assemble the joint sequence directly in the output VMEM block ---
    o_ref[:, :s_cat, :] = x
    if has_num:
        o_ref[:, s_cat:, :] = x_num_ref[...]

    # --- joint transformer stack, fully unrolled, weights resident ---
    xj = o_ref[...]
    for l in range(n_joint):
        xj = _encoder_layer(xj, nhead, *(r[l] for r in joint_refs))
    o_ref[...] = xj


def encoder_core(x_cat_emb, x_num_row, cat_params, joint_params, nhead):
    """x_cat_emb: (B, cat_count, D) f32; x_num_row: (B, 1, D) f32 or None."""
    B, s_cat, D = x_cat_emb.shape
    has_num = x_num_row is not None
    s_out = s_cat + (1 if has_num else 0)
    n_joint = joint_params["wqkv"].shape[0]

    inputs = [x_cat_emb]
    if has_num:
        inputs.append(x_num_row)
    inputs += [cat_params[n] for n in _W_NAMES]
    inputs += [joint_params[n] for n in _W_NAMES]

    return pl.pallas_call(
        functools.partial(_fused_encoder_kernel, nhead, n_joint, s_cat, has_num),
        out_shape=jax.ShapeDtypeStruct((B, s_out, D), jnp.float32),
        in_specs=[pl.BlockSpec(memory_space=pltpu.MemorySpace.VMEM)
                  for _ in inputs],
        out_specs=pl.BlockSpec(memory_space=pltpu.MemorySpace.VMEM),
        compiler_params=pltpu.CompilerParams(
            vmem_limit_bytes=32 * 1024 * 1024),
    )(*inputs)


# ----------------------------------------------------------------------------
# glue: embeddings, positional encoding, numeric projection, full forward
# ----------------------------------------------------------------------------
def sinusoidal_pe(seq_len, d):
    # TODO(synk): PE.PositionalEncoding source not provided; assuming standard
    #             sinusoidal PE added along the sequence dim (dropout = eval identity).
    pos = jnp.arange(seq_len, dtype=jnp.float32)[:, None]
    div = jnp.exp(jnp.arange(0, d, 2, dtype=jnp.float32) * (-math.log(10000.0) / d))
    pe = jnp.zeros((seq_len, d), jnp.float32)
    pe = pe.at[:, 0::2].set(jnp.sin(pos * div))
    pe = pe.at[:, 1::2].set(jnp.cos(pos * div))
    return pe


def numeric_ln_proj(x_num, gamma, beta, w_t, b, eps=1e-5):
    """numAttr_LN + num_projLayer in plain JAX (tiny; XLA fuses it)."""
    mu = jnp.mean(x_num, axis=-1, keepdims=True)
    var = jnp.mean((x_num - mu) ** 2, axis=-1, keepdims=True)
    xn = (x_num - mu) * jax.lax.rsqrt(var + eps) * gamma + beta
    return jnp.dot(xn, w_t) + b


def encoder_forward(x, params, cat_count, num_count, emb_dim, nhead, include_pe=True):
    x_cat = x[:, :cat_count].astype(jnp.int32)
    x_cat_emb_0 = jnp.stack(
        [jnp.take(params["field_emb"][i], x_cat[:, i], axis=0) for i in range(cat_count)],
        axis=1)                                                  # (B, cat_count, D)

    if include_pe:
        x_cat_emb_1 = x_cat_emb_0 + sinusoidal_pe(cat_count, emb_dim)[None]
    else:
        x_cat_emb_1 = x_cat_emb_0

    if num_count > 0:
        x_num = x[:, cat_count:]
        x_num_emb = numeric_ln_proj(x_num, params["num_ln_g"], params["num_ln_b"],
                                    params["num_w"], params["num_b"])
        x_num_row = x_num_emb[:, None, :]                        # (B, 1, D)
        x_emb_0 = jnp.concatenate([x_cat_emb_0, x_num_row], axis=1)
    else:
        x_num_row = None
        x_emb_0 = x_cat_emb_0

    x1 = encoder_core(x_cat_emb_1, x_num_row,
                      params["cat_xformer"], params["joint_layers"], nhead)
    return x1, x_emb_0


# ----------------------------------------------------------------------------
# deterministic parameter init (synthetic — no checkpoint)
# matmul weights pre-transposed (in, out), stored bf16, stacked over layers.
# ----------------------------------------------------------------------------
def init_params(key, emb_dim, nhead, cardinality, num_count, num_layers,
                ff_cat=512, ff_joint=2048):
    keys = iter(jax.random.split(key, 128))

    def nrm(shape, scale=0.02):
        return scale * jax.random.normal(next(keys), shape, dtype=jnp.float32)

    def layer_stack(L, ff):
        return dict(
            wqkv=nrm((L, emb_dim, 3 * emb_dim)).astype(jnp.bfloat16),
            bqkv=jnp.zeros((L, 1, 3 * emb_dim), jnp.float32),
            wo=nrm((L, emb_dim, emb_dim)).astype(jnp.bfloat16),
            bo=jnp.zeros((L, 1, emb_dim), jnp.float32),
            w1=nrm((L, emb_dim, ff)).astype(jnp.bfloat16),
            b1=jnp.zeros((L, 1, ff), jnp.float32),
            w2=nrm((L, ff, emb_dim)).astype(jnp.bfloat16),
            b2=jnp.zeros((L, 1, emb_dim), jnp.float32),
            g1=jnp.ones((L, 1, emb_dim), jnp.float32),
            be1=jnp.zeros((L, 1, emb_dim), jnp.float32),
            g2=jnp.ones((L, 1, emb_dim), jnp.float32),
            be2=jnp.zeros((L, 1, emb_dim), jnp.float32),
        )

    params = dict(
        field_emb=[nrm((c + 1, emb_dim), 1.0) for c in cardinality],
        cat_xformer=layer_stack(1, ff_cat),
        joint_layers=layer_stack(num_layers, ff_joint),
    )
    if num_count > 0:
        params["num_ln_g"] = jnp.ones((1, num_count), jnp.float32)
        params["num_ln_b"] = jnp.zeros((1, num_count), jnp.float32)
        params["num_w"] = nrm((num_count, emb_dim))       # (in, out)
        params["num_b"] = jnp.zeros((1, emb_dim), jnp.float32)
    return params


# ----------------------------------------------------------------------------
if __name__ == "__main__":
    # small, module-consistent shapes
    emb_dim = 32
    nhead = 4
    cardinality = [5, 7, 4]     # 3 categorical columns
    num_count = 3               # 3 numerical columns
    num_layers = 3
    B = 2
    cat_count = len(cardinality)

    key = jax.random.PRNGKey(0)
    k_par, k_cat, k_num = jax.random.split(key, 3)

    params = init_params(k_par, emb_dim, nhead, cardinality, num_count, num_layers)

    # build input x: (B, cat_count + num_count); categorical columns hold integer codes
    cat_keys = jax.random.split(k_cat, cat_count)
    cat_cols = [jax.random.randint(cat_keys[i], (B, 1), 0, cardinality[i] + 1).astype(jnp.float32)
                for i in range(cat_count)]
    x_num = jax.random.normal(k_num, (B, num_count), dtype=jnp.float32)
    x = jnp.concatenate(cat_cols + [x_num], axis=1)            # (2, 6)

    fwd = jax.jit(lambda xx: encoder_forward(
        xx, params, cat_count, num_count, emb_dim, nhead, include_pe=True))

    x1, x_emb_0 = fwd(x)
    jax.block_until_ready((x1, x_emb_0))

    assert x1.shape == (B, cat_count + 1, emb_dim)
    assert x_emb_0.shape == (B, cat_count + 1, emb_dim)
    assert bool(jnp.all(jnp.isfinite(x1))) and bool(jnp.all(jnp.isfinite(x_emb_0)))
    print("KERNEL_OK")
</pallas_src>

<mosaic_0001>
module attributes {stable_mosaic.version = 11 : i64} {
  func.func @_fused_encoder_kernel(%arg0: memref<2x3x32xf32, #tpu.memory_space<vmem>>, %arg1: memref<2x1x32xf32, #tpu.memory_space<vmem>>, %arg2: memref<1x32x96xbf16, #tpu.memory_space<vmem>>, %arg3: memref<1x1x96xf32, #tpu.memory_space<vmem>>, %arg4: memref<1x32x32xbf16, #tpu.memory_space<vmem>>, %arg5: memref<1x1x32xf32, #tpu.memory_space<vmem>>, %arg6: memref<1x32x512xbf16, #tpu.memory_space<vmem>>, %arg7: memref<1x1x512xf32, #tpu.memory_space<vmem>>, %arg8: memref<1x512x32xbf16, #tpu.memory_space<vmem>>, %arg9: memref<1x1x32xf32, #tpu.memory_space<vmem>>, %arg10: memref<1x1x32xf32, #tpu.memory_space<vmem>>, %arg11: memref<1x1x32xf32, #tpu.memory_space<vmem>>, %arg12: memref<1x1x32xf32, #tpu.memory_space<vmem>>, %arg13: memref<1x1x32xf32, #tpu.memory_space<vmem>>, %arg14: memref<3x32x96xbf16, #tpu.memory_space<vmem>>, %arg15: memref<3x1x96xf32, #tpu.memory_space<vmem>>, %arg16: memref<3x32x32xbf16, #tpu.memory_space<vmem>>, %arg17: memref<3x1x32xf32, #tpu.memory_space<vmem>>, %arg18: memref<3x32x2048xbf16, #tpu.memory_space<vmem>>, %arg19: memref<3x1x2048xf32, #tpu.memory_space<vmem>>, %arg20: memref<3x2048x32xbf16, #tpu.memory_space<vmem>>, %arg21: memref<3x1x32xf32, #tpu.memory_space<vmem>>, %arg22: memref<3x1x32xf32, #tpu.memory_space<vmem>>, %arg23: memref<3x1x32xf32, #tpu.memory_space<vmem>>, %arg24: memref<3x1x32xf32, #tpu.memory_space<vmem>>, %arg25: memref<3x1x32xf32, #tpu.memory_space<vmem>>, %arg26: memref<2x4x32xf32, #tpu.memory_space<vmem>>) attributes {dimension_semantics = [], scalar_prefetch = 0 : i64, scratch_operands = 0 : i64, tpu.core_type = #tpu.core_type<tc>} {
    %c0 = arith.constant 0 : index
    %c0_0 = arith.constant 0 : index
    %c0_1 = arith.constant 0 : index
    %0 = vector.load %arg0[%c0, %c0_0, %c0_1] : memref<2x3x32xf32, #tpu.memory_space<vmem>>, vector<2x3x32xf32>
    %c0_2 = arith.constant 0 : index
    %c0_3 = arith.constant 0 : index
    %c0_4 = arith.constant 0 : index
    %1 = vector.load %arg2[%c0_2, %c0_3, %c0_4] : memref<1x32x96xbf16, #tpu.memory_space<vmem>>, vector<1x32x96xbf16>
    %2 = vector.shape_cast %1 : vector<1x32x96xbf16> to vector<32x96xbf16>
    %c0_5 = arith.constant 0 : index
    %c0_6 = arith.constant 0 : index
    %c0_7 = arith.constant 0 : index
    %3 = vector.load %arg3[%c0_5, %c0_6, %c0_7] : memref<1x1x96xf32, #tpu.memory_space<vmem>>, vector<1x1x96xf32>
    %4 = vector.shape_cast %3 : vector<1x1x96xf32> to vector<1x96xf32>
    %c0_8 = arith.constant 0 : index
    %c0_9 = arith.constant 0 : index
    %c0_10 = arith.constant 0 : index
    %5 = vector.load %arg4[%c0_8, %c0_9, %c0_10] : memref<1x32x32xbf16, #tpu.memory_space<vmem>>, vector<1x32x32xbf16>
    %6 = vector.shape_cast %5 : vector<1x32x32xbf16> to vector<32x32xbf16>
    %c0_11 = arith.constant 0 : index
    %c0_12 = arith.constant 0 : index
    %c0_13 = arith.constant 0 : index
    %7 = vector.load %arg5[%c0_11, %c0_12, %c0_13] : memref<1x1x32xf32, #tpu.memory_space<vmem>>, vector<1x1x32xf32>
    %8 = vector.shape_cast %7 : vector<1x1x32xf32> to vector<1x32xf32>
    %c0_14 = arith.constant 0 : index
    %c0_15 = arith.constant 0 : index
    %c0_16 = arith.constant 0 : index
    %9 = vector.load %arg6[%c0_14, %c0_15, %c0_16] : memref<1x32x512xbf16, #tpu.memory_space<vmem>>, vector<1x32x512xbf16>
    %10 = vector.shape_cast %9 : vector<1x32x512xbf16> to vector<32x512xbf16>
    %c0_17 = arith.constant 0 : index
    %c0_18 = arith.constant 0 : index
    %c0_19 = arith.constant 0 : index
    %11 = vector.load %arg7[%c0_17, %c0_18, %c0_19] : memref<1x1x512xf32, #tpu.memory_space<vmem>>, vector<1x1x512xf32>
    %12 = vector.shape_cast %11 : vector<1x1x512xf32> to vector<1x512xf32>
    %c0_20 = arith.constant 0 : index
    %c0_21 = arith.constant 0 : index
    %c0_22 = arith.constant 0 : index
    %13 = vector.load %arg8[%c0_20, %c0_21, %c0_22] : memref<1x512x32xbf16, #tpu.memory_space<vmem>>, vector<1x512x32xbf16>
    %14 = vector.shape_cast %13 : vector<1x512x32xbf16> to vector<512x32xbf16>
    %c0_23 = arith.constant 0 : index
    %c0_24 = arith.constant 0 : index
    %c0_25 = arith.constant 0 : index
    %15 = vector.load %arg9[%c0_23, %c0_24, %c0_25] : memref<1x1x32xf32, #tpu.memory_space<vmem>>, vector<1x1x32xf32>
    %16 = vector.shape_cast %15 : vector<1x1x32xf32> to vector<1x32xf32>
    %c0_26 = arith.constant 0 : index
    %c0_27 = arith.constant 0 : index
    %c0_28 = arith.constant 0 : index
    %17 = vector.load %arg10[%c0_26, %c0_27, %c0_28] : memref<1x1x32xf32, #tpu.memory_space<vmem>>, vector<1x1x32xf32>
    %18 = vector.shape_cast %17 : vector<1x1x32xf32> to vector<1x32xf32>
    %c0_29 = arith.constant 0 : index
    %c0_30 = arith.constant 0 : index
    %c0_31 = arith.constant 0 : index
    %19 = vector.load %arg11[%c0_29, %c0_30, %c0_31] : memref<1x1x32xf32, #tpu.memory_space<vmem>>, vector<1x1x32xf32>
    %20 = vector.shape_cast %19 : vector<1x1x32xf32> to vector<1x32xf32>
    %c0_32 = arith.constant 0 : index
    %c0_33 = arith.constant 0 : index
    %c0_34 = arith.constant 0 : index
    %21 = vector.load %arg12[%c0_32, %c0_33, %c0_34] : memref<1x1x32xf32, #tpu.memory_space<vmem>>, vector<1x1x32xf32>
    %22 = vector.shape_cast %21 : vector<1x1x32xf32> to vector<1x32xf32>
    %c0_35 = arith.constant 0 : index
    %c0_36 = arith.constant 0 : index
    %c0_37 = arith.constant 0 : index
    %23 = vector.load %arg13[%c0_35, %c0_36, %c0_37] : memref<1x1x32xf32, #tpu.memory_space<vmem>>, vector<1x1x32xf32>
    %24 = vector.shape_cast %23 : vector<1x1x32xf32> to vector<1x32xf32>
    %25 = vector.shape_cast %0 : vector<2x3x32xf32> to vector<6x32xf32>
    %26 = arith.truncf %25 : vector<6x32xf32> to vector<6x32xbf16>
    %cst = arith.constant dense<0.000000e+00> : vector<6x96xf32>
    %27 = tpu.matmul %26, %2, %cst {dimension_numbers = #tpu.dot_dimension_numbers<[1], [0], [0], [1], [0, 0, 1, 1], [], []>} : vector<6x32xbf16>, vector<32x96xbf16>, vector<6x96xf32> -> vector<6x96xf32>
    %28 = vector.broadcast %4 : vector<1x96xf32> to vector<6x96xf32>
    %29 = arith.addf %27, %28 : vector<6x96xf32>
    %30 = vector.extract_strided_slice %29 {offsets = [0, 0], sizes = [6, 8], strides = [1, 1]} : vector<6x96xf32> to vector<6x8xf32>
    %31 = vector.shape_cast %30 : vector<6x8xf32> to vector<1x2x3x8xf32>
    %32 = vector.extract_strided_slice %29 {offsets = [0, 8], sizes = [6, 8], strides = [1, 1]} : vector<6x96xf32> to vector<6x8xf32>
    %33 = vector.shape_cast %32 : vector<6x8xf32> to vector<1x2x3x8xf32>
    %34 = vector.extract_strided_slice %29 {offsets = [0, 16], sizes = [6, 8], strides = [1, 1]} : vector<6x96xf32> to vector<6x8xf32>
    %35 = vector.shape_cast %34 : vector<6x8xf32> to vector<1x2x3x8xf32>
    %36 = vector.extract_strided_slice %29 {offsets = [0, 24], sizes = [6, 8], strides = [1, 1]} : vector<6x96xf32> to vector<6x8xf32>
    %37 = vector.shape_cast %36 : vector<6x8xf32> to vector<1x2x3x8xf32>
    %38 = tpu.concatenate %31, %33, %35, %37 in 0 : vector<1x2x3x8xf32>, vector<1x2x3x8xf32>, vector<1x2x3x8xf32>, vector<1x2x3x8xf32> -> vector<4x2x3x8xf32>
    %39 = vector.shape_cast %38 : vector<4x2x3x8xf32> to vector<8x3x8xf32>
    %40 = vector.extract_strided_slice %29 {offsets = [0, 32], sizes = [6, 8], strides = [1, 1]} : vector<6x96xf32> to vector<6x8xf32>
    %41 = vector.shape_cast %40 : vector<6x8xf32> to vector<1x2x3x8xf32>
    %42 = vector.extract_strided_slice %29 {offsets = [0, 40], sizes = [6, 8], strides = [1, 1]} : vector<6x96xf32> to vector<6x8xf32>
    %43 = vector.shape_cast %42 : vector<6x8xf32> to vector<1x2x3x8xf32>
    %44 = vector.extract_strided_slice %29 {offsets = [0, 48], sizes = [6, 8], strides = [1, 1]} : vector<6x96xf32> to vector<6x8xf32>
    %45 = vector.shape_cast %44 : vector<6x8xf32> to vector<1x2x3x8xf32>
    %46 = vector.extract_strided_slice %29 {offsets = [0, 56], sizes = [6, 8], strides = [1, 1]} : vector<6x96xf32> to vector<6x8xf32>
    %47 = vector.shape_cast %46 : vector<6x8xf32> to vector<1x2x3x8xf32>
    %48 = tpu.concatenate %41, %43, %45, %47 in 0 : vector<1x2x3x8xf32>, vector<1x2x3x8xf32>, vector<1x2x3x8xf32>, vector<1x2x3x8xf32> -> vector<4x2x3x8xf32>
    %49 = vector.shape_cast %48 : vector<4x2x3x8xf32> to vector<8x3x8xf32>
    %50 = vector.extract_strided_slice %29 {offsets = [0, 64], sizes = [6, 8], strides = [1, 1]} : vector<6x96xf32> to vector<6x8xf32>
    %51 = vector.shape_cast %50 : vector<6x8xf32> to vector<1x2x3x8xf32>
    %52 = vector.extract_strided_slice %29 {offsets = [0, 72], sizes = [6, 8], strides = [1, 1]} : vector<6x96xf32> to vector<6x8xf32>
    %53 = vector.shape_cast %52 : vector<6x8xf32> to vector<1x2x3x8xf32>
    %54 = vector.extract_strided_slice %29 {offsets = [0, 80], sizes = [6, 8], strides = [1, 1]} : vector<6x96xf32> to vector<6x8xf32>
    %55 = vector.shape_cast %54 : vector<6x8xf32> to vector<1x2x3x8xf32>
    %56 = vector.extract_strided_slice %29 {offsets = [0, 88], sizes = [6, 8], strides = [1, 1]} : vector<6x96xf32> to vector<6x8xf32>
    %57 = vector.shape_cast %56 : vector<6x8xf32> to vector<1x2x3x8xf32>
    %58 = tpu.concatenate %51, %53, %55, %57 in 0 : vector<1x2x3x8xf32>, vector<1x2x3x8xf32>, vector<1x2x3x8xf32>, vector<1x2x3x8xf32> -> vector<4x2x3x8xf32>
    %59 = vector.shape_cast %58 : vector<4x2x3x8xf32> to vector<8x3x8xf32>
    %60 = arith.truncf %39 : vector<8x3x8xf32> to vector<8x3x8xbf16>
    %61 = arith.truncf %49 : vector<8x3x8xf32> to vector<8x3x8xbf16>
    "tpu.trace_start"() <{level = 10 : i32, message = "bqd,bkd->bqk"}> : () -> ()
    %cst_38 = arith.constant dense<0.000000e+00> : vector<8x3x3xf32>
    %62 = tpu.matmul %60, %61, %cst_38 {dimension_numbers = #tpu.dot_dimension_numbers<[2], [2], [1], [1], [0, 0, 0, 1, 1, 1], [0], [0]>} : vector<8x3x8xbf16>, vector<8x3x8xbf16>, vector<8x3x3xf32> -> vector<8x3x3xf32>
    "tpu.trace_stop"() : () -> ()
    %cst_39 = arith.constant 0.353553385 : f32
    %63 = vector.broadcast %cst_39 : f32 to vector<8x3x3xf32>
    %64 = arith.mulf %62, %63 : vector<8x3x3xf32>
    %cst_40 = arith.constant dense<0xFF800000> : vector<8x3xf32>
    %65 = vector.multi_reduction <maximumf>, %64, %cst_40 [2] : vector<8x3x3xf32> to vector<8x3xf32>
    %66 = vector.shape_cast %65 : vector<8x3xf32> to vector<8x3x1xf32>
    %67 = vector.broadcast %66 : vector<8x3x1xf32> to vector<8x3x3xf32>
    %68 = arith.subf %64, %67 : vector<8x3x3xf32>
    %69 = math.exp %68 : vector<8x3x3xf32>
    %cst_41 = arith.constant dense<0.000000e+00> : vector<8x3xf32>
    %70 = vector.multi_reduction <add>, %69, %cst_41 [2] : vector<8x3x3xf32> to vector<8x3xf32>
    %71 = vector.shape_cast %70 : vector<8x3xf32> to vector<8x3x1xf32>
    %72 = tpu.reciprocal %71 {approx = true} : vector<8x3x1xf32> -> vector<8x3x1xf32>
    %73 = vector.broadcast %72 : vector<8x3x1xf32> to vector<8x3x3xf32>
    %74 = arith.mulf %69, %73 : vector<8x3x3xf32>
    %75 = arith.truncf %74 : vector<8x3x3xf32> to vector<8x3x3xbf16>
    %76 = arith.truncf %59 : vector<8x3x8xf32> to vector<8x3x8xbf16>
    "tpu.trace_start"() <{level = 10 : i32, message = "bqk,bkd->bqd"}> : () -> ()
    %cst_42 = arith.constant dense<0.000000e+00> : vector<8x3x8xf32>
    %77 = tpu.matmul %75, %76, %cst_42 {dimension_numbers = #tpu.dot_dimension_numbers<[2], [1], [1], [2], [0, 0, 0, 1, 1, 2], [0], [0]>} : vector<8x3x3xbf16>, vector<8x3x8xbf16>, vector<8x3x8xf32> -> vector<8x3x8xf32>
    "tpu.trace_stop"() : () -> ()
    %78 = vector.extract_strided_slice %77 {offsets = [0, 0, 0], sizes = [2, 3, 8], strides = [1, 1, 1]} : vector<8x3x8xf32> to vector<2x3x8xf32>
    %79 = vector.shape_cast %78 : vector<2x3x8xf32> to vector<6x8xf32>
    %80 = vector.extract_strided_slice %77 {offsets = [2, 0, 0], sizes = [2, 3, 8], strides = [1, 1, 1]} : vector<8x3x8xf32> to vector<2x3x8xf32>
    %81 = vector.shape_cast %80 : vector<2x3x8xf32> to vector<6x8xf32>
    %82 = vector.extract_strided_slice %77 {offsets = [4, 0, 0], sizes = [2, 3, 8], strides = [1, 1, 1]} : vector<8x3x8xf32> to vector<2x3x8xf32>
    %83 = vector.shape_cast %82 : vector<2x3x8xf32> to vector<6x8xf32>
    %84 = vector.extract_strided_slice %77 {offsets = [6, 0, 0], sizes = [2, 3, 8], strides = [1, 1, 1]} : vector<8x3x8xf32> to vector<2x3x8xf32>
    %85 = vector.shape_cast %84 : vector<2x3x8xf32> to vector<6x8xf32>
    %86 = tpu.concatenate %79, %81, %83, %85 in 1 : vector<6x8xf32>, vector<6x8xf32>, vector<6x8xf32>, vector<6x8xf32> -> vector<6x32xf32>
    %87 = arith.truncf %86 : vector<6x32xf32> to vector<6x32xbf16>
    %cst_43 = arith.constant dense<0.000000e+00> : vector<6x32xf32>
    %88 = tpu.matmul %87, %6, %cst_43 {dimension_numbers = #tpu.dot_dimension_numbers<[1], [0], [0], [1], [0, 0, 1, 1], [], []>} : vector<6x32xbf16>, vector<32x32xbf16>, vector<6x32xf32> -> vector<6x32xf32>
    %89 = vector.broadcast %8 : vector<1x32xf32> to vector<6x32xf32>
    %90 = arith.addf %88, %89 : vector<6x32xf32>
    %91 = arith.addf %25, %90 : vector<6x32xf32>
    %cst_44 = arith.constant dense<0.000000e+00> : vector<6xf32>
    %92 = vector.multi_reduction <add>, %91, %cst_44 [1] : vector<6x32xf32> to vector<6xf32>
    %93 = vector.shape_cast %92 : vector<6xf32> to vector<6x1xf32>
    %cst_45 = arith.constant 3.200000e+01 : f32
    %94 = vector.broadcast %cst_45 : f32 to vector<6x1xf32>
    %95 = arith.divf %93, %94 : vector<6x1xf32>
    %96 = vector.broadcast %95 : vector<6x1xf32> to vector<6x32xf32>
    %97 = arith.subf %91, %96 : vector<6x32xf32>
    %98 = arith.mulf %97, %97 : vector<6x32xf32>
    %cst_46 = arith.constant dense<0.000000e+00> : vector<6xf32>
    %99 = vector.multi_reduction <add>, %98, %cst_46 [1] : vector<6x32xf32> to vector<6xf32>
    %100 = vector.shape_cast %99 : vector<6xf32> to vector<6x1xf32>
    %cst_47 = arith.constant 3.200000e+01 : f32
    %101 = vector.broadcast %cst_47 : f32 to vector<6x1xf32>
    %102 = arith.divf %100, %101 : vector<6x1xf32>
    %103 = vector.broadcast %95 : vector<6x1xf32> to vector<6x32xf32>
    %104 = arith.subf %91, %103 : vector<6x32xf32>
    %cst_48 = arith.constant 9.99999974E-6 : f32
    %105 = vector.broadcast %cst_48 : f32 to vector<6x1xf32>
    %106 = arith.addf %102, %105 : vector<6x1xf32>
    %107 = math.rsqrt %106 : vector<6x1xf32>
    %108 = vector.broadcast %107 : vector<6x1xf32> to vector<6x32xf32>
    %109 = arith.mulf %104, %108 : vector<6x32xf32>
    %110 = vector.broadcast %18 : vector<1x32xf32> to vector<6x32xf32>
    %111 = arith.mulf %109, %110 : vector<6x32xf32>
    %112 = vector.broadcast %20 : vector<1x32xf32> to vector<6x32xf32>
    %113 = arith.addf %111, %112 : vector<6x32xf32>
    %114 = arith.truncf %113 : vector<6x32xf32> to vector<6x32xbf16>
    %cst_49 = arith.constant dense<0.000000e+00> : vector<6x512xf32>
    %115 = tpu.matmul %114, %10, %cst_49 {dimension_numbers = #tpu.dot_dimension_numbers<[1], [0], [0], [1], [0, 0, 1, 1], [], []>} : vector<6x32xbf16>, vector<32x512xbf16>, vector<6x512xf32> -> vector<6x512xf32>
    %116 = vector.broadcast %12 : vector<1x512xf32> to vector<6x512xf32>
    %117 = arith.addf %115, %116 : vector<6x512xf32>
    %cst_50 = arith.constant 0.000000e+00 : f32
    %118 = vector.broadcast %cst_50 : f32 to vector<6x512xf32>
    %119 = arith.maximumf %117, %118 : vector<6x512xf32>
    %120 = arith.truncf %119 : vector<6x512xf32> to vector<6x512xbf16>
    %cst_51 = arith.constant dense<0.000000e+00> : vector<6x32xf32>
    %121 = tpu.matmul %120, %14, %cst_51 {dimension_numbers = #tpu.dot_dimension_numbers<[1], [0], [0], [1], [0, 0, 1, 1], [], []>} : vector<6x512xbf16>, vector<512x32xbf16>, vector<6x32xf32> -> vector<6x32xf32>
    %122 = vector.broadcast %16 : vector<1x32xf32> to vector<6x32xf32>
    %123 = arith.addf %121, %122 : vector<6x32xf32>
    %124 = arith.addf %113, %123 : vector<6x32xf32>
    %cst_52 = arith.constant dense<0.000000e+00> : vector<6xf32>
    %125 = vector.multi_reduction <add>, %124, %cst_52 [1] : vector<6x32xf32> to vector<6xf32>
    %126 = vector.shape_cast %125 : vector<6xf32> to vector<6x1xf32>
    %cst_53 = arith.constant 3.200000e+01 : f32
    %127 = vector.broadcast %cst_53 : f32 to vector<6x1xf32>
    %128 = arith.divf %126, %127 : vector<6x1xf32>
    %129 = vector.broadcast %128 : vector<6x1xf32> to vector<6x32xf32>
    %130 = arith.subf %124, %129 : vector<6x32xf32>
    %131 = arith.mulf %130, %130 : vector<6x32xf32>
    %cst_54 = arith.constant dense<0.000000e+00> : vector<6xf32>
    %132 = vector.multi_reduction <add>, %131, %cst_54 [1] : vector<6x32xf32> to vector<6xf32>
    %133 = vector.shape_cast %132 : vector<6xf32> to vector<6x1xf32>
    %cst_55 = arith.constant 3.200000e+01 : f32
    %134 = vector.broadcast %cst_55 : f32 to vector<6x1xf32>
    %135 = arith.divf %133, %134 : vector<6x1xf32>
    %136 = vector.broadcast %128 : vector<6x1xf32> to vector<6x32xf32>
    %137 = arith.subf %124, %136 : vector<6x32xf32>
    %cst_56 = arith.constant 9.99999974E-6 : f32
    %138 = vector.broadcast %cst_56 : f32 to vector<6x1xf32>
    %139 = arith.addf %135, %138 : vector<6x1xf32>
    %140 = math.rsqrt %139 : vector<6x1xf32>
    %141 = vector.broadcast %140 : vector<6x1xf32> to vector<6x32xf32>
    %142 = arith.mulf %137, %141 : vector<6x32xf32>
    %143 = vector.broadcast %22 : vector<1x32xf32> to vector<6x32xf32>
    %144 = arith.mulf %142, %143 : vector<6x32xf32>
    %145 = vector.broadcast %24 : vector<1x32xf32> to vector<6x32xf32>
    %146 = arith.addf %144, %145 : vector<6x32xf32>
    %147 = vector.shape_cast %146 : vector<6x32xf32> to vector<2x3x32xf32>
    %c0_57 = arith.constant 0 : index
    %c0_58 = arith.constant 0 : index
    %c0_59 = arith.constant 0 : index
    %148 = vector.load %arg26[%c0_57, %c0_58, %c0_59] : memref<2x4x32xf32, #tpu.memory_space<vmem>>, vector<2x3x32xf32>
    tpu.vector_store %arg26[%c0_57, %c0_58, %c0_59], %147 {strides = array<i32>} : memref<2x4x32xf32, #tpu.memory_space<vmem>>, vector<2x3x32xf32>,
    %c0_60 = arith.constant 0 : index
    %c0_61 = arith.constant 0 : index
    %c0_62 = arith.constant 0 : index
    %149 = vector.load %arg1[%c0_60, %c0_61, %c0_62] : memref<2x1x32xf32, #tpu.memory_space<vmem>>, vector<2x1x32xf32>
    %c0_63 = arith.constant 0 : index
    %c3 = arith.constant 3 : index
    %c0_64 = arith.constant 0 : index
    %150 = vector.load %arg26[%c0_63, %c3, %c0_64] : memref<2x4x32xf32, #tpu.memory_space<vmem>>, vector<2x1x32xf32>
    tpu.vector_store %arg26[%c0_63, %c3, %c0_64], %149 {strides = array<i32>} : memref<2x4x32xf32, #tpu.memory_space<vmem>>, vector<2x1x32xf32>,
    %c0_65 = arith.constant 0 : index
    %c0_66 = arith.constant 0 : index
    %c0_67 = arith.constant 0 : index
    %151 = vector.load %arg26[%c0_65, %c0_66, %c0_67] : memref<2x4x32xf32, #tpu.memory_space<vmem>>, vector<2x4x32xf32>
    %c0_68 = arith.constant 0 : index
    %c0_69 = arith.constant 0 : index
    %c0_70 = arith.constant 0 : index
    %152 = vector.load %arg14[%c0_68, %c0_69, %c0_70] : memref<3x32x96xbf16, #tpu.memory_space<vmem>>, vector<1x32x96xbf16>
    %153 = vector.shape_cast %152 : vector<1x32x96xbf16> to vector<32x96xbf16>
    %c0_71 = arith.constant 0 : index
    %c0_72 = arith.constant 0 : index
    %c0_73 = arith.constant 0 : index
    %154 = vector.load %arg15[%c0_71, %c0_72, %c0_73] : memref<3x1x96xf32, #tpu.memory_space<vmem>>, vector<1x1x96xf32>
    %155 = vector.shape_cast %154 : vector<1x1x96xf32> to vector<1x96xf32>
    %c0_74 = arith.constant 0 : index
    %c0_75 = arith.constant 0 : index
    %c0_76 = arith.constant 0 : index
    %156 = vector.load %arg16[%c0_74, %c0_75, %c0_76] : memref<3x32x32xbf16, #tpu.memory_space<vmem>>, vector<1x32x32xbf16>
    %157 = vector.shape_cast %156 : vector<1x32x32xbf16> to vector<32x32xbf16>
    %c0_77 = arith.constant 0 : index
    %c0_78 = arith.constant 0 : index
    %c0_79 = arith.constant 0 : index
    %158 = vector.load %arg17[%c0_77, %c0_78, %c0_79] : memref<3x1x32xf32, #tpu.memory_space<vmem>>, vector<1x1x32xf32>
    %159 = vector.shape_cast %158 : vector<1x1x32xf32> to vector<1x32xf32>
    %c0_80 = arith.constant 0 : index
    %c0_81 = arith.constant 0 : index
    %c0_82 = arith.constant 0 : index
    %160 = vector.load %arg18[%c0_80, %c0_81, %c0_82] : memref<3x32x2048xbf16, #tpu.memory_space<vmem>>, vector<1x32x2048xbf16>
    %161 = vector.shape_cast %160 : vector<1x32x2048xbf16> to vector<32x2048xbf16>
    %c0_83 = arith.constant 0 : index
    %c0_84 = arith.constant 0 : index
    %c0_85 = arith.constant 0 : index
    %162 = vector.load %arg19[%c0_83, %c0_84, %c0_85] : memref<3x1x2048xf32, #tpu.memory_space<vmem>>, vector<1x1x2048xf32>
    %163 = vector.shape_cast %162 : vector<1x1x2048xf32> to vector<1x2048xf32>
    %c0_86 = arith.constant 0 : index
    %c0_87 = arith.constant 0 : index
    %c0_88 = arith.constant 0 : index
    %164 = vector.load %arg20[%c0_86, %c0_87, %c0_88] : memref<3x2048x32xbf16, #tpu.memory_space<vmem>>, vector<1x2048x32xbf16>
    %165 = vector.shape_cast %164 : vector<1x2048x32xbf16> to vector<2048x32xbf16>
    %c0_89 = arith.constant 0 : index
    %c0_90 = arith.constant 0 : index
    %c0_91 = arith.constant 0 : index
    %166 = vector.load %arg21[%c0_89, %c0_90, %c0_91] : memref<3x1x32xf32, #tpu.memory_space<vmem>>, vector<1x1x32xf32>
    %167 = vector.shape_cast %166 : vector<1x1x32xf32> to vector<1x32xf32>
    %c0_92 = arith.constant 0 : index
    %c0_93 = arith.constant 0 : index
    %c0_94 = arith.constant 0 : index
    %168 = vector.load %arg22[%c0_92, %c0_93, %c0_94] : memref<3x1x32xf32, #tpu.memory_space<vmem>>, vector<1x1x32xf32>
    %169 = vector.shape_cast %168 : vector<1x1x32xf32> to vector<1x32xf32>
    %c0_95 = arith.constant 0 : index
    %c0_96 = arith.constant 0 : index
    %c0_97 = arith.constant 0 : index
    %170 = vector.load %arg23[%c0_95, %c0_96, %c0_97] : memref<3x1x32xf32, #tpu.memory_space<vmem>>, vector<1x1x32xf32>
    %171 = vector.shape_cast %170 : vector<1x1x32xf32> to vector<1x32xf32>
    %c0_98 = arith.constant 0 : index
    %c0_99 = arith.constant 0 : index
    %c0_100 = arith.constant 0 : index
    %172 = vector.load %arg24[%c0_98, %c0_99, %c0_100] : memref<3x1x32xf32, #tpu.memory_space<vmem>>, vector<1x1x32xf32>
    %173 = vector.shape_cast %172 : vector<1x1x32xf32> to vector<1x32xf32>
    %c0_101 = arith.constant 0 : index
    %c0_102 = arith.constant 0 : index
    %c0_103 = arith.constant 0 : index
    %174 = vector.load %arg25[%c0_101, %c0_102, %c0_103] : memref<3x1x32xf32, #tpu.memory_space<vmem>>, vector<1x1x32xf32>
    %175 = vector.shape_cast %174 : vector<1x1x32xf32> to vector<1x32xf32>
    %176 = vector.shape_cast %151 : vector<2x4x32xf32> to vector<8x32xf32>
    %177 = arith.truncf %176 : vector<8x32xf32> to vector<8x32xbf16>
    %cst_104 = arith.constant dense<0.000000e+00> : vector<8x96xf32>
    %178 = tpu.matmul %177, %153, %cst_104 {dimension_numbers = #tpu.dot_dimension_numbers<[1], [0], [0], [1], [0, 0, 1, 1], [], []>} : vector<8x32xbf16>, vector<32x96xbf16>, vector<8x96xf32> -> vector<8x96xf32>
    %179 = vector.broadcast %155 : vector<1x96xf32> to vector<8x96xf32>
    %180 = arith.addf %178, %179 : vector<8x96xf32>
    %181 = vector.extract_strided_slice %180 {offsets = [0, 0], sizes = [8, 8], strides = [1, 1]} : vector<8x96xf32> to vector<8x8xf32>
    %182 = vector.shape_cast %181 : vector<8x8xf32> to vector<1x2x4x8xf32>
    %183 = vector.extract_strided_slice %180 {offsets = [0, 8], sizes = [8, 8], strides = [1, 1]} : vector<8x96xf32> to vector<8x8xf32>
    %184 = vector.shape_cast %183 : vector<8x8xf32> to vector<1x2x4x8xf32>
    %185 = vector.extract_strided_slice %180 {offsets = [0, 16], sizes = [8, 8], strides = [1, 1]} : vector<8x96xf32> to vector<8x8xf32>
    %186 = vector.shape_cast %185 : vector<8x8xf32> to vector<1x2x4x8xf32>
    %187 = vector.extract_strided_slice %180 {offsets = [0, 24], sizes = [8, 8], strides = [1, 1]} : vector<8x96xf32> to vector<8x8xf32>
    %188 = vector.shape_cast %187 : vector<8x8xf32> to vector<1x2x4x8xf32>
    %189 = tpu.concatenate %182, %184, %186, %188 in 0 : vector<1x2x4x8xf32>, vector<1x2x4x8xf32>, vector<1x2x4x8xf32>, vector<1x2x4x8xf32> -> vector<4x2x4x8xf32>
    %190 = vector.shape_cast %189 : vector<4x2x4x8xf32> to vector<8x4x8xf32>
    %191 = vector.extract_strided_slice %180 {offsets = [0, 32], sizes = [8, 8], strides = [1, 1]} : vector<8x96xf32> to vector<8x8xf32>
    %192 = vector.shape_cast %191 : vector<8x8xf32> to vector<1x2x4x8xf32>
    %193 = vector.extract_strided_slice %180 {offsets = [0, 40], sizes = [8, 8], strides = [1, 1]} : vector<8x96xf32> to vector<8x8xf32>
    %194 = vector.shape_cast %193 : vector<8x8xf32> to vector<1x2x4x8xf32>
    %195 = vector.extract_strided_slice %180 {offsets = [0, 48], sizes = [8, 8], strides = [1, 1]} : vector<8x96xf32> to vector<8x8xf32>
    %196 = vector.shape_cast %195 : vector<8x8xf32> to vector<1x2x4x8xf32>
    %197 = vector.extract_strided_slice %180 {offsets = [0, 56], sizes = [8, 8], strides = [1, 1]} : vector<8x96xf32> to vector<8x8xf32>
    %198 = vector.shape_cast %197 : vector<8x8xf32> to vector<1x2x4x8xf32>
    %199 = tpu.concatenate %192, %194, %196, %198 in 0 : vector<1x2x4x8xf32>, vector<1x2x4x8xf32>, vector<1x2x4x8xf32>, vector<1x2x4x8xf32> -> vector<4x2x4x8xf32>
    %200 = vector.shape_cast %199 : vector<4x2x4x8xf32> to vector<8x4x8xf32>
    %201 = vector.extract_strided_slice %180 {offsets = [0, 64], sizes = [8, 8], strides = [1, 1]} : vector<8x96xf32> to vector<8x8xf32>
    %202 = vector.shape_cast %201 : vector<8x8xf32> to vector<1x2x4x8xf32>
    %203 = vector.extract_strided_slice %180 {offsets = [0, 72], sizes = [8, 8], strides = [1, 1]} : vector<8x96xf32> to vector<8x8xf32>
    %204 = vector.shape_cast %203 : vector<8x8xf32> to vector<1x2x4x8xf32>
    %205 = vector.extract_strided_slice %180 {offsets = [0, 80], sizes = [8, 8], strides = [1, 1]} : vector<8x96xf32> to vector<8x8xf32>
    %206 = vector.shape_cast %205 : vector<8x8xf32> to vector<1x2x4x8xf32>
    %207 = vector.extract_strided_slice %180 {offsets = [0, 88], sizes = [8, 8], strides = [1, 1]} : vector<8x96xf32> to vector<8x8xf32>
    %208 = vector.shape_cast %207 : vector<8x8xf32> to vector<1x2x4x8xf32>
    %209 = tpu.concatenate %202, %204, %206, %208 in 0 : vector<1x2x4x8xf32>, vector<1x2x4x8xf32>, vector<1x2x4x8xf32>, vector<1x2x4x8xf32> -> vector<4x2x4x8xf32>
    %210 = vector.shape_cast %209 : vector<4x2x4x8xf32> to vector<8x4x8xf32>
    %211 = arith.truncf %190 : vector<8x4x8xf32> to vector<8x4x8xbf16>
    %212 = arith.truncf %200 : vector<8x4x8xf32> to vector<8x4x8xbf16>
    "tpu.trace_start"() <{level = 10 : i32, message = "bqd,bkd->bqk"}> : () -> ()
    %cst_105 = arith.constant dense<0.000000e+00> : vector<8x4x4xf32>
    %213 = tpu.matmul %211, %212, %cst_105 {dimension_numbers = #tpu.dot_dimension_numbers<[2], [2], [1], [1], [0, 0, 0, 1, 1, 1], [0], [0]>} : vector<8x4x8xbf16>, vector<8x4x8xbf16>, vector<8x4x4xf32> -> vector<8x4x4xf32>
    "tpu.trace_stop"() : () -> ()
    %cst_106 = arith.constant 0.353553385 : f32
    %214 = vector.broadcast %cst_106 : f32 to vector<8x4x4xf32>
    %215 = arith.mulf %213, %214 : vector<8x4x4xf32>
    %cst_107 = arith.constant dense<0xFF800000> : vector<8x4xf32>
    %216 = vector.multi_reduction <maximumf>, %215, %cst_107 [2] : vector<8x4x4xf32> to vector<8x4xf32>
    %217 = vector.shape_cast %216 : vector<8x4xf32> to vector<8x4x1xf32>
    %218 = vector.broadcast %217 : vector<8x4x1xf32> to vector<8x4x4xf32>
    %219 = arith.subf %215, %218 : vector<8x4x4xf32>
    %220 = math.exp %219 : vector<8x4x4xf32>
    %cst_108 = arith.constant dense<0.000000e+00> : vector<8x4xf32>
    %221 = vector.multi_reduction <add>, %220, %cst_108 [2] : vector<8x4x4xf32> to vector<8x4xf32>
    %222 = vector.shape_cast %221 : vector<8x4xf32> to vector<8x4x1xf32>
    %223 = tpu.reciprocal %222 {approx = true} : vector<8x4x1xf32> -> vector<8x4x1xf32>
    %224 = vector.broadcast %223 : vector<8x4x1xf32> to vector<8x4x4xf32>
    %225 = arith.mulf %220, %224 : vector<8x4x4xf32>
    %226 = arith.truncf %225 : vector<8x4x4xf32> to vector<8x4x4xbf16>
    %227 = arith.truncf %210 : vector<8x4x8xf32> to vector<8x4x8xbf16>
    "tpu.trace_start"() <{level = 10 : i32, message = "bqk,bkd->bqd"}> : () -> ()
    %cst_109 = arith.constant dense<0.000000e+00> : vector<8x4x8xf32>
    %228 = tpu.matmul %226, %227, %cst_109 {dimension_numbers = #tpu.dot_dimension_numbers<[2], [1], [1], [2], [0, 0, 0, 1, 1, 2], [0], [0]>} : vector<8x4x4xbf16>, vector<8x4x8xbf16>, vector<8x4x8xf32> -> vector<8x4x8xf32>
    "tpu.trace_stop"() : () -> ()
    %229 = vector.extract_strided_slice %228 {offsets = [0, 0, 0], sizes = [2, 4, 8], strides = [1, 1, 1]} : vector<8x4x8xf32> to vector<2x4x8xf32>
    %230 = vector.shape_cast %229 : vector<2x4x8xf32> to vector<8x8xf32>
    %231 = vector.extract_strided_slice %228 {offsets = [2, 0, 0], sizes = [2, 4, 8], strides = [1, 1, 1]} : vector<8x4x8xf32> to vector<2x4x8xf32>
    %232 = vector.shape_cast %231 : vector<2x4x8xf32> to vector<8x8xf32>
    %233 = vector.extract_strided_slice %228 {offsets = [4, 0, 0], sizes = [2, 4, 8], strides = [1, 1, 1]} : vector<8x4x8xf32> to vector<2x4x8xf32>
    %234 = vector.shape_cast %233 : vector<2x4x8xf32> to vector<8x8xf32>
    %235 = vector.extract_strided_slice %228 {offsets = [6, 0, 0], sizes = [2, 4, 8], strides = [1, 1, 1]} : vector<8x4x8xf32> to vector<2x4x8xf32>
    %236 = vector.shape_cast %235 : vector<2x4x8xf32> to vector<8x8xf32>
    %237 = tpu.concatenate %230, %232, %234, %236 in 1 : vector<8x8xf32>, vector<8x8xf32>, vector<8x8xf32>, vector<8x8xf32> -> vector<8x32xf32>
    %238 = arith.truncf %237 : vector<8x32xf32> to vector<8x32xbf16>
    %cst_110 = arith.constant dense<0.000000e+00> : vector<8x32xf32>
    %239 = tpu.matmul %238, %157, %cst_110 {dimension_numbers = #tpu.dot_dimension_numbers<[1], [0], [0], [1], [0, 0, 1, 1], [], []>} : vector<8x32xbf16>, vector<32x32xbf16>, vector<8x32xf32> -> vector<8x32xf32>
    %240 = vector.broadcast %159 : vector<1x32xf32> to vector<8x32xf32>
    %241 = arith.addf %239, %240 : vector<8x32xf32>
    %242 = arith.addf %176, %241 : vector<8x32xf32>
    %cst_111 = arith.constant dense<0.000000e+00> : vector<8xf32>
    %243 = vector.multi_reduction <add>, %242, %cst_111 [1] : vector<8x32xf32> to vector<8xf32>
    %244 = vector.shape_cast %243 : vector<8xf32> to vector<8x1xf32>
    %cst_112 = arith.constant 3.200000e+01 : f32
    %245 = vector.broadcast %cst_112 : f32 to vector<8x1xf32>
    %246 = arith.divf %244, %245 : vector<8x1xf32>
    %247 = vector.broadcast %246 : vector<8x1xf32> to vector<8x32xf32>
    %248 = arith.subf %242, %247 : vector<8x32xf32>
    %249 = arith.mulf %248, %248 : vector<8x32xf32>
    %cst_113 = arith.constant dense<0.000000e+00> : vector<8xf32>
    %250 = vector.multi_reduction <add>, %249, %cst_113 [1] : vector<8x32xf32> to vector<8xf32>
    %251 = vector.shape_cast %250 : vector<8xf32> to vector<8x1xf32>
    %cst_114 = arith.constant 3.200000e+01 : f32
    %252 = vector.broadcast %cst_114 : f32 to vector<8x1xf32>
    %253 = arith.divf %251, %252 : vector<8x1xf32>
    %254 = vector.broadcast %246 : vector<8x1xf32> to vector<8x32xf32>
    %255 = arith.subf %242, %254 : vector<8x32xf32>
    %cst_115 = arith.constant 9.99999974E-6 : f32
    %256 = vector.broadcast %cst_115 : f32 to vector<8x1xf32>
    %257 = arith.addf %253, %256 : vector<8x1xf32>
    %258 = math.rsqrt %257 : vector<8x1xf32>
    %259 = vector.broadcast %258 : vector<8x1xf32> to vector<8x32xf32>
    %260 = arith.mulf %255, %259 : vector<8x32xf32>
    %261 = vector.broadcast %169 : vector<1x32xf32> to vector<8x32xf32>
    %262 = arith.mulf %260, %261 : vector<8x32xf32>
    %263 = vector.broadcast %171 : vector<1x32xf32> to vector<8x32xf32>
    %264 = arith.addf %262, %263 : vector<8x32xf32>
    %265 = arith.truncf %264 : vector<8x32xf32> to vector<8x32xbf16>
    %cst_116 = arith.constant dense<0.000000e+00> : vector<8x2048xf32>
    %266 = tpu.matmul %265, %161, %cst_116 {dimension_numbers = #tpu.dot_dimension_numbers<[1], [0], [0], [1], [0, 0, 1, 1], [], []>} : vector<8x32xbf16>, vector<32x2048xbf16>, vector<8x2048xf32> -> vector<8x2048xf32>
    %267 = vector.broadcast %163 : vector<1x2048xf32> to vector<8x2048xf32>
    %268 = arith.addf %266, %267 : vector<8x2048xf32>
    %cst_117 = arith.constant 0.000000e+00 : f32
    %269 = vector.broadcast %cst_117 : f32 to vector<8x2048xf32>
    %270 = arith.maximumf %268, %269 : vector<8x2048xf32>
    %271 = arith.truncf %270 : vector<8x2048xf32> to vector<8x2048xbf16>
    %cst_118 = arith.constant dense<0.000000e+00> : vector<8x32xf32>
    %272 = tpu.matmul %271, %165, %cst_118 {dimension_numbers = #tpu.dot_dimension_numbers<[1], [0], [0], [1], [0, 0, 1, 1], [], []>} : vector<8x2048xbf16>, vector<2048x32xbf16>, vector<8x32xf32> -> vector<8x32xf32>
    %273 = vector.broadcast %167 : vector<1x32xf32> to vector<8x32xf32>
    %274 = arith.addf %272, %273 : vector<8x32xf32>
    %275 = arith.addf %264, %274 : vector<8x32xf32>
    %cst_119 = arith.constant dense<0.000000e+00> : vector<8xf32>
    %276 = vector.multi_reduction <add>, %275, %cst_119 [1] : vector<8x32xf32> to vector<8xf32>
    %277 = vector.shape_cast %276 : vector<8xf32> to vector<8x1xf32>
    %cst_120 = arith.constant 3.200000e+01 : f32
    %278 = vector.broadcast %cst_120 : f32 to vector<8x1xf32>
    %279 = arith.divf %277, %278 : vector<8x1xf32>
    %280 = vector.broadcast %279 : vector<8x1xf32> to vector<8x32xf32>
    %281 = arith.subf %275, %280 : vector<8x32xf32>
    %282 = arith.mulf %281, %281 : vector<8x32xf32>
    %cst_121 = arith.constant dense<0.000000e+00> : vector<8xf32>
    %283 = vector.multi_reduction <add>, %282, %cst_121 [1] : vector<8x32xf32> to vector<8xf32>
    %284 = vector.shape_cast %283 : vector<8xf32> to vector<8x1xf32>
    %cst_122 = arith.constant 3.200000e+01 : f32
    %285 = vector.broadcast %cst_122 : f32 to vector<8x1xf32>
    %286 = arith.divf %284, %285 : vector<8x1xf32>
    %287 = vector.broadcast %279 : vector<8x1xf32> to vector<8x32xf32>
    %288 = arith.subf %275, %287 : vector<8x32xf32>
    %cst_123 = arith.constant 9.99999974E-6 : f32
    %289 = vector.broadcast %cst_123 : f32 to vector<8x1xf32>
    %290 = arith.addf %286, %289 : vector<8x1xf32>
    %291 = math.rsqrt %290 : vector<8x1xf32>
    %292 = vector.broadcast %291 : vector<8x1xf32> to vector<8x32xf32>
    %293 = arith.mulf %288, %292 : vector<8x32xf32>
    %294 = vector.broadcast %173 : vector<1x32xf32> to vector<8x32xf32>
    %295 = arith.mulf %293, %294 : vector<8x32xf32>
    %296 = vector.broadcast %175 : vector<1x32xf32> to vector<8x32xf32>
    %297 = arith.addf %295, %296 : vector<8x32xf32>
    %298 = vector.shape_cast %297 : vector<8x32xf32> to vector<2x4x32xf32>
    %c1 = arith.constant 1 : index
    %c0_124 = arith.constant 0 : index
    %c0_125 = arith.constant 0 : index
    %299 = vector.load %arg14[%c1, %c0_124, %c0_125] : memref<3x32x96xbf16, #tpu.memory_space<vmem>>, vector<1x32x96xbf16>
    %300 = vector.shape_cast %299 : vector<1x32x96xbf16> to vector<32x96xbf16>
    %c1_126 = arith.constant 1 : index
    %c0_127 = arith.constant 0 : index
    %c0_128 = arith.constant 0 : index
    %301 = vector.load %arg15[%c1_126, %c0_127, %c0_128] : memref<3x1x96xf32, #tpu.memory_space<vmem>>, vector<1x1x96xf32>
    %302 = vector.shape_cast %301 : vector<1x1x96xf32> to vector<1x96xf32>
    %c1_129 = arith.constant 1 : index
    %c0_130 = arith.constant 0 : index
    %c0_131 = arith.constant 0 : index
    %303 = vector.load %arg16[%c1_129, %c0_130, %c0_131] : memref<3x32x32xbf16, #tpu.memory_space<vmem>>, vector<1x32x32xbf16>
    %304 = vector.shape_cast %303 : vector<1x32x32xbf16> to vector<32x32xbf16>
    %c1_132 = arith.constant 1 : index
    %c0_133 = arith.constant 0 : index
    %c0_134 = arith.constant 0 : index
    %305 = vector.load %arg17[%c1_132, %c0_133, %c0_134] : memref<3x1x32xf32, #tpu.memory_space<vmem>>, vector<1x1x32xf32>
    %306 = vector.shape_cast %305 : vector<1x1x32xf32> to vector<1x32xf32>
    %c1_135 = arith.constant 1 : index
    %c0_136 = arith.constant 0 : index
    %c0_137 = arith.constant 0 : index
    %307 = vector.load %arg18[%c1_135, %c0_136, %c0_137] : memref<3x32x2048xbf16, #tpu.memory_space<vmem>>, vector<1x32x2048xbf16>
    %308 = vector.shape_cast %307 : vector<1x32x2048xbf16> to vector<32x2048xbf16>
    %c1_138 = arith.constant 1 : index
    %c0_139 = arith.constant 0 : index
    %c0_140 = arith.constant 0 : index
    %309 = vector.load %arg19[%c1_138, %c0_139, %c0_140] : memref<3x1x2048xf32, #tpu.memory_space<vmem>>, vector<1x1x2048xf32>
    %310 = vector.shape_cast %309 : vector<1x1x2048xf32> to vector<1x2048xf32>
    %c1_141 = arith.constant 1 : index
    %c0_142 = arith.constant 0 : index
    %c0_143 = arith.constant 0 : index
    %311 = vector.load %arg20[%c1_141, %c0_142, %c0_143] : memref<3x2048x32xbf16, #tpu.memory_space<vmem>>, vector<1x2048x32xbf16>
    %312 = vector.shape_cast %311 : vector<1x2048x32xbf16> to vector<2048x32xbf16>
    %c1_144 = arith.constant 1 : index
    %c0_145 = arith.constant 0 : index
    %c0_146 = arith.constant 0 : index
    %313 = vector.load %arg21[%c1_144, %c0_145, %c0_146] : memref<3x1x32xf32, #tpu.memory_space<vmem>>, vector<1x1x32xf32>
    %314 = vector.shape_cast %313 : vector<1x1x32xf32> to vector<1x32xf32>
    %c1_147 = arith.constant 1 : index
    %c0_148 = arith.constant 0 : index
    %c0_149 = arith.constant 0 : index
    %315 = vector.load %arg22[%c1_147, %c0_148, %c0_149] : memref<3x1x32xf32, #tpu.memory_space<vmem>>, vector<1x1x32xf32>
    %316 = vector.shape_cast %315 : vector<1x1x32xf32> to vector<1x32xf32>
    %c1_150 = arith.constant 1 : index
    %c0_151 = arith.constant 0 : index
    %c0_152 = arith.constant 0 : index
    %317 = vector.load %arg23[%c1_150, %c0_151, %c0_152] : memref<3x1x32xf32, #tpu.memory_space<vmem>>, vector<1x1x32xf32>
    %318 = vector.shape_cast %317 : vector<1x1x32xf32> to vector<1x32xf32>
    %c1_153 = arith.constant 1 : index
    %c0_154 = arith.constant 0 : index
    %c0_155 = arith.constant 0 : index
    %319 = vector.load %arg24[%c1_153, %c0_154, %c0_155] : memref<3x1x32xf32, #tpu.memory_space<vmem>>, vector<1x1x32xf32>
    %320 = vector.shape_cast %319 : vector<1x1x32xf32> to vector<1x32xf32>
    %c1_156 = arith.constant 1 : index
    %c0_157 = arith.constant 0 : index
    %c0_158 = arith.constant 0 : index
    %321 = vector.load %arg25[%c1_156, %c0_157, %c0_158] : memref<3x1x32xf32, #tpu.memory_space<vmem>>, vector<1x1x32xf32>
    %322 = vector.shape_cast %321 : vector<1x1x32xf32> to vector<1x32xf32>
    %323 = vector.shape_cast %298 : vector<2x4x32xf32> to vector<8x32xf32>
    %324 = arith.truncf %323 : vector<8x32xf32> to vector<8x32xbf16>
    %cst_159 = arith.constant dense<0.000000e+00> : vector<8x96xf32>
    %325 = tpu.matmul %324, %300, %cst_159 {dimension_numbers = #tpu.dot_dimension_numbers<[1], [0], [0], [1], [0, 0, 1, 1], [], []>} : vector<8x32xbf16>, vector<32x96xbf16>, vector<8x96xf32> -> vector<8x96xf32>
    %326 = vector.broadcast %302 : vector<1x96xf32> to vector<8x96xf32>
    %327 = arith.addf %325, %326 : vector<8x96xf32>
    %328 = vector.extract_strided_slice %327 {offsets = [0, 0], sizes = [8, 8], strides = [1, 1]} : vector<8x96xf32> to vector<8x8xf32>
    %329 = vector.shape_cast %328 : vector<8x8xf32> to vector<1x2x4x8xf32>
    %330 = vector.extract_strided_slice %327 {offsets = [0, 8], sizes = [8, 8], strides = [1, 1]} : vector<8x96xf32> to vector<8x8xf32>
    %331 = vector.shape_cast %330 : vector<8x8xf32> to vector<1x2x4x8xf32>
    %332 = vector.extract_strided_slice %327 {offsets = [0, 16], sizes = [8, 8], strides = [1, 1]} : vector<8x96xf32> to vector<8x8xf32>
    %333 = vector.shape_cast %332 : vector<8x8xf32> to vector<1x2x4x8xf32>
    %334 = vector.extract_strided_slice %327 {offsets = [0, 24], sizes = [8, 8], strides = [1, 1]} : vector<8x96xf32> to vector<8x8xf32>
    %335 = vector.shape_cast %334 : vector<8x8xf32> to vector<1x2x4x8xf32>
    %336 = tpu.concatenate %329, %331, %333, %335 in 0 : vector<1x2x4x8xf32>, vector<1x2x4x8xf32>, vector<1x2x4x8xf32>, vector<1x2x4x8xf32> -> vector<4x2x4x8xf32>
    %337 = vector.shape_cast %336 : vector<4x2x4x8xf32> to vector<8x4x8xf32>
    %338 = vector.extract_strided_slice %327 {offsets = [0, 32], sizes = [8, 8], strides = [1, 1]} : vector<8x96xf32> to vector<8x8xf32>
    %339 = vector.shape_cast %338 : vector<8x8xf32> to vector<1x2x4x8xf32>
    %340 = vector.extract_strided_slice %327 {offsets = [0, 40], sizes = [8, 8], strides = [1, 1]} : vector<8x96xf32> to vector<8x8xf32>
    %341 = vector.shape_cast %340 : vector<8x8xf32> to vector<1x2x4x8xf32>
    %342 = vector.extract_strided_slice %327 {offsets = [0, 48], sizes = [8, 8], strides = [1, 1]} : vector<8x96xf32> to vector<8x8xf32>
    %343 = vector.shape_cast %342 : vector<8x8xf32> to vector<1x2x4x8xf32>
    %344 = vector.extract_strided_slice %327 {offsets = [0, 56], sizes = [8, 8], strides = [1, 1]} : vector<8x96xf32> to vector<8x8xf32>
    %345 = vector.shape_cast %344 : vector<8x8xf32> to vector<1x2x4x8xf32>
    %346 = tpu.concatenate %339, %341, %343, %345 in 0 : vector<1x2x4x8xf32>, vector<1x2x4x8xf32>, vector<1x2x4x8xf32>, vector<1x2x4x8xf32> -> vector<4x2x4x8xf32>
    %347 = vector.shape_cast %346 : vector<4x2x4x8xf32> to vector<8x4x8xf32>
    %348 = vector.extract_strided_slice %327 {offsets = [0, 64], sizes = [8, 8], strides = [1, 1]} : vector<8x96xf32> to vector<8x8xf32>
    %349 = vector.shape_cast %348 : vector<8x8xf32> to vector<1x2x4x8xf32>
    %350 = vector.extract_strided_slice %327 {offsets = [0, 72], sizes = [8, 8], strides = [1, 1]} : vector<8x96xf32> to vector<8x8xf32>
    %351 = vector.shape_cast %350 : vector<8x8xf32> to vector<1x2x4x8xf32>
    %352 = vector.extract_strided_slice %327 {offsets = [0, 80], sizes = [8, 8], strides = [1, 1]} : vector<8x96xf32> to vector<8x8xf32>
    %353 = vector.shape_cast %352 : vector<8x8xf32> to vector<1x2x4x8xf32>
    %354 = vector.extract_strided_slice %327 {offsets = [0, 88], sizes = [8, 8], strides = [1, 1]} : vector<8x96xf32> to vector<8x8xf32>
    %355 = vector.shape_cast %354 : vector<8x8xf32> to vector<1x2x4x8xf32>
    %356 = tpu.concatenate %349, %351, %353, %355 in 0 : vector<1x2x4x8xf32>, vector<1x2x4x8xf32>, vector<1x2x4x8xf32>, vector<1x2x4x8xf32> -> vector<4x2x4x8xf32>
    %357 = vector.shape_cast %356 : vector<4x2x4x8xf32> to vector<8x4x8xf32>
    %358 = arith.truncf %337 : vector<8x4x8xf32> to vector<8x4x8xbf16>
    %359 = arith.truncf %347 : vector<8x4x8xf32> to vector<8x4x8xbf16>
    "tpu.trace_start"() <{level = 10 : i32, message = "bqd,bkd->bqk"}> : () -> ()
    %cst_160 = arith.constant dense<0.000000e+00> : vector<8x4x4xf32>
    %360 = tpu.matmul %358, %359, %cst_160 {dimension_numbers = #tpu.dot_dimension_numbers<[2], [2], [1], [1], [0, 0, 0, 1, 1, 1], [0], [0]>} : vector<8x4x8xbf16>, vector<8x4x8xbf16>, vector<8x4x4xf32> -> vector<8x4x4xf32>
    "tpu.trace_stop"() : () -> ()
    %cst_161 = arith.constant 0.353553385 : f32
    %361 = vector.broadcast %cst_161 : f32 to vector<8x4x4xf32>
    %362 = arith.mulf %360, %361 : vector<8x4x4xf32>
    %cst_162 = arith.constant dense<0xFF800000> : vector<8x4xf32>
    %363 = vector.multi_reduction <maximumf>, %362, %cst_162 [2] : vector<8x4x4xf32> to vector<8x4xf32>
    %364 = vector.shape_cast %363 : vector<8x4xf32> to vector<8x4x1xf32>
    %365 = vector.broadcast %364 : vector<8x4x1xf32> to vector<8x4x4xf32>
    %366 = arith.subf %362, %365 : vector<8x4x4xf32>
    %367 = math.exp %366 : vector<8x4x4xf32>
    %cst_163 = arith.constant dense<0.000000e+00> : vector<8x4xf32>
    %368 = vector.multi_reduction <add>, %367, %cst_163 [2] : vector<8x4x4xf32> to vector<8x4xf32>
    %369 = vector.shape_cast %368 : vector<8x4xf32> to vector<8x4x1xf32>
    %370 = tpu.reciprocal %369 {approx = true} : vector<8x4x1xf32> -> vector<8x4x1xf32>
    %371 = vector.broadcast %370 : vector<8x4x1xf32> to vector<8x4x4xf32>
    %372 = arith.mulf %367, %371 : vector<8x4x4xf32>
    %373 = arith.truncf %372 : vector<8x4x4xf32> to vector<8x4x4xbf16>
    %374 = arith.truncf %357 : vector<8x4x8xf32> to vector<8x4x8xbf16>
    "tpu.trace_start"() <{level = 10 : i32, message = "bqk,bkd->bqd"}> : () -> ()
    %cst_164 = arith.constant dense<0.000000e+00> : vector<8x4x8xf32>
    %375 = tpu.matmul %373, %374, %cst_164 {dimension_numbers = #tpu.dot_dimension_numbers<[2], [1], [1], [2], [0, 0, 0, 1, 1, 2], [0], [0]>} : vector<8x4x4xbf16>, vector<8x4x8xbf16>, vector<8x4x8xf32> -> vector<8x4x8xf32>
    "tpu.trace_stop"() : () -> ()
    %376 = vector.extract_strided_slice %375 {offsets = [0, 0, 0], sizes = [2, 4, 8], strides = [1, 1, 1]} : vector<8x4x8xf32> to vector<2x4x8xf32>
    %377 = vector.shape_cast %376 : vector<2x4x8xf32> to vector<8x8xf32>
    %378 = vector.extract_strided_slice %375 {offsets = [2, 0, 0], sizes = [2, 4, 8], strides = [1, 1, 1]} : vector<8x4x8xf32> to vector<2x4x8xf32>
    %379 = vector.shape_cast %378 : vector<2x4x8xf32> to vector<8x8xf32>
    %380 = vector.extract_strided_slice %375 {offsets = [4, 0, 0], sizes = [2, 4, 8], strides = [1, 1, 1]} : vector<8x4x8xf32> to vector<2x4x8xf32>
    %381 = vector.shape_cast %380 : vector<2x4x8xf32> to vector<8x8xf32>
    %382 = vector.extract_strided_slice %375 {offsets = [6, 0, 0], sizes = [2, 4, 8], strides = [1, 1, 1]} : vector<8x4x8xf32> to vector<2x4x8xf32>
    %383 = vector.shape_cast %382 : vector<2x4x8xf32> to vector<8x8xf32>
    %384 = tpu.concatenate %377, %379, %381, %383 in 1 : vector<8x8xf32>, vector<8x8xf32>, vector<8x8xf32>, vector<8x8xf32> -> vector<8x32xf32>
    %385 = arith.truncf %384 : vector<8x32xf32> to vector<8x32xbf16>
    %cst_165 = arith.constant dense<0.000000e+00> : vector<8x32xf32>
    %386 = tpu.matmul %385, %304, %cst_165 {dimension_numbers = #tpu.dot_dimension_numbers<[1], [0], [0], [1], [0, 0, 1, 1], [], []>} : vector<8x32xbf16>, vector<32x32xbf16>, vector<8x32xf32> -> vector<8x32xf32>
    %387 = vector.broadcast %306 : vector<1x32xf32> to vector<8x32xf32>
    %388 = arith.addf %386, %387 : vector<8x32xf32>
    %389 = arith.addf %323, %388 : vector<8x32xf32>
    %cst_166 = arith.constant dense<0.000000e+00> : vector<8xf32>
    %390 = vector.multi_reduction <add>, %389, %cst_166 [1] : vector<8x32xf32> to vector<8xf32>
    %391 = vector.shape_cast %390 : vector<8xf32> to vector<8x1xf32>
    %cst_167 = arith.constant 3.200000e+01 : f32
    %392 = vector.broadcast %cst_167 : f32 to vector<8x1xf32>
    %393 = arith.divf %391, %392 : vector<8x1xf32>
    %394 = vector.broadcast %393 : vector<8x1xf32> to vector<8x32xf32>
    %395 = arith.subf %389, %394 : vector<8x32xf32>
    %396 = arith.mulf %395, %395 : vector<8x32xf32>
    %cst_168 = arith.constant dense<0.000000e+00> : vector<8xf32>
    %397 = vector.multi_reduction <add>, %396, %cst_168 [1] : vector<8x32xf32> to vector<8xf32>
    %398 = vector.shape_cast %397 : vector<8xf32> to vector<8x1xf32>
    %cst_169 = arith.constant 3.200000e+01 : f32
    %399 = vector.broadcast %cst_169 : f32 to vector<8x1xf32>
    %400 = arith.divf %398, %399 : vector<8x1xf32>
    %401 = vector.broadcast %393 : vector<8x1xf32> to vector<8x32xf32>
    %402 = arith.subf %389, %401 : vector<8x32xf32>
    %cst_170 = arith.constant 9.99999974E-6 : f32
    %403 = vector.broadcast %cst_170 : f32 to vector<8x1xf32>
    %404 = arith.addf %400, %403 : vector<8x1xf32>
    %405 = math.rsqrt %404 : vector<8x1xf32>
    %406 = vector.broadcast %405 : vector<8x1xf32> to vector<8x32xf32>
    %407 = arith.mulf %402, %406 : vector<8x32xf32>
    %408 = vector.broadcast %316 : vector<1x32xf32> to vector<8x32xf32>
    %409 = arith.mulf %407, %408 : vector<8x32xf32>
    %410 = vector.broadcast %318 : vector<1x32xf32> to vector<8x32xf32>
    %411 = arith.addf %409, %410 : vector<8x32xf32>
    %412 = arith.truncf %411 : vector<8x32xf32> to vector<8x32xbf16>
    %cst_171 = arith.constant dense<0.000000e+00> : vector<8x2048xf32>
    %413 = tpu.matmul %412, %308, %cst_171 {dimension_numbers = #tpu.dot_dimension_numbers<[1], [0], [0], [1], [0, 0, 1, 1], [], []>} : vector<8x32xbf16>, vector<32x2048xbf16>, vector<8x2048xf32> -> vector<8x2048xf32>
    %414 = vector.broadcast %310 : vector<1x2048xf32> to vector<8x2048xf32>
    %415 = arith.addf %413, %414 : vector<8x2048xf32>
    %cst_172 = arith.constant 0.000000e+00 : f32
    %416 = vector.broadcast %cst_172 : f32 to vector<8x2048xf32>
    %417 = arith.maximumf %415, %416 : vector<8x2048xf32>
    %418 = arith.truncf %417 : vector<8x2048xf32> to vector<8x2048xbf16>
    %cst_173 = arith.constant dense<0.000000e+00> : vector<8x32xf32>
    %419 = tpu.matmul %418, %312, %cst_173 {dimension_numbers = #tpu.dot_dimension_numbers<[1], [0], [0], [1], [0, 0, 1, 1], [], []>} : vector<8x2048xbf16>, vector<2048x32xbf16>, vector<8x32xf32> -> vector<8x32xf32>
    %420 = vector.broadcast %314 : vector<1x32xf32> to vector<8x32xf32>
    %421 = arith.addf %419, %420 : vector<8x32xf32>
    %422 = arith.addf %411, %421 : vector<8x32xf32>
    %cst_174 = arith.constant dense<0.000000e+00> : vector<8xf32>
    %423 = vector.multi_reduction <add>, %422, %cst_174 [1] : vector<8x32xf32> to vector<8xf32>
    %424 = vector.shape_cast %423 : vector<8xf32> to vector<8x1xf32>
    %cst_175 = arith.constant 3.200000e+01 : f32
    %425 = vector.broadcast %cst_175 : f32 to vector<8x1xf32>
    %426 = arith.divf %424, %425 : vector<8x1xf32>
    %427 = vector.broadcast %426 : vector<8x1xf32> to vector<8x32xf32>
    %428 = arith.subf %422, %427 : vector<8x32xf32>
    %429 = arith.mulf %428, %428 : vector<8x32xf32>
    %cst_176 = arith.constant dense<0.000000e+00> : vector<8xf32>
    %430 = vector.multi_reduction <add>, %429, %cst_176 [1] : vector<8x32xf32> to vector<8xf32>
    %431 = vector.shape_cast %430 : vector<8xf32> to vector<8x1xf32>
    %cst_177 = arith.constant 3.200000e+01 : f32
    %432 = vector.broadcast %cst_177 : f32 to vector<8x1xf32>
    %433 = arith.divf %431, %432 : vector<8x1xf32>
    %434 = vector.broadcast %426 : vector<8x1xf32> to vector<8x32xf32>
    %435 = arith.subf %422, %434 : vector<8x32xf32>
    %cst_178 = arith.constant 9.99999974E-6 : f32
    %436 = vector.broadcast %cst_178 : f32 to vector<8x1xf32>
    %437 = arith.addf %433, %436 : vector<8x1xf32>
    %438 = math.rsqrt %437 : vector<8x1xf32>
    %439 = vector.broadcast %438 : vector<8x1xf32> to vector<8x32xf32>
    %440 = arith.mulf %435, %439 : vector<8x32xf32>
    %441 = vector.broadcast %320 : vector<1x32xf32> to vector<8x32xf32>
    %442 = arith.mulf %440, %441 : vector<8x32xf32>
    %443 = vector.broadcast %322 : vector<1x32xf32> to vector<8x32xf32>
    %444 = arith.addf %442, %443 : vector<8x32xf32>
    %445 = vector.shape_cast %444 : vector<8x32xf32> to vector<2x4x32xf32>
    %c2 = arith.constant 2 : index
    %c0_179 = arith.constant 0 : index
    %c0_180 = arith.constant 0 : index
    %446 = vector.load %arg14[%c2, %c0_179, %c0_180] : memref<3x32x96xbf16, #tpu.memory_space<vmem>>, vector<1x32x96xbf16>
    %447 = vector.shape_cast %446 : vector<1x32x96xbf16> to vector<32x96xbf16>
    %c2_181 = arith.constant 2 : index
    %c0_182 = arith.constant 0 : index
    %c0_183 = arith.constant 0 : index
    %448 = vector.load %arg15[%c2_181, %c0_182, %c0_183] : memref<3x1x96xf32, #tpu.memory_space<vmem>>, vector<1x1x96xf32>
    %449 = vector.shape_cast %448 : vector<1x1x96xf32> to vector<1x96xf32>
    %c2_184 = arith.constant 2 : index
    %c0_185 = arith.constant 0 : index
    %c0_186 = arith.constant 0 : index
    %450 = vector.load %arg16[%c2_184, %c0_185, %c0_186] : memref<3x32x32xbf16, #tpu.memory_space<vmem>>, vector<1x32x32xbf16>
    %451 = vector.shape_cast %450 : vector<1x32x32xbf16> to vector<32x32xbf16>
    %c2_187 = arith.constant 2 : index
    %c0_188 = arith.constant 0 : index
    %c0_189 = arith.constant 0 : index
    %452 = vector.load %arg17[%c2_187, %c0_188, %c0_189] : memref<3x1x32xf32, #tpu.memory_space<vmem>>, vector<1x1x32xf32>
    %453 = vector.shape_cast %452 : vector<1x1x32xf32> to vector<1x32xf32>
    %c2_190 = arith.constant 2 : index
    %c0_191 = arith.constant 0 : index
    %c0_192 = arith.constant 0 : index
    %454 = vector.load %arg18[%c2_190, %c0_191, %c0_192] : memref<3x32x2048xbf16, #tpu.memory_space<vmem>>, vector<1x32x2048xbf16>
    %455 = vector.shape_cast %454 : vector<1x32x2048xbf16> to vector<32x2048xbf16>
    %c2_193 = arith.constant 2 : index
    %c0_194 = arith.constant 0 : index
    %c0_195 = arith.constant 0 : index
    %456 = vector.load %arg19[%c2_193, %c0_194, %c0_195] : memref<3x1x2048xf32, #tpu.memory_space<vmem>>, vector<1x1x2048xf32>
    %457 = vector.shape_cast %456 : vector<1x1x2048xf32> to vector<1x2048xf32>
    %c2_196 = arith.constant 2 : index
    %c0_197 = arith.constant 0 : index
    %c0_198 = arith.constant 0 : index
    %458 = vector.load %arg20[%c2_196, %c0_197, %c0_198] : memref<3x2048x32xbf16, #tpu.memory_space<vmem>>, vector<1x2048x32xbf16>
    %459 = vector.shape_cast %458 : vector<1x2048x32xbf16> to vector<2048x32xbf16>
    %c2_199 = arith.constant 2 : index
    %c0_200 = arith.constant 0 : index
    %c0_201 = arith.constant 0 : index
    %460 = vector.load %arg21[%c2_199, %c0_200, %c0_201] : memref<3x1x32xf32, #tpu.memory_space<vmem>>, vector<1x1x32xf32>
    %461 = vector.shape_cast %460 : vector<1x1x32xf32> to vector<1x32xf32>
    %c2_202 = arith.constant 2 : index
    %c0_203 = arith.constant 0 : index
    %c0_204 = arith.constant 0 : index
    %462 = vector.load %arg22[%c2_202, %c0_203, %c0_204] : memref<3x1x32xf32, #tpu.memory_space<vmem>>, vector<1x1x32xf32>
    %463 = vector.shape_cast %462 : vector<1x1x32xf32> to vector<1x32xf32>
    %c2_205 = arith.constant 2 : index
    %c0_206 = arith.constant 0 : index
    %c0_207 = arith.constant 0 : index
    %464 = vector.load %arg23[%c2_205, %c0_206, %c0_207] : memref<3x1x32xf32, #tpu.memory_space<vmem>>, vector<1x1x32xf32>
    %465 = vector.shape_cast %464 : vector<1x1x32xf32> to vector<1x32xf32>
    %c2_208 = arith.constant 2 : index
    %c0_209 = arith.constant 0 : index
    %c0_210 = arith.constant 0 : index
    %466 = vector.load %arg24[%c2_208, %c0_209, %c0_210] : memref<3x1x32xf32, #tpu.memory_space<vmem>>, vector<1x1x32xf32>
    %467 = vector.shape_cast %466 : vector<1x1x32xf32> to vector<1x32xf32>
    %c2_211 = arith.constant 2 : index
    %c0_212 = arith.constant 0 : index
    %c0_213 = arith.constant 0 : index
    %468 = vector.load %arg25[%c2_211, %c0_212, %c0_213] : memref<3x1x32xf32, #tpu.memory_space<vmem>>, vector<1x1x32xf32>
    %469 = vector.shape_cast %468 : vector<1x1x32xf32> to vector<1x32xf32>
    %470 = vector.shape_cast %445 : vector<2x4x32xf32> to vector<8x32xf32>
    %471 = arith.truncf %470 : vector<8x32xf32> to vector<8x32xbf16>
    %cst_214 = arith.constant dense<0.000000e+00> : vector<8x96xf32>
    %472 = tpu.matmul %471, %447, %cst_214 {dimension_numbers = #tpu.dot_dimension_numbers<[1], [0], [0], [1], [0, 0, 1, 1], [], []>} : vector<8x32xbf16>, vector<32x96xbf16>, vector<8x96xf32> -> vector<8x96xf32>
    %473 = vector.broadcast %449 : vector<1x96xf32> to vector<8x96xf32>
    %474 = arith.addf %472, %473 : vector<8x96xf32>
    %475 = vector.extract_strided_slice %474 {offsets = [0, 0], sizes = [8, 8], strides = [1, 1]} : vector<8x96xf32> to vector<8x8xf32>
    %476 = vector.shape_cast %475 : vector<8x8xf32> to vector<1x2x4x8xf32>
    %477 = vector.extract_strided_slice %474 {offsets = [0, 8], sizes = [8, 8], strides = [1, 1]} : vector<8x96xf32> to vector<8x8xf32>
    %478 = vector.shape_cast %477 : vector<8x8xf32> to vector<1x2x4x8xf32>
    %479 = vector.extract_strided_slice %474 {offsets = [0, 16], sizes = [8, 8], strides = [1, 1]} : vector<8x96xf32> to vector<8x8xf32>
    %480 = vector.shape_cast %479 : vector<8x8xf32> to vector<1x2x4x8xf32>
    %481 = vector.extract_strided_slice %474 {offsets = [0, 24], sizes = [8, 8], strides = [1, 1]} : vector<8x96xf32> to vector<8x8xf32>
    %482 = vector.shape_cast %481 : vector<8x8xf32> to vector<1x2x4x8xf32>
    %483 = tpu.concatenate %476, %478, %480, %482 in 0 : vector<1x2x4x8xf32>, vector<1x2x4x8xf32>, vector<1x2x4x8xf32>, vector<1x2x4x8xf32> -> vector<4x2x4x8xf32>
    %484 = vector.shape_cast %483 : vector<4x2x4x8xf32> to vector<8x4x8xf32>
    %485 = vector.extract_strided_slice %474 {offsets = [0, 32], sizes = [8, 8], strides = [1, 1]} : vector<8x96xf32> to vector<8x8xf32>
    %486 = vector.shape_cast %485 : vector<8x8xf32> to vector<1x2x4x8xf32>
    %487 = vector.extract_strided_slice %474 {offsets = [0, 40], sizes = [8, 8], strides = [1, 1]} : vector<8x96xf32> to vector<8x8xf32>
    %488 = vector.shape_cast %487 : vector<8x8xf32> to vector<1x2x4x8xf32>
    %489 = vector.extract_strided_slice %474 {offsets = [0, 48], sizes = [8, 8], strides = [1, 1]} : vector<8x96xf32> to vector<8x8xf32>
    %490 = vector.shape_cast %489 : vector<8x8xf32> to vector<1x2x4x8xf32>
    %491 = vector.extract_strided_slice %474 {offsets = [0, 56], sizes = [8, 8], strides = [1, 1]} : vector<8x96xf32> to vector<8x8xf32>
    %492 = vector.shape_cast %491 : vector<8x8xf32> to vector<1x2x4x8xf32>
    %493 = tpu.concatenate %486, %488, %490, %492 in 0 : vector<1x2x4x8xf32>, vector<1x2x4x8xf32>, vector<1x2x4x8xf32>, vector<1x2x4x8xf32> -> vector<4x2x4x8xf32>
    %494 = vector.shape_cast %493 : vector<4x2x4x8xf32> to vector<8x4x8xf32>
    %495 = vector.extract_strided_slice %474 {offsets = [0, 64], sizes = [8, 8], strides = [1, 1]} : vector<8x96xf32> to vector<8x8xf32>
    %496 = vector.shape_cast %495 : vector<8x8xf32> to vector<1x2x4x8xf32>
    %497 = vector.extract_strided_slice %474 {offsets = [0, 72], sizes = [8, 8], strides = [1, 1]} : vector<8x96xf32> to vector<8x8xf32>
    %498 = vector.shape_cast %497 : vector<8x8xf32> to vector<1x2x4x8xf32>
    %499 = vector.extract_strided_slice %474 {offsets = [0, 80], sizes = [8, 8], strides = [1, 1]} : vector<8x96xf32> to vector<8x8xf32>
    %500 = vector.shape_cast %499 : vector<8x8xf32> to vector<1x2x4x8xf32>
    %501 = vector.extract_strided_slice %474 {offsets = [0, 88], sizes = [8, 8], strides = [1, 1]} : vector<8x96xf32> to vector<8x8xf32>
    %502 = vector.shape_cast %501 : vector<8x8xf32> to vector<1x2x4x8xf32>
    %503 = tpu.concatenate %496, %498, %500, %502 in 0 : vector<1x2x4x8xf32>, vector<1x2x4x8xf32>, vector<1x2x4x8xf32>, vector<1x2x4x8xf32> -> vector<4x2x4x8xf32>
    %504 = vector.shape_cast %503 : vector<4x2x4x8xf32> to vector<8x4x8xf32>
    %505 = arith.truncf %484 : vector<8x4x8xf32> to vector<8x4x8xbf16>
    %506 = arith.truncf %494 : vector<8x4x8xf32> to vector<8x4x8xbf16>
    "tpu.trace_start"() <{level = 10 : i32, message = "bqd,bkd->bqk"}> : () -> ()
    %cst_215 = arith.constant dense<0.000000e+00> : vector<8x4x4xf32>
    %507 = tpu.matmul %505, %506, %cst_215 {dimension_numbers = #tpu.dot_dimension_numbers<[2], [2], [1], [1], [0, 0, 0, 1, 1, 1], [0], [0]>} : vector<8x4x8xbf16>, vector<8x4x8xbf16>, vector<8x4x4xf32> -> vector<8x4x4xf32>
    "tpu.trace_stop"() : () -> ()
    %cst_216 = arith.constant 0.353553385 : f32
    %508 = vector.broadcast %cst_216 : f32 to vector<8x4x4xf32>
    %509 = arith.mulf %507, %508 : vector<8x4x4xf32>
    %cst_217 = arith.constant dense<0xFF800000> : vector<8x4xf32>
    %510 = vector.multi_reduction <maximumf>, %509, %cst_217 [2] : vector<8x4x4xf32> to vector<8x4xf32>
    %511 = vector.shape_cast %510 : vector<8x4xf32> to vector<8x4x1xf32>
    %512 = vector.broadcast %511 : vector<8x4x1xf32> to vector<8x4x4xf32>
    %513 = arith.subf %509, %512 : vector<8x4x4xf32>
    %514 = math.exp %513 : vector<8x4x4xf32>
    %cst_218 = arith.constant dense<0.000000e+00> : vector<8x4xf32>
    %515 = vector.multi_reduction <add>, %514, %cst_218 [2] : vector<8x4x4xf32> to vector<8x4xf32>
    %516 = vector.shape_cast %515 : vector<8x4xf32> to vector<8x4x1xf32>
    %517 = tpu.reciprocal %516 {approx = true} : vector<8x4x1xf32> -> vector<8x4x1xf32>
    %518 = vector.broadcast %517 : vector<8x4x1xf32> to vector<8x4x4xf32>
    %519 = arith.mulf %514, %518 : vector<8x4x4xf32>
    %520 = arith.truncf %519 : vector<8x4x4xf32> to vector<8x4x4xbf16>
    %521 = arith.truncf %504 : vector<8x4x8xf32> to vector<8x4x8xbf16>
    "tpu.trace_start"() <{level = 10 : i32, message = "bqk,bkd->bqd"}> : () -> ()
    %cst_219 = arith.constant dense<0.000000e+00> : vector<8x4x8xf32>
    %522 = tpu.matmul %520, %521, %cst_219 {dimension_numbers = #tpu.dot_dimension_numbers<[2], [1], [1], [2], [0, 0, 0, 1, 1, 2], [0], [0]>} : vector<8x4x4xbf16>, vector<8x4x8xbf16>, vector<8x4x8xf32> -> vector<8x4x8xf32>
    "tpu.trace_stop"() : () -> ()
    %523 = vector.extract_strided_slice %522 {offsets = [0, 0, 0], sizes = [2, 4, 8], strides = [1, 1, 1]} : vector<8x4x8xf32> to vector<2x4x8xf32>
    %524 = vector.shape_cast %523 : vector<2x4x8xf32> to vector<8x8xf32>
    %525 = vector.extract_strided_slice %522 {offsets = [2, 0, 0], sizes = [2, 4, 8], strides = [1, 1, 1]} : vector<8x4x8xf32> to vector<2x4x8xf32>
    %526 = vector.shape_cast %525 : vector<2x4x8xf32> to vector<8x8xf32>
    %527 = vector.extract_strided_slice %522 {offsets = [4, 0, 0], sizes = [2, 4, 8], strides = [1, 1, 1]} : vector<8x4x8xf32> to vector<2x4x8xf32>
    %528 = vector.shape_cast %527 : vector<2x4x8xf32> to vector<8x8xf32>
    %529 = vector.extract_strided_slice %522 {offsets = [6, 0, 0], sizes = [2, 4, 8], strides = [1, 1, 1]} : vector<8x4x8xf32> to vector<2x4x8xf32>
    %530 = vector.shape_cast %529 : vector<2x4x8xf32> to vector<8x8xf32>
    %531 = tpu.concatenate %524, %526, %528, %530 in 1 : vector<8x8xf32>, vector<8x8xf32>, vector<8x8xf32>, vector<8x8xf32> -> vector<8x32xf32>
    %532 = arith.truncf %531 : vector<8x32xf32> to vector<8x32xbf16>
    %cst_220 = arith.constant dense<0.000000e+00> : vector<8x32xf32>
    %533 = tpu.matmul %532, %451, %cst_220 {dimension_numbers = #tpu.dot_dimension_numbers<[1], [0], [0], [1], [0, 0, 1, 1], [], []>} : vector<8x32xbf16>, vector<32x32xbf16>, vector<8x32xf32> -> vector<8x32xf32>
    %534 = vector.broadcast %453 : vector<1x32xf32> to vector<8x32xf32>
    %535 = arith.addf %533, %534 : vector<8x32xf32>
    %536 = arith.addf %470, %535 : vector<8x32xf32>
    %cst_221 = arith.constant dense<0.000000e+00> : vector<8xf32>
    %537 = vector.multi_reduction <add>, %536, %cst_221 [1] : vector<8x32xf32> to vector<8xf32>
    %538 = vector.shape_cast %537 : vector<8xf32> to vector<8x1xf32>
    %cst_222 = arith.constant 3.200000e+01 : f32
    %539 = vector.broadcast %cst_222 : f32 to vector<8x1xf32>
    %540 = arith.divf %538, %539 : vector<8x1xf32>
    %541 = vector.broadcast %540 : vector<8x1xf32> to vector<8x32xf32>
    %542 = arith.subf %536, %541 : vector<8x32xf32>
    %543 = arith.mulf %542, %542 : vector<8x32xf32>
    %cst_223 = arith.constant dense<0.000000e+00> : vector<8xf32>
    %544 = vector.multi_reduction <add>, %543, %cst_223 [1] : vector<8x32xf32> to vector<8xf32>
    %545 = vector.shape_cast %544 : vector<8xf32> to vector<8x1xf32>
    %cst_224 = arith.constant 3.200000e+01 : f32
    %546 = vector.broadcast %cst_224 : f32 to vector<8x1xf32>
    %547 = arith.divf %545, %546 : vector<8x1xf32>
    %548 = vector.broadcast %540 : vector<8x1xf32> to vector<8x32xf32>
    %549 = arith.subf %536, %548 : vector<8x32xf32>
    %cst_225 = arith.constant 9.99999974E-6 : f32
    %550 = vector.broadcast %cst_225 : f32 to vector<8x1xf32>
    %551 = arith.addf %547, %550 : vector<8x1xf32>
    %552 = math.rsqrt %551 : vector<8x1xf32>
    %553 = vector.broadcast %552 : vector<8x1xf32> to vector<8x32xf32>
    %554 = arith.mulf %549, %553 : vector<8x32xf32>
    %555 = vector.broadcast %463 : vector<1x32xf32> to vector<8x32xf32>
    %556 = arith.mulf %554, %555 : vector<8x32xf32>
    %557 = vector.broadcast %465 : vector<1x32xf32> to vector<8x32xf32>
    %558 = arith.addf %556, %557 : vector<8x32xf32>
    %559 = arith.truncf %558 : vector<8x32xf32> to vector<8x32xbf16>
    %cst_226 = arith.constant dense<0.000000e+00> : vector<8x2048xf32>
    %560 = tpu.matmul %559, %455, %cst_226 {dimension_numbers = #tpu.dot_dimension_numbers<[1], [0], [0], [1], [0, 0, 1, 1], [], []>} : vector<8x32xbf16>, vector<32x2048xbf16>, vector<8x2048xf32> -> vector<8x2048xf32>
    %561 = vector.broadcast %457 : vector<1x2048xf32> to vector<8x2048xf32>
    %562 = arith.addf %560, %561 : vector<8x2048xf32>
    %cst_227 = arith.constant 0.000000e+00 : f32
    %563 = vector.broadcast %cst_227 : f32 to vector<8x2048xf32>
    %564 = arith.maximumf %562, %563 : vector<8x2048xf32>
    %565 = arith.truncf %564 : vector<8x2048xf32> to vector<8x2048xbf16>
    %cst_228 = arith.constant dense<0.000000e+00> : vector<8x32xf32>
    %566 = tpu.matmul %565, %459, %cst_228 {dimension_numbers = #tpu.dot_dimension_numbers<[1], [0], [0], [1], [0, 0, 1, 1], [], []>} : vector<8x2048xbf16>, vector<2048x32xbf16>, vector<8x32xf32> -> vector<8x32xf32>
    %567 = vector.broadcast %461 : vector<1x32xf32> to vector<8x32xf32>
    %568 = arith.addf %566, %567 : vector<8x32xf32>
    %569 = arith.addf %558, %568 : vector<8x32xf32>
    %cst_229 = arith.constant dense<0.000000e+00> : vector<8xf32>
    %570 = vector.multi_reduction <add>, %569, %cst_229 [1] : vector<8x32xf32> to vector<8xf32>
    %571 = vector.shape_cast %570 : vector<8xf32> to vector<8x1xf32>
    %cst_230 = arith.constant 3.200000e+01 : f32
    %572 = vector.broadcast %cst_230 : f32 to vector<8x1xf32>
    %573 = arith.divf %571, %572 : vector<8x1xf32>
    %574 = vector.broadcast %573 : vector<8x1xf32> to vector<8x32xf32>
    %575 = arith.subf %569, %574 : vector<8x32xf32>
    %576 = arith.mulf %575, %575 : vector<8x32xf32>
    %cst_231 = arith.constant dense<0.000000e+00> : vector<8xf32>
    %577 = vector.multi_reduction <add>, %576, %cst_231 [1] : vector<8x32xf32> to vector<8xf32>
    %578 = vector.shape_cast %577 : vector<8xf32> to vector<8x1xf32>
    %cst_232 = arith.constant 3.200000e+01 : f32
    %579 = vector.broadcast %cst_232 : f32 to vector<8x1xf32>
    %580 = arith.divf %578, %579 : vector<8x1xf32>
    %581 = vector.broadcast %573 : vector<8x1xf32> to vector<8x32xf32>
    %582 = arith.subf %569, %581 : vector<8x32xf32>
    %cst_233 = arith.constant 9.99999974E-6 : f32
    %583 = vector.broadcast %cst_233 : f32 to vector<8x1xf32>
    %584 = arith.addf %580, %583 : vector<8x1xf32>
    %585 = math.rsqrt %584 : vector<8x1xf32>
    %586 = vector.broadcast %585 : vector<8x1xf32> to vector<8x32xf32>
    %587 = arith.mulf %582, %586 : vector<8x32xf32>
    %588 = vector.broadcast %467 : vector<1x32xf32> to vector<8x32xf32>
    %589 = arith.mulf %587, %588 : vector<8x32xf32>
    %590 = vector.broadcast %469 : vector<1x32xf32> to vector<8x32xf32>
    %591 = arith.addf %589, %590 : vector<8x32xf32>
    %592 = vector.shape_cast %591 : vector<8x32xf32> to vector<2x4x32xf32>
    %c0_234 = arith.constant 0 : index
    %c0_235 = arith.constant 0 : index
    %c0_236 = arith.constant 0 : index
    %593 = vector.load %arg26[%c0_234, %c0_235, %c0_236] : memref<2x4x32xf32, #tpu.memory_space<vmem>>, vector<2x4x32xf32>
    tpu.vector_store %arg26[%c0_234, %c0_235, %c0_236], %592 {strides = array<i32>} : memref<2x4x32xf32, #tpu.memory_space<vmem>>, vector<2x4x32xf32>,
    return
  }
}

</mosaic_0001>

<bundles_post_ra>
// kernel: _lambda_.1
= control target key start
LH: loop header
LB: loop body
LE: loop exit
PB: predicated region body
PF: predicated region fallthrough
CT: control target
= control target key end

     0   :  { %s14129_s0 = inlined_call_operand.vmem [shape: f32[2,3,32], index: 0, kind: input, shape index: {}]   ;;  %s14130_s1 = inlined_call_operand.vmem [shape: f32[2,1,32], index: 1, kind: input, shape index: {}]   ;;  %s14131_s2 = inlined_call_operand.hbm [shape: bf16[1,32,96], index: 2, kind: input, shape index: {}]   ;;  %s14132_s3 = inlined_call_operand.vmem [shape: f32[1,1,96], index: 3, kind: input, shape index: {}]   ;;  %s14133_s4 = inlined_call_operand.hbm [shape: bf16[1,32,32], index: 4, kind: input, shape index: {}]   ;;  %s14134_s5 = inlined_call_operand.vmem [shape: f32[1,1,32], index: 5, kind: input, shape index: {}, may-alias: {5,9,11,13}]   ;;  %s14135_s6 = inlined_call_operand.hbm [shape: bf16[1,32,512], index: 6, kind: input, shape index: {}]   ;;  %s14136_s7 = inlined_call_operand.vmem [shape: f32[1,1,512], index: 7, kind: input, shape index: {}]   ;;  %s14137_s8 = inlined_call_operand.hbm [shape: bf16[1,512,32], index: 8, kind: input, shape index: {}]   ;;  %s14138_s9 = inlined_call_operand.vmem [shape: f32[1,1,32], index: 9, kind: input, shape index: {}, may-alias: {5,9,11,13}]   ;;  %s14139_s10 = inlined_call_operand.vmem [shape: f32[1,1,32], index: 10, kind: input, shape index: {}, may-alias: {10,12}]   ;;  %s14140_s11 = inlined_call_operand.vmem [shape: f32[1,1,32], index: 11, kind: input, shape index: {}, may-alias: {5,9,11,13}]   ;;  %s14141_s12 = inlined_call_operand.vmem [shape: f32[1,1,32], index: 12, kind: input, shape index: {}, may-alias: {10,12}]   ;;  %s14142_s13 = inlined_call_operand.vmem [shape: f32[1,1,32], index: 13, kind: input, shape index: {}, may-alias: {5,9,11,13}]   ;;  %s14143_s14 = inlined_call_operand.hbm [shape: bf16[3,32,96], index: 14, kind: input, shape index: {}]   ;;  %s14144_s15 = inlined_call_operand.vmem [shape: f32[3,1,96], index: 15, kind: input, shape index: {}]   ;;  %s14145_s16 = inlined_call_operand.hbm [shape: bf16[3,32,32], index: 16, kind: input, shape index: {}]   ;;  %s14146_s17 = inlined_call_operand.vmem [shape: f32[3,1,32], index: 17, kind: input, shape index: {}, may-alias: {17,21,23,25}]   ;;  %s14147_s18 = inlined_call_operand.hbm [shape: bf16[3,32,2048], index: 18, kind: input, shape index: {}]   ;;  %s14148_s19 = inlined_call_operand.vmem [shape: f32[3,1,2048], index: 19, kind: input, shape index: {}]   ;;  %s14149_s20 = inlined_call_operand.hbm [shape: bf16[3,2048,32], index: 20, kind: input, shape index: {}]   ;;  %s14150_s21 = inlined_call_operand.vmem [shape: f32[3,1,32], index: 21, kind: input, shape index: {}, may-alias: {17,21,23,25}]   ;;  %s14151_s22 = inlined_call_operand.vmem [shape: f32[3,1,32], index: 22, kind: input, shape index: {}, may-alias: {22,24}]   ;;  %s14152_s23 = inlined_call_operand.vmem [shape: f32[3,1,32], index: 23, kind: input, shape index: {}, may-alias: {17,21,23,25}]   ;;  %s14153_s24 = inlined_call_operand.vmem [shape: f32[3,1,32], index: 24, kind: input, shape index: {}, may-alias: {22,24}]   ;;  %s14154_s25 = inlined_call_operand.vmem [shape: f32[3,1,32], index: 25, kind: input, shape index: {}, may-alias: {17,21,23,25}]   ;;  %s14155_s26 = inlined_call_operand.hbm [shape: f32[2,4,32], index: 26, kind: output, shape index: {}]  }
   0x1   :  { %14158 = sst [smem:[#allocation23_spill]] %s14129_s0 }
   0x2   :  { %14159 = sst [smem:[#allocation24_spill]] %s14130_s1 }
   0x3   :  { %14160 = sst [smem:[#allocation25_spill]] %s14131_s2 }
   0x4   :  { %14161 = sst [smem:[#allocation26_spill]] %s14132_s3 }
   0x5   :  { %14162 = sst [smem:[#allocation27_spill]] %s14133_s4 }
   0x6   :  { %14163 = sst [smem:[#allocation28_spill]] %s14134_s5 }
   0x7   :  { %14164 = sst [smem:[#allocation29_spill]] %s14135_s6 }
   0x8   :  { %14165 = sst [smem:[#allocation30_spill]] %s14136_s7 }
   0x9   :  { %14166 = sst [smem:[#allocation31_spill]] %s14137_s8 }
   0xa   :  { %14167 = sst [smem:[#allocation32_spill]] %s14138_s9 }
   0xb   :  { %14168 = sst [smem:[#allocation33_spill]] %s14139_s10 }
   0xc   :  { %14169 = sst [smem:[#allocation34_spill]] %s14155_s26 }
   0xd   :  { %31 = vsyncpa [#allocation3], 0 }
   0xe   :  { %32 = vsyncpa [#allocation6], 0 }
   0xf   :  { %33 = vsyncpa [#allocation9], 0 }
  0x10   :  { %34 = vsyncpa [#allocation12], 0 }
  0x11   :  { %35 = vsyncpa [#allocation15], 0 }
  0x12   :  { %36 = vsyncpa [#allocation4], 0  ;;  %s14170_s7 = sld [smem:[#allocation27_spill]]  ;;  %s12659_s8 = smov [#allocation5]  }
  0x13   :  { %s62_s4 = sshll.u32 %s12659_s8, 4  ;;  %s14171_s9 = sld [smem:[#allocation31_spill]]  ;;  %s63_s4 = int_to_ptr.vmem [resolvable:$true] %s62_s4 }
  0x14   :  { %s12660_s2 = smov 64   ;;  %s12661_s5 = smov 4  }
  0x15   :  { %s12662_s10 = smov [#allocation8]   ;;  %s128_s3 = sshll.u32 %s14145_s16, 4  ;;  %s129_s3 = int_to_ptr.hbm [resolvable:$true] %s128_s3 }
  0x16   :  { %s92_s6 = sshll.u32 %s12662_s10, 4  ;;  %s14172_s29 = sld [smem:[#allocation25_spill]]  ;;  %s93_s6 = int_to_ptr.vmem [resolvable:$true] %s92_s6 }
  0x17   :  { %s14173_s1 = sld [smem:[#allocation29_spill]] }
  0x18   :  { %s60_s28 = sshll.u32 %s14170_s7, 4  ;;  %s158_s7 = sshll.u32 %s14149_s20, 4  ;;  %s61_s28 = int_to_ptr.hbm [resolvable:$true] %s60_s28  ;;  %s159_s7 = int_to_ptr.hbm [resolvable:$true] %s158_s7 }
  0x19   :  { %s90_s30 = sshll.u32 %s14171_s9, 4  ;;  %s12663_s9 = smov [#allocation11]   ;;  %s91_s30 = int_to_ptr.hbm [resolvable:$true] %s90_s30 }
  0x1a   :  { %68 = dma.hbm_to_vmem [thread:$0]  %s61_s28, 256, %s63_s4, [#allocation6], %s12660_s2, %s12660_s2, %s12661_s5  }
  0x1b   :  { %98 = dma.hbm_to_vmem [thread:$0]  %s91_s30, 4096, %s93_s6, [#allocation9], %s12660_s2, %s12660_s2, %s12661_s5  }
  0x1c   :  { %s45_s0 = sshll.u32 %s14172_s29, 4  ;;  %s130_s26 = sshll.u32 %s12663_s9, 4  ;;  %s46_s0 = int_to_ptr.hbm [resolvable:$true] %s45_s0  ;;  %s131_s26 = int_to_ptr.vmem [resolvable:$true] %s130_s26 }
  0x1d   :  { %136 = dma.hbm_to_vmem [thread:$0]  %s129_s3, 768, %s131_s26, [#allocation12], %s12660_s2, %s12660_s2, %s12661_s5  }
  0x1e   :  { %s12664_s28 = smov [#allocation2]   ;;  %s75_s27 = sshll.u32 %s14173_s1, 4  ;;  %s76_s27 = int_to_ptr.hbm [resolvable:$true] %s75_s27 }
  0x1f   :  { %s47_s16 = sshll.u32 %s12664_s28, 4  ;;  %s12665_s30 = smov [#allocation7]   ;;  %s48_s16 = int_to_ptr.vmem [resolvable:$true] %s47_s16 }
  0x20   :  { %53 = dma.hbm_to_vmem [thread:$0]  %s46_s0, 256, %s48_s16, [#allocation3], %s12660_s2, %s12660_s2, %s12661_s5  }
  0x21   :  { %s77_s6 = sshll.u32 %s12665_s30, 4  ;;  %s113_s29 = sshll.u32 %s14143_s14, 4  ;;  %s78_s6 = int_to_ptr.vmem [resolvable:$true] %s77_s6  ;;  %s114_s29 = int_to_ptr.hbm [resolvable:$true] %s113_s29 }
  0x22   :  { %s12666_s26 = smov 256   ;;  %s12667_s3 = smov 16  }
  0x23   :  { %83 = dma.hbm_to_vmem [thread:$0]  %s76_s27, 1024, %s78_s6, [#allocation6], %s12666_s26, %s12666_s26, %s12667_s3  }
  0x24   :  { %s12668_s9 = smov [#allocation10]   ;;  %s143_s1 = sshll.u32 %s14147_s18, 4  ;;  %s144_s1 = int_to_ptr.hbm [resolvable:$true] %s143_s1 }
  0x25   :  { %s115_s28 = sshll.u32 %s12668_s9, 4  ;;  %s12669_s0 = smov [#allocation13]   ;;  %s116_s28 = int_to_ptr.vmem [resolvable:$true] %s115_s28 }
  0x26   :  { %121 = dma.hbm_to_vmem [thread:$0]  %s114_s29, 768, %s116_s28, [#allocation9], %s12660_s2, %s12660_s2, %s12661_s5  }
  0x27   :  { %s145_s16 = sshll.u32 %s12669_s0, 4  ;;  %s12670_s27 = smov 1024   ;;  %s146_s16 = int_to_ptr.vmem [resolvable:$true] %s145_s16 }
  0x28   :  { %151 = dma.hbm_to_vmem [thread:$0]  %s144_s1, 12288, %s146_s16, [#allocation12], %s12670_s27, %s12670_s27, %s12660_s2  }
  0x29   :  { %s12671_s6 = smov [#allocation14]  }
  0x2a   :  { %s160_s8 = sshll.u32 %s12671_s6, 4  ;;  %s161_s8 = int_to_ptr.vmem [resolvable:$true] %s160_s8 }
  0x2b   :  { %166 = dma.hbm_to_vmem [thread:$0]  %s159_s7, 49152, %s161_s8, [#allocation15], %s12660_s2, %s12660_s2, %s12661_s5  }
  0x2c   :  { %12647 = dma.done.wait [#allocation3], 256  }
  0x2d   :  { %12648 = vsyncadd [#allocation3], 4294967040 }
  0x2e   :  { %12649 = dma.done.wait [#allocation6], 1280  }
  0x2f   :  { %12650 = vsyncadd [#allocation6], 4294966016 }
  0x30   :  { %12651 = dma.done.wait [#allocation9], 4864  }
  0x31   :  { %12652 = vsyncadd [#allocation9], 4294962432 }
  0x32   :  { %12653 = dma.done.wait [#allocation12], 13056  }
  0x33   :  { %12654 = vsyncadd [#allocation12], 4294954240 }
  0x34   :  { %12655 = dma.done.wait [#allocation15], 49152  }
  0x35   :  { %12656 = vsyncadd [#allocation15], 4294918144  ;;  %v11698_v0 = vld [vmem:[#allocation2 + $0x8] sm:$0xff]  ;;  %v11697_v1 = vld [vmem:[#allocation2] sm:$0xff]  ;;  %s14174_s29 = sld [smem:[#allocation23_spill]]  ;;  %vm339_vm0 = vcmask 261120  }
  0x36   :  { %349 = vmatpush.bf16.msra.mxu0 %v11698_v0  ;;  %s14175_s10 = sld [smem:[#allocation26_spill]]  ;;  %s12672_s1 = smov 120   ;;  %vm503_vm1 = vcmask 64512   ;;  %vm699_vm2 = vcmask 18432   ;;  %vm855_vm3 = vcmask 1040384   ;;  %vm856_vm4 = vcmask 1041408  }
  0x37   :  { %s12673_s0 = smov 112   ;;  %s12674_s16 = smov 104   ;;  %vm851_vm5 = vcmask 23552   ;;  %vm1126_vm6 = vcmask 130048   ;;  %vm1128_vm7 = vcmask 195584   ;;  %vm1198_vm8 = vcmask 259072  }
  0x38   :  { %s12675_s14 = smov 96   ;;  %s12677_s30 = smov 8   ;;  %vm1884_vm13 = vcmask 253952  }
  0x39   :  { %s12678_s7 = smov 24   ;;  %s14176_s8 = sld [smem:[#allocation28_spill]] }
  0x3a   :  { %350 = vmatpush.bf16.msra.mxu0 %v11697_v1  ;;  %s14178_s4 = sld [smem:[#allocation30_spill]] }
  0x3b   :  { %v12865_v2 = vld [vmem:[%s14174_s29] sm:$0x7]  ;;  %v12870_v3 = vld [vmem:[%s14174_s29 + $0x4] sm:$0x7]  ;;  %s14177_s29 = sld [smem:[#allocation33_spill]] }
  0x3c   :  { %v302_v4 = vrot.slane %v12865_v2, 1  ;;  %v303_v5 = vrot.slane %v12865_v2, 2  ;;  %310 = vst [vmem:[#allocation1] ss:$9 sm:$0xff] %v12865_v2  ;;  %v304_v6 = vrot.slane %v12870_v3, 1  ;;  %v305_v7 = vrot.slane %v12870_v3, 2 }
  0x3d   :  { %316 = vst [vmem:[#allocation1 + $0x3] ss:$9 sm:$0xff] %v12870_v3  ;;  %v12257_v10 = vld [vmem:[%s14175_s10] ss:$0 sm:$0xff]  ;;  %s14179_s6 = sld [smem:[#allocation32_spill]] }
  0x3e   :  { %312 = vst [vmem:[#allocation1 + $0x1] ss:$9 sm:$0xff] %v302_v4  ;;  %s14180_s20 = sld [smem:[#allocation24_spill]] }
  0x3f   :  { %314 = vst [vmem:[#allocation1 + $0x2] ss:$9 sm:$0xff] %v303_v5  ;;  %s14181_s10 = sld [smem:[#allocation34_spill]] }
  0x40   :  { %318 = vst [vmem:[#allocation1 + $0x4] ss:$9 sm:$0xff] %v304_v6 }
  0x41   :  { %320 = vst [vmem:[#allocation1 + $0x5] ss:$9 sm:$0xff] %v305_v7 }
  0x45   :  { %s9394_s27 = sshll.u32 %s14181_s10, 4  ;;  %s9395_s27 = int_to_ptr.hbm [resolvable:$true] %s9394_s27 }
  0x48   :  { %v321_v8 = vld [vmem:[#allocation1] sm:$0xff] }
  0x49   :  { %v323_v9 = vpack.c.bf16 %v321_v8, %v321_v8 }
  0x4b   :  { %9419 = vmatmul.msk.bf16.vlgmr.msra.gmra.mxu0 %vm339_vm0, %v323_v9 }
  0xc8   :  { %v352_v11 = vpop.f32.mrf.mxu0 }
  0xc9   :  { %v12890_v12 = vadd.f32 %v12257_v10, %v352_v11 }
  0xcb   :  { %398 = vst [vmem:[#allocation1] ss:$9 sm:$0xff] %v12890_v12  ;;  %362 = vrot.lane.b32.xlu0 %v12890_v12, %s12672_s1  ;;  %v12896_v13 = vrot.slane %v12890_v12, 4  ;;  %v12899_v14 = vrot.slane %v12890_v12, 2  ;;  %v12902_v15 = vrot.slane %v12890_v12, 1  ;;  %v12913_v17 = vrot.slane %v12890_v12, 5 }
  0xcc   :  { %v12916_v18 = vrot.slane %v12890_v12, 3 }
  0xcd   :  { %370 = vrot.lane.b32.xlu2 %v12896_v13, %s12672_s1  ;;  %366 = vrot.lane.b32.xlu1 %v12899_v14, %s12672_s1  ;;  %402 = vst [vmem:[#allocation1 + $0x2] ss:$9 sm:$0xff] %v12899_v14 }
  0xce   :  { %400 = vst [vmem:[#allocation1 + $0x1] ss:$9 sm:$0xff] %v12902_v15 }
  0xd0   :  { %v354_v16 = vpop.f32.mrf.mxu0 }
  0xd3   :  { %364 = vrot.lane.b32.xlu0 %v12902_v15, %s12672_s1 }
  0xd5   :  { %372 = vrot.lane.b32.xlu2 %v12913_v17, %s12672_s1  ;;  %368 = vrot.lane.b32.xlu1 %v12916_v18, %s12672_s1  ;;  %v12922_v19 = vld [vmem:[#allocation1] sm:$0xff] }
  0xd6   :  { %404 = vst [vmem:[#allocation1] ss:$9 sm:$0xff] %v12916_v18 }
  0xd7   :  { %405 = vst [vmem:[#allocation1 + $0x1] ss:$9 sm:$0xff] %v12896_v13 }
  0xd8   :  { %406 = vst [vmem:[#allocation1 + $0x2] ss:$9 sm:$0xff] %v12913_v17 }
  0xdb   :  { %374 = vrot.lane.b32.xlu0 %v12890_v12, %s12673_s0 }
  0xdd   :  { %378 = vrot.lane.b32.xlu2 %v12899_v14, %s12673_s0  ;;  %376 = vrot.lane.b32.xlu1 %v12902_v15, %s12673_s0 }
  0xdf   :  { %v12953_v21 = vld [vmem:[#allocation1] sm:$0xff] }
  0xe3   :  { %380 = vrot.lane.b32.xlu0 %v12916_v18, %s12673_s0 }
  0xe5   :  { %384 = vrot.lane.b32.xlu2 %v12913_v17, %s12673_s0  ;;  %382 = vrot.lane.b32.xlu1 %v12896_v13, %s12673_s0 }
  0xeb   :  { %386 = vrot.lane.b32.xlu0 %v12890_v12, %s12674_s16 }
  0xed   :  { %390 = vrot.lane.b32.xlu2 %v12899_v14, %s12674_s16  ;;  %388 = vrot.lane.b32.xlu1 %v12902_v15, %s12674_s16 }
  0xf3   :  { %392 = vrot.lane.b32.xlu0 %v12916_v18, %s12674_s16 }
  0xf5   :  { %396 = vrot.lane.b32.xlu2 %v12913_v17, %s12674_s16  ;;  %394 = vrot.lane.b32.xlu1 %v12896_v13, %s12674_s16 }
 0x127   :  { %v12959_v23 = vpop.permute.xlu2 %370 }
 0x12f   :  { %v12964_v25 = vpop.permute.xlu2 %372 }
 0x137   :  { %v12973_v28 = vpop.permute.xlu2 %378 }
 0x13d   :  { %v12951_v20 = vpop.permute.xlu0 %362 }
 0x13e   :  { %408 = vst [vmem:[#allocation1] ss:$9 sm:$0xff] %v12951_v20 }
 0x13f   :  { %v12956_v22 = vpop.permute.xlu1 %366  ;;  %v12984_v32 = vpop.permute.xlu2 %384 }
 0x140   :  { %410 = vst [vmem:[#allocation1 + $0x2] ss:$9 sm:$0xff] %v12956_v22 }
 0x145   :  { %v12961_v24 = vpop.permute.xlu0 %364 }
 0x146   :  { %409 = vst [vmem:[#allocation1 + $0x1] ss:$9 sm:$0xff] %v12961_v24 }
 0x147   :  { %v12970_v27 = vpop.permute.xlu1 %368  ;;  %v12995_v36 = vpop.permute.xlu2 %390 }
 0x14d   :  { %v12966_v26 = vld [vmem:[#allocation1] sm:$0xff]  ;;  %v12978_v30 = vpop.permute.xlu0 %374 }
 0x14e   :  { %413 = vst [vmem:[#allocation1 + $0x1] ss:$9 sm:$0xff] %v12959_v23 }
 0x14f   :  { %414 = vst [vmem:[#allocation1 + $0x2] ss:$9 sm:$0xff] %v12964_v25  ;;  %v12981_v31 = vpop.permute.xlu1 %376  ;;  %v13006_v40 = vpop.permute.xlu2 %396 }
 0x150   :  { %412 = vst [vmem:[#allocation1] ss:$9 sm:$0xff] %v12970_v27 }
 0x155   :  { %v12989_v34 = vpop.permute.xlu0 %380 }
 0x157   :  { %v12975_v29 = vld [vmem:[#allocation1] sm:$0xff]  ;;  %v12992_v35 = vpop.permute.xlu1 %382 }
 0x158   :  { %418 = vst [vmem:[#allocation1 + $0x2] ss:$9 sm:$0xff] %v12973_v28 }
 0x159   :  { %416 = vst [vmem:[#allocation1] ss:$9 sm:$0xff] %v12978_v30 }
 0x15a   :  { %417 = vst [vmem:[#allocation1 + $0x1] ss:$9 sm:$0xff] %v12981_v31 }
 0x15d   :  { %v13000_v38 = vpop.permute.xlu0 %386 }
 0x15f   :  { %v13003_v39 = vpop.permute.xlu1 %388 }
 0x161   :  { %v12986_v33 = vld [vmem:[#allocation1] sm:$0xff] }
 0x162   :  { %422 = vst [vmem:[#allocation1 + $0x2] ss:$9 sm:$0xff] %v12984_v32 }
 0x163   :  { %420 = vst [vmem:[#allocation1] ss:$9 sm:$0xff] %v12989_v34 }
 0x164   :  { %421 = vst [vmem:[#allocation1 + $0x1] ss:$9 sm:$0xff] %v12992_v35 }
 0x165   :  { %v13011_v42 = vpop.permute.xlu0 %392 }
 0x167   :  { %v13014_v43 = vpop.permute.xlu1 %394 }
 0x16b   :  { %v12997_v37 = vld [vmem:[#allocation1] sm:$0xff] }
 0x16c   :  { %426 = vst [vmem:[#allocation1 + $0x2] ss:$9 sm:$0xff] %v12995_v36 }
 0x16d   :  { %424 = vst [vmem:[#allocation1] ss:$9 sm:$0xff] %v13000_v38 }
 0x16e   :  { %425 = vst [vmem:[#allocation1 + $0x1] ss:$9 sm:$0xff] %v13003_v39 }
 0x175   :  { %v13008_v41 = vld [vmem:[#allocation1] sm:$0xff] }
 0x176   :  { %430 = vst [vmem:[#allocation1 + $0x2] ss:$9 sm:$0xff] %v13006_v40 }
 0x177   :  { %428 = vst [vmem:[#allocation1] ss:$9 sm:$0xff] %v13011_v42 }
 0x178   :  { %429 = vst [vmem:[#allocation1 + $0x1] ss:$9 sm:$0xff] %v13014_v43 }
 0x17f   :  { %v13017_v44 = vld [vmem:[#allocation1] sm:$0xff] }
 0x180   :  { %448 = vst [vmem:[#allocation1] ss:$9 sm:$0xff] %v12890_v12 }
 0x181   :  { %450 = vst [vmem:[#allocation1 + $0x1] ss:$9 sm:$0xff] %v12902_v15 }
 0x182   :  { %452 = vst [vmem:[#allocation1 + $0x2] ss:$9 sm:$0xff] %v12899_v14 }
 0x189   :  { %v453_v45 = vld [vmem:[#allocation1] sm:$0xff] }
 0x18a   :  { %454 = vst [vmem:[#allocation1] ss:$9 sm:$0xff] %v12916_v18  ;;  %v490_v46 = vpack.c.bf16 %v453_v45, %v453_v45 }
 0x18b   :  { %455 = vst [vmem:[#allocation1 + $0x1] ss:$9 sm:$0xff] %v12896_v13 }
 0x18c   :  { %456 = vst [vmem:[#allocation1 + $0x2] ss:$9 sm:$0xff] %v12913_v17  ;;  %v499_v47 = vunpack.c.l.b16 %v490_v46 }
 0x18e   :  { %v500_v48 = vpack.c.b16 %v499_v47, %v499_v47 }
 0x190   :  { %501 = vrot.lane.b32.xlu2 %v500_v48, %s12675_s14 }
 0x193   :  { %v457_v49 = vld [vmem:[#allocation1] sm:$0xff] }
 0x194   :  { %458 = vst [vmem:[#allocation1] ss:$9 sm:$0xff] %v12951_v20  ;;  %v491_v50 = vpack.c.bf16 %v457_v49, %v457_v49 }
 0x195   :  { %459 = vst [vmem:[#allocation1 + $0x1] ss:$9 sm:$0xff] %v12961_v24 }
 0x196   :  { %460 = vst [vmem:[#allocation1 + $0x2] ss:$9 sm:$0xff] %v12956_v22  ;;  %v524_v51 = vunpack.c.l.b16 %v491_v50 }
 0x198   :  { %v525_v52 = vpack.c.b16 %v524_v51, %v524_v51 }
 0x19a   :  { %526 = vrot.lane.b32.xlu0 %v525_v52, %s12675_s14 }
 0x19d   :  { %v461_v53 = vld [vmem:[#allocation1] sm:$0xff] }
 0x19e   :  { %462 = vst [vmem:[#allocation1] ss:$9 sm:$0xff] %v12970_v27  ;;  %v492_v54 = vpack.c.bf16 %v461_v53, %v461_v53 }
 0x19f   :  { %463 = vst [vmem:[#allocation1 + $0x1] ss:$9 sm:$0xff] %v12959_v23 }
 0x1a0   :  { %464 = vst [vmem:[#allocation1 + $0x2] ss:$9 sm:$0xff] %v12964_v25  ;;  %v548_v55 = vunpack.c.l.b16 %v492_v54 }
 0x1a2   :  { %v549_v56 = vpack.c.b16 %v548_v55, %v548_v55 }
 0x1a4   :  { %550 = vrot.lane.b32.xlu1 %v549_v56, %s12675_s14 }
 0x1a7   :  { %v465_v57 = vld [vmem:[#allocation1] sm:$0xff] }
 0x1a8   :  { %466 = vst [vmem:[#allocation1] ss:$9 sm:$0xff] %v12978_v30  ;;  %v493_v58 = vpack.c.bf16 %v465_v57, %v465_v57 }
 0x1a9   :  { %467 = vst [vmem:[#allocation1 + $0x1] ss:$9 sm:$0xff] %v12981_v31 }
 0x1aa   :  { %468 = vst [vmem:[#allocation1 + $0x2] ss:$9 sm:$0xff] %v12973_v28  ;;  %v572_v59 = vunpack.c.l.b16 %v493_v58 }
 0x1ac   :  { %v573_v60 = vpack.c.b16 %v572_v59, %v572_v59 }
 0x1ae   :  { %574 = vrot.lane.b32.xlu1 %v573_v60, %s12675_s14 }
 0x1b1   :  { %v469_v61 = vld [vmem:[#allocation1] sm:$0xff] }
 0x1b2   :  { %470 = vst [vmem:[#allocation1] ss:$9 sm:$0xff] %v12989_v34  ;;  %v494_v8 = vpack.c.bf16 %v469_v61, %v469_v61 }
 0x1b3   :  { %471 = vst [vmem:[#allocation1 + $0x1] ss:$9 sm:$0xff] %v12992_v35 }
 0x1b4   :  { %472 = vst [vmem:[#allocation1 + $0x2] ss:$9 sm:$0xff] %v12984_v32  ;;  %v596_v9 = vunpack.c.l.b16 %v494_v8 }
 0x1b6   :  { %v597_v16 = vpack.c.b16 %v596_v9, %v596_v9 }
 0x1bb   :  { %v473_v62 = vld [vmem:[#allocation1] sm:$0xff] }
 0x1bc   :  { %474 = vst [vmem:[#allocation1] ss:$9 sm:$0xff] %v13000_v38  ;;  %v495_v63 = vpack.c.bf16 %v473_v62, %v473_v62 }
 0x1bd   :  { %475 = vst [vmem:[#allocation1 + $0x1] ss:$9 sm:$0xff] %v13003_v39 }
 0x1be   :  { %476 = vst [vmem:[#allocation1 + $0x2] ss:$9 sm:$0xff] %v12995_v36  ;;  %v620_v0 = vunpack.c.l.b16 %v495_v63 }
 0x1c0   :  { %v621_v1 = vpack.c.b16 %v620_v0, %v620_v0 }
 0x1c2   :  { %622 = vrot.lane.b32.xlu0 %v621_v1, %s12675_s14 }
 0x1c5   :  { %v477_v10 = vld [vmem:[#allocation1] sm:$0xff] }
 0x1c6   :  { %478 = vst [vmem:[#allocation1] ss:$9 sm:$0xff] %v13011_v42  ;;  %v496_v11 = vpack.c.bf16 %v477_v10, %v477_v10 }
 0x1c7   :  { %479 = vst [vmem:[#allocation1 + $0x1] ss:$9 sm:$0xff] %v13014_v43 }
 0x1c8   :  { %480 = vst [vmem:[#allocation1 + $0x2] ss:$9 sm:$0xff] %v13006_v40  ;;  %v644_v45 = vunpack.c.l.b16 %v496_v11 }
 0x1ca   :  { %598 = vrot.lane.b32.xlu0 %v597_v16, %s12675_s14  ;;  %v645_v46 = vpack.c.b16 %v644_v45, %v644_v45 }
 0x1cc   :  { %646 = vrot.lane.b32.xlu2 %v645_v46, %s12675_s14 }
 0x1cf   :  { %v481_v47 = vld [vmem:[#allocation1] sm:$0xff] }
 0x1d0   :  { %796 = vst [vmem:[#allocation1] ss:$9 sm:$0xff] %v12890_v12  ;;  %v497_v48 = vpack.c.bf16 %v481_v47, %v481_v47 }
 0x1d1   :  { %798 = vst [vmem:[#allocation1 + $0x1] ss:$9 sm:$0xff] %v12902_v15 }
 0x1d2   :  { %800 = vst [vmem:[#allocation1 + $0x2] ss:$9 sm:$0xff] %v12899_v14  ;;  %v668_v49 = vunpack.c.l.b16 %v497_v48 }
 0x1d4   :  { %v669_v50 = vpack.c.b16 %v668_v49, %v668_v49 }
 0x1d6   :  { %670 = vrot.lane.b32.xlu1 %v669_v50, %s12675_s14 }
 0x1d9   :  { %v13054_v51 = vld [vmem:[#allocation1] sm:$0xff] }
 0x1da   :  { %802 = vst [vmem:[#allocation1] ss:$9 sm:$0xff] %v12916_v18  ;;  %v838_v50 = vpack.c.bf16 %v13054_v51, %v13054_v51 }
 0x1db   :  { %803 = vst [vmem:[#allocation1 + $0x1] ss:$9 sm:$0xff] %v12896_v13  ;;  %v440_v13 = vpack.c.bf16 %v12922_v19, %v12922_v19 }
 0x1dc   :  { %804 = vst [vmem:[#allocation1 + $0x2] ss:$9 sm:$0xff] %v12913_v17 }
 0x1e3   :  { %v13059_v52 = vld [vmem:[#allocation1] sm:$0xff] }
 0x1e4   :  { %806 = vst [vmem:[#allocation1] ss:$9 sm:$0xff] %v12951_v20 }
 0x1e5   :  { %807 = vst [vmem:[#allocation1 + $0x1] ss:$9 sm:$0xff] %v12961_v24 }
 0x1e6   :  { %808 = vst [vmem:[#allocation1 + $0x2] ss:$9 sm:$0xff] %v12956_v22 }
 0x1ea   :  { %v502_v12 = vpop.permute.xlu2 %501 }
 0x1eb   :  { %v508_v14 = vsel %vm503_vm1, %v502_v12, 0 }
 0x1ec   :  { %517 = vmatpush.bf16.xpose.msra.mxu1 %v508_v14  ;;  %v847_v14 = vunpack.c.l.b16 %v838_v50 }
 0x1ed   :  { %v13065_v15 = vld [vmem:[#allocation1] sm:$0xff] }
 0x1ee   :  { %810 = vst [vmem:[#allocation1] ss:$9 sm:$0xff] %v12970_v27 }
 0x1ef   :  { %811 = vst [vmem:[#allocation1 + $0x1] ss:$9 sm:$0xff] %v12959_v23  ;;  %v441_v23 = vpack.c.bf16 %v12953_v21, %v12953_v21 }
 0x1f0   :  { %812 = vst [vmem:[#allocation1 + $0x2] ss:$9 sm:$0xff] %v12964_v25 }
 0x1f3   :  { %9420 = vmatmul.msk.bf16.vlgmr.msra.gmra.mxu1 %vm503_vm1, %v440_v13 }
 0x1f7   :  { %v13073_v17 = vld [vmem:[#allocation1] sm:$0xff] }
 0x1f8   :  { %814 = vst [vmem:[#allocation1] ss:$9 sm:$0xff] %v12978_v30 }
 0x1f9   :  { %815 = vst [vmem:[#allocation1 + $0x1] ss:$9 sm:$0xff] %v12981_v31 }
 0x1fa   :  { %816 = vst [vmem:[#allocation1 + $0x2] ss:$9 sm:$0xff] %v12973_v28  ;;  %v442_v28 = vpack.c.bf16 %v12966_v26, %v12966_v26 }
 0x201   :  { %v13078_v18 = vld [vmem:[#allocation1] sm:$0xff] }
 0x202   :  { %818 = vst [vmem:[#allocation1] ss:$9 sm:$0xff] %v12989_v34  ;;  %v443_v34 = vpack.c.bf16 %v12975_v29, %v12975_v29 }
 0x203   :  { %819 = vst [vmem:[#allocation1 + $0x1] ss:$9 sm:$0xff] %v12992_v35  ;;  %v446_v35 = vpack.c.bf16 %v13008_v41, %v13008_v41 }
 0x204   :  { %820 = vst [vmem:[#allocation1 + $0x2] ss:$9 sm:$0xff] %v12984_v32 }
 0x20b   :  { %v13083_v20 = vld [vmem:[#allocation1] sm:$0xff] }
 0x20c   :  { %822 = vst [vmem:[#allocation1] ss:$9 sm:$0xff] %v13000_v38  ;;  %v527_v19 = vpop.permute.xlu0 %526  ;;  %v445_v38 = vpack.c.bf16 %v12997_v37, %v12997_v37 }
 0x20d   :  { %823 = vst [vmem:[#allocation1 + $0x1] ss:$9 sm:$0xff] %v13003_v39  ;;  %v532_v22 = vsel %vm503_vm1, %v527_v19, 0  ;;  %v848_v19 = vpack.c.b16 %v847_v14, %v847_v14 }
 0x20e   :  { %824 = vst [vmem:[#allocation1 + $0x2] ss:$9 sm:$0xff] %v12995_v36  ;;  %541 = vmatpush.bf16.xpose.msra.mxu2 %v532_v22  ;;  %v841_v22 = vpack.c.bf16 %v13073_v17, %v13073_v17  ;;  %v843_v17 = vpack.c.bf16 %v13083_v20, %v13083_v20 }
 0x210   :  { %v924_v51 = vunpack.c.l.b16 %v841_v22 }
 0x215   :  { %v13091_v24 = vld [vmem:[#allocation1] sm:$0xff]  ;;  %9421 = vmatmul.msk.bf16.vlgmr.msra.gmra.mxu2 %vm503_vm1, %v441_v23 }
 0x216   :  { %826 = vst [vmem:[#allocation1] ss:$9 sm:$0xff] %v13011_v42  ;;  %v551_v25 = vpop.permute.xlu1 %550 }
 0x217   :  { %827 = vst [vmem:[#allocation1 + $0x1] ss:$9 sm:$0xff] %v13014_v43  ;;  %v556_v27 = vsel %vm503_vm1, %v551_v25, 0  ;;  %v447_v43 = vpack.c.bf16 %v13017_v44, %v13017_v44 }
 0x218   :  { %828 = vst [vmem:[#allocation1 + $0x2] ss:$9 sm:$0xff] %v13006_v40  ;;  %565 = vmatpush.bf16.xpose.msra.mxu3 %v556_v27  ;;  %v444_v40 = vpack.c.bf16 %v12986_v33, %v12986_v33  ;;  %v840_v27 = vpack.c.bf16 %v13065_v15, %v13065_v15  ;;  %v839_v15 = vpack.c.bf16 %v13059_v52, %v13059_v52 }
 0x21f   :  { %9422 = vmatmul.msk.bf16.vlgmr.msra.gmra.mxu3 %vm503_vm1, %v442_v28  ;;  %v829_v50 = vld [vmem:[#allocation1] sm:$0xff] }
 0x220   :  { %v575_v21 = vpop.permute.xlu1 %574  ;;  %v845_v14 = vpack.c.bf16 %v829_v50, %v829_v50 }
 0x221   :  { %v580_v30 = vsel %vm503_vm1, %v575_v21, 0  ;;  %v900_v21 = vunpack.c.l.b16 %v840_v27 }
 0x222   :  { %589 = vmatpush.bf16.xpose.msrb.mxu0 %v580_v30  ;;  %v925_v30 = vpack.c.b16 %v924_v51, %v924_v51 }
 0x226   :  { %v647_v31 = vpop.permute.xlu2 %646 }
 0x227   :  { %v652_v32 = vsel %vm503_vm1, %v647_v31, 0 }
 0x228   :  { %661 = vmatpush.bf16.xpose.msrb.mxu3 %v652_v32  ;;  %v901_v32 = vpack.c.b16 %v900_v21, %v900_v21 }
 0x229   :  { %9423 = vmatmul.msk.bf16.vlgmr.msrb.gmra.mxu0 %vm503_vm1, %v443_v34  ;;  %v972_v34 = vunpack.c.l.b16 %v843_v17 }
 0x22f   :  { %9426 = vmatmul.msk.bf16.vlgmr.msrb.gmra.mxu3 %vm503_vm1, %v446_v35  ;;  %v973_v35 = vpack.c.b16 %v972_v34, %v972_v34 }
 0x234   :  { %v623_v26 = vpop.permute.xlu0 %622 }
 0x235   :  { %v628_v36 = vsel %vm503_vm1, %v623_v26, 0  ;;  %v876_v26 = vunpack.c.l.b16 %v839_v15 }
 0x236   :  { %637 = vmatpush.bf16.xpose.msrb.mxu2 %v628_v36 }
 0x237   :  { %v877_v36 = vpack.c.b16 %v876_v26, %v876_v26 }
 0x23c   :  { %v599_v39 = vpop.permute.xlu0 %598 }
 0x23d   :  { %9425 = vmatmul.msk.bf16.vlgmr.msrb.gmra.mxu2 %vm503_vm1, %v445_v38  ;;  %v604_v29 = vsel %vm503_vm1, %v599_v39, 0 }
 0x23e   :  { %613 = vmatpush.bf16.xpose.msrb.mxu1 %v604_v29 }
 0x245   :  { %9424 = vmatmul.msk.bf16.vlgmr.msrb.gmra.mxu1 %vm503_vm1, %v444_v40 }
 0x248   :  { %v671_v41 = vpop.permute.xlu1 %670 }
 0x249   :  { %v676_v42 = vsel %vm503_vm1, %v671_v41, 0 }
 0x24a   :  { %685 = vmatpush.bf16.xpose.msra.mxu0 %v676_v42 }
 0x251   :  { %9427 = vmatmul.msk.bf16.vlgmr.msra.gmra.mxu0 %vm503_vm1, %v447_v43 }
 0x270   :  { %v519_v37 = vpop.f32.mrf.mxu1 }
 0x271   :  { %v691_v53 = vmul.f32 0.35355338, %v519_v37 }
 0x273   :  { %v700_v54 = vsel %vm699_vm2, %v691_v53, -inf }
 0x274   :  { %701 = vmax.xlane.f32.xlu0 %v700_v54 }
 0x278   :  { %v521_v55 = vpop.f32.mrf.mxu1 }
 0x298   :  { %v543_v56 = vpop.f32.mrf.mxu2 }
 0x299   :  { %v13122_v33 = vmul.f32 0.35355338, %v543_v56 }
 0x29b   :  { %v703_v57 = vsel %vm699_vm2, %v13122_v33, -inf }
 0x29c   :  { %704 = vmax.xlane.f32.xlu2 %v703_v57 }
 0x2a0   :  { %v545_v58 = vpop.f32.mrf.mxu2 }
 0x2a2   :  { %v567_v59 = vpop.f32.mrf.mxu3 }
 0x2a3   :  { %v13126_v60 = vmul.f32 0.35355338, %v567_v59 }
 0x2a5   :  { %v706_v44 = vsel %vm699_vm2, %v13126_v60, -inf }
 0x2a6   :  { %v591_v61 = vpop.f32.mrf.mxu0  ;;  %707 = vmax.xlane.f32.xlu1 %v706_v44 }
 0x2a7   :  { %v13130_v62 = vmul.f32 0.35355338, %v591_v61 }
 0x2a9   :  { %v709_v63 = vsel %vm699_vm2, %v13130_v62, -inf }
 0x2aa   :  { %710 = vmax.xlane.f32.xlu2 %v709_v63  ;;  %v569_v0 = vpop.f32.mrf.mxu3 }
 0x2ae   :  { %v593_v1 = vpop.f32.mrf.mxu0 }
 0x2b2   :  { %v663_v8 = vpop.f32.mrf.mxu3 }
 0x2b3   :  { %v13134_v9 = vmul.f32 0.35355338, %v663_v8 }
 0x2b5   :  { %v718_v10 = vsel %vm699_vm2, %v13134_v9, -inf }
 0x2b6   :  { %719 = vmax.xlane.f32.xlu1 %v718_v10 }
 0x2ba   :  { %v665_v11 = vpop.f32.mrf.mxu3 }
 0x2c0   :  { %v639_v16 = vpop.f32.mrf.mxu2 }
 0x2c1   :  { %v13138_v45 = vmul.f32 0.35355338, %v639_v16 }
 0x2c2   :  { %v615_v46 = vpop.f32.mrf.mxu1 }
 0x2c3   :  { %v13140_v47 = vmul.f32 0.35355338, %v615_v46  ;;  %v715_v48 = vsel %vm699_vm2, %v13138_v45, -inf }
 0x2c4   :  { %716 = vmax.xlane.f32.xlu2 %v715_v48  ;;  %v12676_v48 = vmov 65535  }
 0x2c5   :  { %v712_v49 = vsel %vm699_vm2, %v13140_v47, -inf }
 0x2c6   :  { %713 = vmax.xlane.f32.xlu0 %v712_v49  ;;  %v857_v49 = vsel %vm855_vm3, 4294967295, %v12676_v48  ;;  %vm1879_vm3 = vcmask 256000  }
 0x2c8   :  { %v641_v12 = vpop.f32.mrf.mxu2 }
 0x2c9   :  { %v13192_v12 = vsel %vm856_vm4, %v857_v49, 0 }
 0x2ca   :  { %v617_v13 = vpop.f32.mrf.mxu1 }
 0x2ce   :  { %v687_v23 = vpop.f32.mrf.mxu0 }
 0x2cf   :  { %v13150_v25 = vmul.f32 0.35355338, %v687_v23  ;;  %849 = vrot.lane.b32.xlu1 %v848_v19, %s12660_s2  ;;  %v1020_v23 = vunpack.c.l.b16 %v845_v14 }
 0x2d1   :  { %v721_v28 = vsel %vm699_vm2, %v13150_v25, -inf }
 0x2d2   :  { %722 = vmax.xlane.f32.xlu2 %v721_v28 }
 0x2d6   :  { %v689_v31 = vpop.f32.mrf.mxu0 }
 0x2d7   :  { %926 = vrot.lane.b32.xlu1 %v925_v30, %s12660_s2  ;;  %v1021_v30 = vpack.c.b16 %v1020_v23, %v1020_v23 }
 0x2da   :  { %902 = vrot.lane.b32.xlu0 %v901_v32, %s12660_s2 }
 0x2e2   :  { %974 = vrot.lane.b32.xlu0 %v973_v35, %s12660_s2 }
 0x2e7   :  { %v702_v38 = vpop.xlane.xlu0 %701 }
 0x2e8   :  { %v724_v39 = vsub.f32 %v691_v53, %v702_v38 }
 0x2ea   :  { %878 = vrot.lane.b32.xlu2 %v877_v36, %s12660_s2  ;;  %v732_v29 = vmul.f32 1.442695, %v724_v39  ;;  %v842_v36 = vpack.c.bf16 %v13078_v18, %v13078_v18 }
 0x2ec   :  { %12285 = vpow2.f32 %v732_v29  ;;  %v948_v29 = vunpack.c.l.b16 %v842_v36 }
 0x2f2   :  { %v13165_v40 = vpop.eup %12285 }
 0x2f3   :  { %v748_v20 = vsel %vm699_vm2, %v13165_v40, 0.0 }
 0x301   :  { %749 = vadd.xlane.f32.xlu1 %v748_v20  ;;  %v949_v20 = vpack.c.b16 %v948_v29, %v948_v29 }
 0x30f   :  { %v705_v41 = vpop.xlane.xlu2 %704 }
 0x310   :  { %v725_v42 = vsub.f32 %v13122_v33, %v705_v41  ;;  %v844_v41 = vpack.c.bf16 %v13091_v24, %v13091_v24 }
 0x312   :  { %v734_v52 = vmul.f32 1.442695, %v725_v42  ;;  %v996_v42 = vunpack.c.l.b16 %v844_v41 }
 0x314   :  { %12287 = vpow2.f32 %v734_v52  ;;  %v997_v52 = vpack.c.b16 %v996_v42, %v996_v42 }
 0x319   :  { %v708_v43 = vpop.xlane.xlu1 %707 }
 0x31a   :  { %v13170_v37 = vpop.eup %12287  ;;  %v726_v54 = vsub.f32 %v13126_v60, %v708_v43 }
 0x31b   :  { %v751_v53 = vsel %vm699_vm2, %v13170_v37, 0.0 }
 0x31c   :  { %v736_v55 = vmul.f32 1.442695, %v726_v54  ;;  %752 = vadd.xlane.f32.xlu0 %v751_v53 }
 0x31d   :  { %v711_v56 = vpop.xlane.xlu2 %710 }
 0x31e   :  { %12289 = vpow2.f32 %v736_v55  ;;  %v727_v57 = vsub.f32 %v13130_v62, %v711_v56 }
 0x320   :  { %v738_v58 = vmul.f32 1.442695, %v727_v57 }
 0x322   :  { %12291 = vpow2.f32 %v738_v58 }
 0x324   :  { %v13176_v59 = vpop.eup %12289 }
 0x325   :  { %v754_v33 = vsel %vm699_vm2, %v13176_v59, 0.0 }
 0x326   :  { %755 = vadd.xlane.f32.xlu0 %v754_v33 }
 0x328   :  { %v13180_v61 = vpop.eup %12291 }
 0x329   :  { %v720_v44 = vpop.xlane.xlu1 %719  ;;  %v757_v0 = vsel %vm699_vm2, %v13180_v61, 0.0 }
 0x32a   :  { %v730_v60 = vsub.f32 %v13134_v9, %v720_v44 }
 0x32c   :  { %v744_v63 = vmul.f32 1.442695, %v730_v60 }
 0x32e   :  { %12293 = vpow2.f32 %v744_v63  ;;  %758 = vadd.xlane.f32.xlu0 %v757_v0 }
 0x334   :  { %v13185_v62 = vpop.eup %12293 }
 0x335   :  { %v766_v1 = vsel %vm699_vm2, %v13185_v62, 0.0 }
 0x336   :  { %767 = vadd.xlane.f32.xlu0 %v766_v1 }
 0x337   :  { %v717_v8 = vpop.xlane.xlu2 %716 }
 0x338   :  { %v729_v10 = vsub.f32 %v13138_v45, %v717_v8 }
 0x339   :  { %v714_v11 = vpop.xlane.xlu0 %713 }
 0x33a   :  { %v742_v16 = vmul.f32 1.442695, %v729_v10  ;;  %v728_v9 = vsub.f32 %v13140_v47, %v714_v11 }
 0x33c   :  { %12295 = vpow2.f32 %v742_v16  ;;  %v740_v46 = vmul.f32 1.442695, %v728_v9 }
 0x33e   :  { %12297 = vpow2.f32 %v740_v46 }
 0x341   :  { %v850_v13 = vpop.permute.xlu1 %849 }
 0x342   :  { %v13194_v19 = vpop.eup %12295  ;;  %v860_v45 = vand.u32 %v13192_v12, %v850_v13 }
 0x343   :  { %v763_v22 = vsel %vm699_vm2, %v13194_v19, 0.0 }
 0x344   :  { %v13199_v47 = vpop.eup %12297  ;;  %764 = vadd.xlane.f32.xlu2 %v763_v22  ;;  %869 = vmatpush.bf16.msra.mxu1 %v860_v45 }
 0x345   :  { %v723_v27 = vpop.xlane.xlu2 %722  ;;  %v760_v28 = vsel %vm699_vm2, %v13199_v47, 0.0 }
 0x346   :  { %v731_v51 = vsub.f32 %v13150_v25, %v723_v27  ;;  %761 = vadd.xlane.f32.xlu1 %v760_v28 }
 0x348   :  { %v746_v21 = vmul.f32 1.442695, %v731_v51 }
 0x349   :  { %v927_v31 = vpop.permute.xlu1 %926 }
 0x34a   :  { %12299 = vpow2.f32 %v746_v21  ;;  %v932_v32 = vand.u32 %v927_v31, %v13192_v12  ;;  %1022 = vrot.lane.b32.xlu0 %v1021_v30, %s12660_s2 }
 0x34c   :  { %v903_v17 = vpop.permute.xlu0 %902  ;;  %941 = vmatpush.bf16.msrb.mxu0 %v932_v32 }
 0x34d   :  { %v879_v34 = vpop.permute.xlu2 %878  ;;  %v908_v35 = vand.u32 %v903_v17, %v13192_v12 }
 0x34e   :  { %v884_v15 = vand.u32 %v879_v34, %v13192_v12 }
 0x34f   :  { %917 = vmatpush.bf16.msra.mxu3 %v908_v35 }
 0x350   :  { %v12300_v26 = vpop.eup %12299  ;;  %893 = vmatpush.bf16.msra.mxu2 %v884_v15 }
 0x351   :  { %v769_v25 = vsel %vm699_vm2, %v12300_v26, 0.0 }
 0x352   :  { %770 = vadd.xlane.f32.xlu1 %v769_v25 }
 0x354   :  { %v975_v38 = vpop.permute.xlu0 %974 }
 0x355   :  { %v980_v39 = vand.u32 %v975_v38, %v13192_v12 }
 0x357   :  { %989 = vmatpush.bf16.msrb.mxu2 %v980_v39 }
 0x35c   :  { %950 = vrot.lane.b32.xlu2 %v949_v20, %s12660_s2 }
 0x36b   :  { %998 = vrot.lane.b32.xlu1 %v997_v52, %s12660_s2 }
 0x374   :  { %v750_v43 = vpop.xlane.xlu1 %749 }
 0x375   :  { %12301 = vrcp.f32 %v750_v43 }
 0x37b   :  { %v12302_v54 = vpop.eup %12301 }
 0x37c   :  { %v780_v18 = vmul.f32 %v12302_v54, %v13165_v40 }
 0x37e   :  { %v788_v53 = vpack.c.bf16 %v780_v18, %v780_v18 }
 0x380   :  { %9428 = vmatmul.msk.bf16.vlgmr.msra.gmra.mxu1 %vm851_vm5, %v788_v53 }
 0x38f   :  { %v753_v55 = vpop.xlane.xlu0 %752 }
 0x390   :  { %12303 = vrcp.f32 %v753_v55 }
 0x396   :  { %v12304_v56 = vpop.eup %12303 }
 0x397   :  { %v781_v57 = vmul.f32 %v12304_v56, %v13170_v37 }
 0x399   :  { %v789_v58 = vpack.c.bf16 %v781_v57, %v781_v57  ;;  %v756_v24 = vpop.xlane.xlu0 %755 }
 0x39a   :  { %12305 = vrcp.f32 %v756_v24 }
 0x39b   :  { %9429 = vmatmul.msk.bf16.vlgmr.msra.gmra.mxu2 %vm851_vm5, %v789_v58 }
 0x3a0   :  { %v12306_v33 = vpop.eup %12305 }
 0x3a1   :  { %v782_v44 = vmul.f32 %v12306_v33, %v13176_v59  ;;  %v759_v60 = vpop.xlane.xlu0 %758 }
 0x3a2   :  { %12307 = vrcp.f32 %v759_v60 }
 0x3a3   :  { %v790_v40 = vpack.c.bf16 %v782_v44, %v782_v44 }
 0x3a5   :  { %9430 = vmatmul.msk.bf16.vlgmr.msra.gmra.mxu3 %vm851_vm5, %v790_v40 }
 0x3a8   :  { %v12308_v63 = vpop.eup %12307 }
 0x3a9   :  { %v783_v0 = vmul.f32 %v12308_v63, %v13180_v61  ;;  %v768_v37 = vpop.xlane.xlu0 %767 }
 0x3ab   :  { %v791_v1 = vpack.c.bf16 %v783_v0, %v783_v0 }
 0x3ad   :  { %9431 = vmatmul.msk.bf16.vlgmr.msrb.gmra.mxu0 %vm851_vm5, %v791_v1 }
 0x3b7   :  { %v765_v8 = vpop.xlane.xlu2 %764 }
 0x3b8   :  { %12309 = vrcp.f32 %v765_v8  ;;  %v11699_v8 = vld [vmem:[#allocation5] sm:$0xff] }
 0x3b9   :  { %v762_v10 = vpop.xlane.xlu1 %761 }
 0x3ba   :  { %12311 = vrcp.f32 %v762_v10 }
 0x3bc   :  { %v1023_v11 = vpop.permute.xlu0 %1022 }
 0x3bd   :  { %v1028_v16 = vand.u32 %v1023_v11, %v13192_v12 }
 0x3be   :  { %v12310_v59 = vpop.eup %12309 }
 0x3bf   :  { %v785_v9 = vmul.f32 %v12310_v59, %v13194_v19  ;;  %v951_v46 = vpop.permute.xlu2 %950  ;;  %1037 = vmatpush.bf16.msra.mxu0 %v1028_v16 }
 0x3c0   :  { %v12312_v48 = vpop.eup %12311  ;;  %v956_v49 = vand.u32 %v951_v46, %v13192_v12 }
 0x3c1   :  { %v793_v61 = vpack.c.bf16 %v785_v9, %v785_v9  ;;  %v784_v50 = vmul.f32 %v12312_v48, %v13199_v47 }
 0x3c2   :  { %965 = vmatpush.bf16.msrb.mxu1 %v956_v49  ;;  %v12258_v49 = vld [vmem:[%s14176_s8] ss:$0 sm:$0xff] }
 0x3c3   :  { %v792_v14 = vpack.c.bf16 %v784_v50, %v784_v50  ;;  %9433 = vmatmul.msk.bf16.vlgmr.msrb.gmra.mxu2 %vm851_vm5, %v793_v61 }
 0x3c5   :  { %v771_v13 = vpop.xlane.xlu1 %770  ;;  %9432 = vmatmul.msk.bf16.vlgmr.msrb.gmra.mxu1 %vm851_vm5, %v792_v14 }
 0x3c6   :  { %12313 = vrcp.f32 %v771_v13 }
 0x3c7   :  { %12315 = vrcp.f32 %v768_v37  ;;  %v11700_v37 = vld [vmem:[#allocation5 + $0x8] sm:$0xff] }
 0x3c8   :  { %1155 = vmatpush.bf16.msra.mxu1 %v11700_v37  ;;  %v11708_v37 = vld [vmem:[#allocation7 + $0x34] sm:$0xf0] }
 0x3cc   :  { %v12314_v45 = vpop.eup %12313  ;;  %1156 = vmatpush.bf16.msra.mxu1 %v11699_v8 }
 0x3cd   :  { %v787_v22 = vmul.f32 %v12314_v45, %v12300_v26  ;;  %v12316_v19 = vpop.eup %12315 }
 0x3ce   :  { %v786_v27 = vmul.f32 %v12316_v19, %v13185_v62 }
 0x3cf   :  { %v795_v23 = vpack.c.bf16 %v787_v22, %v787_v22 }
 0x3d0   :  { %v794_v51 = vpack.c.bf16 %v786_v27, %v786_v27 }
 0x3d1   :  { %9435 = vmatmul.msk.bf16.vlgmr.msra.gmra.mxu0 %vm851_vm5, %v795_v23 }
 0x3dd   :  { %v999_v28 = vpop.permute.xlu1 %998 }
 0x3de   :  { %v1004_v47 = vand.u32 %v999_v28, %v13192_v12 }
 0x3e0   :  { %1013 = vmatpush.bf16.msrb.mxu3 %v1004_v47 }
 0x3e3   :  { %9434 = vmatmul.msk.bf16.vlgmr.msrb.gmra.mxu3 %vm851_vm5, %v794_v51  ;;  %vm2462_vm5 = vcmask 27648  }
 0x3fd   :  { %v871_v21 = vpop.f32.mrf.mxu1 }
 0x3fe   :  { %v1045_v30 = vrot.slane %v871_v21, 1  ;;  %v1046_v31 = vrot.slane %v871_v21, 2  ;;  %1067 = vst [vmem:[#allocation1] ss:$9 sm:$0xff] %v871_v21 }
 0x400   :  { %1069 = vst [vmem:[#allocation1 + $0x1] ss:$9 sm:$0xff] %v1045_v30 }
 0x401   :  { %1071 = vst [vmem:[#allocation1 + $0x2] ss:$9 sm:$0xff] %v1046_v31 }
 0x405   :  { %v873_v32 = vpop.f32.mrf.mxu1 }
 0x41e   :  { %v895_v17 = vpop.f32.mrf.mxu2 }
 0x41f   :  { %v1047_v34 = vrot.slane %v895_v17, 1  ;;  %v1048_v35 = vrot.slane %v895_v17, 2  ;;  %1073 = vst [vmem:[#allocation1 + $0x3] ss:$9 sm:$0xff] %v895_v17 }
 0x421   :  { %1075 = vst [vmem:[#allocation1 + $0x4] ss:$9 sm:$0xff] %v1047_v34 }
 0x422   :  { %1077 = vst [vmem:[#allocation1 + $0x5] ss:$9 sm:$0xff] %v1048_v35 }
 0x426   :  { %v897_v62 = vpop.f32.mrf.mxu2 }
 0x428   :  { %v919_v15 = vpop.f32.mrf.mxu3 }
 0x429   :  { %v1078_v12 = vld [vmem:[#allocation1] sm:$0xff]  ;;  %v1051_v26 = vrot.slane %v919_v15, 1  ;;  %v1052_v25 = vrot.slane %v919_v15, 2 }
 0x42a   :  { %1080 = vst [vmem:[#allocation1] ss:$9 sm:$0xff] %v919_v15  ;;  %v943_v36 = vpop.f32.mrf.mxu0 }
 0x42b   :  { %1082 = vst [vmem:[#allocation1 + $0x1] ss:$9 sm:$0xff] %v1051_v26  ;;  %v1053_v38 = vrot.slane %v943_v36, 1  ;;  %v1054_v39 = vrot.slane %v943_v36, 2 }
 0x42c   :  { %1084 = vst [vmem:[#allocation1 + $0x2] ss:$9 sm:$0xff] %v1052_v25 }
 0x42d   :  { %1086 = vst [vmem:[#allocation1 + $0x3] ss:$9 sm:$0xff] %v943_v36 }
 0x42e   :  { %1088 = vst [vmem:[#allocation1 + $0x4] ss:$9 sm:$0xff] %v1053_v38 }
 0x42f   :  { %1090 = vst [vmem:[#allocation1 + $0x5] ss:$9 sm:$0xff] %v1054_v39 }
 0x430   :  { %v921_v29 = vpop.f32.mrf.mxu3 }
 0x432   :  { %v945_v20 = vpop.f32.mrf.mxu0 }
 0x436   :  { %v1091_v41 = vld [vmem:[#allocation1] sm:$0xff] }
 0x437   :  { %1092 = vrot.lane.b32.xlu2 %v1091_v41, %s12677_s30 }
 0x442   :  { %v967_v42 = vpop.f32.mrf.mxu1 }
 0x443   :  { %v1057_v52 = vrot.slane %v967_v42, 1  ;;  %v1058_v43 = vrot.slane %v967_v42, 2  ;;  %1095 = vst [vmem:[#allocation1] ss:$9 sm:$0xff] %v967_v42 }
 0x445   :  { %1097 = vst [vmem:[#allocation1 + $0x1] ss:$9 sm:$0xff] %v1057_v52 }
 0x446   :  { %1099 = vst [vmem:[#allocation1 + $0x2] ss:$9 sm:$0xff] %v1058_v43  ;;  %v991_v54 = vpop.f32.mrf.mxu2 }
 0x447   :  { %v1059_v18 = vrot.slane %v991_v54, 1  ;;  %v1060_v53 = vrot.slane %v991_v54, 2  ;;  %1101 = vst [vmem:[#allocation1 + $0x3] ss:$9 sm:$0xff] %v991_v54 }
 0x449   :  { %1103 = vst [vmem:[#allocation1 + $0x4] ss:$9 sm:$0xff] %v1059_v18 }
 0x44a   :  { %1105 = vst [vmem:[#allocation1 + $0x5] ss:$9 sm:$0xff] %v1060_v53  ;;  %v969_v55 = vpop.f32.mrf.mxu1 }
 0x44e   :  { %v1039_v56 = vpop.f32.mrf.mxu0  ;;  %v993_v57 = vpop.f32.mrf.mxu2 }
 0x44f   :  { %v1065_v24 = vrot.slane %v1039_v56, 1  ;;  %v1066_v33 = vrot.slane %v1039_v56, 2 }
 0x451   :  { %v1106_v58 = vld [vmem:[#allocation1] sm:$0xff] }
 0x452   :  { %1116 = vst [vmem:[#allocation1 + $0x3] ss:$9 sm:$0xff] %v1039_v56  ;;  %1107 = vrot.lane.b32.xlu2 %v1106_v58, %s12667_s3 }
 0x453   :  { %1118 = vst [vmem:[#allocation1 + $0x4] ss:$9 sm:$0xff] %v1065_v24 }
 0x454   :  { %1120 = vst [vmem:[#allocation1 + $0x5] ss:$9 sm:$0xff] %v1066_v33 }
 0x456   :  { %v1041_v44 = vpop.f32.mrf.mxu0 }
 0x457   :  { %v9463_v44 = vld [vmem:[#allocation7 + $0x20] sm:$0xf] }
 0x466   :  { %v1015_v60 = vpop.f32.mrf.mxu3 }
 0x467   :  { %v1063_v40 = vrot.slane %v1015_v60, 1  ;;  %v1064_v63 = vrot.slane %v1015_v60, 2  ;;  %1110 = vst [vmem:[#allocation1] ss:$9 sm:$0xff] %v1015_v60  ;;  %v11707_v60 = vld [vmem:[#allocation7 + $0x2c] sm:$0xf0] }
 0x469   :  { %1112 = vst [vmem:[#allocation1 + $0x1] ss:$9 sm:$0xff] %v1063_v40  ;;  %v11705_v40 = vld [vmem:[#allocation7 + $0x24] sm:$0xf] }
 0x46a   :  { %1114 = vst [vmem:[#allocation1 + $0x2] ss:$9 sm:$0xff] %v1064_v63  ;;  %v9464_v63 = vor.u32 %v11707_v60, %v9463_v44 }
 0x46c   :  { %1404 = vmatpush.bf16.msra.mxu2 %v9464_v63 }
 0x46e   :  { %v1017_v0 = vpop.f32.mrf.mxu3 }
 0x46f   :  { %v9465_v0 = vld [vmem:[#allocation7 + $0x30] sm:$0xf0] }
 0x470   :  { %v9468_v8 = vor.u32 %v11705_v40, %v9465_v0 }
 0x471   :  { %v1121_v1 = vld [vmem:[#allocation1] sm:$0xff] }
 0x472   :  { %1122 = vrot.lane.b32.xlu2 %v1121_v1, %s12678_s7  ;;  %v9471_v1 = vld [vmem:[#allocation7 + $0x28] sm:$0xf]  ;;  %1417 = vmatpush.bf16.msra.mxu3 %v9468_v8 }
 0x491   :  { %v1093_v10 = vpop.permute.xlu2 %1092 }
 0x492   :  { %v1125_v16 = vsel %vm503_vm1, %v1078_v12, %v1093_v10  ;;  %v9472_v10 = vor.u32 %v11708_v37, %v9471_v1  ;;  %v11729_v1 = vld [vmem:[#allocation8 + $0xa0] sm:$0xff] }
 0x494   :  { %1430 = vmatpush.bf16.msrb.mxu0 %v9472_v10 }
 0x4ac   :  { %v1108_v11 = vpop.permute.xlu2 %1107 }
 0x4ad   :  { %v1127_v59 = vsel %vm1126_vm6, %v1125_v16, %v1108_v11  ;;  %v11706_v11 = vld [vmem:[#allocation7 + $0x2c] sm:$0xf]  ;;  %v9473_v16 = vld [vmem:[#allocation7 + $0x38] sm:$0xf0] }
 0x4cc   :  { %v1123_v9 = vpop.permute.xlu2 %1122 }
 0x4cd   :  { %v1129_v46 = vsel %vm1128_vm7, %v1127_v59, %v1123_v9  ;;  %v9476_v59 = vor.u32 %v11706_v11, %v9473_v16  ;;  %v9447_v9 = vld [vmem:[#allocation7] sm:$0xf] }
 0x4ce   :  { %v1130_v48 = vpack.c.bf16 %v1129_v46, %v1129_v46  ;;  %v11703_v46 = vld [vmem:[#allocation7 + $0xc] sm:$0xf0]  ;;  %v11737_v16 = vld [vmem:[#allocation8 + $0xe0] sm:$0xff] }
 0x4cf   :  { %1443 = vmatpush.bf16.msrb.mxu1 %v9476_v59 }
 0x4d0   :  { %9444 = vmatmul.msk.bf16.vlgmr.msra.gmra.mxu1 %vm339_vm0, %v1130_v48  ;;  %v11701_v48 = vld [vmem:[#allocation7 + $0x4] sm:$0xf] }
 0x54d   :  { %v1158_v61 = vpop.f32.mrf.mxu1 }
 0x54e   :  { %v1159_v50 = vadd.f32 %v12258_v49, %v1158_v61  ;;  %v9448_v49 = vor.u32 %v11703_v46, %v9447_v9  ;;  %v9449_v61 = vld [vmem:[#allocation7 + $0x10] sm:$0xf0] }
 0x550   :  { %v1163_v14 = vrot.slane %v1159_v50, 1  ;;  %v1164_v13 = vrot.slane %v1159_v50, 2  ;;  %v1165_v45 = vrot.slane %v1159_v50, 3  ;;  %v1166_v22 = vrot.slane %v1159_v50, 4  ;;  %1405 = vmatpush.bf16.msra.mxu2 %v9448_v49 }
 0x551   :  { %v1167_v23 = vrot.slane %v1159_v50, 5  ;;  %v1173_v19 = vadd.f32 %v1159_v50, %v12865_v2  ;;  %v9455_v50 = vld [vmem:[#allocation7 + $0x8] sm:$0xf] }
 0x552   :  { %v1174_v27 = vadd.f32 %v1163_v14, %v302_v4  ;;  %v1175_v28 = vadd.f32 %v1164_v13, %v303_v5  ;;  %v1176_v47 = vadd.f32 %v1165_v45, %v12870_v3  ;;  %v1177_v51 = vadd.f32 %v1166_v22, %v304_v6  ;;  %v11704_v14 = vld [vmem:[#allocation7 + $0x14] sm:$0xf0] }
 0x553   :  { %1185 = vst [vmem:[#allocation1] ss:$9 sm:$0xff] %v1173_v19  ;;  %v1178_v21 = vadd.f32 %v1167_v23, %v305_v7  ;;  %v12679_v5 = vmov 32.0   ;;  %v9452_v45 = vor.u32 %v11701_v48, %v9449_v61  ;;  %v9456_v22 = vor.u32 %v11704_v14, %v9455_v50  ;;  %v11702_v23 = vld [vmem:[#allocation7 + $0xc] sm:$0xf]  ;;  %v11728_v50 = vld [vmem:[#allocation8 + $0x98] sm:$0xff] }
 0x554   :  { %1187 = vst [vmem:[#allocation1 + $0x1] ss:$9 sm:$0xff] %v1174_v27  ;;  %12317 = vrcp.f32 %v12679_v5  ;;  %v12259_v5 = vld [vmem:[%s14177_s29] ss:$0 sm:$0xff] }
 0x555   :  { %1189 = vst [vmem:[#allocation1 + $0x2] ss:$9 sm:$0xff] %v1175_v28  ;;  %v1160_v30 = vpop.f32.mrf.mxu1  ;;  %1418 = vmatpush.bf16.msra.mxu3 %v9452_v45  ;;  %1431 = vmatpush.bf16.msrb.mxu0 %v9456_v22  ;;  %v11712_v45 = vld [vmem:[#allocation8 + $0x18] sm:$0xff] }
 0x556   :  { %1191 = vst [vmem:[#allocation1 + $0x3] ss:$9 sm:$0xff] %v1176_v47 }
 0x557   :  { %1193 = vst [vmem:[#allocation1 + $0x4] ss:$9 sm:$0xff] %v1177_v51 }
 0x558   :  { %1195 = vst [vmem:[#allocation1 + $0x5] ss:$9 sm:$0xff] %v1178_v21 }
 0x55a   :  { %v12318_v31 = vpop.eup %12317 }
 0x55b   :  { %v1203_v32 = vmul.f32 32.0, %v12318_v31  ;;  %vm1207_vm9 = vweird.f32 %v12318_v31 }
 0x55d   :  { %v1204_v6 = vsub.f32 1.0, %v1203_v32  ;;  %v11739_v32 = vld [vmem:[#allocation8 + $0xf0] sm:$0xff] }
 0x55f   :  { %v1196_v4 = vld [vmem:[#allocation1] sm:$0xff]  ;;  %v1205_v17 = vmul.f32 %v12318_v31, %v1204_v6 }
 0x560   :  { %v1199_v2 = vsel %vm1198_vm8, %v1196_v4, 0.0  ;;  %v11716_v4 = vld [vmem:[#allocation8 + $0x38] sm:$0xff] }
 0x561   :  { %1200 = vadd.xlane.f32.xlu0 %v1199_v2  ;;  %v1206_v34 = vadd.f32 %v12318_v31, %v1205_v17  ;;  %v11724_v2 = vld [vmem:[#allocation8 + $0x78] sm:$0xff]  ;;  %1653 = vmatpush.bf16.msrb.mxu2 %v11716_v4  ;;  %v11715_v17 = vld [vmem:[#allocation8 + $0x30] sm:$0xff] }
 0x562   :  { %1666 = vmatpush.bf16.msrb.mxu3 %v11724_v2  ;;  %v11711_v4 = vld [vmem:[#allocation8 + $0x10] sm:$0xff] }
 0x563   :  { %v13255_v3 = vsel %vm1207_vm9, %v12318_v31, %v1206_v34  ;;  %v11731_v31 = vld [vmem:[#allocation8 + $0xb0] sm:$0xff] }
 0x564   :  { %v11723_v34 = vld [vmem:[#allocation8 + $0x70] sm:$0xff] }
 0x565   :  { %1654 = vmatpush.bf16.msrb.mxu2 %v11715_v17  ;;  %v11719_v2 = vld [vmem:[#allocation8 + $0x50] sm:$0xff]  ;;  %v11709_v17 = vld [vmem:[#allocation8] sm:$0xff] }
 0x566   :  { %1667 = vmatpush.bf16.msrb.mxu3 %v11723_v34  ;;  %v11717_v34 = vld [vmem:[#allocation8 + $0x40] sm:$0xff] }
 0x5d4   :  { %v1201_v7 = vpop.xlane.xlu0 %1200 }
 0x5d5   :  { %v1209_v35 = vmul.f32 %v13255_v3, %v1201_v7  ;;  %v13290_v7 = vld [vmem:[%s14140_s11] ss:$0 sm:$0xff] }
 0x5d6   :  { %v1312_v37 = vrot.slane %v13290_v7, 3  ;;  %v1313_v8 = vrot.slane %v13290_v7, 4  ;;  %v1314_v46 = vrot.slane %v13290_v7, 5 }
 0x5d7   :  { %v1211_v62 = vperm.slane %v1209_v35, 0  ;;  %v1212_v15 = vperm.slane %v1209_v35, 1  ;;  %v1213_v12 = vperm.slane %v1209_v35, 2  ;;  %v1214_v26 = vperm.slane %v1209_v35, 3 }
 0x5d8   :  { %v1215_v25 = vperm.slane %v1209_v35, 4  ;;  %v1216_v36 = vperm.slane %v1209_v35, 5 }
 0x5d9   :  { %v13258_v38 = vsub.f32 %v1173_v19, %v1211_v62  ;;  %v13260_v39 = vsub.f32 %v1174_v27, %v1212_v15  ;;  %v13262_v29 = vsub.f32 %v1175_v28, %v1213_v12  ;;  %v13264_v20 = vsub.f32 %v1176_v47, %v1214_v26  ;;  %v9457_v19 = vld [vmem:[#allocation7 + $0x18] sm:$0xf0]  ;;  %v11730_v12 = vld [vmem:[#allocation8 + $0xa8] sm:$0xff] }
 0x5da   :  { %v13266_v41 = vsub.f32 %v1177_v51, %v1215_v25  ;;  %v13268_v42 = vsub.f32 %v1178_v21, %v1216_v36  ;;  %v9460_v28 = vor.u32 %v11702_v23, %v9457_v19  ;;  %v11732_v51 = vld [vmem:[#allocation8 + $0xb8] sm:$0xff]  ;;  %v1291_v62 = vrot.slane %v12259_v5, 1 }
 0x5db   :  { %v1229_v52 = vmul.f32 %v13258_v38, %v13258_v38  ;;  %v1230_v43 = vmul.f32 %v13260_v39, %v13260_v39  ;;  %v1231_v54 = vmul.f32 %v13262_v29, %v13262_v29  ;;  %v1232_v18 = vmul.f32 %v13264_v20, %v13264_v20  ;;  %v11740_v21 = vld [vmem:[#allocation8 + $0xf8] sm:$0xff]  ;;  %1679 = vmatpush.bf16.msra.mxu0 %v11732_v51 }
 0x5dc   :  { %v1233_v53 = vmul.f32 %v13266_v41, %v13266_v41  ;;  %v1234_v55 = vmul.f32 %v13268_v42, %v13268_v42  ;;  %1444 = vmatpush.bf16.msrb.mxu1 %v9460_v28  ;;  %v1292_v15 = vrot.slane %v12259_v5, 2  ;;  %v1293_v26 = vrot.slane %v12259_v5, 3  ;;  %v11720_v23 = vld [vmem:[#allocation8 + $0x58] sm:$0xff]  ;;  %v11735_v28 = vld [vmem:[#allocation8 + $0xd0] sm:$0xff] }
 0x5dd   :  { %1241 = vst [vmem:[#allocation1] ss:$9 sm:$0xff] %v1229_v52  ;;  %v1294_v25 = vrot.slane %v12259_v5, 4  ;;  %v1295_v36 = vrot.slane %v12259_v5, 5 }
 0x5de   :  { %1243 = vst [vmem:[#allocation1 + $0x1] ss:$9 sm:$0xff] %v1230_v43  ;;  %v11738_v43 = vld [vmem:[#allocation8 + $0xe8] sm:$0xff] }
 0x5df   :  { %1245 = vst [vmem:[#allocation1 + $0x2] ss:$9 sm:$0xff] %v1231_v54  ;;  %1680 = vmatpush.bf16.msra.mxu0 %v11731_v31  ;;  %v11714_v54 = vld [vmem:[#allocation8 + $0x28] sm:$0xff]  ;;  %v11733_v31 = vld [vmem:[#allocation8 + $0xc0] sm:$0xff] }
 0x5e0   :  { %1247 = vst [vmem:[#allocation1 + $0x3] ss:$9 sm:$0xff] %v1232_v18  ;;  %1692 = vmatpush.bf16.msra.mxu1 %v11740_v21  ;;  %1655 = vmatpush.bf16.msrb.mxu2 %v11714_v54  ;;  %v11726_v21 = vld [vmem:[#allocation8 + $0x88] sm:$0xff] }
 0x5e1   :  { %1249 = vst [vmem:[#allocation1 + $0x4] ss:$9 sm:$0xff] %v1233_v53 }
 0x5e2   :  { %1251 = vst [vmem:[#allocation1 + $0x5] ss:$9 sm:$0xff] %v1234_v55 }
 0x5e3   :  { %1681 = vmatpush.bf16.msra.mxu0 %v11730_v12 }
 0x5e4   :  { %1693 = vmatpush.bf16.msra.mxu1 %v11739_v32  ;;  %v11710_v32 = vld [vmem:[#allocation8 + $0x8] sm:$0xff] }
 0x5e7   :  { %1682 = vmatpush.bf16.msra.mxu0 %v11729_v1 }
 0x5e8   :  { %1694 = vmatpush.bf16.msra.mxu1 %v11738_v43 }
 0x5e9   :  { %v1252_v56 = vld [vmem:[#allocation1] sm:$0xff] }
 0x5ea   :  { %v1254_v57 = vsel %vm1198_vm8, %v1252_v56, 0.0 }
 0x5eb   :  { %1255 = vadd.xlane.f32.xlu1 %v1254_v57  ;;  %v11722_v57 = vld [vmem:[#allocation8 + $0x68] sm:$0xff]  ;;  %1683 = vmatpush.bf16.msra.mxu0 %v11728_v50 }
 0x5ec   :  { %1668 = vmatpush.bf16.msrb.mxu3 %v11722_v57  ;;  %1695 = vmatpush.bf16.msra.mxu1 %v11737_v16  ;;  %v12261_v16 = vld [vmem:[%s14179_s6] ss:$0 sm:$0xff] }
 0x65e   :  { %v1256_v58 = vpop.xlane.xlu1 %1255 }
 0x65f   :  { %v1257_v24 = vmul.f32 %v1256_v58, %v13255_v3  ;;  %v1310_v58 = vrot.slane %v13290_v7, 1 }
 0x661   :  { %v1258_v33 = vadd.f32 1e-05, %v1257_v24  ;;  %v1311_v24 = vrot.slane %v13290_v7, 2 }
 0x663   :  { %12319 = vrsqrt.f32 %v1258_v33  ;;  %vm1265_vm11 = vweird.f32 %v1258_v33 }
 0x669   :  { %v12320_v13 = vpop.eup %12319 }
 0x66a   :  { %v1260_v27 = vmul.f32 %v12320_v13, %v1258_v33  ;;  %vm1266_vm10 = vweird.f32 %v12320_v13 }
 0x66b   :  { %vm1267_vm12 = vmor %vm1265_vm11, %vm1266_vm10 }
 0x66c   :  { %v1261_v47 = vmul.f32 %v12320_v13, %v1260_v27  ;;  %v11727_v27 = vld [vmem:[#allocation8 + $0x90] sm:$0xff] }
 0x66d   :  { %1684 = vmatpush.bf16.msra.mxu0 %v11727_v27 }
 0x66e   :  { %v1262_v30 = vmul.f32 0.5, %v1261_v47 }
 0x670   :  { %v1263_v6 = vsub.f32 1.5, %v1262_v30  ;;  %v11734_v30 = vld [vmem:[#allocation8 + $0xc8] sm:$0xff] }
 0x671   :  { %1685 = vmatpush.bf16.msra.mxu0 %v11726_v21 }
 0x672   :  { %v1264_v35 = vmul.f32 %v12320_v13, %v1263_v6  ;;  %v11718_v6 = vld [vmem:[#allocation8 + $0x48] sm:$0xff] }
 0x674   :  { %v1268_v52 = vsel %vm1267_vm12, %v12320_v13, %v1264_v35  ;;  %v11736_v13 = vld [vmem:[#allocation8 + $0xd8] sm:$0xff] }
 0x675   :  { %v1270_v18 = vperm.slane %v1268_v52, 0  ;;  %v1271_v53 = vperm.slane %v1268_v52, 1  ;;  %v1272_v55 = vperm.slane %v1268_v52, 2  ;;  %v1273_v56 = vperm.slane %v1268_v52, 3  ;;  %1696 = vmatpush.bf16.msra.mxu1 %v11736_v13 }
 0x676   :  { %v1274_v33 = vperm.slane %v1268_v52, 4  ;;  %v1275_v44 = vperm.slane %v1268_v52, 5 }
 0x677   :  { %v1282_v60 = vmul.f32 %v1270_v18, %v13258_v38  ;;  %v1283_v40 = vmul.f32 %v1271_v53, %v13260_v39  ;;  %v1284_v63 = vmul.f32 %v1272_v55, %v13262_v29  ;;  %v1285_v0 = vmul.f32 %v1273_v56, %v13264_v20  ;;  %v11713_v38 = vld [vmem:[#allocation8 + $0x20] sm:$0xff] }
 0x678   :  { %v1286_v10 = vmul.f32 %v1274_v33, %v13266_v41  ;;  %v1287_v11 = vmul.f32 %v1275_v44, %v13268_v42  ;;  %v11721_v20 = vld [vmem:[#allocation8 + $0x60] sm:$0xff]  ;;  %1656 = vmatpush.bf16.msrb.mxu2 %v11713_v38 }
 0x679   :  { %v1301_v59 = vmul.f32 %v12259_v5, %v1282_v60  ;;  %v1302_v39 = vmul.f32 %v1291_v62, %v1283_v40  ;;  %v1303_v9 = vmul.f32 %v1292_v15, %v1284_v63  ;;  %v1304_v29 = vmul.f32 %v1293_v26, %v1285_v0  ;;  %1669 = vmatpush.bf16.msrb.mxu3 %v11721_v20  ;;  %v11725_v5 = vld [vmem:[#allocation8 + $0x80] sm:$0xff] }
 0x67a   :  { %v1305_v48 = vmul.f32 %v1294_v25, %v1286_v10  ;;  %v1306_v49 = vmul.f32 %v1295_v36, %v1287_v11  ;;  %1697 = vmatpush.bf16.msra.mxu1 %v11735_v28  ;;  %1686 = vmatpush.bf16.msra.mxu0 %v11725_v5 }
 0x67b   :  { %v13304_v61 = vadd.f32 %v13290_v7, %v1301_v59  ;;  %v13306_v41 = vadd.f32 %v1310_v58, %v1302_v39  ;;  %v13308_v42 = vadd.f32 %v1311_v24, %v1303_v9  ;;  %v13310_v14 = vadd.f32 %v1312_v37, %v1304_v29  ;;  %v230_v7 = vld [vmem:[%s14178_s4] sm:$0xf]  ;;  %s12682_s4 = smov [#allocation16]  }
 0x67c   :  { %v13312_v22 = vadd.f32 %v1313_v8, %v1305_v48  ;;  %v13315_v19 = vadd.f32 %v1314_v46, %v1306_v49  ;;  %1657 = vmatpush.bf16.msrb.mxu2 %v11712_v45  ;;  %v1349_v35 = vperm.slane %v230_v7, 2  ;;  %v1350_v62 = vperm.slane %v230_v7, 3 }
 0x67d   :  { %1332 = vst [vmem:[#allocation1] ss:$9 sm:$0xff] %v13304_v61  ;;  %1670 = vmatpush.bf16.msrb.mxu3 %v11720_v23  ;;  %v1347_v36 = vperm.slane %v230_v7, 0  ;;  %v1348_v52 = vperm.slane %v230_v7, 1 }
 0x67e   :  { %1334 = vst [vmem:[#allocation1 + $0x1] ss:$9 sm:$0xff] %v13306_v41  ;;  %1698 = vmatpush.bf16.msra.mxu1 %v11734_v30 }
 0x67f   :  { %1336 = vst [vmem:[#allocation1 + $0x2] ss:$9 sm:$0xff] %v13308_v42 }
 0x680   :  { %1338 = vst [vmem:[#allocation1 + $0x3] ss:$9 sm:$0xff] %v13310_v14  ;;  %1658 = vmatpush.bf16.msrb.mxu2 %v11711_v4 }
 0x681   :  { %1340 = vst [vmem:[#allocation1 + $0x4] ss:$9 sm:$0xff] %v13312_v22  ;;  %1671 = vmatpush.bf16.msrb.mxu3 %v11719_v2 }
 0x682   :  { %1342 = vst [vmem:[#allocation1 + $0x5] ss:$9 sm:$0xff] %v13315_v19  ;;  %1699 = vmatpush.bf16.msra.mxu1 %v11733_v31 }
 0x684   :  { %1659 = vmatpush.bf16.msrb.mxu2 %v11710_v32 }
 0x685   :  { %1672 = vmatpush.bf16.msrb.mxu3 %v11718_v6 }
 0x688   :  { %1660 = vmatpush.bf16.msrb.mxu2 %v11709_v17 }
 0x689   :  { %v1343_v47 = vld [vmem:[#allocation1] sm:$0xff]  ;;  %1673 = vmatpush.bf16.msrb.mxu3 %v11717_v34 }
 0x68a   :  { %v1345_v51 = vpack.c.bf16 %v1343_v47, %v1343_v47 }
 0x68c   :  { %9477 = vmatmul.msk.bf16.vlgmr.msra.gmra.mxu2 %vm339_vm0, %v1345_v51  ;;  %9478 = vmatmul.msk.bf16.vlgmr.msra.gmra.mxu3 %vm339_vm0, %v1345_v51 }
 0x68d   :  { %9479 = vmatmul.msk.bf16.vlgmr.msrb.gmra.mxu0 %vm339_vm0, %v1345_v51  ;;  %9480 = vmatmul.msk.bf16.vlgmr.msrb.gmra.mxu1 %vm339_vm0, %v1345_v51 }
 0x70a   :  { %v1433_v15 = vpop.f32.mrf.mxu0  ;;  %v1446_v12 = vpop.f32.mrf.mxu1 }
 0x70b   :  { %v1434_v26 = vadd.f32 %v1433_v15, %v1349_v35  ;;  %v1447_v25 = vadd.f32 %v1446_v12, %v1350_v62 }
 0x70d   :  { %v1452_v43 = vmax.f32 %v1434_v26, 0.0  ;;  %v1453_v54 = vmax.f32 %v1447_v25, 0.0 }
 0x70f   :  { %v1456_v18 = vpack.c.bf16 %v1452_v43, %v1452_v43  ;;  %v1457_v53 = vpack.c.bf16 %v1453_v54, %v1453_v54  ;;  %v1407_v55 = vpop.f32.mrf.mxu2  ;;  %v1420_v56 = vpop.f32.mrf.mxu3 }
 0x710   :  { %v1408_v57 = vadd.f32 %v1407_v55, %v1347_v36  ;;  %v1421_v58 = vadd.f32 %v1420_v56, %v1348_v52  ;;  %v1882_v56 = vld [vmem:[%s14180_s20] sm:$0x1] }
 0x711   :  { %1687 = vmatmul.bf16.vlgmr.msra.gmra.mxu0 %v1456_v18  ;;  %1700 = vmatmul.bf16.vlgmr.msra.gmra.mxu1 %v1457_v53  ;;  %1885 = vst.msk [vmem:[#allocation16 + $0x3] sm:$0x1] %vm1884_vm13, %v1882_v56 }
 0x712   :  { %v1450_v24 = vmax.f32 %v1408_v57, 0.0  ;;  %v1451_v33 = vmax.f32 %v1421_v58, 0.0  ;;  %v1435_v44 = vpop.f32.mrf.mxu0  ;;  %v1448_v60 = vpop.f32.mrf.mxu1 }
 0x713   :  { %v11742_v60 = vld [vmem:[#allocation10 + $0x8] sm:$0xff] }
 0x714   :  { %v1454_v40 = vpack.c.bf16 %v1450_v24, %v1450_v24  ;;  %v1455_v63 = vpack.c.bf16 %v1451_v33, %v1451_v33  ;;  %v12262_v33 = vld [vmem:[%s14141_s12] ss:$0 sm:$0xff]  ;;  %2226 = vmatpush.bf16.msra.mxu2 %v11742_v60 }
 0x716   :  { %1661 = vmatmul.bf16.vlgmr.msrb.gmra.mxu2 %v1454_v40  ;;  %1674 = vmatmul.bf16.vlgmr.msrb.gmra.mxu3 %v1455_v63  ;;  %v1883_v40 = vld [vmem:[%s14180_s20 + $0x1] sm:$0x1]  ;;  %v12263_v63 = vld [vmem:[%s14142_s13] ss:$0 sm:$0xff] }
 0x717   :  { %v1409_v0 = vpop.f32.mrf.mxu2  ;;  %v1422_v1 = vpop.f32.mrf.mxu3  ;;  %1886 = vst.msk [vmem:[#allocation16 + $0x7] sm:$0x1] %vm1884_vm13, %v1883_v40 }
 0x718   :  { %v11741_v1 = vld [vmem:[#allocation10] sm:$0xff] }
 0x719   :  { %2227 = vmatpush.bf16.msra.mxu2 %v11741_v1 }
 0x78e   :  { %v1688_v37 = vpop.f32.mrf.mxu0  ;;  %v1701_v8 = vpop.f32.mrf.mxu1 }
 0x796   :  { %v1690_v10 = vpop.f32.mrf.mxu0  ;;  %v1703_v11 = vpop.f32.mrf.mxu1 }
 0x797   :  { %v1827_v10 = vrot.slane %v12262_v33, 2 }
 0x799   :  { %v1662_v38 = vpop.f32.mrf.mxu2  ;;  %v1675_v59 = vpop.f32.mrf.mxu3 }
 0x79a   :  { %v1663_v39 = vadd.f32 %v12261_v16, %v1662_v38 }
 0x79c   :  { %v1676_v9 = vadd.f32 %v1675_v59, %v1663_v39  ;;  %v1845_v59 = vrot.slane %v12263_v63, 1  ;;  %v1846_v39 = vrot.slane %v12263_v63, 2 }
 0x79e   :  { %v1689_v29 = vadd.f32 %v1688_v37, %v1676_v9  ;;  %v1826_v37 = vrot.slane %v12262_v33, 1 }
 0x7a0   :  { %v1702_v20 = vadd.f32 %v1701_v8, %v1689_v29 }
 0x7a1   :  { %v1664_v46 = vpop.f32.mrf.mxu2  ;;  %v1677_v48 = vpop.f32.mrf.mxu3 }
 0x7a2   :  { %v1706_v49 = vrot.slane %v1702_v20, 1  ;;  %v1707_v50 = vrot.slane %v1702_v20, 2  ;;  %v1708_v13 = vrot.slane %v1702_v20, 3  ;;  %v1709_v45 = vrot.slane %v1702_v20, 4 }
 0x7a3   :  { %v1710_v23 = vrot.slane %v1702_v20, 5  ;;  %v1716_v27 = vadd.f32 %v1702_v20, %v13304_v61 }
 0x7a4   :  { %v1717_v28 = vadd.f32 %v1706_v49, %v13306_v41  ;;  %v1718_v47 = vadd.f32 %v1707_v50, %v13308_v42  ;;  %v1719_v51 = vadd.f32 %v1708_v13, %v13310_v14  ;;  %v1720_v21 = vadd.f32 %v1709_v45, %v13312_v22 }
 0x7a5   :  { %1728 = vst [vmem:[#allocation1] ss:$9 sm:$0xff] %v1716_v27  ;;  %v1721_v30 = vadd.f32 %v1710_v23, %v13315_v19 }
 0x7a6   :  { %1730 = vst [vmem:[#allocation1 + $0x1] ss:$9 sm:$0xff] %v1717_v28 }
 0x7a7   :  { %1732 = vst [vmem:[#allocation1 + $0x2] ss:$9 sm:$0xff] %v1718_v47 }
 0x7a8   :  { %1734 = vst [vmem:[#allocation1 + $0x3] ss:$9 sm:$0xff] %v1719_v51 }
 0x7a9   :  { %1736 = vst [vmem:[#allocation1 + $0x4] ss:$9 sm:$0xff] %v1720_v21 }
 0x7aa   :  { %1738 = vst [vmem:[#allocation1 + $0x5] ss:$9 sm:$0xff] %v1721_v30 }
 0x7b1   :  { %v1739_v4 = vld [vmem:[#allocation1] sm:$0xff] }
 0x7b2   :  { %v1741_v2 = vsel %vm1198_vm8, %v1739_v4, 0.0  ;;  %v1830_v4 = vrot.slane %v12262_v33, 5 }
 0x7b3   :  { %1742 = vadd.xlane.f32.xlu2 %v1741_v2 }
 0x826   :  { %v1743_v61 = vpop.xlane.xlu2 %1742 }
 0x827   :  { %v1744_v41 = vmul.f32 %v1743_v61, %v13255_v3  ;;  %v1847_v61 = vrot.slane %v12263_v63, 3 }
 0x829   :  { %v1746_v42 = vperm.slane %v1744_v41, 0  ;;  %v1747_v5 = vperm.slane %v1744_v41, 1  ;;  %v1748_v14 = vperm.slane %v1744_v41, 2  ;;  %v1749_v31 = vperm.slane %v1744_v41, 3 }
 0x82a   :  { %v1750_v22 = vperm.slane %v1744_v41, 4  ;;  %v1751_v32 = vperm.slane %v1744_v41, 5 }
 0x82b   :  { %v1758_v6 = vsub.f32 %v1716_v27, %v1746_v42  ;;  %v1759_v19 = vsub.f32 %v1717_v28, %v1747_v5  ;;  %v1760_v17 = vsub.f32 %v1718_v47, %v1748_v14  ;;  %v13340_v34 = vsub.f32 %v1719_v51, %v1749_v31 }
 0x82c   :  { %v13342_v7 = vsub.f32 %v1720_v21, %v1750_v22  ;;  %v13344_v35 = vsub.f32 %v1721_v30, %v1751_v32  ;;  %v1828_v47 = vrot.slane %v12262_v33, 3  ;;  %v1829_v21 = vrot.slane %v12262_v33, 4 }
 0x82d   :  { %v1764_v62 = vmul.f32 %v1758_v6, %v1758_v6  ;;  %v1765_v15 = vmul.f32 %v1759_v19, %v1759_v19  ;;  %v1766_v12 = vmul.f32 %v1760_v17, %v1760_v17  ;;  %v1767_v26 = vmul.f32 %v13340_v34, %v13340_v34 }
 0x82e   :  { %v1768_v25 = vmul.f32 %v13342_v7, %v13342_v7  ;;  %v1769_v36 = vmul.f32 %v13344_v35, %v13344_v35  ;;  %v1848_v42 = vrot.slane %v12263_v63, 4  ;;  %v1849_v14 = vrot.slane %v12263_v63, 5 }
 0x82f   :  { %1776 = vst [vmem:[#allocation1] ss:$9 sm:$0xff] %v1764_v62 }
 0x830   :  { %1778 = vst [vmem:[#allocation1 + $0x1] ss:$9 sm:$0xff] %v1765_v15  ;;  %v12264_v15 = vld [vmem:[%s14144_s15] ss:$0 sm:$0xff] }
 0x831   :  { %1780 = vst [vmem:[#allocation1 + $0x2] ss:$9 sm:$0xff] %v1766_v12 }
 0x832   :  { %1782 = vst [vmem:[#allocation1 + $0x3] ss:$9 sm:$0xff] %v1767_v26 }
 0x833   :  { %1784 = vst [vmem:[#allocation1 + $0x4] ss:$9 sm:$0xff] %v1768_v25 }
 0x834   :  { %1786 = vst [vmem:[#allocation1 + $0x5] ss:$9 sm:$0xff] %v1769_v36 }
 0x83b   :  { %v1787_v52 = vld [vmem:[#allocation1] sm:$0xff] }
 0x83c   :  { %v1789_v43 = vsel %vm1198_vm8, %v1787_v52, 0.0  ;;  %vm2561_vm8 = vcmask 31744  }
 0x83d   :  { %1790 = vadd.xlane.f32.xlu0 %v1789_v43 }
 0x8b0   :  { %v1791_v54 = vpop.xlane.xlu0 %1790 }
 0x8b1   :  { %v1792_v18 = vmul.f32 %v1791_v54, %v13255_v3 }
 0x8b3   :  { %v1793_v53 = vadd.f32 1e-05, %v1792_v18 }
 0x8b5   :  { %12321 = vrsqrt.f32 %v1793_v53  ;;  %vm1800_vm15 = vweird.f32 %v1793_v53 }
 0x8bb   :  { %v12322_v55 = vpop.eup %12321 }
 0x8bc   :  { %v1795_v57 = vmul.f32 %v12322_v55, %v1793_v53  ;;  %vm1801_vm14 = vweird.f32 %v12322_v55 }
 0x8bd   :  { %vm1802_vm2 = vmor %vm1800_vm15, %vm1801_vm14 }
 0x8be   :  { %v1796_v58 = vmul.f32 %v12322_v55, %v1795_v57 }
 0x8c0   :  { %v1797_v24 = vmul.f32 0.5, %v1796_v58 }
 0x8c2   :  { %v1798_v44 = vsub.f32 1.5, %v1797_v24 }
 0x8c4   :  { %v1799_v0 = vmul.f32 %v12322_v55, %v1798_v44 }
 0x8c6   :  { %v1803_v8 = vsel %vm1802_vm2, %v12322_v55, %v1799_v0 }
 0x8c7   :  { %v1805_v11 = vperm.slane %v1803_v8, 0  ;;  %v1806_v16 = vperm.slane %v1803_v8, 1  ;;  %v1807_v38 = vperm.slane %v1803_v8, 2  ;;  %v1808_v46 = vperm.slane %v1803_v8, 3 }
 0x8c8   :  { %v1809_v13 = vperm.slane %v1803_v8, 4  ;;  %v1810_v45 = vperm.slane %v1803_v8, 5 }
 0x8c9   :  { %v1817_v9 = vmul.f32 %v1805_v11, %v1758_v6  ;;  %v1818_v29 = vmul.f32 %v1806_v16, %v1759_v19  ;;  %v1819_v20 = vmul.f32 %v1807_v38, %v1760_v17  ;;  %v1820_v51 = vmul.f32 %v1808_v46, %v13340_v34 }
 0x8ca   :  { %v1821_v30 = vmul.f32 %v1809_v13, %v13342_v7  ;;  %v1822_v2 = vmul.f32 %v1810_v45, %v13344_v35 }
 0x8cb   :  { %v1836_v48 = vmul.f32 %v12262_v33, %v1817_v9  ;;  %v1837_v49 = vmul.f32 %v1826_v37, %v1818_v29  ;;  %v1838_v50 = vmul.f32 %v1827_v10, %v1819_v20  ;;  %v1839_v41 = vmul.f32 %v1828_v47, %v1820_v51 }
 0x8cc   :  { %v1840_v5 = vmul.f32 %v1829_v21, %v1821_v30  ;;  %v1841_v31 = vmul.f32 %v1830_v4, %v1822_v2 }
 0x8cd   :  { %v1855_v23 = vadd.f32 %v12263_v63, %v1836_v48  ;;  %v1856_v27 = vadd.f32 %v1845_v59, %v1837_v49  ;;  %v1857_v28 = vadd.f32 %v1846_v39, %v1838_v50  ;;  %v1858_v22 = vadd.f32 %v1847_v61, %v1839_v41 }
 0x8ce   :  { %v1859_v32 = vadd.f32 %v1848_v42, %v1840_v5  ;;  %v1860_v19 = vadd.f32 %v1849_v14, %v1841_v31 }
 0x8cf   :  { %1867 = vst [vmem:[#allocation1] ss:$9 sm:$0xff] %v1855_v23 }
 0x8d0   :  { %1869 = vst [vmem:[#allocation1 + $0x1] ss:$9 sm:$0xff] %v1856_v27 }
 0x8d1   :  { %1871 = vst [vmem:[#allocation1 + $0x2] ss:$9 sm:$0xff] %v1857_v28 }
 0x8d8   :  { %v1872_v6 = vld [vmem:[#allocation1] sm:$0xff] }
 0x8d9   :  { %1873 = vst [vmem:[#allocation1] ss:$9 sm:$0xff] %v1858_v22 }
 0x8da   :  { %1874 = vst [vmem:[#allocation1 + $0x1] ss:$9 sm:$0xff] %v1859_v32 }
 0x8db   :  { %1875 = vst [vmem:[#allocation1 + $0x2] ss:$9 sm:$0xff] %v1860_v19 }
 0x8dc   :  { %1880 = vst.msk [vmem:[#allocation16] sm:$0x7] %vm1879_vm3, %v1872_v6 }
 0x8e2   :  { %v1876_v17 = vld [vmem:[#allocation1] sm:$0xff] }
 0x8e3   :  { %1881 = vst.msk [vmem:[#allocation16 + $0x4] sm:$0x7] %vm1879_vm3, %v1876_v17  ;;  %v13369_v34 = vld [vmem:[#allocation16] sm:$0xf] }
 0x8e4   :  { %2196 = vst [vmem:[#allocation1] ss:$2 sm:$0xff] %v13369_v34 }
 0x8ea   :  { %v13372_v7 = vld [vmem:[#allocation16 + $0x4] sm:$0xf] }
 0x8eb   :  { %2198 = vst [vmem:[#allocation1 + $0x1] ss:$2 sm:$0xff] %v13372_v7 }
 0x8f2   :  { %v2199_v35 = vld.sshfl [vmem:[#allocation1] sm:$0xff pattern:$0x75316420] }
 0x8f3   :  { %v2201_v62 = vpack.c.bf16 %v2199_v35, %v2199_v35 }
 0x8f5   :  { %9617 = vmatmul.msk.bf16.vlgmr.msra.gmra.mxu2 %vm339_vm0, %v2201_v62 }
 0x978   :  { %v2229_v12 = vpop.f32.mrf.mxu2 }
 0x979   :  { %v2230_v26 = vadd.f32 %v12264_v15, %v2229_v12 }
 0x97b   :  { %2236 = vrot.lane.b32.xlu0 %v2230_v26, %s12672_s1  ;;  %2242 = vrot.lane.b32.xlu2 %v2230_v26, %s12673_s0  ;;  %v2234_v25 = vrot.slane %v2230_v26, 4  ;;  %v2254_v43 = vpack.c.bf16 %v2230_v26, %v2230_v26 }
 0x97d   :  { %2238 = vrot.lane.b32.xlu1 %v2234_v25, %s12672_s1  ;;  %v2255_v52 = vpack.c.bf16 %v2234_v25, %v2234_v25  ;;  %v2263_v18 = vunpack.c.l.b16 %v2254_v43 }
 0x97f   :  { %v2287_v54 = vunpack.c.l.b16 %v2255_v52  ;;  %v13389_v55 = vpack.c.b16 %v2263_v18, %v2263_v18 }
 0x980   :  { %v2231_v36 = vpop.f32.mrf.mxu2 }
 0x981   :  { %v13385_v53 = vpack.c.b16 %v2287_v54, %v2287_v54 }
 0x983   :  { %2248 = vrot.lane.b32.xlu2 %v2230_v26, %s12674_s16  ;;  %2244 = vrot.lane.b32.xlu0 %v2234_v25, %s12673_s0 }
 0x985   :  { %2250 = vrot.lane.b32.xlu1 %v2234_v25, %s12674_s16 }
 0x98b   :  { %2289 = vrot.lane.b32.xlu2 %v13385_v53, %s12675_s14 }
 0x98d   :  { %2265 = vrot.lane.b32.xlu1 %v13389_v55, %s12675_s14 }
 0x9d5   :  { %v2243_v56 = vpop.permute.xlu2 %2242 }
 0x9d6   :  { %v2258_v57 = vpack.c.bf16 %v2243_v56, %v2243_v56 }
 0x9d8   :  { %v2359_v58 = vunpack.c.l.b16 %v2258_v57 }
 0x9da   :  { %v13393_v24 = vpack.c.b16 %v2359_v58, %v2359_v58 }
 0x9dc   :  { %2361 = vrot.lane.b32.xlu1 %v13393_v24, %s12675_s14 }
 0x9dd   :  { %v2249_v33 = vpop.permute.xlu2 %2248 }
 0x9de   :  { %v2260_v20 = vpack.c.bf16 %v2249_v33, %v2249_v33 }
 0x9e0   :  { %v2407_v50 = vunpack.c.l.b16 %v2260_v20 }
 0x9e2   :  { %v13416_v45 = vpack.c.b16 %v2407_v50, %v2407_v50 }
 0x9e5   :  { %v2290_v44 = vpop.permute.xlu2 %2289 }
 0x9e6   :  { %v2295_v60 = vsel %vm503_vm1, %v2290_v44, 0 }
 0x9e7   :  { %2304 = vmatpush.bf16.xpose.msrb.mxu0 %v2295_v60 }
 0x9ed   :  { %v2237_v40 = vpop.permute.xlu0 %2236 }
 0x9ee   :  { %9619 = vmatmul.msk.bf16.vlgmr.msrb.gmra.mxu0 %vm503_vm1, %v2255_v52  ;;  %v2256_v37 = vpack.c.bf16 %v2237_v40, %v2237_v40 }
 0x9ef   :  { %v2239_v63 = vpop.permute.xlu1 %2238 }
 0x9f0   :  { %v2257_v0 = vpack.c.bf16 %v2239_v63, %v2239_v63  ;;  %v2311_v38 = vunpack.c.l.b16 %v2256_v37 }
 0x9f2   :  { %v2335_v1 = vunpack.c.l.b16 %v2257_v0  ;;  %v13405_v46 = vpack.c.b16 %v2311_v38, %v2311_v38 }
 0x9f4   :  { %v13399_v8 = vpack.c.b16 %v2335_v1, %v2335_v1 }
 0x9f5   :  { %v2245_v10 = vpop.permute.xlu0 %2244 }
 0x9f6   :  { %v2259_v11 = vpack.c.bf16 %v2245_v10, %v2245_v10  ;;  %2337 = vrot.lane.b32.xlu0 %v13399_v8, %s12675_s14 }
 0x9f7   :  { %v2251_v16 = vpop.permute.xlu1 %2250 }
 0x9f8   :  { %v2383_v59 = vunpack.c.l.b16 %v2259_v11  ;;  %v2261_v39 = vpack.c.bf16 %v2251_v16, %v2251_v16 }
 0x9fa   :  { %v13403_v9 = vpack.c.b16 %v2383_v59, %v2383_v59  ;;  %v2431_v29 = vunpack.c.l.b16 %v2261_v39 }
 0x9fc   :  { %v13407_v48 = vpack.c.b16 %v2431_v29, %v2431_v29  ;;  %2385 = vrot.lane.b32.xlu1 %v13403_v9, %s12675_s14 }
 0x9fe   :  { %2313 = vrot.lane.b32.xlu0 %v13405_v46, %s12675_s14  ;;  %2433 = vrot.lane.b32.xlu2 %v13407_v48, %s12675_s14 }
 0x9ff   :  { %v2266_v49 = vpop.permute.xlu1 %2265 }
 0xa00   :  { %v2271_v13 = vsel %vm503_vm1, %v2266_v49, 0 }
 0xa01   :  { %2280 = vmatpush.bf16.xpose.msra.mxu3 %v2271_v13 }
 0xa06   :  { %2409 = vrot.lane.b32.xlu0 %v13416_v45, %s12675_s14 }
 0xa08   :  { %9618 = vmatmul.msk.bf16.vlgmr.msra.gmra.mxu3 %vm503_vm1, %v2254_v43 }
 0xa4e   :  { %v2362_v23 = vpop.permute.xlu1 %2361 }
 0xa4f   :  { %v2367_v27 = vsel %vm503_vm1, %v2362_v23, 0 }
 0xa50   :  { %2376 = vmatpush.bf16.xpose.msrb.mxu3 %v2367_v27 }
 0xa57   :  { %9622 = vmatmul.msk.bf16.vlgmr.msrb.gmra.mxu3 %vm503_vm1, %v2258_v57 }
 0xa58   :  { %v2434_v28 = vpop.permute.xlu2 %2433 }
 0xa59   :  { %v2439_v21 = vsel %vm503_vm1, %v2434_v28, 0 }
 0xa68   :  { %v2338_v47 = vpop.permute.xlu0 %2337 }
 0xa69   :  { %v2343_v51 = vsel %vm503_vm1, %v2338_v47, 0 }
 0xa6a   :  { %2352 = vmatpush.bf16.xpose.msrb.mxu2 %v2343_v51 }
 0xa6b   :  { %v2306_v30 = vpop.f32.mrf.mxu0 }
 0xa6c   :  { %v2455_v4 = vmul.f32 0.35355338, %v2306_v30 }
 0xa6e   :  { %v2386_v2 = vpop.permute.xlu1 %2385  ;;  %v2466_v61 = vsel %vm2462_vm5, %v2455_v4, -inf }
 0xa6f   :  { %v2391_v41 = vsel %vm503_vm1, %v2386_v2, 0  ;;  %2467 = vmax.xlane.f32.xlu1 %v2466_v61 }
 0xa70   :  { %v2314_v42 = vpop.permute.xlu0 %2313  ;;  %2400 = vmatpush.bf16.xpose.msra.mxu0 %v2391_v41 }
 0xa71   :  { %v2319_v5 = vsel %vm503_vm1, %v2314_v42, 0  ;;  %9621 = vmatmul.msk.bf16.vlgmr.msrb.gmra.mxu2 %vm503_vm1, %v2257_v0 }
 0xa72   :  { %2448 = vmatpush.bf16.xpose.msra.mxu2 %v2439_v21  ;;  %2328 = vmatpush.bf16.xpose.msrb.mxu1 %v2319_v5 }
 0xa73   :  { %v2308_v14 = vpop.f32.mrf.mxu0 }
 0xa77   :  { %9623 = vmatmul.msk.bf16.vlgmr.msra.gmra.mxu0 %vm503_vm1, %v2259_v11 }
 0xa78   :  { %v2410_v31 = vpop.permute.xlu0 %2409 }
 0xa79   :  { %v2415_v22 = vsel %vm503_vm1, %v2410_v31, 0  ;;  %9620 = vmatmul.msk.bf16.vlgmr.msrb.gmra.mxu1 %vm503_vm1, %v2256_v37 }
 0xa7a   :  { %2424 = vmatpush.bf16.xpose.msra.mxu1 %v2415_v22 }
 0xa81   :  { %9625 = vmatmul.msk.bf16.vlgmr.msra.gmra.mxu2 %vm503_vm1, %v2261_v39 }
 0xa89   :  { %9624 = vmatmul.msk.bf16.vlgmr.msra.gmra.mxu1 %vm503_vm1, %v2260_v20 }
 0xa8b   :  { %v2282_v32 = vpop.f32.mrf.mxu3 }
 0xa8c   :  { %v2454_v6 = vmul.f32 0.35355338, %v2282_v32 }
 0xa8e   :  { %v2463_v19 = vsel %vm2462_vm5, %v2454_v6, -inf }
 0xa8f   :  { %2464 = vmax.xlane.f32.xlu2 %v2463_v19 }
 0xa93   :  { %v2284_v17 = vpop.f32.mrf.mxu3 }
 0xada   :  { %v2378_v35 = vpop.f32.mrf.mxu3 }
 0xadb   :  { %v2458_v62 = vmul.f32 0.35355338, %v2378_v35 }
 0xadd   :  { %v2475_v15 = vsel %vm2462_vm5, %v2458_v62, -inf }
 0xade   :  { %2476 = vmax.xlane.f32.xlu1 %v2475_v15 }
 0xae2   :  { %v2380_v12 = vpop.f32.mrf.mxu3  ;;  %v2468_v37 = vpop.xlane.xlu1 %2467 }
 0xae3   :  { %v2488_v10 = vsub.f32 %v2455_v4, %v2468_v37 }
 0xae5   :  { %v2497_v38 = vmul.f32 1.442695, %v2488_v10 }
 0xae7   :  { %12323 = vpow2.f32 %v2497_v38 }
 0xaed   :  { %v12324_v39 = vpop.eup %12323 }
 0xaf4   :  { %v2354_v26 = vpop.f32.mrf.mxu2  ;;  %v2402_v25 = vpop.f32.mrf.mxu0 }
 0xaf5   :  { %v2459_v36 = vmul.f32 0.35355338, %v2402_v25  ;;  %v2457_v56 = vmul.f32 0.35355338, %v2354_v26 }
 0xaf6   :  { %v2330_v52 = vpop.f32.mrf.mxu1 }
 0xaf7   :  { %v2456_v43 = vmul.f32 0.35355338, %v2330_v52  ;;  %2581 = vrot.lane.b32.xlu1 %v13385_v53, %s12660_s2  ;;  %v2478_v54 = vsel %vm2462_vm5, %v2459_v36, -inf  ;;  %v2472_v44 = vsel %vm2462_vm5, %v2457_v56, -inf }
 0xaf8   :  { %2479 = vmax.xlane.f32.xlu0 %v2478_v54 }
 0xaf9   :  { %v2469_v18 = vsel %vm2462_vm5, %v2456_v43, -inf }
 0xafa   :  { %2470 = vmax.xlane.f32.xlu2 %v2469_v18 }
 0xafc   :  { %v2356_v57 = vpop.f32.mrf.mxu2  ;;  %v2404_v58 = vpop.f32.mrf.mxu0 }
 0xafe   :  { %v2332_v33 = vpop.f32.mrf.mxu1 }
 0xb00   :  { %2473 = vmax.xlane.f32.xlu0 %v2472_v44 }
 0xb02   :  { %v2465_v11 = vpop.xlane.xlu2 %2464 }
 0xb03   :  { %v2487_v16 = vsub.f32 %v2454_v6, %v2465_v11 }
 0xb04   :  { %v2450_v60 = vpop.f32.mrf.mxu2 }
 0xb05   :  { %v2495_v59 = vmul.f32 1.442695, %v2487_v16  ;;  %v13456_v20 = vmul.f32 0.35355338, %v2450_v60 }
 0xb06   :  { %v2426_v40 = vpop.f32.mrf.mxu1 }
 0xb07   :  { %v13445_v53 = vmul.f32 0.35355338, %v2426_v40  ;;  %12325 = vpow2.f32 %v2495_v59  ;;  %v2484_v49 = vsel %vm2462_vm5, %v13456_v20, -inf }
 0xb09   :  { %v2481_v1 = vsel %vm2462_vm5, %v13445_v53, -inf }
 0xb0c   :  { %v2452_v63 = vpop.f32.mrf.mxu2 }
 0xb0d   :  { %v13449_v29 = vpop.eup %12325 }
 0xb0e   :  { %v2428_v0 = vpop.f32.mrf.mxu1 }
 0xb12   :  { %2623 = vrot.lane.b32.xlu2 %v13399_v8, %s12660_s2  ;;  %v2511_v8 = vsel %vm2462_vm5, %v13449_v29, 0.0 }
 0xb14   :  { %2559 = vrot.lane.b32.xlu0 %v13389_v55, %s12660_s2  ;;  %v2514_v55 = vsel %vm2462_vm5, %v12324_v39, 0.0 }
 0xb21   :  { %2482 = vmax.xlane.f32.xlu1 %v2481_v1 }
 0xb3a   :  { %2602 = vrot.lane.b32.xlu1 %v13405_v46, %s12660_s2 }
 0xb3b   :  { %2515 = vadd.xlane.f32.xlu2 %v2514_v55 }
 0xb3e   :  { %2512 = vadd.xlane.f32.xlu0 %v2511_v8 }
 0xb43   :  { %2485 = vmax.xlane.f32.xlu2 %v2484_v49 }
 0xb51   :  { %v2477_v50 = vpop.xlane.xlu1 %2476 }
 0xb52   :  { %v2491_v21 = vsub.f32 %v2458_v62, %v2477_v50 }
 0xb54   :  { %v2503_v4 = vmul.f32 1.442695, %v2491_v21 }
 0xb69   :  { %v2582_v13 = vpop.permute.xlu1 %2581 }
 0xb6a   :  { %v2587_v23 = vsel %vm856_vm4, %v2582_v13, 0 }
 0xb6b   :  { %2596 = vmatpush.bf16.msrb.mxu0 %v2587_v23  ;;  %v2480_v27 = vpop.xlane.xlu0 %2479 }
 0xb6c   :  { %v2492_v46 = vsub.f32 %v2459_v36, %v2480_v27 }
 0xb6d   :  { %v2471_v28 = vpop.xlane.xlu2 %2470 }
 0xb6e   :  { %v2505_v47 = vmul.f32 1.442695, %v2492_v46  ;;  %v2489_v51 = vsub.f32 %v2456_v43, %v2471_v28 }
 0xb70   :  { %12327 = vpow2.f32 %v2505_v47  ;;  %v2499_v30 = vmul.f32 1.442695, %v2489_v51 }
 0xb72   :  { %12329 = vpow2.f32 %v2499_v30 }
 0xb73   :  { %v2474_v2 = vpop.xlane.xlu0 %2473  ;;  %12331 = vpow2.f32 %v2503_v4 }
 0xb74   :  { %v2490_v61 = vsub.f32 %v2457_v56, %v2474_v2 }
 0xb75   :  { %v2624_v41 = vpop.permute.xlu2 %2623 }
 0xb76   :  { %v13461_v42 = vpop.eup %12327  ;;  %v2501_v5 = vmul.f32 1.442695, %v2490_v61  ;;  %v2629_v14 = vsel %vm856_vm4, %v2624_v41, 0 }
 0xb77   :  { %2638 = vmatpush.bf16.msrb.mxu2 %v2629_v14  ;;  %v2526_v31 = vsel %vm2462_vm5, %v13461_v42, 0.0 }
 0xb78   :  { %v12330_v22 = vpop.eup %12329  ;;  %12333 = vpow2.f32 %v2501_v5  ;;  %2527 = vadd.xlane.f32.xlu0 %v2526_v31 }
 0xb79   :  { %v2517_v32 = vsel %vm2462_vm5, %v12330_v22, 0.0  ;;  %v12332_v6 = vpop.eup %12331 }
 0xb7a   :  { %2518 = vadd.xlane.f32.xlu2 %v2517_v32  ;;  %v2523_v35 = vsel %vm2462_vm5, %v12332_v6, 0.0 }
 0xb7e   :  { %v12334_v19 = vpop.eup %12333 }
 0xb7f   :  { %v2520_v17 = vsel %vm2462_vm5, %v12334_v19, 0.0 }
 0xb80   :  { %2521 = vadd.xlane.f32.xlu1 %v2520_v17 }
 0xb82   :  { %2524 = vadd.xlane.f32.xlu2 %v2523_v35 }
 0xb86   :  { %v2560_v62 = vpop.permute.xlu0 %2559 }
 0xb87   :  { %v2566_v15 = vsel %vm856_vm4, %v2560_v62, 0 }
 0xb88   :  { %2575 = vmatpush.bf16.msra.mxu3 %v2566_v15 }
 0xb8c   :  { %2665 = vrot.lane.b32.xlu0 %v13403_v9, %s12660_s2 }
 0xb94   :  { %2707 = vrot.lane.b32.xlu0 %v13407_v48, %s12660_s2  ;;  %v2483_v12 = vpop.xlane.xlu1 %2482 }
 0xb95   :  { %v2493_v52 = vsub.f32 %v13445_v53, %v2483_v12 }
 0xb97   :  { %v2507_v18 = vmul.f32 1.442695, %v2493_v52 }
 0xb9a   :  { %2644 = vrot.lane.b32.xlu2 %v13393_v24, %s12660_s2 }
 0xbac   :  { %v2603_v26 = vpop.permute.xlu1 %2602 }
 0xbad   :  { %v2608_v25 = vsel %vm856_vm4, %v2603_v26, 0 }
 0xbae   :  { %2617 = vmatpush.bf16.msrb.mxu1 %v2608_v25  ;;  %v2516_v36 = vpop.xlane.xlu2 %2515 }
 0xbaf   :  { %12335 = vrcp.f32 %v2516_v36 }
 0xbb1   :  { %v2513_v43 = vpop.xlane.xlu0 %2512 }
 0xbb2   :  { %12337 = vrcp.f32 %v2513_v43 }
 0xbb3   :  { %12339 = vpow2.f32 %v2507_v18 }
 0xbb5   :  { %v12336_v54 = vpop.eup %12335 }
 0xbb6   :  { %v2544_v9 = vmul.f32 %v12336_v54, %v12324_v39  ;;  %v2486_v56 = vpop.xlane.xlu2 %2485 }
 0xbb7   :  { %v2494_v48 = vsub.f32 %v13456_v20, %v2486_v56 }
 0xbb8   :  { %v12338_v57 = vpop.eup %12337  ;;  %v2552_v24 = vpack.c.bf16 %v2544_v9, %v2544_v9 }
 0xbb9   :  { %v2543_v58 = vmul.f32 %v12338_v57, %v13449_v29  ;;  %v2509_v33 = vmul.f32 1.442695, %v2494_v48  ;;  %v12340_v60 = vpop.eup %12339  ;;  %v11744_v57 = vld [vmem:[#allocation11 + $0x8] sm:$0xff] }
 0xbba   :  { %9627 = vmatmul.msk.bf16.vlgmr.msrb.gmra.mxu0 %vm2561_vm8, %v2552_v24  ;;  %v2529_v63 = vsel %vm2462_vm5, %v12340_v60, 0.0  ;;  %v11743_v24 = vld [vmem:[#allocation11] sm:$0xff] }
 0xbbb   :  { %v2551_v44 = vpack.c.bf16 %v2543_v58, %v2543_v58  ;;  %12341 = vpow2.f32 %v2509_v33 }
 0xbbd   :  { %9626 = vmatmul.msk.bf16.vlgmr.msra.gmra.mxu3 %vm2561_vm8, %v2551_v44 }
 0xbc1   :  { %v12342_v40 = vpop.eup %12341 }
 0xbc2   :  { %v2532_v0 = vsel %vm2462_vm5, %v12342_v40, 0.0 }
 0xbc3   :  { %2530 = vadd.xlane.f32.xlu2 %v2529_v63  ;;  %2533 = vadd.xlane.f32.xlu1 %v2532_v0 }
 0xbdc   :  { %2686 = vrot.lane.b32.xlu1 %v13416_v45, %s12660_s2 }
 0xbeb   :  { %v2528_v1 = vpop.xlane.xlu0 %2527 }
 0xbed   :  { %v2519_v53 = vpop.xlane.xlu2 %2518 }
 0xbee   :  { %12343 = vrcp.f32 %v2519_v53  ;;  %v12265_v53 = vld [vmem:[%s14146_s17] ss:$0 sm:$0xff] }
 0xbef   :  { %12345 = vrcp.f32 %v2528_v1 }
 0xbf3   :  { %v2522_v37 = vpop.xlane.xlu1 %2521 }
 0xbf4   :  { %v12344_v10 = vpop.eup %12343  ;;  %12347 = vrcp.f32 %v2522_v37 }
 0xbf5   :  { %v2545_v11 = vmul.f32 %v12344_v10, %v12330_v22  ;;  %v2525_v16 = vpop.xlane.xlu2 %2524  ;;  %v12346_v59 = vpop.eup %12345 }
 0xbf6   :  { %12349 = vrcp.f32 %v2525_v16  ;;  %v2548_v8 = vmul.f32 %v12346_v59, %v13461_v42 }
 0xbf7   :  { %v2553_v38 = vpack.c.bf16 %v2545_v11, %v2545_v11 }
 0xbf8   :  { %v2556_v46 = vpack.c.bf16 %v2548_v8, %v2548_v8  ;;  %v12681_v8 = vmov 1985246804  }
 0xbf9   :  { %9628 = vmatmul.msk.bf16.vlgmr.msrb.gmra.mxu1 %vm2561_vm8, %v2553_v38 }
 0xbfa   :  { %v12348_v39 = vpop.eup %12347 }
 0xbfb   :  { %v2546_v29 = vmul.f32 %v12348_v39, %v12334_v19 }
 0xbfc   :  { %v12350_v55 = vpop.eup %12349 }
 0xbfd   :  { %v2554_v45 = vpack.c.bf16 %v2546_v29, %v2546_v29  ;;  %v2547_v20 = vmul.f32 %v12350_v55, %v12332_v6  ;;  %v2645_v49 = vpop.permute.xlu2 %2644  ;;  %v12680_v29 = vmov 839922192  }
 0xbfe   :  { %v2650_v50 = vsel %vm856_vm4, %v2645_v49, 0  ;;  %v2666_v13 = vpop.permute.xlu0 %2665  ;;  %v2815_v55 = vunpack.c.l.s4 %v12680_v29  ;;  %v9669_v29 = vld [vmem:[#allocation13 + $0x18] sm:$0xf] }
 0xbff   :  { %v2555_v23 = vpack.c.bf16 %v2547_v20, %v2547_v20  ;;  %v2671_v27 = vsel %vm856_vm4, %v2666_v13, 0  ;;  %9629 = vmatmul.msk.bf16.vlgmr.msrb.gmra.mxu2 %vm2561_vm8, %v2554_v45  ;;  %2659 = vmatpush.bf16.msrb.mxu3 %v2650_v50  ;;  %v2819_v45 = vunpack.c.l.s4 %v12681_v8 }
 0xc00   :  { %2680 = vmatpush.bf16.msra.mxu0 %v2671_v27  ;;  %v13510_v20 = vunpack.c.0.s8 %v2815_v55  ;;  %v11756_v55 = vld [vmem:[#allocation13 + $0x54] sm:$0xf0] }
 0xc01   :  { %v13512_v49 = vunpack.c.0.s8 %v2819_v45 }
 0xc02   :  { %9630 = vmatmul.msk.bf16.vlgmr.msrb.gmra.mxu3 %vm2561_vm8, %v2555_v23 }
 0xc03   :  { %9631 = vmatmul.msk.bf16.vlgmr.msra.gmra.mxu0 %vm2561_vm8, %v2556_v46  ;;  %2790 = vmatpush.bf16.msra.mxu3 %v11744_v57  ;;  %v11771_v57 = vld [vmem:[#allocation13 + $0xcc] sm:$0xf0] }
 0xc06   :  { %v2708_v28 = vpop.permute.xlu0 %2707 }
 0xc07   :  { %v2713_v47 = vsel %vm856_vm4, %v2708_v28, 0  ;;  %2791 = vmatpush.bf16.msra.mxu3 %v11743_v24  ;;  %v11763_v24 = vld [vmem:[#allocation13 + $0x94] sm:$0xf] }
 0xc08   :  { %2722 = vmatpush.bf16.msra.mxu2 %v2713_v47 }
 0xc36   :  { %v2534_v51 = vpop.xlane.xlu1 %2533  ;;  %v2531_v42 = vpop.xlane.xlu2 %2530 }
 0xc37   :  { %12351 = vrcp.f32 %v2534_v51  ;;  %v2598_v21 = vpop.f32.mrf.mxu0 }
 0xc38   :  { %2732 = vst [vmem:[#allocation1 + $0x1] ss:$2 sm:$0xff] %v2598_v21  ;;  %12353 = vrcp.f32 %v2531_v42  ;;  %v9711_v42 = vld [vmem:[#allocation13 + $0xc0] sm:$0xf0] }
 0xc3d   :  { %v12352_v30 = vpop.eup %12351 }
 0xc3e   :  { %v2550_v4 = vmul.f32 %v12352_v30, %v12342_v40  ;;  %v12354_v14 = vpop.eup %12353  ;;  %v9709_v30 = vld [vmem:[#allocation13 + $0x80] sm:$0xf] }
 0xc3f   :  { %v2600_v2 = vpop.f32.mrf.mxu0  ;;  %v2549_v31 = vmul.f32 %v12354_v14, %v12340_v60  ;;  %v11770_v14 = vld [vmem:[#allocation13 + $0xc4] sm:$0xf0] }
 0xc40   :  { %v2558_v61 = vpack.c.bf16 %v2550_v4, %v2550_v4  ;;  %v2577_v41 = vpop.f32.mrf.mxu3  ;;  %v11769_v4 = vld [vmem:[#allocation13 + $0xbc] sm:$0xf0]  ;;  %v11761_v2 = vld [vmem:[#allocation13 + $0x84] sm:$0xf] }
 0xc41   :  { %2730 = vst [vmem:[#allocation1] ss:$2 sm:$0xff] %v2577_v41  ;;  %v2557_v6 = vpack.c.bf16 %v2549_v31, %v2549_v31  ;;  %v9710_v41 = vor.u32 %v11769_v4, %v9709_v30  ;;  %v9714_v31 = vor.u32 %v11761_v2, %v9711_v42 }
 0xc42   :  { %9633 = vmatmul.msk.bf16.vlgmr.msra.gmra.mxu2 %vm2561_vm8, %v2558_v61 }
 0xc43   :  { %3088 = vmatpush.bf16.msrb.mxu0 %v9710_v41 }
 0xc48   :  { %v2579_v5 = vpop.f32.mrf.mxu3  ;;  %v2733_v19 = vld.sshfl [vmem:[#allocation1] sm:$0xff pattern:$0x75316420] }
 0xc49   :  { %v9717_v5 = vld [vmem:[#allocation13 + $0x88] sm:$0xf] }
 0xc4e   :  { %v2687_v22 = vpop.permute.xlu1 %2686 }
 0xc4f   :  { %v2692_v32 = vsel %vm856_vm4, %v2687_v22, 0  ;;  %v9718_v22 = vor.u32 %v11770_v14, %v9717_v5 }
 0xc50   :  { %2701 = vmatpush.bf16.msra.mxu1 %v2692_v32  ;;  %v11762_v32 = vld [vmem:[#allocation13 + $0x8c] sm:$0xf] }
 0xc51   :  { %3114 = vmatpush.bf16.msrb.mxu2 %v9718_v22 }
 0xc53   :  { %9632 = vmatmul.msk.bf16.vlgmr.msra.gmra.mxu1 %vm2561_vm8, %v2557_v6  ;;  %v9719_v6 = vld [vmem:[#allocation13 + $0xc8] sm:$0xf0] }
 0xc54   :  { %3101 = vmatpush.bf16.msrb.mxu1 %v9714_v31 }
 0xc76   :  { %v2619_v17 = vpop.f32.mrf.mxu1 }
 0xc77   :  { %2737 = vst [vmem:[#allocation1] ss:$2 sm:$0xff] %v2619_v17 }
 0xc7e   :  { %v2621_v35 = vpop.f32.mrf.mxu1 }
 0xc7f   :  { %v9722_v35 = vor.u32 %v11762_v32, %v9719_v6  ;;  %v9741_v32 = vld [vmem:[#allocation13 + $0xa0] sm:$0xf] }
 0xc80   :  { %v2682_v62 = vpop.f32.mrf.mxu0  ;;  %v11773_v6 = vld [vmem:[#allocation13 + $0xdc] sm:$0xf0] }
 0xc81   :  { %3127 = vmatpush.bf16.msrb.mxu3 %v9722_v35  ;;  %v9749_v35 = vld [vmem:[#allocation13 + $0xa8] sm:$0xf] }
 0xc82   :  { %v2640_v15 = vpop.f32.mrf.mxu2 }
 0xc83   :  { %2739 = vst [vmem:[#allocation1 + $0x1] ss:$2 sm:$0xff] %v2640_v15  ;;  %v11745_v15 = vld [vmem:[#allocation13 + $0x4] sm:$0xf] }
 0xc85   :  { %v2661_v12 = vpop.f32.mrf.mxu3 }
 0xc88   :  { %v2684_v26 = vpop.f32.mrf.mxu0 }
 0xc89   :  { %v9647_v26 = vld [vmem:[#allocation13 + $0x40] sm:$0xf0] }
 0xc8a   :  { %v2740_v25 = vld.sshfl [vmem:[#allocation1] sm:$0xff pattern:$0x75316420]  ;;  %v2642_v36 = vpop.f32.mrf.mxu2 }
 0xc8b   :  { %2748 = vst [vmem:[#allocation1 + $0x1] ss:$2 sm:$0xff] %v2682_v62  ;;  %2741 = vrot.lane.b32.xlu2 %v2740_v25, %s12677_s30  ;;  %v11753_v62 = vld [vmem:[#allocation13 + $0x3c] sm:$0xf0]  ;;  %v9653_v25 = vld [vmem:[#allocation13 + $0x8] sm:$0xf] }
 0xc8c   :  { %2746 = vst [vmem:[#allocation1] ss:$2 sm:$0xff] %v2661_v12  ;;  %v11754_v36 = vld [vmem:[#allocation13 + $0x44] sm:$0xf0] }
 0xc8d   :  { %v2663_v52 = vpop.f32.mrf.mxu3 }
 0xc8e   :  { %v9650_v52 = vor.u32 %v11745_v15, %v9647_v26  ;;  %v11766_v15 = vld [vmem:[#allocation13 + $0xac] sm:$0xf]  ;;  %v9742_v26 = vor.u32 %v11773_v6, %v9741_v32 }
 0xc8f   :  { %v11790_v32 = vld [vmem:[#allocation14 + $0x68] sm:$0xff] }
 0xc90   :  { %3102 = vmatpush.bf16.msrb.mxu1 %v9650_v52  ;;  %v11757_v52 = vld [vmem:[#allocation13 + $0x5c] sm:$0xf0]  ;;  %v11798_v6 = vld [vmem:[#allocation14 + $0xa8] sm:$0xff] }
 0xc93   :  { %v2749_v43 = vld.sshfl [vmem:[#allocation1] sm:$0xff pattern:$0x75316420] }
 0xc94   :  { %2750 = vrot.lane.b32.xlu0 %v2749_v43, %s12667_s3  ;;  %v9654_v43 = vor.u32 %v11754_v36, %v9653_v25  ;;  %v9677_v36 = vld [vmem:[#allocation13 + $0x20] sm:$0xf] }
 0xc96   :  { %3115 = vmatpush.bf16.msrb.mxu2 %v9654_v43 }
 0xcc5   :  { %v2724_v54 = vpop.f32.mrf.mxu2 }
 0xcc6   :  { %2757 = vst [vmem:[#allocation1 + $0x1] ss:$2 sm:$0xff] %v2724_v54  ;;  %v11746_v54 = vld [vmem:[#allocation13 + $0xc] sm:$0xf] }
 0xccd   :  { %v2726_v18 = vpop.f32.mrf.mxu2 }
 0xcce   :  { %v9655_v18 = vld [vmem:[#allocation13 + $0x48] sm:$0xf0] }
 0xcd0   :  { %v2703_v9 = vpop.f32.mrf.mxu1 }
 0xcd1   :  { %2755 = vst [vmem:[#allocation1] ss:$2 sm:$0xff] %v2703_v9  ;;  %v9658_v9 = vor.u32 %v11746_v54, %v9655_v18  ;;  %v11749_v18 = vld [vmem:[#allocation13 + $0x24] sm:$0xf] }
 0xcd3   :  { %3128 = vmatpush.bf16.msrb.mxu3 %v9658_v9  ;;  %v9679_v9 = vld [vmem:[#allocation13 + $0x60] sm:$0xf0] }
 0xcd8   :  { %v2758_v56 = vld.sshfl [vmem:[#allocation1] sm:$0xff pattern:$0x75316420]  ;;  %v2705_v48 = vpop.f32.mrf.mxu1 }
 0xcd9   :  { %2759 = vrot.lane.b32.xlu0 %v2758_v56, %s12678_s7  ;;  %v9725_v48 = vld [vmem:[#allocation13 + $0x90] sm:$0xf] }
 0xce5   :  { %v2742_v33 = vpop.permute.xlu2 %2741 }
 0xce6   :  { %v2762_v44 = vsel %vm503_vm1, %v2733_v19, %v2742_v33  ;;  %v9645_v19 = vld [vmem:[#allocation13] sm:$0xf]  ;;  %v9726_v33 = vor.u32 %v11771_v57, %v9725_v48  ;;  %v11758_v48 = vld [vmem:[#allocation13 + $0x64] sm:$0xf0]  ;;  %v11750_v57 = vld [vmem:[#allocation13 + $0x2c] sm:$0xf] }
 0xce7   :  { %v9646_v12 = vor.u32 %v11753_v62, %v9645_v19  ;;  %v11765_v19 = vld [vmem:[#allocation13 + $0xa4] sm:$0xf]  ;;  %v11774_v62 = vld [vmem:[#allocation13 + $0xe4] sm:$0xf0] }
 0xce8   :  { %v9750_v43 = vor.u32 %v11774_v62, %v9749_v35  ;;  %v11789_v35 = vld [vmem:[#allocation14 + $0x60] sm:$0xff] }
 0xce9   :  { %3089 = vmatpush.bf16.msrb.mxu0 %v9646_v12  ;;  %v11797_v62 = vld [vmem:[#allocation14 + $0xa0] sm:$0xff] }
 0xced   :  { %3140 = vmatpush.bf16.msra.mxu0 %v9726_v33  ;;  %v9682_v33 = vor.u32 %v11749_v18, %v9679_v9  ;;  %v11778_v18 = vld [vmem:[#allocation14 + $0x8] sm:$0xff] }
 0xcee   :  { %v11786_v9 = vld [vmem:[#allocation14 + $0x48] sm:$0xff] }
 0xd06   :  { %v2751_v58 = vpop.permute.xlu0 %2750 }
 0xd07   :  { %v2763_v60 = vsel %vm1126_vm6, %v2762_v44, %v2751_v58  ;;  %v9727_v44 = vld [vmem:[#allocation13 + $0xd0] sm:$0xf0] }
 0xd4b   :  { %v2760_v40 = vpop.permute.xlu0 %2759 }
 0xd4c   :  { %v2764_v63 = vsel %vm1128_vm7, %v2763_v60, %v2760_v40  ;;  %v9733_v60 = vld [vmem:[#allocation13 + $0x98] sm:$0xf] }
 0xd4d   :  { %v2765_v0 = vpack.c.bf16 %v2764_v63, %v2764_v63  ;;  %v11772_v40 = vld [vmem:[#allocation13 + $0xd4] sm:$0xf0]  ;;  %v9730_v63 = vor.u32 %v11763_v24, %v9727_v44  ;;  %v9687_v24 = vld [vmem:[#allocation13 + $0x68] sm:$0xf0] }
 0xd4f   :  { %9642 = vmatmul.msk.bf16.vlgmr.msra.gmra.mxu3 %vm339_vm0, %v2765_v0  ;;  %v9734_v0 = vor.u32 %v11772_v40, %v9733_v60  ;;  %3153 = vmatpush.bf16.msra.mxu1 %v9730_v63  ;;  %v9690_v60 = vor.u32 %v11750_v57, %v9687_v24  ;;  %v9757_v40 = vld [vmem:[#allocation13 + $0xb0] sm:$0xf]  ;;  %v11777_v57 = vld [vmem:[#allocation14] sm:$0xff]  ;;  %v11816_v24 = vld [vmem:[#allocation14 + $0x138] sm:$0xff] }
 0xd50   :  { %v11775_v63 = vld [vmem:[#allocation13 + $0xec] sm:$0xf0] }
 0xd51   :  { %3166 = vmatpush.bf16.msra.mxu2 %v9734_v0  ;;  %v11767_v0 = vld [vmem:[#allocation13 + $0xb4] sm:$0xf] }
 0xdd2   :  { %v2793_v1 = vpop.f32.mrf.mxu3 }
 0xdd3   :  { %v2794_v37 = vadd.f32 %v12265_v53, %v2793_v1  ;;  %v11764_v53 = vld [vmem:[#allocation13 + $0x9c] sm:$0xf] }
 0xdd4   :  { %v9735_v1 = vld [vmem:[#allocation13 + $0xd8] sm:$0xf0] }
 0xdd5   :  { %v2798_v10 = vrot.slane %v2794_v37, 4  ;;  %v2800_v11 = vadd.f32 %v2794_v37, %v13369_v34 }
 0xdd7   :  { %v2801_v16 = vadd.f32 %v2798_v10, %v13372_v7  ;;  %2804 = vst [vmem:[#allocation1] ss:$2 sm:$0xff] %v2800_v11  ;;  %v9738_v10 = vor.u32 %v11764_v53, %v9735_v1  ;;  %v9759_v53 = vld [vmem:[#allocation13 + $0xf0] sm:$0xf0]  ;;  %v9765_v1 = vld [vmem:[#allocation13 + $0xb8] sm:$0xf] }
 0xdd9   :  { %2806 = vst [vmem:[#allocation1 + $0x1] ss:$2 sm:$0xff] %v2801_v16  ;;  %3179 = vmatpush.bf16.msra.mxu3 %v9738_v10  ;;  %v11768_v10 = vld [vmem:[#allocation13 + $0xbc] sm:$0xf] }
 0xdda   :  { %v2795_v38 = vpop.f32.mrf.mxu3 }
 0xddb   :  { %v11747_v38 = vld [vmem:[#allocation13 + $0x14] sm:$0xf] }
 0xde0   :  { %v2807_v59 = vld.sshfl [vmem:[#allocation1] sm:$0xff pattern:$0x75316420] }
 0xde1   :  { %v2809_v39 = vsel %vm339_vm0, %v2807_v59, 0.0 }
 0xde2   :  { %2810 = vadd.xlane.f32.xlu0 %v2809_v39  ;;  %v9663_v39 = vld [vmem:[#allocation13 + $0x50] sm:$0xf0] }
 0xde3   :  { %v9666_v45 = vor.u32 %v11747_v38, %v9663_v39  ;;  %v9762_v38 = vor.u32 %v11767_v0, %v9759_v53  ;;  %v11759_v39 = vld [vmem:[#allocation13 + $0x6c] sm:$0xf0] }
 0xde4   :  { %v11823_v0 = vld [vmem:[#allocation14 + $0x170] sm:$0xff] }
 0xde5   :  { %3154 = vmatpush.bf16.msra.mxu1 %v9666_v45  ;;  %v9695_v45 = vld [vmem:[#allocation13 + $0x70] sm:$0xf0] }
 0xde6   :  { %v11831_v53 = vld [vmem:[#allocation14 + $0x1b0] sm:$0xff] }
 0xe55   :  { %v2811_v50 = vpop.xlane.xlu0 %2810 }
 0xe56   :  { %v2812_v34 = vmul.f32 %v2811_v50, %v13255_v3  ;;  %v9670_v50 = vor.u32 %v11756_v55, %v9669_v29 }
 0xe58   :  { %v2817_v7 = vperm.slane %v2812_v34, %v13510_v20  ;;  %v2821_v13 = vperm.slane %v2812_v34, %v13512_v49  ;;  %v11748_v34 = vld [vmem:[#allocation13 + $0x1c] sm:$0xf]  ;;  %3167 = vmatpush.bf16.msra.mxu2 %v9670_v50  ;;  %v9701_v50 = vld [vmem:[#allocation13 + $0x38] sm:$0xf] }
 0xe5a   :  { %v13517_v23 = vsub.f32 %v2800_v11, %v2817_v7  ;;  %v13519_v27 = vsub.f32 %v2801_v16, %v2821_v13  ;;  %v9661_v11 = vld [vmem:[#allocation13 + $0x10] sm:$0xf]  ;;  %v9671_v7 = vld [vmem:[#allocation13 + $0x58] sm:$0xf0] }
 0xe5b   :  { %v11755_v16 = vld [vmem:[#allocation13 + $0x4c] sm:$0xf0]  ;;  %v9674_v13 = vor.u32 %v11748_v34, %v9671_v7  ;;  %v11760_v34 = vld [vmem:[#allocation13 + $0x74] sm:$0xf0]  ;;  %v11752_v7 = vld [vmem:[#allocation13 + $0x3c] sm:$0xf] }
 0xe5c   :  { %v2826_v46 = vmul.f32 %v13517_v23, %v13517_v23  ;;  %v2827_v28 = vmul.f32 %v13519_v27, %v13519_v27  ;;  %v9662_v59 = vor.u32 %v11755_v16, %v9661_v11  ;;  %v9767_v11 = vld [vmem:[#allocation13 + $0xf8] sm:$0xf0]  ;;  %v9758_v16 = vor.u32 %v11775_v63, %v9757_v40  ;;  %v11815_v63 = vld [vmem:[#allocation14 + $0x130] sm:$0xff] }
 0xe5d   :  { %3180 = vmatpush.bf16.msra.mxu3 %v9674_v13  ;;  %v9770_v55 = vor.u32 %v11768_v10, %v9767_v11  ;;  %v9703_v13 = vld [vmem:[#allocation13 + $0x78] sm:$0xf0]  ;;  %v11822_v10 = vld [vmem:[#allocation14 + $0x168] sm:$0xff] }
 0xe5e   :  { %2830 = vst [vmem:[#allocation1] ss:$2 sm:$0xff] %v2826_v46  ;;  %3141 = vmatpush.bf16.msra.mxu0 %v9662_v59  ;;  %v9693_v59 = vld [vmem:[#allocation13 + $0x30] sm:$0xf]  ;;  %v11840_v40 = vld [vmem:[#allocation14 + $0x1f8] sm:$0xff]  ;;  %v11830_v11 = vld [vmem:[#allocation14 + $0x1a8] sm:$0xff] }
 0xe5f   :  { %2832 = vst [vmem:[#allocation1 + $0x1] ss:$2 sm:$0xff] %v2827_v28  ;;  %v12266_v28 = vld [vmem:[%s14151_s22] ss:$0 sm:$0xff] }
 0xe60   :  { %v2866_v30 = vrot.slane %v12266_v28, 4 }
 0xe66   :  { %v2833_v47 = vld.sshfl [vmem:[#allocation1] sm:$0xff pattern:$0x75316420] }
 0xe67   :  { %v2835_v51 = vsel %vm339_vm0, %v2833_v47, 0.0 }
 0xe68   :  { %2836 = vadd.xlane.f32.xlu1 %v2835_v51  ;;  %v12267_v51 = vld [vmem:[%s14152_s23] ss:$0 sm:$0xff] }
 0xedb   :  { %v2837_v21 = vpop.xlane.xlu1 %2836 }
 0xedc   :  { %v2838_v61 = vmul.f32 %v2837_v21, %v13255_v3 }
 0xede   :  { %v13527_v17 = vadd.f32 1e-05, %v2838_v61  ;;  %v2873_v61 = vrot.slane %v12267_v51, 4 }
 0xee0   :  { %12355 = vrsqrt.f32 %v13527_v17  ;;  %vm2846_vm10 = vweird.f32 %v13527_v17 }
 0xee6   :  { %v12356_v56 = vpop.eup %12355 }
 0xee7   :  { %v2841_v58 = vmul.f32 %v12356_v56, %v13527_v17  ;;  %vm2847_vm9 = vweird.f32 %v12356_v56  ;;  %v9743_v17 = vld [vmem:[#allocation13 + $0xe0] sm:$0xf0] }
 0xee8   :  { %vm2848_vm11 = vmor %vm2846_vm10, %vm2847_vm9  ;;  %v9746_v25 = vor.u32 %v11765_v19, %v9743_v17  ;;  %v11806_v19 = vld [vmem:[#allocation14 + $0xe8] sm:$0xff]  ;;  %v11781_v17 = vld [vmem:[#allocation14 + $0x20] sm:$0xff] }
 0xee9   :  { %v2842_v37 = vmul.f32 %v12356_v56, %v2841_v58  ;;  %v9678_v58 = vor.u32 %v11757_v52, %v9677_v36  ;;  %v11779_v36 = vld [vmem:[#allocation14 + $0x10] sm:$0xff] }
 0xeea   :  { %v11787_v52 = vld [vmem:[#allocation14 + $0x50] sm:$0xff] }
 0xeeb   :  { %v2843_v8 = vmul.f32 0.5, %v2842_v37  ;;  %v11776_v37 = vld [vmem:[#allocation13 + $0xf4] sm:$0xf0] }
 0xeec   :  { %v9766_v29 = vor.u32 %v11776_v37, %v9765_v1  ;;  %v11839_v1 = vld [vmem:[#allocation14 + $0x1f0] sm:$0xff]  ;;  %v11814_v37 = vld [vmem:[#allocation14 + $0x128] sm:$0xff] }
 0xeed   :  { %v2844_v46 = vsub.f32 1.5, %v2843_v8  ;;  %v11751_v8 = vld [vmem:[#allocation13 + $0x34] sm:$0xf] }
 0xeef   :  { %v2845_v47 = vmul.f32 %v12356_v56, %v2844_v46  ;;  %v9694_v46 = vor.u32 %v11759_v39, %v9693_v59  ;;  %v11821_v59 = vld [vmem:[#allocation14 + $0x160] sm:$0xff] }
 0xef0   :  { %v11829_v39 = vld [vmem:[#allocation14 + $0x1a0] sm:$0xff] }
 0xef1   :  { %v2849_v21 = vsel %vm2848_vm11, %v12356_v56, %v2845_v47  ;;  %v9685_v56 = vld [vmem:[#allocation13 + $0x28] sm:$0xf]  ;;  %v9702_v47 = vor.u32 %v11760_v34, %v9701_v50  ;;  %v11819_v50 = vld [vmem:[#allocation14 + $0x150] sm:$0xff]  ;;  %v11828_v34 = vld [vmem:[#allocation14 + $0x198] sm:$0xff] }
 0xef2   :  { %v2854_v4 = vperm.slane %v2849_v21, %v13510_v20  ;;  %v2858_v2 = vperm.slane %v2849_v21, %v13512_v49  ;;  %v9686_v44 = vor.u32 %v11758_v48, %v9685_v56  ;;  %v11784_v21 = vld [vmem:[#allocation14 + $0x38] sm:$0xff]  ;;  %v11794_v56 = vld [vmem:[#allocation14 + $0x88] sm:$0xff] }
 0xef3   :  { %v11802_v48 = vld [vmem:[#allocation14 + $0xc8] sm:$0xff] }
 0xef4   :  { %v2861_v41 = vmul.f32 %v2854_v4, %v13517_v23  ;;  %v2862_v42 = vmul.f32 %v2858_v2, %v13519_v27  ;;  %v9751_v23 = vld [vmem:[#allocation13 + $0xe8] sm:$0xf0]  ;;  %v11800_v4 = vld [vmem:[#allocation14 + $0xb8] sm:$0xff] }
 0xef5   :  { %v9754_v54 = vor.u32 %v11766_v15, %v9751_v23  ;;  %v11808_v2 = vld [vmem:[#allocation14 + $0xf8] sm:$0xff]  ;;  %v11805_v15 = vld [vmem:[#allocation14 + $0xe0] sm:$0xff] }
 0xef6   :  { %v2868_v5 = vmul.f32 %v12266_v28, %v2861_v41  ;;  %v2869_v14 = vmul.f32 %v2866_v30, %v2862_v42  ;;  %v9698_v28 = vor.u32 %v11751_v8, %v9695_v45  ;;  %v11792_v30 = vld [vmem:[#allocation14 + $0x78] sm:$0xff]  ;;  %v11791_v41 = vld [vmem:[#allocation14 + $0x70] sm:$0xff] }
 0xef7   :  { %v11799_v42 = vld [vmem:[#allocation14 + $0xb0] sm:$0xff]  ;;  %v11780_v23 = vld [vmem:[#allocation14 + $0x18] sm:$0xff] }
 0xef8   :  { %v13542_v31 = vadd.f32 %v12267_v51, %v2868_v5  ;;  %v13544_v22 = vadd.f32 %v2873_v61, %v2869_v14  ;;  %v9706_v51 = vor.u32 %v11752_v7, %v9703_v13  ;;  %v11783_v61 = vld [vmem:[#allocation14 + $0x30] sm:$0xff]  ;;  %v11782_v14 = vld [vmem:[#allocation14 + $0x28] sm:$0xff]  ;;  %v11820_v8 = vld [vmem:[#allocation14 + $0x158] sm:$0xff] }
 0xef9   :  { %v11807_v5 = vld [vmem:[#allocation14 + $0xf0] sm:$0xff]  ;;  %v11836_v7 = vld [vmem:[#allocation14 + $0x1d8] sm:$0xff]  ;;  %v11810_v13 = vld [vmem:[#allocation14 + $0x108] sm:$0xff] }
 0xefa   :  { %2879 = vst [vmem:[#allocation1] ss:$2 sm:$0xff] %v13542_v31  ;;  %v11811_v45 = vld [vmem:[#allocation14 + $0x110] sm:$0xff] }
 0xefb   :  { %2881 = vst [vmem:[#allocation1 + $0x1] ss:$2 sm:$0xff] %v13544_v22 }
 0xf02   :  { %v2882_v12 = vld.sshfl [vmem:[#allocation1] sm:$0xff pattern:$0x75316420] }
 0xf03   :  { %v13548_v27 = vpack.c.bf16 %v2882_v12, %v2882_v12  ;;  %v11788_v12 = vld [vmem:[#allocation14 + $0x58] sm:$0xff] }
 0xf05   :  { %9771 = vmatmul.msk.bf16.vlgmr.msrb.gmra.mxu0 %vm339_vm0, %v13548_v27  ;;  %9772 = vmatmul.msk.bf16.vlgmr.msrb.gmra.mxu1 %vm339_vm0, %v13548_v27 }
 0xf06   :  { %9773 = vmatmul.msk.bf16.vlgmr.msrb.gmra.mxu2 %vm339_vm0, %v13548_v27  ;;  %9774 = vmatmul.msk.bf16.vlgmr.msrb.gmra.mxu3 %vm339_vm0, %v13548_v27 }
 0xf07   :  { %3192 = vmatpush.bf16.msrb.mxu0 %v9742_v26  ;;  %3205 = vmatpush.bf16.msrb.mxu1 %v9746_v25  ;;  %v11796_v26 = vld [vmem:[#allocation14 + $0x98] sm:$0xff] }
 0xf08   :  { %3218 = vmatpush.bf16.msrb.mxu2 %v9750_v43  ;;  %3231 = vmatpush.bf16.msrb.mxu3 %v9754_v54  ;;  %v11804_v25 = vld [vmem:[#allocation14 + $0xd8] sm:$0xff]  ;;  %v11795_v43 = vld [vmem:[#allocation14 + $0x90] sm:$0xff] }
 0xf09   :  { %v11803_v54 = vld [vmem:[#allocation14 + $0xd0] sm:$0xff] }
 0xf0b   :  { %3193 = vmatpush.bf16.msrb.mxu0 %v9678_v58  ;;  %3206 = vmatpush.bf16.msrb.mxu1 %v9682_v33  ;;  %v11824_v58 = vld [vmem:[#allocation14 + $0x178] sm:$0xff]  ;;  %v11793_v33 = vld [vmem:[#allocation14 + $0x80] sm:$0xff] }
 0xf0c   :  { %3219 = vmatpush.bf16.msrb.mxu2 %v9686_v44  ;;  %3232 = vmatpush.bf16.msrb.mxu3 %v9690_v60  ;;  %v11801_v44 = vld [vmem:[#allocation14 + $0xc0] sm:$0xff]  ;;  %v11832_v60 = vld [vmem:[#allocation14 + $0x1b8] sm:$0xff] }
 0xf15   :  { %9775 = vmatmul.msk.bf16.vlgmr.msra.gmra.mxu0 %vm339_vm0, %v13548_v27  ;;  %9776 = vmatmul.msk.bf16.vlgmr.msra.gmra.mxu1 %vm339_vm0, %v13548_v27 }
 0xf16   :  { %9777 = vmatmul.msk.bf16.vlgmr.msra.gmra.mxu2 %vm339_vm0, %v13548_v27  ;;  %9778 = vmatmul.msk.bf16.vlgmr.msra.gmra.mxu3 %vm339_vm0, %v13548_v27 }
 0xf17   :  { %3244 = vmatpush.bf16.msra.mxu0 %v9758_v16  ;;  %3257 = vmatpush.bf16.msra.mxu1 %v9762_v38  ;;  %v11838_v16 = vld [vmem:[#allocation14 + $0x1e8] sm:$0xff]  ;;  %v11813_v38 = vld [vmem:[#allocation14 + $0x120] sm:$0xff] }
 0xf18   :  { %3270 = vmatpush.bf16.msra.mxu2 %v9766_v29  ;;  %3283 = vmatpush.bf16.msra.mxu3 %v9770_v55  ;;  %v11837_v29 = vld [vmem:[#allocation14 + $0x1e0] sm:$0xff]  ;;  %v11812_v55 = vld [vmem:[#allocation14 + $0x118] sm:$0xff] }
 0xf1b   :  { %3245 = vmatpush.bf16.msra.mxu0 %v9694_v46  ;;  %3258 = vmatpush.bf16.msra.mxu1 %v9698_v28  ;;  %v11818_v46 = vld [vmem:[#allocation14 + $0x148] sm:$0xff]  ;;  %v11827_v28 = vld [vmem:[#allocation14 + $0x190] sm:$0xff] }
 0xf1c   :  { %3271 = vmatpush.bf16.msra.mxu2 %v9702_v47  ;;  %3284 = vmatpush.bf16.msra.mxu3 %v9706_v51  ;;  %v11835_v47 = vld [vmem:[#allocation14 + $0x1d0] sm:$0xff]  ;;  %v11809_v51 = vld [vmem:[#allocation14 + $0x100] sm:$0xff] }
 0xf25   :  { %9779 = vmatmul.msk.bf16.vlgmr.msrb.gmra.mxu0 %vm339_vm0, %v13548_v27  ;;  %9780 = vmatmul.msk.bf16.vlgmr.msrb.gmra.mxu1 %vm339_vm0, %v13548_v27 }
 0xf26   :  { %9781 = vmatmul.msk.bf16.vlgmr.msrb.gmra.mxu2 %vm339_vm0, %v13548_v27  ;;  %9782 = vmatmul.msk.bf16.vlgmr.msrb.gmra.mxu3 %vm339_vm0, %v13548_v27 }
 0xf27   :  { %4093 = vmatpush.bf16.msrb.mxu0 %v11784_v21  ;;  %4106 = vmatpush.bf16.msrb.mxu1 %v11792_v30  ;;  %v11817_v21 = vld [vmem:[#allocation14 + $0x140] sm:$0xff]  ;;  %v11826_v30 = vld [vmem:[#allocation14 + $0x188] sm:$0xff] }
 0xf28   :  { %4119 = vmatpush.bf16.msrb.mxu2 %v11800_v4  ;;  %4132 = vmatpush.bf16.msrb.mxu3 %v11808_v2  ;;  %v11834_v4 = vld [vmem:[#allocation14 + $0x1c8] sm:$0xff]  ;;  %v11825_v2 = vld [vmem:[#allocation14 + $0x180] sm:$0xff] }
 0xf2b   :  { %4094 = vmatpush.bf16.msrb.mxu0 %v11783_v61  ;;  %4107 = vmatpush.bf16.msrb.mxu1 %v11791_v41  ;;  %v11833_v61 = vld [vmem:[#allocation14 + $0x1c0] sm:$0xff]  ;;  %v13585_v41 = vld [vmem:[%s14148_s19] sm:$0xff] }
 0xf2c   :  { %4120 = vmatpush.bf16.msrb.mxu2 %v11799_v42  ;;  %4133 = vmatpush.bf16.msrb.mxu3 %v11807_v5  ;;  %v2887_v42 = vperm.slane %v13585_v41, 0  ;;  %v2888_v5 = vperm.slane %v13585_v41, 1 }
 0xf2f   :  { %4095 = vmatpush.bf16.msrb.mxu0 %v11782_v14  ;;  %4108 = vmatpush.bf16.msrb.mxu1 %v11790_v32 }
 0xf30   :  { %4121 = vmatpush.bf16.msrb.mxu2 %v11798_v6  ;;  %4134 = vmatpush.bf16.msrb.mxu3 %v11806_v19 }
 0xf33   :  { %4096 = vmatpush.bf16.msrb.mxu0 %v11781_v17  ;;  %4109 = vmatpush.bf16.msrb.mxu1 %v11789_v35 }
 0xf34   :  { %4122 = vmatpush.bf16.msrb.mxu2 %v11797_v62  ;;  %4135 = vmatpush.bf16.msrb.mxu3 %v11805_v15  ;;  %v2889_v62 = vperm.slane %v13585_v41, 2  ;;  %v2890_v15 = vperm.slane %v13585_v41, 3 }
 0xf35   :  { %9783 = vmatmul.msk.bf16.vlgmr.msra.gmra.mxu0 %vm339_vm0, %v13548_v27  ;;  %9784 = vmatmul.msk.bf16.vlgmr.msra.gmra.mxu1 %vm339_vm0, %v13548_v27 }
 0xf36   :  { %9785 = vmatmul.msk.bf16.vlgmr.msra.gmra.mxu2 %vm339_vm0, %v13548_v27  ;;  %9786 = vmatmul.msk.bf16.vlgmr.msra.gmra.mxu3 %vm339_vm0, %v13548_v27  ;;  %v11785_v27 = vld [vmem:[#allocation14 + $0x40] sm:$0xff] }
 0xf37   :  { %4097 = vmatpush.bf16.msrb.mxu0 %v11780_v23  ;;  %4110 = vmatpush.bf16.msrb.mxu1 %v11788_v12  ;;  %v11848_v23 = vld [vmem:[#allocation14 + $0x238] sm:$0xff] }
 0xf38   :  { %4123 = vmatpush.bf16.msrb.mxu2 %v11796_v26  ;;  %4136 = vmatpush.bf16.msrb.mxu3 %v11804_v25  ;;  %v11856_v12 = vld [vmem:[#allocation14 + $0x278] sm:$0xff] }
 0xf3b   :  { %4098 = vmatpush.bf16.msrb.mxu0 %v11779_v36  ;;  %4111 = vmatpush.bf16.msrb.mxu1 %v11787_v52 }
 0xf3c   :  { %4124 = vmatpush.bf16.msrb.mxu2 %v11795_v43  ;;  %4137 = vmatpush.bf16.msrb.mxu3 %v11803_v54 }
 0xf3f   :  { %4099 = vmatpush.bf16.msrb.mxu0 %v11778_v18  ;;  %4112 = vmatpush.bf16.msrb.mxu1 %v11786_v9 }
 0xf40   :  { %4125 = vmatpush.bf16.msrb.mxu2 %v11794_v56  ;;  %4138 = vmatpush.bf16.msrb.mxu3 %v11802_v48  ;;  %v11847_v56 = vld [vmem:[#allocation14 + $0x230] sm:$0xff] }
 0xf41   :  { %v11855_v48 = vld [vmem:[#allocation14 + $0x270] sm:$0xff] }
 0xf43   :  { %4100 = vmatpush.bf16.msrb.mxu0 %v11777_v57  ;;  %4113 = vmatpush.bf16.msrb.mxu1 %v11785_v27 }
 0xf44   :  { %4126 = vmatpush.bf16.msrb.mxu2 %v11793_v33  ;;  %4139 = vmatpush.bf16.msrb.mxu3 %v11801_v44 }
 0xf47   :  { %4145 = vmatpush.bf16.msra.mxu0 %v11816_v24  ;;  %4158 = vmatpush.bf16.msra.mxu1 %v11824_v58  ;;  %v11864_v24 = vld [vmem:[#allocation14 + $0x2b8] sm:$0xff] }
 0xf48   :  { %4171 = vmatpush.bf16.msra.mxu2 %v11832_v60  ;;  %4184 = vmatpush.bf16.msra.mxu3 %v11840_v40  ;;  %v11872_v58 = vld [vmem:[#allocation14 + $0x2f8] sm:$0xff]  ;;  %v11846_v60 = vld [vmem:[#allocation14 + $0x228] sm:$0xff] }
 0xf49   :  { %v11854_v40 = vld [vmem:[#allocation14 + $0x268] sm:$0xff] }
 0xf4b   :  { %4146 = vmatpush.bf16.msra.mxu0 %v11815_v63  ;;  %4159 = vmatpush.bf16.msra.mxu1 %v11823_v0  ;;  %v2891_v63 = vperm.slane %v13585_v41, 4  ;;  %v2892_v0 = vperm.slane %v13585_v41, 5 }
 0xf4c   :  { %4172 = vmatpush.bf16.msra.mxu2 %v11831_v53  ;;  %4185 = vmatpush.bf16.msra.mxu3 %v11839_v1 }
 0xf4f   :  { %4147 = vmatpush.bf16.msra.mxu0 %v11814_v37  ;;  %4160 = vmatpush.bf16.msra.mxu1 %v11822_v10  ;;  %v11863_v37 = vld [vmem:[#allocation14 + $0x2b0] sm:$0xff] }
 0xf50   :  { %4173 = vmatpush.bf16.msra.mxu2 %v11830_v11  ;;  %4186 = vmatpush.bf16.msra.mxu3 %v11838_v16  ;;  %v11871_v10 = vld [vmem:[#allocation14 + $0x2f0] sm:$0xff] }
 0xf53   :  { %4148 = vmatpush.bf16.msra.mxu0 %v11813_v38  ;;  %4161 = vmatpush.bf16.msra.mxu1 %v11821_v59  ;;  %v11845_v38 = vld [vmem:[#allocation14 + $0x220] sm:$0xff] }
 0xf54   :  { %4174 = vmatpush.bf16.msra.mxu2 %v11829_v39  ;;  %4187 = vmatpush.bf16.msra.mxu3 %v11837_v29  ;;  %v11853_v59 = vld [vmem:[#allocation14 + $0x260] sm:$0xff] }
 0xf57   :  { %4149 = vmatpush.bf16.msra.mxu0 %v11812_v55  ;;  %4162 = vmatpush.bf16.msra.mxu1 %v11820_v8 }
 0xf58   :  { %4175 = vmatpush.bf16.msra.mxu2 %v11828_v34  ;;  %4188 = vmatpush.bf16.msra.mxu3 %v11836_v7  ;;  %v2893_v34 = vperm.slane %v13585_v41, 6  ;;  %v2894_v7 = vperm.slane %v13585_v41, 7  ;;  %v11851_v41 = vld [vmem:[#allocation14 + $0x250] sm:$0xff] }
 0xf5b   :  { %4150 = vmatpush.bf16.msra.mxu0 %v11811_v45  ;;  %4163 = vmatpush.bf16.msra.mxu1 %v11819_v50  ;;  %v11862_v45 = vld [vmem:[#allocation14 + $0x2a8] sm:$0xff] }
 0xf5c   :  { %4176 = vmatpush.bf16.msra.mxu2 %v11827_v28  ;;  %4189 = vmatpush.bf16.msra.mxu3 %v11835_v47  ;;  %v11870_v50 = vld [vmem:[#allocation14 + $0x2e8] sm:$0xff]  ;;  %v11844_v28 = vld [vmem:[#allocation14 + $0x218] sm:$0xff] }
 0xf5d   :  { %v11852_v47 = vld [vmem:[#allocation14 + $0x258] sm:$0xff] }
 0xf5f   :  { %4151 = vmatpush.bf16.msra.mxu0 %v11810_v13  ;;  %4164 = vmatpush.bf16.msra.mxu1 %v11818_v46 }
 0xf60   :  { %4177 = vmatpush.bf16.msra.mxu2 %v11826_v30  ;;  %4190 = vmatpush.bf16.msra.mxu3 %v11834_v4  ;;  %v11861_v30 = vld [vmem:[#allocation14 + $0x2a0] sm:$0xff] }
 0xf61   :  { %v11869_v4 = vld [vmem:[#allocation14 + $0x2e0] sm:$0xff] }
 0xf63   :  { %4152 = vmatpush.bf16.msra.mxu0 %v11809_v51  ;;  %4165 = vmatpush.bf16.msra.mxu1 %v11817_v21 }
 0xf64   :  { %4178 = vmatpush.bf16.msra.mxu2 %v11825_v2  ;;  %4191 = vmatpush.bf16.msra.mxu3 %v11833_v61 }
 0xf82   :  { %v3091_v14 = vpop.f32.mrf.mxu0  ;;  %v3104_v32 = vpop.f32.mrf.mxu1 }
 0xf83   :  { %v3092_v6 = vadd.f32 %v3091_v14, %v2887_v42  ;;  %v3105_v19 = vadd.f32 %v3104_v32, %v2888_v5  ;;  %v11843_v14 = vld [vmem:[#allocation14 + $0x210] sm:$0xff] }
 0xf85   :  { %v3290_v17 = vmax.f32 %v3092_v6, 0.0  ;;  %v3291_v35 = vmax.f32 %v3105_v19, 0.0  ;;  %v13598_v19 = vld [vmem:[%s14148_s19 + $0x8] sm:$0xff] }
 0xf87   :  { %v3306_v26 = vpack.c.bf16 %v3290_v17, %v3290_v17  ;;  %v3307_v25 = vpack.c.bf16 %v3291_v35, %v3291_v35  ;;  %v11860_v17 = vld [vmem:[#allocation14 + $0x298] sm:$0xff] }
 0xf88   :  { %v11868_v35 = vld [vmem:[#allocation14 + $0x2d8] sm:$0xff] }
 0xf89   :  { %v3117_v36 = vpop.f32.mrf.mxu2  ;;  %v3130_v52 = vpop.f32.mrf.mxu3  ;;  %4101 = vmatmul.bf16.vlgmr.msrb.gmra.mxu0 %v3306_v26  ;;  %4114 = vmatmul.bf16.vlgmr.msrb.gmra.mxu1 %v3307_v25  ;;  %v2895_v26 = vperm.slane %v13598_v19, 0  ;;  %v2896_v25 = vperm.slane %v13598_v19, 1 }
 0xf8a   :  { %v3118_v43 = vadd.f32 %v3117_v36, %v2889_v62  ;;  %v3131_v54 = vadd.f32 %v3130_v52, %v2890_v15  ;;  %4197 = vmatpush.bf16.msrb.mxu0 %v11848_v23  ;;  %4210 = vmatpush.bf16.msrb.mxu1 %v11856_v12  ;;  %v3093_v18 = vpop.f32.mrf.mxu0  ;;  %v3106_v9 = vpop.f32.mrf.mxu1  ;;  %v11842_v23 = vld [vmem:[#allocation14 + $0x208] sm:$0xff] }
 0xf8b   :  { %v11850_v12 = vld [vmem:[#allocation14 + $0x248] sm:$0xff] }
 0xf8c   :  { %v3292_v57 = vmax.f32 %v3118_v43, 0.0  ;;  %v3293_v27 = vmax.f32 %v3131_v54, 0.0  ;;  %v11859_v43 = vld [vmem:[#allocation14 + $0x290] sm:$0xff] }
 0xf8d   :  { %v11867_v54 = vld [vmem:[#allocation14 + $0x2d0] sm:$0xff] }
 0xf8e   :  { %v3308_v33 = vpack.c.bf16 %v3292_v57, %v3292_v57  ;;  %v3309_v44 = vpack.c.bf16 %v3293_v27, %v3293_v27  ;;  %4198 = vmatpush.bf16.msrb.mxu0 %v11847_v56  ;;  %4211 = vmatpush.bf16.msrb.mxu1 %v11855_v48  ;;  %v11841_v57 = vld [vmem:[#allocation14 + $0x200] sm:$0xff] }
 0xf8f   :  { %v11849_v27 = vld [vmem:[#allocation14 + $0x240] sm:$0xff] }
 0xf90   :  { %4127 = vmatmul.bf16.vlgmr.msrb.gmra.mxu2 %v3308_v33  ;;  %4140 = vmatmul.bf16.vlgmr.msrb.gmra.mxu3 %v3309_v44 }
 0xf91   :  { %4223 = vmatpush.bf16.msrb.mxu2 %v11864_v24  ;;  %4236 = vmatpush.bf16.msrb.mxu3 %v11872_v58  ;;  %v3119_v53 = vpop.f32.mrf.mxu2  ;;  %v3132_v1 = vpop.f32.mrf.mxu3  ;;  %v11880_v24 = vld [vmem:[#allocation14 + $0x338] sm:$0xff] }
 0xf92   :  { %4199 = vmatpush.bf16.msrb.mxu0 %v11846_v60  ;;  %4212 = vmatpush.bf16.msrb.mxu1 %v11854_v40  ;;  %v3143_v11 = vpop.f32.mrf.mxu0  ;;  %v3156_v16 = vpop.f32.mrf.mxu1  ;;  %v11888_v58 = vld [vmem:[#allocation14 + $0x378] sm:$0xff]  ;;  %v11858_v60 = vld [vmem:[#allocation14 + $0x288] sm:$0xff] }
 0xf93   :  { %v3144_v39 = vadd.f32 %v3143_v11, %v2891_v63  ;;  %v3157_v29 = vadd.f32 %v3156_v16, %v2892_v0  ;;  %v11866_v40 = vld [vmem:[#allocation14 + $0x2c8] sm:$0xff]  ;;  %v2897_v63 = vperm.slane %v13598_v19, 2  ;;  %v2898_v0 = vperm.slane %v13598_v19, 3 }
 0xf95   :  { %v3294_v55 = vmax.f32 %v3144_v39, 0.0  ;;  %v3295_v8 = vmax.f32 %v3157_v29, 0.0  ;;  %4224 = vmatpush.bf16.msrb.mxu2 %v11863_v37  ;;  %4237 = vmatpush.bf16.msrb.mxu3 %v11871_v10  ;;  %v11879_v37 = vld [vmem:[#allocation14 + $0x330] sm:$0xff] }
 0xf96   :  { %4200 = vmatpush.bf16.msrb.mxu0 %v11845_v38  ;;  %4213 = vmatpush.bf16.msrb.mxu1 %v11853_v59  ;;  %v11887_v10 = vld [vmem:[#allocation14 + $0x370] sm:$0xff]  ;;  %v11857_v38 = vld [vmem:[#allocation14 + $0x280] sm:$0xff] }
 0xf97   :  { %v3310_v13 = vpack.c.bf16 %v3294_v55, %v3294_v55  ;;  %v3311_v46 = vpack.c.bf16 %v3295_v8, %v3295_v8  ;;  %v11865_v59 = vld [vmem:[#allocation14 + $0x2c0] sm:$0xff] }
 0xf99   :  { %4225 = vmatpush.bf16.msrb.mxu2 %v11862_v45  ;;  %4238 = vmatpush.bf16.msrb.mxu3 %v11870_v50  ;;  %v3169_v51 = vpop.f32.mrf.mxu2  ;;  %v3182_v21 = vpop.f32.mrf.mxu3  ;;  %v11896_v45 = vld [vmem:[#allocation14 + $0x3b8] sm:$0xff] }
 0xf9a   :  { %v3170_v2 = vadd.f32 %v3169_v51, %v2893_v34  ;;  %v3183_v61 = vadd.f32 %v3182_v21, %v2894_v7  ;;  %4153 = vmatmul.bf16.vlgmr.msra.gmra.mxu0 %v3310_v13  ;;  %4166 = vmatmul.bf16.vlgmr.msra.gmra.mxu1 %v3311_v46  ;;  %v3145_v42 = vpop.f32.mrf.mxu0  ;;  %v3158_v5 = vpop.f32.mrf.mxu1  ;;  %v11904_v50 = vld [vmem:[#allocation14 + $0x3f8] sm:$0xff]  ;;  %v11878_v13 = vld [vmem:[#allocation14 + $0x328] sm:$0xff]  ;;  %v11895_v51 = vld [vmem:[#allocation14 + $0x3b0] sm:$0xff] }
 0xf9b   :  { %4201 = vmatpush.bf16.msrb.mxu0 %v11844_v28  ;;  %4214 = vmatpush.bf16.msrb.mxu1 %v11852_v47  ;;  %v11886_v46 = vld [vmem:[#allocation14 + $0x368] sm:$0xff]  ;;  %v11903_v21 = vld [vmem:[#allocation14 + $0x3f0] sm:$0xff] }
 0xf9c   :  { %v3296_v32 = vmax.f32 %v3170_v2, 0.0  ;;  %v3297_v6 = vmax.f32 %v3183_v61, 0.0 }
 0xf9d   :  { %4226 = vmatpush.bf16.msrb.mxu2 %v11861_v30  ;;  %4239 = vmatpush.bf16.msrb.mxu3 %v11869_v4  ;;  %v11877_v30 = vld [vmem:[#allocation14 + $0x320] sm:$0xff] }
 0xf9e   :  { %v3312_v62 = vpack.c.bf16 %v3296_v32, %v3296_v32  ;;  %v3313_v15 = vpack.c.bf16 %v3297_v6, %v3297_v6  ;;  %v11885_v4 = vld [vmem:[#allocation14 + $0x360] sm:$0xff]  ;;  %v11876_v32 = vld [vmem:[#allocation14 + $0x318] sm:$0xff] }
 0xf9f   :  { %4202 = vmatpush.bf16.msrb.mxu0 %v11843_v14  ;;  %4215 = vmatpush.bf16.msrb.mxu1 %v11851_v41  ;;  %v11894_v14 = vld [vmem:[#allocation14 + $0x3a8] sm:$0xff]  ;;  %v11884_v6 = vld [vmem:[#allocation14 + $0x358] sm:$0xff] }
 0xfa0   :  { %4179 = vmatmul.bf16.vlgmr.msra.gmra.mxu2 %v3312_v62  ;;  %4192 = vmatmul.bf16.vlgmr.msra.gmra.mxu3 %v3313_v15  ;;  %v11902_v41 = vld [vmem:[#allocation14 + $0x3e8] sm:$0xff]  ;;  %v11875_v62 = vld [vmem:[#allocation14 + $0x310] sm:$0xff] }
 0xfa1   :  { %4227 = vmatpush.bf16.msrb.mxu2 %v11860_v17  ;;  %4240 = vmatpush.bf16.msrb.mxu3 %v11868_v35  ;;  %v3171_v36 = vpop.f32.mrf.mxu2  ;;  %v3184_v52 = vpop.f32.mrf.mxu3  ;;  %v11893_v17 = vld [vmem:[#allocation14 + $0x3a0] sm:$0xff]  ;;  %v11883_v15 = vld [vmem:[#allocation14 + $0x350] sm:$0xff] }
 0xfa2   :  { %v3195_v18 = vpop.f32.mrf.mxu0  ;;  %v3208_v9 = vpop.f32.mrf.mxu1  ;;  %v11901_v35 = vld [vmem:[#allocation14 + $0x3e0] sm:$0xff] }
 0xfa3   :  { %4203 = vmatpush.bf16.msrb.mxu0 %v11842_v23  ;;  %4216 = vmatpush.bf16.msrb.mxu1 %v11850_v12  ;;  %v3196_v56 = vadd.f32 %v3195_v18, %v2895_v26  ;;  %v3209_v48 = vadd.f32 %v3208_v9, %v2896_v25  ;;  %v2899_v23 = vperm.slane %v13598_v19, 4  ;;  %v2900_v12 = vperm.slane %v13598_v19, 5  ;;  %v11874_v18 = vld [vmem:[#allocation14 + $0x308] sm:$0xff] }
 0xfa4   :  { %v11882_v9 = vld [vmem:[#allocation14 + $0x348] sm:$0xff] }
 0xfa5   :  { %v3298_v33 = vmax.f32 %v3196_v56, 0.0  ;;  %v3299_v44 = vmax.f32 %v3209_v48, 0.0  ;;  %4228 = vmatpush.bf16.msrb.mxu2 %v11859_v43  ;;  %4241 = vmatpush.bf16.msrb.mxu3 %v11867_v54  ;;  %v11892_v43 = vld [vmem:[#allocation14 + $0x398] sm:$0xff] }
 0xfa6   :  { %v11900_v54 = vld [vmem:[#allocation14 + $0x3d8] sm:$0xff] }
 0xfa7   :  { %v3314_v53 = vpack.c.bf16 %v3298_v33, %v3298_v33  ;;  %v3315_v1 = vpack.c.bf16 %v3299_v44, %v3299_v44  ;;  %4204 = vmatpush.bf16.msrb.mxu0 %v11841_v57  ;;  %4217 = vmatpush.bf16.msrb.mxu1 %v11849_v27  ;;  %v11891_v57 = vld [vmem:[#allocation14 + $0x390] sm:$0xff]  ;;  %v11873_v33 = vld [vmem:[#allocation14 + $0x300] sm:$0xff] }
 0xfa8   :  { %v11899_v27 = vld [vmem:[#allocation14 + $0x3d0] sm:$0xff]  ;;  %v11881_v44 = vld [vmem:[#allocation14 + $0x340] sm:$0xff] }
 0xfa9   :  { %4229 = vmatpush.bf16.msrb.mxu2 %v11858_v60  ;;  %4242 = vmatpush.bf16.msrb.mxu3 %v11866_v40  ;;  %v3221_v11 = vpop.f32.mrf.mxu2  ;;  %v3234_v16 = vpop.f32.mrf.mxu3 }
 0xfaa   :  { %v3222_v39 = vadd.f32 %v3221_v11, %v2897_v63  ;;  %v3235_v29 = vadd.f32 %v3234_v16, %v2898_v0  ;;  %4205 = vmatmul.bf16.vlgmr.msrb.gmra.mxu0 %v3314_v53  ;;  %4218 = vmatmul.bf16.vlgmr.msrb.gmra.mxu1 %v3315_v1  ;;  %v3197_v55 = vpop.f32.mrf.mxu0  ;;  %v3210_v8 = vpop.f32.mrf.mxu1  ;;  %v11890_v53 = vld [vmem:[#allocation14 + $0x388] sm:$0xff] }
 0xfab   :  { %4249 = vmatpush.bf16.msra.mxu0 %v11880_v24  ;;  %4262 = vmatpush.bf16.msra.mxu1 %v11888_v58  ;;  %v2901_v24 = vperm.slane %v13598_v19, 6  ;;  %v2902_v58 = vperm.slane %v13598_v19, 7  ;;  %v11898_v1 = vld [vmem:[#allocation14 + $0x3c8] sm:$0xff]  ;;  %v11889_v19 = vld [vmem:[#allocation14 + $0x380] sm:$0xff] }
 0xfac   :  { %v3300_v34 = vmax.f32 %v3222_v39, 0.0  ;;  %v3301_v7 = vmax.f32 %v3235_v29, 0.0 }
 0xfad   :  { %4230 = vmatpush.bf16.msrb.mxu2 %v11857_v38  ;;  %4243 = vmatpush.bf16.msrb.mxu3 %v11865_v59  ;;  %v11897_v38 = vld [vmem:[#allocation14 + $0x3c0] sm:$0xff] }
 0xfae   :  { %v3316_v28 = vpack.c.bf16 %v3300_v34, %v3300_v34  ;;  %v3317_v47 = vpack.c.bf16 %v3301_v7, %v3301_v7 }
 0xfaf   :  { %4250 = vmatpush.bf16.msra.mxu0 %v11879_v37  ;;  %4263 = vmatpush.bf16.msra.mxu1 %v11887_v10 }
 0xfb0   :  { %4231 = vmatmul.bf16.vlgmr.msrb.gmra.mxu2 %v3316_v28  ;;  %4244 = vmatmul.bf16.vlgmr.msrb.gmra.mxu3 %v3317_v47 }
 0xfb1   :  { %4275 = vmatpush.bf16.msra.mxu2 %v11896_v45  ;;  %4288 = vmatpush.bf16.msra.mxu3 %v11904_v50  ;;  %v3223_v2 = vpop.f32.mrf.mxu2  ;;  %v3236_v61 = vpop.f32.mrf.mxu3 }
 0xfb2   :  { %v3247_v42 = vpop.f32.mrf.mxu0  ;;  %v3260_v5 = vpop.f32.mrf.mxu1 }
 0xfb3   :  { %4251 = vmatpush.bf16.msra.mxu0 %v11878_v13  ;;  %4264 = vmatpush.bf16.msra.mxu1 %v11886_v46  ;;  %v3248_v56 = vadd.f32 %v3247_v42, %v2899_v23  ;;  %v3261_v48 = vadd.f32 %v3260_v5, %v2900_v12 }
 0xfb5   :  { %4276 = vmatpush.bf16.msra.mxu2 %v11895_v51  ;;  %4289 = vmatpush.bf16.msra.mxu3 %v11903_v21  ;;  %v3302_v60 = vmax.f32 %v3248_v56, 0.0  ;;  %v3303_v40 = vmax.f32 %v3261_v48, 0.0  ;;  %v12268_v21 = vld [vmem:[%s14150_s21] ss:$0 sm:$0xff] }
 0xfb7   :  { %4252 = vmatpush.bf16.msra.mxu0 %v11877_v30  ;;  %4265 = vmatpush.bf16.msra.mxu1 %v11885_v4  ;;  %v3318_v11 = vpack.c.bf16 %v3302_v60, %v3302_v60  ;;  %v3319_v16 = vpack.c.bf16 %v3303_v40, %v3303_v40 }
 0xfb9   :  { %4277 = vmatpush.bf16.msra.mxu2 %v11894_v14  ;;  %4290 = vmatpush.bf16.msra.mxu3 %v11902_v41  ;;  %v3273_v26 = vpop.f32.mrf.mxu2  ;;  %v3286_v25 = vpop.f32.mrf.mxu3 }
 0xfba   :  { %v3249_v36 = vpop.f32.mrf.mxu0  ;;  %v3262_v52 = vpop.f32.mrf.mxu1  ;;  %v3274_v37 = vadd.f32 %v3273_v26, %v2901_v24  ;;  %v3287_v10 = vadd.f32 %v3286_v25, %v2902_v58 }
 0xfbb   :  { %4253 = vmatpush.bf16.msra.mxu0 %v11876_v32  ;;  %4266 = vmatpush.bf16.msra.mxu1 %v11884_v6 }
 0xfbc   :  { %v3304_v59 = vmax.f32 %v3274_v37, 0.0  ;;  %v3305_v39 = vmax.f32 %v3287_v10, 0.0 }
 0xfbd   :  { %4278 = vmatpush.bf16.msra.mxu2 %v11893_v17  ;;  %4291 = vmatpush.bf16.msra.mxu3 %v11901_v35 }
 0xfbe   :  { %v3320_v29 = vpack.c.bf16 %v3304_v59, %v3304_v59  ;;  %v3321_v55 = vpack.c.bf16 %v3305_v39, %v3305_v39 }
 0xfbf   :  { %4254 = vmatpush.bf16.msra.mxu0 %v11875_v62  ;;  %4267 = vmatpush.bf16.msra.mxu1 %v11883_v15 }
 0xfc1   :  { %4279 = vmatpush.bf16.msra.mxu2 %v11892_v43  ;;  %4292 = vmatpush.bf16.msra.mxu3 %v11900_v54  ;;  %v3275_v63 = vpop.f32.mrf.mxu2  ;;  %v3288_v0 = vpop.f32.mrf.mxu3 }
 0xfc3   :  { %4255 = vmatpush.bf16.msra.mxu0 %v11874_v18  ;;  %4268 = vmatpush.bf16.msra.mxu1 %v11882_v9 }
 0xfc5   :  { %4280 = vmatpush.bf16.msra.mxu2 %v11891_v57  ;;  %4293 = vmatpush.bf16.msra.mxu3 %v11899_v27 }
 0xfc7   :  { %4256 = vmatpush.bf16.msra.mxu0 %v11873_v33  ;;  %4269 = vmatpush.bf16.msra.mxu1 %v11881_v44 }
 0xfc9   :  { %4281 = vmatpush.bf16.msra.mxu2 %v11890_v53  ;;  %4294 = vmatpush.bf16.msra.mxu3 %v11898_v1 }
 0xfca   :  { %4257 = vmatmul.bf16.vlgmr.msra.gmra.mxu0 %v3318_v11  ;;  %4270 = vmatmul.bf16.vlgmr.msra.gmra.mxu1 %v3319_v16 }
 0xfcd   :  { %4282 = vmatpush.bf16.msra.mxu2 %v11889_v19  ;;  %4295 = vmatpush.bf16.msra.mxu3 %v11897_v38 }
 0xfd0   :  { %4283 = vmatmul.bf16.vlgmr.msra.gmra.mxu2 %v3320_v29  ;;  %4296 = vmatmul.bf16.vlgmr.msra.gmra.mxu3 %v3321_v55 }
0x1006   :  { %v4102_v8 = vpop.f32.mrf.mxu0  ;;  %v4115_v45 = vpop.f32.mrf.mxu1 }
0x1007   :  { %v4103_v2 = vadd.f32 %v12268_v21, %v4102_v8 }
0x1009   :  { %v4116_v5 = vadd.f32 %v4115_v45, %v4103_v2  ;;  %v12269_v2 = vld [vmem:[%s14153_s24] ss:$0 sm:$0xff] }
0x100e   :  { %v4104_v50 = vpop.f32.mrf.mxu0  ;;  %v4117_v34 = vpop.f32.mrf.mxu1 }
0x1013   :  { %v4128_v7 = vpop.f32.mrf.mxu2  ;;  %v4141_v13 = vpop.f32.mrf.mxu3 }
0x1014   :  { %v4129_v32 = vadd.f32 %v4128_v7, %v4116_v5  ;;  %v11906_v7 = vld [vmem:[#allocation10 + $0x18] sm:$0xff] }
0x1015   :  { %4730 = vmatpush.bf16.msrb.mxu0 %v11906_v7 }
0x1016   :  { %v4142_v35 = vadd.f32 %v4141_v13, %v4129_v32 }
0x1017   :  { %v4154_v46 = vpop.f32.mrf.mxu0  ;;  %v4167_v28 = vpop.f32.mrf.mxu1 }
0x1018   :  { %v4155_v23 = vadd.f32 %v4154_v46, %v4142_v35  ;;  %v11905_v46 = vld [vmem:[#allocation10 + $0x10] sm:$0xff] }
0x1019   :  { %4731 = vmatpush.bf16.msrb.mxu0 %v11905_v46 }
0x101a   :  { %v4168_v25 = vadd.f32 %v4167_v28, %v4155_v23 }
0x101b   :  { %v4130_v47 = vpop.f32.mrf.mxu2  ;;  %v4143_v51 = vpop.f32.mrf.mxu3 }
0x101f   :  { %v4156_v30 = vpop.f32.mrf.mxu0  ;;  %v4169_v4 = vpop.f32.mrf.mxu1 }
0x1023   :  { %v4180_v61 = vpop.f32.mrf.mxu2  ;;  %v4193_v42 = vpop.f32.mrf.mxu3 }
0x1024   :  { %v4181_v36 = vadd.f32 %v4180_v61, %v4168_v25 }
0x1026   :  { %v4194_v52 = vadd.f32 %v4193_v42, %v4181_v36  ;;  %v12270_v42 = vld [vmem:[%s14154_s25] ss:$0 sm:$0xff]  ;;  %v12271_v36 = vld [vmem:[%s14144_s15 + $0x1] ss:$0 sm:$0xff] }
0x1027   :  { %v4206_v14 = vpop.f32.mrf.mxu0  ;;  %v4219_v41 = vpop.f32.mrf.mxu1 }
0x1028   :  { %v4207_v18 = vadd.f32 %v4206_v14, %v4194_v52  ;;  %v4370_v14 = vrot.slane %v12269_v2, 4 }
0x102a   :  { %v4220_v9 = vadd.f32 %v4219_v41, %v4207_v18 }
0x102b   :  { %v4182_v6 = vpop.f32.mrf.mxu2  ;;  %v4195_v17 = vpop.f32.mrf.mxu3 }
0x102c   :  { %v4377_v6 = vrot.slane %v12270_v42, 4 }
0x102f   :  { %v4208_v62 = vpop.f32.mrf.mxu0  ;;  %v4221_v15 = vpop.f32.mrf.mxu1 }
0x1033   :  { %v4232_v12 = vpop.f32.mrf.mxu2  ;;  %v4245_v26 = vpop.f32.mrf.mxu3 }
0x1034   :  { %v4233_v57 = vadd.f32 %v4232_v12, %v4220_v9 }
0x1036   :  { %v4246_v27 = vadd.f32 %v4245_v26, %v4233_v57 }
0x103b   :  { %v4234_v43 = vpop.f32.mrf.mxu2  ;;  %v4247_v54 = vpop.f32.mrf.mxu3 }
0x1047   :  { %v4258_v56 = vpop.f32.mrf.mxu0  ;;  %v4271_v48 = vpop.f32.mrf.mxu1 }
0x1048   :  { %v4259_v24 = vadd.f32 %v4258_v56, %v4246_v27 }
0x104a   :  { %v4272_v44 = vadd.f32 %v4271_v48, %v4259_v24 }
0x104f   :  { %v4260_v58 = vpop.f32.mrf.mxu0  ;;  %v4273_v33 = vpop.f32.mrf.mxu1 }
0x1053   :  { %v4284_v60 = vpop.f32.mrf.mxu2  ;;  %v4297_v40 = vpop.f32.mrf.mxu3 }
0x1054   :  { %v4285_v63 = vadd.f32 %v4284_v60, %v4272_v44 }
0x1056   :  { %v4298_v0 = vadd.f32 %v4297_v40, %v4285_v63 }
0x1058   :  { %v4302_v53 = vrot.slane %v4298_v0, 4  ;;  %v4304_v1 = vadd.f32 %v4298_v0, %v13542_v31 }
0x105a   :  { %v4305_v37 = vadd.f32 %v4302_v53, %v13544_v22  ;;  %4308 = vst [vmem:[#allocation1] ss:$2 sm:$0xff] %v4304_v1 }
0x105b   :  { %v4286_v10 = vpop.f32.mrf.mxu2  ;;  %v4299_v11 = vpop.f32.mrf.mxu3 }
0x105c   :  { %4310 = vst [vmem:[#allocation1 + $0x1] ss:$2 sm:$0xff] %v4305_v37 }
0x1063   :  { %v4311_v16 = vld.sshfl [vmem:[#allocation1] sm:$0xff pattern:$0x75316420] }
0x1064   :  { %v4313_v19 = vsel %vm339_vm0, %v4311_v16, 0.0 }
0x1065   :  { %4314 = vadd.xlane.f32.xlu2 %v4313_v19 }
0x10d8   :  { %v4315_v38 = vpop.xlane.xlu2 %4314 }
0x10d9   :  { %v4316_v59 = vmul.f32 %v4315_v38, %v13255_v3 }
0x10db   :  { %v4321_v39 = vperm.slane %v4316_v59, %v13510_v20  ;;  %v4325_v29 = vperm.slane %v4316_v59, %v13512_v49 }
0x10dd   :  { %v4328_v55 = vsub.f32 %v4304_v1, %v4321_v39  ;;  %v4329_v8 = vsub.f32 %v4305_v37, %v4325_v29 }
0x10df   :  { %v4330_v31 = vmul.f32 %v4328_v55, %v4328_v55  ;;  %v4331_v45 = vmul.f32 %v4329_v8, %v4329_v8 }
0x10e1   :  { %4334 = vst [vmem:[#allocation1] ss:$2 sm:$0xff] %v4330_v31 }
0x10e2   :  { %4336 = vst [vmem:[#allocation1 + $0x1] ss:$2 sm:$0xff] %v4331_v45 }
0x10e9   :  { %v4337_v22 = vld.sshfl [vmem:[#allocation1] sm:$0xff pattern:$0x75316420] }
0x10ea   :  { %v4339_v50 = vsel %vm339_vm0, %v4337_v22, 0.0 }
0x10eb   :  { %4340 = vadd.xlane.f32.xlu0 %v4339_v50 }
0x115e   :  { %v4341_v34 = vpop.xlane.xlu0 %4340 }
0x115f   :  { %v4342_v13 = vmul.f32 %v4341_v34, %v13255_v3 }
0x1161   :  { %v4343_v28 = vadd.f32 1e-05, %v4342_v13 }
0x1163   :  { %12357 = vrsqrt.f32 %v4343_v28  ;;  %vm4350_vm13 = vweird.f32 %v4343_v28 }
0x1169   :  { %v12358_v47 = vpop.eup %12357 }
0x116a   :  { %v4345_v51 = vmul.f32 %v12358_v47, %v4343_v28  ;;  %vm4351_vm12 = vweird.f32 %v12358_v47 }
0x116b   :  { %vm4352_vm14 = vmor %vm4350_vm13, %vm4351_vm12 }
0x116c   :  { %v4346_v21 = vmul.f32 %v12358_v47, %v4345_v51 }
0x116e   :  { %v4347_v30 = vmul.f32 0.5, %v4346_v21 }
0x1170   :  { %v4348_v4 = vsub.f32 1.5, %v4347_v30 }
0x1172   :  { %v4349_v61 = vmul.f32 %v12358_v47, %v4348_v4 }
0x1174   :  { %v4353_v5 = vsel %vm4352_vm14, %v12358_v47, %v4349_v61 }
0x1175   :  { %v4358_v41 = vperm.slane %v4353_v5, %v13510_v20  ;;  %v4362_v32 = vperm.slane %v4353_v5, %v13512_v49 }
0x1177   :  { %v4365_v17 = vmul.f32 %v4358_v41, %v4328_v55  ;;  %v4366_v35 = vmul.f32 %v4362_v32, %v4329_v8 }
0x1179   :  { %v4372_v62 = vmul.f32 %v12269_v2, %v4365_v17  ;;  %v4373_v15 = vmul.f32 %v4370_v14, %v4366_v35 }
0x117b   :  { %v13627_v23 = vadd.f32 %v12270_v42, %v4372_v62  ;;  %v13629_v12 = vadd.f32 %v4377_v6, %v4373_v15 }
0x117d   :  { %4700 = vst [vmem:[#allocation1] ss:$2 sm:$0xff] %v13627_v23 }
0x117e   :  { %4702 = vst [vmem:[#allocation1 + $0x1] ss:$2 sm:$0xff] %v13629_v12 }
0x1185   :  { %v4703_v26 = vld.sshfl [vmem:[#allocation1] sm:$0xff pattern:$0x75316420] }
0x1186   :  { %v4705_v25 = vpack.c.bf16 %v4703_v26, %v4703_v26 }
0x1188   :  { %10316 = vmatmul.msk.bf16.vlgmr.msrb.gmra.mxu0 %vm339_vm0, %v4705_v25 }
0x1205   :  { %v4733_v52 = vpop.f32.mrf.mxu0 }
0x1206   :  { %v4734_v43 = vadd.f32 %v12271_v36, %v4733_v52 }
0x1208   :  { %4740 = vrot.lane.b32.xlu1 %v4734_v43, %s12672_s1  ;;  %v4738_v54 = vrot.slane %v4734_v43, 4  ;;  %v4758_v56 = vpack.c.bf16 %v4734_v43, %v4734_v43 }
0x120a   :  { %4742 = vrot.lane.b32.xlu0 %v4738_v54, %s12672_s1  ;;  %4748 = vrot.lane.b32.xlu2 %v4738_v54, %s12673_s0  ;;  %v4759_v9 = vpack.c.bf16 %v4738_v54, %v4738_v54  ;;  %v4767_v57 = vunpack.c.l.b16 %v4758_v56 }
0x120c   :  { %v4791_v48 = vunpack.c.l.b16 %v4759_v9  ;;  %v13647_v24 = vpack.c.b16 %v4767_v57, %v4767_v57 }
0x120d   :  { %v4735_v18 = vpop.f32.mrf.mxu0 }
0x120e   :  { %v13643_v27 = vpack.c.b16 %v4791_v48, %v4791_v48 }
0x1210   :  { %4752 = vrot.lane.b32.xlu1 %v4734_v43, %s12674_s16 }
0x1212   :  { %4746 = vrot.lane.b32.xlu0 %v4734_v43, %s12673_s0  ;;  %4754 = vrot.lane.b32.xlu2 %v4738_v54, %s12674_s16 }
0x1218   :  { %4793 = vrot.lane.b32.xlu1 %v13643_v27, %s12675_s14 }
0x121a   :  { %4769 = vrot.lane.b32.xlu2 %v13647_v24, %s12675_s14 }
0x1264   :  { %v4749_v58 = vpop.permute.xlu2 %4748 }
0x1265   :  { %v4763_v33 = vpack.c.bf16 %v4749_v58, %v4749_v58 }
0x1267   :  { %v4887_v44 = vunpack.c.l.b16 %v4763_v33 }
0x1269   :  { %v13651_v60 = vpack.c.b16 %v4887_v44, %v4887_v44 }
0x126b   :  { %4889 = vrot.lane.b32.xlu1 %v13651_v60, %s12675_s14 }
0x126c   :  { %v4755_v40 = vpop.permute.xlu2 %4754 }
0x126d   :  { %v4765_v8 = vpack.c.bf16 %v4755_v40, %v4755_v40 }
0x126f   :  { %v4935_v7 = vunpack.c.l.b16 %v4765_v8 }
0x1271   :  { %v13671_v46 = vpack.c.b16 %v4935_v7, %v4935_v7 }
0x1274   :  { %v4770_v63 = vpop.permute.xlu2 %4769 }
0x1275   :  { %v4775_v0 = vsel %vm503_vm1, %v4770_v63, 0 }
0x1276   :  { %4784 = vmatpush.bf16.xpose.msrb.mxu1 %v4775_v0 }
0x127a   :  { %v4741_v53 = vpop.permute.xlu1 %4740 }
0x127b   :  { %v4760_v1 = vpack.c.bf16 %v4741_v53, %v4741_v53 }
0x127c   :  { %v4743_v37 = vpop.permute.xlu0 %4742 }
0x127d   :  { %v4815_v10 = vunpack.c.l.b16 %v4760_v1  ;;  %10317 = vmatmul.msk.bf16.vlgmr.msrb.gmra.mxu1 %vm503_vm1, %v4758_v56  ;;  %v4761_v16 = vpack.c.bf16 %v4743_v37, %v4743_v37 }
0x127f   :  { %v13657_v11 = vpack.c.b16 %v4815_v10, %v4815_v10  ;;  %v4839_v38 = vunpack.c.l.b16 %v4761_v16 }
0x1281   :  { %4817 = vrot.lane.b32.xlu0 %v13657_v11, %s12675_s14  ;;  %v4840_v31 = vpack.c.b16 %v4839_v38, %v4839_v38 }
0x1282   :  { %v4753_v19 = vpop.permute.xlu1 %4752 }
0x1283   :  { %v4764_v59 = vpack.c.bf16 %v4753_v19, %v4753_v19 }
0x1284   :  { %v4747_v39 = vpop.permute.xlu0 %4746 }
0x1285   :  { %v4911_v29 = vunpack.c.l.b16 %v4764_v59  ;;  %v4762_v55 = vpack.c.bf16 %v4747_v39, %v4747_v39 }
0x1287   :  { %v13661_v45 = vpack.c.b16 %v4911_v29, %v4911_v29  ;;  %v4863_v22 = vunpack.c.l.b16 %v4762_v55 }
0x1289   :  { %v13663_v50 = vpack.c.b16 %v4863_v22, %v4863_v22  ;;  %4841 = vrot.lane.b32.xlu0 %v4840_v31, %s12675_s14  ;;  %4913 = vrot.lane.b32.xlu2 %v13661_v45, %s12675_s14 }
0x128a   :  { %v4794_v34 = vpop.permute.xlu1 %4793 }
0x128b   :  { %v4799_v13 = vsel %vm503_vm1, %v4794_v34, 0  ;;  %4865 = vrot.lane.b32.xlu1 %v13663_v50, %s12675_s14 }
0x128c   :  { %4808 = vmatpush.bf16.xpose.msrb.mxu2 %v4799_v13 }
0x1291   :  { %4937 = vrot.lane.b32.xlu0 %v13671_v46, %s12675_s14 }
0x1293   :  { %10318 = vmatmul.msk.bf16.vlgmr.msrb.gmra.mxu2 %vm503_vm1, %v4759_v9 }
0x12dd   :  { %v4890_v28 = vpop.permute.xlu1 %4889 }
0x12de   :  { %v4895_v47 = vsel %vm503_vm1, %v4890_v28, 0 }
0x12df   :  { %4904 = vmatpush.bf16.xpose.msra.mxu2 %v4895_v47 }
0x12e3   :  { %v4914_v51 = vpop.permute.xlu2 %4913 }
0x12e4   :  { %v4919_v4 = vsel %vm503_vm1, %v4914_v51, 0 }
0x12e6   :  { %10322 = vmatmul.msk.bf16.vlgmr.msra.gmra.mxu2 %vm503_vm1, %v4763_v33 }
0x12f3   :  { %v4818_v21 = vpop.permute.xlu0 %4817 }
0x12f4   :  { %v4823_v30 = vsel %vm503_vm1, %v4818_v21, 0 }
0x12f5   :  { %4832 = vmatpush.bf16.xpose.msrb.mxu3 %v4823_v30 }
0x12fa   :  { %v4786_v2 = vpop.f32.mrf.mxu1 }
0x12fb   :  { %v4958_v61 = vmul.f32 0.35355338, %v4786_v2  ;;  %v4842_v42 = vpop.permute.xlu0 %4841 }
0x12fc   :  { %v4847_v5 = vsel %vm503_vm1, %v4842_v42, 0  ;;  %10319 = vmatmul.msk.bf16.vlgmr.msrb.gmra.mxu3 %vm503_vm1, %v4760_v1 }
0x12fd   :  { %4928 = vmatpush.bf16.xpose.msra.mxu3 %v4919_v4  ;;  %4856 = vmatpush.bf16.xpose.msra.mxu0 %v4847_v5  ;;  %v4866_v14 = vpop.permute.xlu1 %4865  ;;  %v4966_v41 = vsel %vm2462_vm5, %v4958_v61, -inf }
0x12fe   :  { %v4871_v32 = vsel %vm503_vm1, %v4866_v14, 0  ;;  %4967 = vmax.xlane.f32.xlu1 %v4966_v41 }
0x12ff   :  { %4880 = vmatpush.bf16.xpose.msra.mxu1 %v4871_v32 }
0x1302   :  { %v4788_v6 = vpop.f32.mrf.mxu1 }
0x1303   :  { %v4938_v17 = vpop.permute.xlu0 %4937 }
0x1304   :  { %v4943_v35 = vsel %vm503_vm1, %v4938_v17, 0  ;;  %10320 = vmatmul.msk.bf16.vlgmr.msra.gmra.mxu0 %vm503_vm1, %v4761_v16 }
0x1305   :  { %4952 = vmatpush.bf16.xpose.msrb.mxu0 %v4943_v35 }
0x1306   :  { %10321 = vmatmul.msk.bf16.vlgmr.msra.gmra.mxu1 %vm503_vm1, %v4762_v55 }
0x130c   :  { %10323 = vmatmul.msk.bf16.vlgmr.msra.gmra.mxu3 %vm503_vm1, %v4764_v59 }
0x1314   :  { %10324 = vmatmul.msk.bf16.vlgmr.msrb.gmra.mxu0 %vm503_vm1, %v4765_v8 }
0x1316   :  { %v4810_v62 = vpop.f32.mrf.mxu2 }
0x1317   :  { %v4959_v15 = vmul.f32 0.35355338, %v4810_v62  ;;  %5062 = vrot.lane.b32.xlu1 %v13647_v24, %s12660_s2 }
0x1319   :  { %v4969_v26 = vsel %vm2462_vm5, %v4959_v15, -inf }
0x131a   :  { %4970 = vmax.xlane.f32.xlu2 %v4969_v26 }
0x131e   :  { %v4812_v25 = vpop.f32.mrf.mxu2 }
0x1369   :  { %v4906_v36 = vpop.f32.mrf.mxu2 }
0x136a   :  { %v4963_v52 = vmul.f32 0.35355338, %v4906_v36 }
0x136c   :  { %v4981_v43 = vsel %vm2462_vm5, %v4963_v52, -inf }
0x136d   :  { %4982 = vmax.xlane.f32.xlu1 %v4981_v43 }
0x1371   :  { %v4908_v54 = vpop.f32.mrf.mxu2  ;;  %v4968_v9 = vpop.xlane.xlu1 %4967 }
0x1372   :  { %v4990_v29 = vsub.f32 %v4958_v61, %v4968_v9 }
0x1374   :  { %v4998_v55 = vmul.f32 1.442695, %v4990_v29 }
0x1376   :  { %12359 = vpow2.f32 %v4998_v55 }
0x137c   :  { %v12360_v34 = vpop.eup %12359 }
0x137d   :  { %v5014_v7 = vsel %vm2462_vm5, %v12360_v34, 0.0 }
0x137f   :  { %v4834_v18 = vpop.f32.mrf.mxu3 }
0x1380   :  { %v4960_v0 = vmul.f32 0.35355338, %v4834_v18 }
0x1381   :  { %v4858_v56 = vpop.f32.mrf.mxu0 }
0x1382   :  { %v4961_v48 = vmul.f32 0.35355338, %v4858_v56  ;;  %v4972_v37 = vsel %vm2462_vm5, %v4960_v0, -inf }
0x1383   :  { %v4882_v57 = vpop.f32.mrf.mxu1 }
0x1384   :  { %v4962_v58 = vmul.f32 0.35355338, %v4882_v57  ;;  %v4975_v33 = vsel %vm2462_vm5, %v4961_v48, -inf }
0x1385   :  { %4976 = vmax.xlane.f32.xlu2 %v4975_v33 }
0x1386   :  { %5125 = vrot.lane.b32.xlu1 %v4840_v31, %s12660_s2  ;;  %v4978_v24 = vsel %vm2462_vm5, %v4962_v58, -inf }
0x1387   :  { %v4836_v44 = vpop.f32.mrf.mxu3  ;;  %4979 = vmax.xlane.f32.xlu0 %v4978_v24 }
0x1389   :  { %v4860_v40 = vpop.f32.mrf.mxu0  ;;  %v5063_v63 = vpop.permute.xlu1 %5062 }
0x138a   :  { %v5068_v53 = vsel %vm856_vm4, %v5063_v63, 0 }
0x138b   :  { %v4884_v1 = vpop.f32.mrf.mxu1  ;;  %5077 = vmatpush.bf16.msrb.mxu1 %v5068_v53 }
0x138d   :  { %v4971_v8 = vpop.xlane.xlu2 %4970 }
0x138e   :  { %v4991_v31 = vsub.f32 %v4959_v15, %v4971_v8 }
0x138f   :  { %v4930_v10 = vpop.f32.mrf.mxu3  ;;  %4973 = vmax.xlane.f32.xlu0 %v4972_v37 }
0x1390   :  { %v5000_v22 = vmul.f32 1.442695, %v4991_v31 }
0x1391   :  { %v4954_v16 = vpop.f32.mrf.mxu0 }
0x1392   :  { %v13702_v59 = vmul.f32 0.35355338, %v4954_v16  ;;  %12361 = vpow2.f32 %v5000_v22 }
0x1394   :  { %v4987_v39 = vsel %vm2462_vm5, %v13702_v59, -inf }
0x1397   :  { %v4932_v19 = vpop.f32.mrf.mxu3 }
0x1399   :  { %v4956_v38 = vpop.f32.mrf.mxu0 }
0x139d   :  { %5104 = vrot.lane.b32.xlu2 %v13657_v11, %s12660_s2  ;;  %v13707_v11 = vpop.eup %12361 }
0x139e   :  { %v5017_v13 = vsel %vm2462_vm5, %v13707_v11, 0.0 }
0x13a3   :  { %5083 = vrot.lane.b32.xlu0 %v13643_v27, %s12660_s2  ;;  %v4964_v27 = vmul.f32 0.35355338, %v4930_v10 }
0x13a5   :  { %v4984_v28 = vsel %vm2462_vm5, %v4964_v27, -inf }
0x13b0   :  { %4988 = vmax.xlane.f32.xlu1 %v4987_v39 }
0x13c6   :  { %5015 = vadd.xlane.f32.xlu2 %v5014_v7 }
0x13cd   :  { %5018 = vadd.xlane.f32.xlu0 %v5017_v13 }
0x13ce   :  { %4985 = vmax.xlane.f32.xlu2 %v4984_v28 }
0x13e0   :  { %v4983_v47 = vpop.xlane.xlu1 %4982 }
0x13e1   :  { %v4995_v61 = vsub.f32 %v4963_v52, %v4983_v47 }
0x13e3   :  { %v5008_v41 = vmul.f32 1.442695, %v4995_v61 }
0x13f8   :  { %v4977_v51 = vpop.xlane.xlu2 %4976  ;;  %v5126_v21 = vpop.permute.xlu1 %5125 }
0x13f9   :  { %v4993_v30 = vsub.f32 %v4961_v48, %v4977_v51  ;;  %v5131_v4 = vsel %vm856_vm4, %v5126_v21, 0 }
0x13fa   :  { %v4980_v2 = vpop.xlane.xlu0 %4979  ;;  %5140 = vmatpush.bf16.msra.mxu0 %v5131_v4 }
0x13fb   :  { %v5004_v42 = vmul.f32 1.442695, %v4993_v30  ;;  %v4994_v5 = vsub.f32 %v4962_v58, %v4980_v2 }
0x13fd   :  { %12363 = vpow2.f32 %v5004_v42  ;;  %v5006_v14 = vmul.f32 1.442695, %v4994_v5 }
0x13ff   :  { %12365 = vpow2.f32 %v5006_v14 }
0x1400   :  { %v5105_v32 = vpop.permute.xlu2 %5104  ;;  %12367 = vpow2.f32 %v5008_v41 }
0x1401   :  { %v5110_v6 = vsel %vm856_vm4, %v5105_v32, 0 }
0x1402   :  { %5119 = vmatpush.bf16.msrb.mxu3 %v5110_v6  ;;  %v4974_v17 = vpop.xlane.xlu0 %4973 }
0x1403   :  { %v12364_v35 = vpop.eup %12363  ;;  %v4992_v62 = vsub.f32 %v4960_v0, %v4974_v17 }
0x1404   :  { %v5023_v15 = vsel %vm2462_vm5, %v12364_v35, 0.0 }
0x1405   :  { %v13715_v26 = vpop.eup %12365  ;;  %v5002_v25 = vmul.f32 1.442695, %v4992_v62  ;;  %5024 = vadd.xlane.f32.xlu2 %v5023_v15 }
0x1406   :  { %v5026_v36 = vsel %vm2462_vm5, %v13715_v26, 0.0  ;;  %v12368_v52 = vpop.eup %12367 }
0x1407   :  { %12369 = vpow2.f32 %v5002_v25  ;;  %5027 = vadd.xlane.f32.xlu0 %v5026_v36  ;;  %v5029_v43 = vsel %vm2462_vm5, %v12368_v52, 0.0 }
0x140d   :  { %v12370_v54 = vpop.eup %12369  ;;  %5030 = vadd.xlane.f32.xlu2 %v5029_v43 }
0x140e   :  { %v5020_v18 = vsel %vm2462_vm5, %v12370_v54, 0.0 }
0x140f   :  { %5021 = vadd.xlane.f32.xlu1 %v5020_v18 }
0x1415   :  { %v5084_v9 = vpop.permute.xlu0 %5083 }
0x1416   :  { %v5089_v56 = vsel %vm856_vm4, %v5084_v9, 0 }
0x1417   :  { %5098 = vmatpush.bf16.msrb.mxu2 %v5089_v56 }
0x141b   :  { %5146 = vrot.lane.b32.xlu0 %v13663_v50, %s12660_s2 }
0x1423   :  { %5209 = vrot.lane.b32.xlu0 %v13671_v46, %s12660_s2  ;;  %v4989_v48 = vpop.xlane.xlu1 %4988 }
0x1424   :  { %v4997_v58 = vsub.f32 %v13702_v59, %v4989_v48 }
0x1425   :  { %5167 = vrot.lane.b32.xlu2 %v13651_v60, %s12660_s2 }
0x1426   :  { %v5012_v24 = vmul.f32 1.442695, %v4997_v58 }
0x1439   :  { %v5016_v57 = vpop.xlane.xlu2 %5015 }
0x143a   :  { %12371 = vrcp.f32 %v5016_v57 }
0x1440   :  { %v12372_v33 = vpop.eup %12371  ;;  %v5019_v44 = vpop.xlane.xlu0 %5018 }
0x1441   :  { %v5046_v40 = vmul.f32 %v12372_v33, %v12360_v34  ;;  %12373 = vrcp.f32 %v5019_v44  ;;  %v4986_v63 = vpop.xlane.xlu2 %4985 }
0x1442   :  { %v4996_v0 = vsub.f32 %v4964_v27, %v4986_v63  ;;  %12375 = vpow2.f32 %v5012_v24 }
0x1443   :  { %v5054_v53 = vpack.c.bf16 %v5046_v40, %v5046_v40 }
0x1444   :  { %v5010_v50 = vmul.f32 1.442695, %v4996_v0 }
0x1445   :  { %10325 = vmatmul.msk.bf16.vlgmr.msrb.gmra.mxu1 %vm2561_vm8, %v5054_v53 }
0x1446   :  { %12377 = vpow2.f32 %v5010_v50 }
0x1447   :  { %v12374_v46 = vpop.eup %12373 }
0x1448   :  { %v5047_v60 = vmul.f32 %v12374_v46, %v13707_v11  ;;  %v12376_v1 = vpop.eup %12375  ;;  %v11908_v46 = vld [vmem:[#allocation11 + $0x18] sm:$0xff] }
0x1449   :  { %v5035_v19 = vsel %vm2462_vm5, %v12376_v1, 0.0 }
0x144a   :  { %v5055_v37 = vpack.c.bf16 %v5047_v60, %v5047_v60  ;;  %v11907_v60 = vld [vmem:[#allocation11 + $0x10] sm:$0xff] }
0x144c   :  { %v12378_v10 = vpop.eup %12377  ;;  %10326 = vmatmul.msk.bf16.vlgmr.msrb.gmra.mxu2 %vm2561_vm8, %v5055_v37 }
0x144d   :  { %v5032_v16 = vsel %vm2462_vm5, %v12378_v10, 0.0 }
0x144e   :  { %5033 = vadd.xlane.f32.xlu1 %v5032_v16  ;;  %5036 = vadd.xlane.f32.xlu2 %v5035_v19 }
0x1467   :  { %5188 = vrot.lane.b32.xlu1 %v13661_v45, %s12660_s2 }
0x1478   :  { %v5025_v38 = vpop.xlane.xlu2 %5024 }
0x1479   :  { %12379 = vrcp.f32 %v5025_v38 }
0x147a   :  { %v5028_v39 = vpop.xlane.xlu0 %5027 }
0x147f   :  { %v12380_v59 = vpop.eup %12379 }
0x1480   :  { %v5049_v29 = vmul.f32 %v12380_v59, %v12364_v35  ;;  %v5031_v55 = vpop.xlane.xlu2 %5030 }
0x1481   :  { %12381 = vrcp.f32 %v5031_v55 }
0x1482   :  { %v5057_v8 = vpack.c.bf16 %v5049_v29, %v5049_v29  ;;  %12383 = vrcp.f32 %v5028_v39  ;;  %v5022_v31 = vpop.xlane.xlu1 %5021  ;;  %v12272_v39 = vld [vmem:[%s14146_s17 + $0x1] ss:$0 sm:$0xff] }
0x1483   :  { %12385 = vrcp.f32 %v5022_v31 }
0x1484   :  { %10328 = vmatmul.msk.bf16.vlgmr.msra.gmra.mxu0 %vm2561_vm8, %v5057_v8 }
0x1487   :  { %v12382_v22 = vpop.eup %12381 }
0x1488   :  { %v12384_v34 = vpop.eup %12383  ;;  %v5051_v7 = vmul.f32 %v12382_v22, %v12368_v52  ;;  %v5168_v11 = vpop.permute.xlu2 %5167 }
0x1489   :  { %v12386_v27 = vpop.eup %12385  ;;  %v5173_v45 = vsel %vm856_vm4, %v5168_v11, 0  ;;  %v5050_v47 = vmul.f32 %v12384_v34, %v13715_v26 }
0x148a   :  { %v5059_v13 = vpack.c.bf16 %v5051_v7, %v5051_v7  ;;  %v5048_v28 = vmul.f32 %v12386_v27, %v12370_v54  ;;  %5182 = vmatpush.bf16.msra.mxu2 %v5173_v45 }
0x148b   :  { %v5058_v4 = vpack.c.bf16 %v5050_v47, %v5050_v47 }
0x148c   :  { %v5056_v51 = vpack.c.bf16 %v5048_v28, %v5048_v28 }
0x148d   :  { %v5147_v21 = vpop.permute.xlu0 %5146  ;;  %10330 = vmatmul.msk.bf16.vlgmr.msra.gmra.mxu2 %vm2561_vm8, %v5059_v13 }
0x148e   :  { %v5152_v30 = vsel %vm856_vm4, %v5147_v21, 0  ;;  %10327 = vmatmul.msk.bf16.vlgmr.msrb.gmra.mxu3 %vm2561_vm8, %v5056_v51 }
0x148f   :  { %5161 = vmatpush.bf16.msra.mxu1 %v5152_v30 }
0x1492   :  { %10329 = vmatmul.msk.bf16.vlgmr.msra.gmra.mxu1 %vm2561_vm8, %v5058_v4 }
0x1493   :  { %5292 = vmatpush.bf16.msrb.mxu1 %v11908_v46  ;;  %v10426_v46 = vld [vmem:[#allocation13 + $0x1d0] sm:$0xf0] }
0x1495   :  { %v5210_v2 = vpop.permute.xlu0 %5209 }
0x1496   :  { %v5215_v61 = vsel %vm856_vm4, %v5210_v2, 0  ;;  %v10408_v2 = vld [vmem:[#allocation13 + $0x180] sm:$0xf] }
0x1497   :  { %5224 = vmatpush.bf16.msrb.mxu0 %v5215_v61  ;;  %5293 = vmatpush.bf16.msrb.mxu1 %v11907_v60  ;;  %v11933_v61 = vld [vmem:[#allocation13 + $0x1bc] sm:$0xf0]  ;;  %v10432_v60 = vld [vmem:[#allocation13 + $0x198] sm:$0xf] }
0x14c1   :  { %v5037_v42 = vpop.xlane.xlu2 %5036  ;;  %v5034_v17 = vpop.xlane.xlu1 %5033 }
0x14c2   :  { %12387 = vrcp.f32 %v5037_v42  ;;  %v5079_v5 = vpop.f32.mrf.mxu1  ;;  %v11925_v42 = vld [vmem:[#allocation13 + $0x184] sm:$0xf] }
0x14c3   :  { %5232 = vst [vmem:[#allocation1] ss:$2 sm:$0xff] %v5079_v5  ;;  %12389 = vrcp.f32 %v5034_v17 }
0x14c8   :  { %v12388_v14 = vpop.eup %12387 }
0x14c9   :  { %v5053_v41 = vmul.f32 %v12388_v14, %v12376_v1  ;;  %v12390_v62 = vpop.eup %12389  ;;  %v10409_v14 = vor.u32 %v11933_v61, %v10408_v2 }
0x14ca   :  { %v5081_v32 = vpop.f32.mrf.mxu1  ;;  %v5052_v26 = vmul.f32 %v12390_v62, %v12378_v10  ;;  %v11926_v62 = vld [vmem:[#allocation13 + $0x18c] sm:$0xf] }
0x14cb   :  { %v5061_v6 = vpack.c.bf16 %v5053_v41, %v5053_v41  ;;  %v10410_v41 = vld [vmem:[#allocation13 + $0x1c0] sm:$0xf0]  ;;  %v10416_v32 = vld [vmem:[#allocation13 + $0x188] sm:$0xf]  ;;  %5590 = vmatpush.bf16.msrb.mxu2 %v10409_v14 }
0x14cc   :  { %v5060_v52 = vpack.c.bf16 %v5052_v26, %v5052_v26  ;;  %v10413_v17 = vor.u32 %v11925_v42, %v10410_v41  ;;  %v10344_v26 = vld [vmem:[#allocation13 + $0x100] sm:$0xf] }
0x14cd   :  { %10332 = vmatmul.msk.bf16.vlgmr.msrb.gmra.mxu0 %vm2561_vm8, %v5061_v6  ;;  %v11934_v6 = vld [vmem:[#allocation13 + $0x1c4] sm:$0xf0] }
0x14cf   :  { %v5100_v35 = vpop.f32.mrf.mxu2 }
0x14d0   :  { %5234 = vst [vmem:[#allocation1 + $0x1] ss:$2 sm:$0xff] %v5100_v35  ;;  %v10417_v35 = vor.u32 %v11934_v6, %v10416_v32 }
0x14d2   :  { %5616 = vmatpush.bf16.msra.mxu0 %v10417_v35 }
0x14d7   :  { %v5102_v15 = vpop.f32.mrf.mxu2  ;;  %v5235_v43 = vld.sshfl [vmem:[#allocation1] sm:$0xff pattern:$0x75316420] }
0x14d8   :  { %v10418_v15 = vld [vmem:[#allocation13 + $0x1c8] sm:$0xf0] }
0x14d9   :  { %v5189_v25 = vpop.permute.xlu1 %5188 }
0x14da   :  { %v5194_v36 = vsel %vm856_vm4, %v5189_v25, 0 }
0x14db   :  { %5203 = vmatpush.bf16.msra.mxu3 %v5194_v36  ;;  %v10421_v36 = vor.u32 %v11926_v62, %v10418_v15  ;;  %v10440_v62 = vld [vmem:[#allocation13 + $0x1a0] sm:$0xf] }
0x14dc   :  { %v11937_v15 = vld [vmem:[#allocation13 + $0x1dc] sm:$0xf0] }
0x14dd   :  { %5629 = vmatpush.bf16.msra.mxu1 %v10421_v36  ;;  %v10448_v36 = vld [vmem:[#allocation13 + $0x1a8] sm:$0xf] }
0x14de   :  { %10331 = vmatmul.msk.bf16.vlgmr.msra.gmra.mxu3 %vm2561_vm8, %v5060_v52  ;;  %v11917_v52 = vld [vmem:[#allocation13 + $0x13c] sm:$0xf0] }
0x14df   :  { %5603 = vmatpush.bf16.msrb.mxu3 %v10413_v17 }
0x1501   :  { %v5142_v54 = vpop.f32.mrf.mxu0 }
0x1502   :  { %5241 = vst [vmem:[#allocation1 + $0x1] ss:$2 sm:$0xff] %v5142_v54  ;;  %v10345_v54 = vor.u32 %v11917_v52, %v10344_v26  ;;  %v11929_v26 = vld [vmem:[#allocation13 + $0x1a4] sm:$0xf]  ;;  %v11938_v52 = vld [vmem:[#allocation13 + $0x1e4] sm:$0xf0] }
0x1504   :  { %5591 = vmatpush.bf16.msrb.mxu2 %v10345_v54 }
0x1509   :  { %v5144_v18 = vpop.f32.mrf.mxu0 }
0x150a   :  { %v10346_v18 = vld [vmem:[#allocation13 + $0x140] sm:$0xf0] }
0x150f   :  { %v5163_v9 = vpop.f32.mrf.mxu1 }
0x1510   :  { %v5184_v56 = vpop.f32.mrf.mxu2 }
0x1511   :  { %v5121_v48 = vpop.f32.mrf.mxu3 }
0x1512   :  { %5239 = vst [vmem:[#allocation1] ss:$2 sm:$0xff] %v5121_v48 }
0x1517   :  { %v5165_v57 = vpop.f32.mrf.mxu1 }
0x1518   :  { %v5186_v58 = vpop.f32.mrf.mxu2 }
0x1519   :  { %v5123_v33 = vpop.f32.mrf.mxu3  ;;  %v5242_v24 = vld.sshfl [vmem:[#allocation1] sm:$0xff pattern:$0x75316420]  ;;  %v11910_v58 = vld [vmem:[#allocation13 + $0x10c] sm:$0xf] }
0x151a   :  { %5243 = vrot.lane.b32.xlu0 %v5242_v24, %s12677_s30  ;;  %5248 = vst [vmem:[#allocation1] ss:$2 sm:$0xff] %v5163_v9  ;;  %v10352_v9 = vld [vmem:[#allocation13 + $0x108] sm:$0xf]  ;;  %v10354_v33 = vld [vmem:[#allocation13 + $0x148] sm:$0xf0] }
0x151b   :  { %5250 = vst [vmem:[#allocation1 + $0x1] ss:$2 sm:$0xff] %v5184_v56  ;;  %v11918_v56 = vld [vmem:[#allocation13 + $0x144] sm:$0xf0]  ;;  %v10357_v24 = vor.u32 %v11910_v58, %v10354_v33  ;;  %v11913_v33 = vld [vmem:[#allocation13 + $0x124] sm:$0xf] }
0x151c   :  { %v10353_v57 = vor.u32 %v11918_v56, %v10352_v9  ;;  %v10376_v56 = vld [vmem:[#allocation13 + $0x120] sm:$0xf] }
0x151d   :  { %5630 = vmatpush.bf16.msra.mxu1 %v10357_v24  ;;  %v10378_v24 = vld [vmem:[#allocation13 + $0x160] sm:$0xf0] }
0x151e   :  { %5617 = vmatpush.bf16.msra.mxu0 %v10353_v57  ;;  %v10449_v57 = vor.u32 %v11938_v52, %v10448_v36  ;;  %v11969_v36 = vld [vmem:[#allocation14 + $0x4e0] sm:$0xff] }
0x151f   :  { %v11945_v52 = vld [vmem:[#allocation14 + $0x420] sm:$0xff] }
0x1522   :  { %v5251_v44 = vld.sshfl [vmem:[#allocation1] sm:$0xff pattern:$0x75316420] }
0x1523   :  { %5252 = vrot.lane.b32.xlu2 %v5251_v44, %s12667_s3 }
0x154a   :  { %v5226_v40 = vpop.f32.mrf.mxu0 }
0x154b   :  { %5259 = vst [vmem:[#allocation1 + $0x1] ss:$2 sm:$0xff] %v5226_v40  ;;  %v10424_v40 = vld [vmem:[#allocation13 + $0x190] sm:$0xf] }
0x1552   :  { %v5228_v63 = vpop.f32.mrf.mxu0 }
0x1553   :  { %v11935_v63 = vld [vmem:[#allocation13 + $0x1cc] sm:$0xf0] }
0x1561   :  { %v5205_v0 = vpop.f32.mrf.mxu3 }
0x1562   :  { %5257 = vst [vmem:[#allocation1] ss:$2 sm:$0xff] %v5205_v0  ;;  %v11927_v0 = vld [vmem:[#allocation13 + $0x194] sm:$0xf] }
0x1569   :  { %v5207_v53 = vpop.f32.mrf.mxu3  ;;  %v5260_v50 = vld.sshfl [vmem:[#allocation1] sm:$0xff pattern:$0x75316420] }
0x156a   :  { %5261 = vrot.lane.b32.xlu0 %v5260_v50, %s12678_s7  ;;  %v10425_v50 = vor.u32 %v11935_v63, %v10424_v40  ;;  %v11922_v40 = vld [vmem:[#allocation13 + $0x164] sm:$0xf0]  ;;  %v11914_v63 = vld [vmem:[#allocation13 + $0x12c] sm:$0xf] }
0x156c   :  { %5642 = vmatpush.bf16.msra.mxu2 %v10425_v50  ;;  %v10381_v50 = vor.u32 %v11913_v33, %v10378_v24  ;;  %v11958_v33 = vld [vmem:[#allocation14 + $0x488] sm:$0xff] }
0x156d   :  { %v11966_v24 = vld [vmem:[#allocation14 + $0x4c8] sm:$0xff] }
0x157d   :  { %v5253_v10 = vpop.permute.xlu2 %5252 }
0x158c   :  { %v5244_v1 = vpop.permute.xlu0 %5243 }
0x158d   :  { %v5264_v37 = vsel %vm503_vm1, %v5235_v43, %v5244_v1  ;;  %v11909_v43 = vld [vmem:[#allocation13 + $0x104] sm:$0xf]  ;;  %v11936_v1 = vld [vmem:[#allocation13 + $0x1d4] sm:$0xf0] }
0x158e   :  { %v5265_v16 = vsel %vm1126_vm6, %v5264_v37, %v5253_v10  ;;  %v10349_v48 = vor.u32 %v11909_v43, %v10346_v18  ;;  %v10429_v37 = vor.u32 %v11927_v0, %v10426_v46  ;;  %v10433_v10 = vor.u32 %v11936_v1, %v10432_v60  ;;  %v11930_v43 = vld [vmem:[#allocation13 + $0x1ac] sm:$0xf]  ;;  %v10456_v1 = vld [vmem:[#allocation13 + $0x1b0] sm:$0xf] }
0x158f   :  { %v10441_v18 = vor.u32 %v11937_v15, %v10440_v62  ;;  %v10386_v0 = vld [vmem:[#allocation13 + $0x168] sm:$0xf0] }
0x1590   :  { %5604 = vmatpush.bf16.msrb.mxu3 %v10349_v48  ;;  %5668 = vmatpush.bf16.msrb.mxu0 %v10433_v10  ;;  %v11921_v48 = vld [vmem:[#allocation13 + $0x15c] sm:$0xf0]  ;;  %v10389_v60 = vor.u32 %v11914_v63, %v10386_v0  ;;  %v11931_v10 = vld [vmem:[#allocation13 + $0x1b4] sm:$0xf]  ;;  %v11970_v62 = vld [vmem:[#allocation14 + $0x4e8] sm:$0xff] }
0x1591   :  { %v11946_v15 = vld [vmem:[#allocation14 + $0x428] sm:$0xff]  ;;  %v11957_v63 = vld [vmem:[#allocation14 + $0x480] sm:$0xff]  ;;  %v11996_v0 = vld [vmem:[#allocation14 + $0x5b8] sm:$0xff] }
0x1594   :  { %5655 = vmatpush.bf16.msra.mxu3 %v10429_v37  ;;  %v11939_v37 = vld [vmem:[#allocation13 + $0x1ec] sm:$0xf0] }
0x15dc   :  { %v5262_v19 = vpop.permute.xlu0 %5261 }
0x15dd   :  { %v5266_v38 = vsel %vm1128_vm7, %v5265_v16, %v5262_v19  ;;  %v11928_v16 = vld [vmem:[#allocation13 + $0x19c] sm:$0xf] }
0x15de   :  { %v5267_v59 = vpack.c.bf16 %v5266_v38, %v5266_v38  ;;  %v10434_v19 = vld [vmem:[#allocation13 + $0x1d8] sm:$0xf0] }
0x15e0   :  { %10341 = vmatmul.msk.bf16.vlgmr.msrb.gmra.mxu1 %vm339_vm0, %v5267_v59  ;;  %v10437_v59 = vor.u32 %v11928_v16, %v10434_v19  ;;  %v10458_v16 = vld [vmem:[#allocation13 + $0x1f0] sm:$0xf0]  ;;  %v10464_v19 = vld [vmem:[#allocation13 + $0x1b8] sm:$0xf] }
0x15e2   :  { %5681 = vmatpush.bf16.msrb.mxu1 %v10437_v59  ;;  %v11932_v59 = vld [vmem:[#allocation13 + $0x1bc] sm:$0xf] }
0x165d   :  { %v5295_v29 = vpop.f32.mrf.mxu1 }
0x165e   :  { %v5296_v55 = vadd.f32 %v12272_v39, %v5295_v29  ;;  %v10360_v39 = vld [vmem:[#allocation13 + $0x110] sm:$0xf] }
0x165f   :  { %v11919_v29 = vld [vmem:[#allocation13 + $0x14c] sm:$0xf0] }
0x1660   :  { %v5300_v8 = vrot.slane %v5296_v55, 4  ;;  %v5302_v31 = vadd.f32 %v5296_v55, %v13627_v23  ;;  %v11911_v55 = vld [vmem:[#allocation13 + $0x114] sm:$0xf] }
0x1662   :  { %v5303_v22 = vadd.f32 %v5300_v8, %v13629_v12  ;;  %5306 = vst [vmem:[#allocation1] ss:$2 sm:$0xff] %v5302_v31  ;;  %v10361_v8 = vor.u32 %v11919_v29, %v10360_v39  ;;  %v10466_v39 = vld [vmem:[#allocation13 + $0x1f8] sm:$0xf0]  ;;  %v10457_v29 = vor.u32 %v11939_v37, %v10456_v1  ;;  %v11995_v37 = vld [vmem:[#allocation14 + $0x5b0] sm:$0xff] }
0x1663   :  { %v11988_v1 = vld [vmem:[#allocation14 + $0x578] sm:$0xff] }
0x1664   :  { %5308 = vst [vmem:[#allocation1 + $0x1] ss:$2 sm:$0xff] %v5303_v22  ;;  %5643 = vmatpush.bf16.msra.mxu2 %v10361_v8  ;;  %v10392_v8 = vld [vmem:[#allocation13 + $0x130] sm:$0xf] }
0x1665   :  { %v5297_v34 = vpop.f32.mrf.mxu1 }
0x1666   :  { %v11920_v34 = vld [vmem:[#allocation13 + $0x154] sm:$0xf0] }
0x166b   :  { %v5309_v7 = vld.sshfl [vmem:[#allocation1] sm:$0xff pattern:$0x75316420] }
0x166c   :  { %v5311_v11 = vsel %vm339_vm0, %v5309_v7, 0.0 }
0x166d   :  { %5312 = vadd.xlane.f32.xlu0 %v5311_v11 }
0x16e0   :  { %v5313_v27 = vpop.xlane.xlu0 %5312 }
0x16e1   :  { %v5314_v45 = vmul.f32 %v5313_v27, %v13255_v3 }
0x16e3   :  { %v5319_v13 = vperm.slane %v5314_v45, %v13510_v20  ;;  %v5323_v28 = vperm.slane %v5314_v45, %v13512_v49  ;;  %v11912_v45 = vld [vmem:[#allocation13 + $0x11c] sm:$0xf] }
0x16e5   :  { %v13763_v47 = vsub.f32 %v5302_v31, %v5319_v13  ;;  %v13765_v51 = vsub.f32 %v5303_v22, %v5323_v28  ;;  %v10362_v31 = vld [vmem:[#allocation13 + $0x150] sm:$0xf0]  ;;  %v10368_v22 = vld [vmem:[#allocation13 + $0x118] sm:$0xf]  ;;  %v10370_v13 = vld [vmem:[#allocation13 + $0x158] sm:$0xf0] }
0x16e6   :  { %v10365_v11 = vor.u32 %v11911_v55, %v10362_v31  ;;  %v10369_v27 = vor.u32 %v11920_v34, %v10368_v22  ;;  %v10373_v28 = vor.u32 %v11912_v45, %v10370_v13  ;;  %v10461_v55 = vor.u32 %v11931_v10, %v10458_v16  ;;  %v11923_v31 = vld [vmem:[#allocation13 + $0x16c] sm:$0xf0]  ;;  %v11924_v45 = vld [vmem:[#allocation13 + $0x174] sm:$0xf0]  ;;  %v11916_v13 = vld [vmem:[#allocation13 + $0x13c] sm:$0xf] }
0x16e7   :  { %v5328_v23 = vmul.f32 %v13763_v47, %v13763_v47  ;;  %v5329_v12 = vmul.f32 %v13765_v51, %v13765_v51  ;;  %v10469_v34 = vor.u32 %v11932_v59, %v10466_v39  ;;  %v12003_v10 = vld [vmem:[#allocation14 + $0x5f0] sm:$0xff]  ;;  %v12002_v59 = vld [vmem:[#allocation14 + $0x5e8] sm:$0xff] }
0x16e8   :  { %5656 = vmatpush.bf16.msra.mxu3 %v10365_v11  ;;  %5669 = vmatpush.bf16.msrb.mxu0 %v10369_v27  ;;  %v10394_v11 = vld [vmem:[#allocation13 + $0x170] sm:$0xf0]  ;;  %v10400_v27 = vld [vmem:[#allocation13 + $0x138] sm:$0xf]  ;;  %v11978_v39 = vld [vmem:[#allocation14 + $0x528] sm:$0xff] }
0x16e9   :  { %5332 = vst [vmem:[#allocation1] ss:$2 sm:$0xff] %v5328_v23  ;;  %5682 = vmatpush.bf16.msrb.mxu1 %v10373_v28  ;;  %v10402_v28 = vld [vmem:[#allocation13 + $0x178] sm:$0xf0]  ;;  %v11979_v16 = vld [vmem:[#allocation14 + $0x530] sm:$0xff] }
0x16ea   :  { %5334 = vst [vmem:[#allocation1 + $0x1] ss:$2 sm:$0xff] %v5329_v12  ;;  %v12273_v12 = vld [vmem:[%s14151_s22 + $0x1] ss:$0 sm:$0xff] }
0x16eb   :  { %v5368_v2 = vrot.slane %v12273_v12, 4 }
0x16f1   :  { %v5335_v21 = vld.sshfl [vmem:[#allocation1] sm:$0xff pattern:$0x75316420] }
0x16f2   :  { %v5337_v30 = vsel %vm339_vm0, %v5335_v21, 0.0 }
0x16f3   :  { %5338 = vadd.xlane.f32.xlu1 %v5337_v30  ;;  %v12274_v30 = vld [vmem:[%s14152_s23 + $0x1] ss:$0 sm:$0xff] }
0x1766   :  { %v5339_v4 = vpop.xlane.xlu1 %5338 }
0x1767   :  { %v5340_v5 = vmul.f32 %v5339_v4, %v13255_v3 }
0x1769   :  { %v13773_v25 = vadd.f32 1e-05, %v5340_v5  ;;  %v5375_v5 = vrot.slane %v12274_v30, 4 }
0x176b   :  { %12391 = vrsqrt.f32 %v13773_v25  ;;  %vm5348_vm2 = vweird.f32 %v13773_v25 }
0x1771   :  { %v12392_v44 = vpop.eup %12391 }
0x1772   :  { %v5343_v53 = vmul.f32 %v12392_v44, %v13773_v25  ;;  %vm5349_vm15 = vweird.f32 %v12392_v44  ;;  %v10442_v25 = vld [vmem:[#allocation13 + $0x1e0] sm:$0xf0] }
0x1773   :  { %vm5350_vm3 = vmor %vm5348_vm2, %vm5349_vm15  ;;  %v10445_v9 = vor.u32 %v11929_v26, %v10442_v25  ;;  %v11954_v26 = vld [vmem:[#allocation14 + $0x468] sm:$0xff]  ;;  %v11961_v25 = vld [vmem:[#allocation14 + $0x4a0] sm:$0xff] }
0x1774   :  { %v5344_v38 = vmul.f32 %v12392_v44, %v5343_v53  ;;  %v10377_v53 = vor.u32 %v11921_v48, %v10376_v56  ;;  %v11959_v56 = vld [vmem:[#allocation14 + $0x490] sm:$0xff] }
0x1775   :  { %v11967_v48 = vld [vmem:[#allocation14 + $0x4d0] sm:$0xff] }
0x1776   :  { %v5345_v7 = vmul.f32 0.5, %v5344_v38  ;;  %v11940_v38 = vld [vmem:[#allocation13 + $0x1f4] sm:$0xf0] }
0x1777   :  { %v10465_v22 = vor.u32 %v11940_v38, %v10464_v19  ;;  %v11987_v19 = vld [vmem:[#allocation14 + $0x570] sm:$0xff]  ;;  %v11994_v38 = vld [vmem:[#allocation14 + $0x5a8] sm:$0xff] }
0x1778   :  { %v5346_v23 = vsub.f32 1.5, %v5345_v7  ;;  %v11915_v7 = vld [vmem:[#allocation13 + $0x134] sm:$0xf] }
0x177a   :  { %v5347_v21 = vmul.f32 %v12392_v44, %v5346_v23  ;;  %v10393_v23 = vor.u32 %v11923_v31, %v10392_v8  ;;  %v12001_v8 = vld [vmem:[#allocation14 + $0x5e0] sm:$0xff] }
0x177b   :  { %v11977_v31 = vld [vmem:[#allocation14 + $0x520] sm:$0xff] }
0x177c   :  { %v5351_v4 = vsel %vm5350_vm3, %v12392_v44, %v5347_v21  ;;  %v10384_v44 = vld [vmem:[#allocation13 + $0x128] sm:$0xf]  ;;  %v10401_v21 = vor.u32 %v11924_v45, %v10400_v27  ;;  %v11999_v27 = vld [vmem:[#allocation14 + $0x5d0] sm:$0xff]  ;;  %v11976_v45 = vld [vmem:[#allocation14 + $0x518] sm:$0xff] }
0x177d   :  { %v5356_v61 = vperm.slane %v5351_v4, %v13510_v20  ;;  %v5360_v42 = vperm.slane %v5351_v4, %v13512_v49  ;;  %v10385_v46 = vor.u32 %v11922_v40, %v10384_v44  ;;  %v11964_v4 = vld [vmem:[#allocation14 + $0x4b8] sm:$0xff]  ;;  %v11942_v44 = vld [vmem:[#allocation14 + $0x408] sm:$0xff] }
0x177e   :  { %v11950_v40 = vld [vmem:[#allocation14 + $0x448] sm:$0xff] }
0x177f   :  { %v5363_v14 = vmul.f32 %v5356_v61, %v13763_v47  ;;  %v5364_v41 = vmul.f32 %v5360_v42, %v13765_v51  ;;  %v10450_v47 = vld [vmem:[#allocation13 + $0x1e8] sm:$0xf0]  ;;  %v11948_v61 = vld [vmem:[#allocation14 + $0x438] sm:$0xff] }
0x1780   :  { %v10453_v58 = vor.u32 %v11930_v43, %v10450_v47  ;;  %v11956_v42 = vld [vmem:[#allocation14 + $0x478] sm:$0xff]  ;;  %v11953_v43 = vld [vmem:[#allocation14 + $0x460] sm:$0xff] }
0x1781   :  { %v5370_v32 = vmul.f32 %v12273_v12, %v5363_v14  ;;  %v5371_v6 = vmul.f32 %v5368_v2, %v5364_v41  ;;  %v10397_v12 = vor.u32 %v11915_v7, %v10394_v11  ;;  %v11972_v2 = vld [vmem:[#allocation14 + $0x4f8] sm:$0xff]  ;;  %v11971_v14 = vld [vmem:[#allocation14 + $0x4f0] sm:$0xff] }
0x1782   :  { %v11947_v41 = vld [vmem:[#allocation14 + $0x430] sm:$0xff]  ;;  %v11960_v47 = vld [vmem:[#allocation14 + $0x498] sm:$0xff] }
0x1783   :  { %v13788_v17 = vadd.f32 %v12274_v30, %v5370_v32  ;;  %v13790_v35 = vadd.f32 %v5375_v5, %v5371_v6  ;;  %v10405_v30 = vor.u32 %v11916_v13, %v10402_v28  ;;  %v11963_v5 = vld [vmem:[#allocation14 + $0x4b0] sm:$0xff]  ;;  %v11962_v6 = vld [vmem:[#allocation14 + $0x4a8] sm:$0xff]  ;;  %v12000_v7 = vld [vmem:[#allocation14 + $0x5d8] sm:$0xff] }
0x1784   :  { %v11955_v32 = vld [vmem:[#allocation14 + $0x470] sm:$0xff]  ;;  %v11984_v13 = vld [vmem:[#allocation14 + $0x558] sm:$0xff]  ;;  %v11990_v28 = vld [vmem:[#allocation14 + $0x588] sm:$0xff] }
0x1785   :  { %5381 = vst [vmem:[#allocation1] ss:$2 sm:$0xff] %v13788_v17  ;;  %v11991_v11 = vld [vmem:[#allocation14 + $0x590] sm:$0xff] }
0x1786   :  { %5383 = vst [vmem:[#allocation1 + $0x1] ss:$2 sm:$0xff] %v13790_v35 }
0x178d   :  { %v5384_v54 = vld.sshfl [vmem:[#allocation1] sm:$0xff pattern:$0x75316420] }
0x178e   :  { %v13794_v51 = vpack.c.bf16 %v5384_v54, %v5384_v54  ;;  %v11968_v54 = vld [vmem:[#allocation14 + $0x4d8] sm:$0xff] }
0x1790   :  { %10470 = vmatmul.msk.bf16.vlgmr.msrb.gmra.mxu2 %vm339_vm0, %v13794_v51  ;;  %10471 = vmatmul.msk.bf16.vlgmr.msrb.gmra.mxu3 %vm339_vm0, %v13794_v51 }
0x1791   :  { %10472 = vmatmul.msk.bf16.vlgmr.msra.gmra.mxu0 %vm339_vm0, %v13794_v51  ;;  %10473 = vmatmul.msk.bf16.vlgmr.msra.gmra.mxu1 %vm339_vm0, %v13794_v51 }
0x1792   :  { %5694 = vmatpush.bf16.msrb.mxu2 %v10441_v18  ;;  %5707 = vmatpush.bf16.msrb.mxu3 %v10445_v9  ;;  %v11944_v18 = vld [vmem:[#allocation14 + $0x418] sm:$0xff] }
0x1793   :  { %5720 = vmatpush.bf16.msra.mxu0 %v10449_v57  ;;  %5733 = vmatpush.bf16.msra.mxu1 %v10453_v58  ;;  %v11952_v9 = vld [vmem:[#allocation14 + $0x458] sm:$0xff]  ;;  %v11943_v57 = vld [vmem:[#allocation14 + $0x410] sm:$0xff] }
0x1794   :  { %v11951_v58 = vld [vmem:[#allocation14 + $0x450] sm:$0xff] }
0x1796   :  { %5695 = vmatpush.bf16.msrb.mxu2 %v10377_v53  ;;  %5708 = vmatpush.bf16.msrb.mxu3 %v10381_v50  ;;  %v12004_v53 = vld [vmem:[#allocation14 + $0x5f8] sm:$0xff]  ;;  %v11941_v50 = vld [vmem:[#allocation14 + $0x400] sm:$0xff] }
0x1797   :  { %5721 = vmatpush.bf16.msra.mxu0 %v10385_v46  ;;  %5734 = vmatpush.bf16.msra.mxu1 %v10389_v60  ;;  %v11949_v46 = vld [vmem:[#allocation14 + $0x440] sm:$0xff]  ;;  %v11980_v60 = vld [vmem:[#allocation14 + $0x538] sm:$0xff] }
0x17a0   :  { %10474 = vmatmul.msk.bf16.vlgmr.msra.gmra.mxu2 %vm339_vm0, %v13794_v51  ;;  %10475 = vmatmul.msk.bf16.vlgmr.msra.gmra.mxu3 %vm339_vm0, %v13794_v51 }
0x17a1   :  { %10476 = vmatmul.msk.bf16.vlgmr.msrb.gmra.mxu0 %vm339_vm0, %v13794_v51  ;;  %10477 = vmatmul.msk.bf16.vlgmr.msrb.gmra.mxu1 %vm339_vm0, %v13794_v51 }
0x17a2   :  { %5746 = vmatpush.bf16.msra.mxu2 %v10457_v29  ;;  %5759 = vmatpush.bf16.msra.mxu3 %v10461_v55  ;;  %v11986_v29 = vld [vmem:[#allocation14 + $0x568] sm:$0xff]  ;;  %v11993_v55 = vld [vmem:[#allocation14 + $0x5a0] sm:$0xff] }
0x17a3   :  { %5772 = vmatpush.bf16.msrb.mxu0 %v10465_v22  ;;  %5785 = vmatpush.bf16.msrb.mxu1 %v10469_v34  ;;  %v11985_v22 = vld [vmem:[#allocation14 + $0x560] sm:$0xff]  ;;  %v11992_v34 = vld [vmem:[#allocation14 + $0x598] sm:$0xff] }
0x17a6   :  { %5747 = vmatpush.bf16.msra.mxu2 %v10393_v23  ;;  %5760 = vmatpush.bf16.msra.mxu3 %v10397_v12  ;;  %v11998_v23 = vld [vmem:[#allocation14 + $0x5c8] sm:$0xff]  ;;  %v11975_v12 = vld [vmem:[#allocation14 + $0x510] sm:$0xff] }
0x17a7   :  { %5773 = vmatpush.bf16.msrb.mxu0 %v10401_v21  ;;  %5786 = vmatpush.bf16.msrb.mxu1 %v10405_v30  ;;  %v11983_v21 = vld [vmem:[#allocation14 + $0x550] sm:$0xff]  ;;  %v11989_v30 = vld [vmem:[#allocation14 + $0x580] sm:$0xff] }
0x17b0   :  { %10478 = vmatmul.msk.bf16.vlgmr.msrb.gmra.mxu2 %vm339_vm0, %v13794_v51  ;;  %10479 = vmatmul.msk.bf16.vlgmr.msrb.gmra.mxu3 %vm339_vm0, %v13794_v51 }
0x17b1   :  { %10480 = vmatmul.msk.bf16.vlgmr.msra.gmra.mxu0 %vm339_vm0, %v13794_v51  ;;  %10481 = vmatmul.msk.bf16.vlgmr.msra.gmra.mxu1 %vm339_vm0, %v13794_v51 }
0x17b2   :  { %6621 = vmatpush.bf16.msra.mxu0 %v11964_v4  ;;  %6634 = vmatpush.bf16.msra.mxu1 %v11972_v2  ;;  %v11997_v4 = vld [vmem:[#allocation14 + $0x5c0] sm:$0xff]  ;;  %v11974_v2 = vld [vmem:[#allocation14 + $0x508] sm:$0xff] }
0x17b3   :  { %6595 = vmatpush.bf16.msrb.mxu2 %v11948_v61  ;;  %6608 = vmatpush.bf16.msrb.mxu3 %v11956_v42  ;;  %v11982_v61 = vld [vmem:[#allocation14 + $0x548] sm:$0xff]  ;;  %v11973_v42 = vld [vmem:[#allocation14 + $0x500] sm:$0xff] }
0x17b6   :  { %6622 = vmatpush.bf16.msra.mxu0 %v11963_v5  ;;  %6635 = vmatpush.bf16.msra.mxu1 %v11971_v14  ;;  %v11981_v5 = vld [vmem:[#allocation14 + $0x540] sm:$0xff]  ;;  %v13831_v14 = vld [vmem:[%s14148_s19 + $0x10] sm:$0xff] }
0x17b7   :  { %6596 = vmatpush.bf16.msrb.mxu2 %v11947_v41  ;;  %6609 = vmatpush.bf16.msrb.mxu3 %v11955_v32  ;;  %v5391_v41 = vperm.slane %v13831_v14, 2  ;;  %v5392_v32 = vperm.slane %v13831_v14, 3 }
0x17ba   :  { %6623 = vmatpush.bf16.msra.mxu0 %v11962_v6  ;;  %6636 = vmatpush.bf16.msra.mxu1 %v11970_v62 }
0x17bb   :  { %6597 = vmatpush.bf16.msrb.mxu2 %v11946_v15  ;;  %6610 = vmatpush.bf16.msrb.mxu3 %v11954_v26 }
0x17be   :  { %6624 = vmatpush.bf16.msra.mxu0 %v11961_v25  ;;  %6637 = vmatpush.bf16.msra.mxu1 %v11969_v36  ;;  %v5389_v25 = vperm.slane %v13831_v14, 0  ;;  %v5390_v36 = vperm.slane %v13831_v14, 1 }
0x17bf   :  { %6598 = vmatpush.bf16.msrb.mxu2 %v11945_v52  ;;  %6611 = vmatpush.bf16.msrb.mxu3 %v11953_v43 }
0x17c0   :  { %10482 = vmatmul.msk.bf16.vlgmr.msra.gmra.mxu2 %vm339_vm0, %v13794_v51  ;;  %10483 = vmatmul.msk.bf16.vlgmr.msra.gmra.mxu3 %vm339_vm0, %v13794_v51 }
0x17c1   :  { %10484 = vmatmul.msk.bf16.vlgmr.msrb.gmra.mxu0 %vm339_vm0, %v13794_v51  ;;  %10485 = vmatmul.msk.bf16.vlgmr.msrb.gmra.mxu1 %vm339_vm0, %v13794_v51  ;;  %v11965_v51 = vld [vmem:[#allocation14 + $0x4c0] sm:$0xff] }
0x17c2   :  { %6625 = vmatpush.bf16.msra.mxu0 %v11960_v47  ;;  %6638 = vmatpush.bf16.msra.mxu1 %v11968_v54  ;;  %v12028_v47 = vld [vmem:[#allocation14 + $0x6b8] sm:$0xff] }
0x17c3   :  { %6599 = vmatpush.bf16.msrb.mxu2 %v11944_v18  ;;  %6612 = vmatpush.bf16.msrb.mxu3 %v11952_v9  ;;  %v12036_v54 = vld [vmem:[#allocation14 + $0x6f8] sm:$0xff] }
0x17c6   :  { %6626 = vmatpush.bf16.msra.mxu0 %v11959_v56  ;;  %6639 = vmatpush.bf16.msra.mxu1 %v11967_v48 }
0x17c7   :  { %6600 = vmatpush.bf16.msrb.mxu2 %v11943_v57  ;;  %6613 = vmatpush.bf16.msrb.mxu3 %v11951_v58 }
0x17ca   :  { %6627 = vmatpush.bf16.msra.mxu0 %v11958_v33  ;;  %6640 = vmatpush.bf16.msra.mxu1 %v11966_v24 }
0x17cb   :  { %6601 = vmatpush.bf16.msrb.mxu2 %v11942_v44  ;;  %6614 = vmatpush.bf16.msrb.mxu3 %v11950_v40 }
0x17ce   :  { %6628 = vmatpush.bf16.msra.mxu0 %v11957_v63  ;;  %6641 = vmatpush.bf16.msra.mxu1 %v11965_v51  ;;  %v12027_v63 = vld [vmem:[#allocation14 + $0x6b0] sm:$0xff] }
0x17cf   :  { %6602 = vmatpush.bf16.msrb.mxu2 %v11941_v50  ;;  %6615 = vmatpush.bf16.msrb.mxu3 %v11949_v46  ;;  %v12035_v51 = vld [vmem:[#allocation14 + $0x6f0] sm:$0xff]  ;;  %v12012_v50 = vld [vmem:[#allocation14 + $0x638] sm:$0xff] }
0x17d0   :  { %v12020_v46 = vld [vmem:[#allocation14 + $0x678] sm:$0xff] }
0x17d2   :  { %6673 = vmatpush.bf16.msrb.mxu0 %v11996_v0  ;;  %6686 = vmatpush.bf16.msrb.mxu1 %v12004_v53 }
0x17d3   :  { %6647 = vmatpush.bf16.msra.mxu2 %v11980_v60  ;;  %6660 = vmatpush.bf16.msra.mxu3 %v11988_v1  ;;  %v12026_v60 = vld [vmem:[#allocation14 + $0x6a8] sm:$0xff] }
0x17d4   :  { %v12034_v1 = vld [vmem:[#allocation14 + $0x6e8] sm:$0xff] }
0x17d6   :  { %6674 = vmatpush.bf16.msrb.mxu0 %v11995_v37  ;;  %6687 = vmatpush.bf16.msrb.mxu1 %v12003_v10 }
0x17d7   :  { %6648 = vmatpush.bf16.msra.mxu2 %v11979_v16  ;;  %6661 = vmatpush.bf16.msra.mxu3 %v11987_v19  ;;  %v5395_v16 = vperm.slane %v13831_v14, 6  ;;  %v5396_v19 = vperm.slane %v13831_v14, 7 }
0x17da   :  { %6675 = vmatpush.bf16.msrb.mxu0 %v11994_v38  ;;  %6688 = vmatpush.bf16.msrb.mxu1 %v12002_v59  ;;  %v12011_v38 = vld [vmem:[#allocation14 + $0x630] sm:$0xff] }
0x17db   :  { %6649 = vmatpush.bf16.msra.mxu2 %v11978_v39  ;;  %6662 = vmatpush.bf16.msra.mxu3 %v11986_v29  ;;  %v12019_v59 = vld [vmem:[#allocation14 + $0x670] sm:$0xff] }
0x17de   :  { %6676 = vmatpush.bf16.msrb.mxu0 %v11993_v55  ;;  %6689 = vmatpush.bf16.msrb.mxu1 %v12001_v8  ;;  %v12025_v55 = vld [vmem:[#allocation14 + $0x6a0] sm:$0xff] }
0x17df   :  { %6650 = vmatpush.bf16.msra.mxu2 %v11977_v31  ;;  %6663 = vmatpush.bf16.msra.mxu3 %v11985_v22  ;;  %v12033_v8 = vld [vmem:[#allocation14 + $0x6e0] sm:$0xff] }
0x17e2   :  { %6677 = vmatpush.bf16.msrb.mxu0 %v11992_v34  ;;  %6690 = vmatpush.bf16.msrb.mxu1 %v12000_v7  ;;  %v12010_v34 = vld [vmem:[#allocation14 + $0x628] sm:$0xff] }
0x17e3   :  { %6651 = vmatpush.bf16.msra.mxu2 %v11976_v45  ;;  %6664 = vmatpush.bf16.msra.mxu3 %v11984_v13  ;;  %v12018_v7 = vld [vmem:[#allocation14 + $0x668] sm:$0xff] }
0x17e6   :  { %6678 = vmatpush.bf16.msrb.mxu0 %v11991_v11  ;;  %6691 = vmatpush.bf16.msrb.mxu1 %v11999_v27  ;;  %v5393_v11 = vperm.slane %v13831_v14, 4  ;;  %v5394_v27 = vperm.slane %v13831_v14, 5 }
0x17e7   :  { %6652 = vmatpush.bf16.msra.mxu2 %v11975_v12  ;;  %6665 = vmatpush.bf16.msra.mxu3 %v11983_v21 }
0x17ea   :  { %6679 = vmatpush.bf16.msrb.mxu0 %v11990_v28  ;;  %6692 = vmatpush.bf16.msrb.mxu1 %v11998_v23  ;;  %v12024_v28 = vld [vmem:[#allocation14 + $0x698] sm:$0xff] }
0x17eb   :  { %6653 = vmatpush.bf16.msra.mxu2 %v11974_v2  ;;  %6666 = vmatpush.bf16.msra.mxu3 %v11982_v61  ;;  %v12032_v23 = vld [vmem:[#allocation14 + $0x6d8] sm:$0xff] }
0x17ee   :  { %6680 = vmatpush.bf16.msrb.mxu0 %v11989_v30  ;;  %6693 = vmatpush.bf16.msrb.mxu1 %v11997_v4 }
0x17ef   :  { %6654 = vmatpush.bf16.msra.mxu2 %v11973_v42  ;;  %6667 = vmatpush.bf16.msra.mxu3 %v11981_v5  ;;  %v12009_v42 = vld [vmem:[#allocation14 + $0x620] sm:$0xff] }
0x17f0   :  { %v12017_v5 = vld [vmem:[#allocation14 + $0x660] sm:$0xff] }
0x180e   :  { %v5619_v6 = vpop.f32.mrf.mxu0  ;;  %v5632_v62 = vpop.f32.mrf.mxu1 }
0x180f   :  { %v5620_v15 = vadd.f32 %v5619_v6, %v5391_v41  ;;  %v5633_v26 = vadd.f32 %v5632_v62, %v5392_v32  ;;  %v12023_v62 = vld [vmem:[#allocation14 + $0x690] sm:$0xff] }
0x1811   :  { %v5794_v52 = vmax.f32 %v5620_v15, 0.0  ;;  %v5795_v43 = vmax.f32 %v5633_v26, 0.0  ;;  %v12031_v15 = vld [vmem:[#allocation14 + $0x6d0] sm:$0xff] }
0x1813   :  { %v5810_v18 = vpack.c.bf16 %v5794_v52, %v5794_v52  ;;  %v5811_v9 = vpack.c.bf16 %v5795_v43, %v5795_v43  ;;  %v5593_v56 = vpop.f32.mrf.mxu2  ;;  %v5606_v48 = vpop.f32.mrf.mxu3  ;;  %v12016_v52 = vld [vmem:[#allocation14 + $0x658] sm:$0xff]  ;;  %v13844_v43 = vld [vmem:[%s14148_s19 + $0x18] sm:$0xff] }
0x1814   :  { %v5594_v57 = vadd.f32 %v5593_v56, %v5389_v25  ;;  %v5607_v58 = vadd.f32 %v5606_v48, %v5390_v36  ;;  %v12008_v36 = vld [vmem:[#allocation14 + $0x618] sm:$0xff]  ;;  %v5399_v56 = vperm.slane %v13844_v43, 2  ;;  %v5400_v48 = vperm.slane %v13844_v43, 3 }
0x1815   :  { %6629 = vmatmul.bf16.vlgmr.msra.gmra.mxu0 %v5810_v18  ;;  %6642 = vmatmul.bf16.vlgmr.msra.gmra.mxu1 %v5811_v9 }
0x1816   :  { %v5792_v33 = vmax.f32 %v5594_v57, 0.0  ;;  %v5793_v24 = vmax.f32 %v5607_v58, 0.0  ;;  %6725 = vmatpush.bf16.msra.mxu0 %v12028_v47  ;;  %6738 = vmatpush.bf16.msra.mxu1 %v12036_v54  ;;  %v5621_v44 = vpop.f32.mrf.mxu0  ;;  %v5634_v40 = vpop.f32.mrf.mxu1  ;;  %v12022_v47 = vld [vmem:[#allocation14 + $0x688] sm:$0xff]  ;;  %v12007_v57 = vld [vmem:[#allocation14 + $0x610] sm:$0xff] }
0x1817   :  { %v12030_v54 = vld [vmem:[#allocation14 + $0x6c8] sm:$0xff]  ;;  %v12015_v58 = vld [vmem:[#allocation14 + $0x650] sm:$0xff]  ;;  %v12021_v44 = vld [vmem:[#allocation14 + $0x680] sm:$0xff] }
0x1818   :  { %v5808_v0 = vpack.c.bf16 %v5792_v33, %v5792_v33  ;;  %v5809_v53 = vpack.c.bf16 %v5793_v24, %v5793_v24  ;;  %v12029_v40 = vld [vmem:[#allocation14 + $0x6c0] sm:$0xff] }
0x181a   :  { %6726 = vmatpush.bf16.msra.mxu0 %v12027_v63  ;;  %6739 = vmatpush.bf16.msra.mxu1 %v12035_v51 }
0x181b   :  { %6603 = vmatmul.bf16.vlgmr.msrb.gmra.mxu2 %v5808_v0  ;;  %6616 = vmatmul.bf16.vlgmr.msrb.gmra.mxu3 %v5809_v53  ;;  %v5595_v37 = vpop.f32.mrf.mxu2  ;;  %v5608_v10 = vpop.f32.mrf.mxu3  ;;  %v12060_v0 = vld [vmem:[#allocation14 + $0x7b8] sm:$0xff] }
0x181c   :  { %6699 = vmatpush.bf16.msrb.mxu2 %v12012_v50  ;;  %6712 = vmatpush.bf16.msrb.mxu3 %v12020_v46  ;;  %v12068_v53 = vld [vmem:[#allocation14 + $0x7f8] sm:$0xff]  ;;  %v12006_v50 = vld [vmem:[#allocation14 + $0x608] sm:$0xff] }
0x181d   :  { %v12014_v46 = vld [vmem:[#allocation14 + $0x648] sm:$0xff] }
0x181e   :  { %6727 = vmatpush.bf16.msra.mxu0 %v12026_v60  ;;  %6740 = vmatpush.bf16.msra.mxu1 %v12034_v1  ;;  %v5671_v39 = vpop.f32.mrf.mxu0  ;;  %v5684_v29 = vpop.f32.mrf.mxu1  ;;  %v5397_v60 = vperm.slane %v13844_v43, 0  ;;  %v5398_v1 = vperm.slane %v13844_v43, 1 }
0x181f   :  { %v5672_v31 = vadd.f32 %v5671_v39, %v5395_v16  ;;  %v5685_v22 = vadd.f32 %v5684_v29, %v5396_v19  ;;  %v12059_v39 = vld [vmem:[#allocation14 + $0x7b0] sm:$0xff] }
0x1820   :  { %6700 = vmatpush.bf16.msrb.mxu2 %v12011_v38  ;;  %6713 = vmatpush.bf16.msrb.mxu3 %v12019_v59  ;;  %v12067_v29 = vld [vmem:[#allocation14 + $0x7f0] sm:$0xff] }
0x1821   :  { %v5798_v45 = vmax.f32 %v5672_v31, 0.0  ;;  %v5799_v13 = vmax.f32 %v5685_v22, 0.0  ;;  %v12005_v31 = vld [vmem:[#allocation14 + $0x600] sm:$0xff] }
0x1822   :  { %6728 = vmatpush.bf16.msra.mxu0 %v12025_v55  ;;  %6741 = vmatpush.bf16.msra.mxu1 %v12033_v8  ;;  %v12013_v22 = vld [vmem:[#allocation14 + $0x640] sm:$0xff] }
0x1823   :  { %v5814_v12 = vpack.c.bf16 %v5798_v45, %v5798_v45  ;;  %v5815_v21 = vpack.c.bf16 %v5799_v13, %v5799_v13  ;;  %v5645_v30 = vpop.f32.mrf.mxu2  ;;  %v5658_v4 = vpop.f32.mrf.mxu3 }
0x1824   :  { %6701 = vmatpush.bf16.msrb.mxu2 %v12010_v34  ;;  %6714 = vmatpush.bf16.msrb.mxu3 %v12018_v7  ;;  %v5646_v2 = vadd.f32 %v5645_v30, %v5393_v11  ;;  %v5659_v61 = vadd.f32 %v5658_v4, %v5394_v27  ;;  %v12044_v34 = vld [vmem:[#allocation14 + $0x738] sm:$0xff]  ;;  %v12043_v30 = vld [vmem:[#allocation14 + $0x730] sm:$0xff] }
0x1825   :  { %6681 = vmatmul.bf16.vlgmr.msrb.gmra.mxu0 %v5814_v12  ;;  %6694 = vmatmul.bf16.vlgmr.msrb.gmra.mxu1 %v5815_v21  ;;  %v12052_v7 = vld [vmem:[#allocation14 + $0x778] sm:$0xff]  ;;  %v12051_v4 = vld [vmem:[#allocation14 + $0x770] sm:$0xff] }
0x1826   :  { %v5796_v41 = vmax.f32 %v5646_v2, 0.0  ;;  %v5797_v14 = vmax.f32 %v5659_v61, 0.0  ;;  %6729 = vmatpush.bf16.msra.mxu0 %v12024_v28  ;;  %6742 = vmatpush.bf16.msra.mxu1 %v12032_v23  ;;  %v5673_v32 = vpop.f32.mrf.mxu0  ;;  %v5686_v6 = vpop.f32.mrf.mxu1  ;;  %v12058_v28 = vld [vmem:[#allocation14 + $0x7a8] sm:$0xff] }
0x1827   :  { %v12066_v23 = vld [vmem:[#allocation14 + $0x7e8] sm:$0xff] }
0x1828   :  { %v5812_v26 = vpack.c.bf16 %v5796_v41, %v5796_v41  ;;  %v5813_v25 = vpack.c.bf16 %v5797_v14, %v5797_v14  ;;  %6702 = vmatpush.bf16.msrb.mxu2 %v12009_v42  ;;  %6715 = vmatpush.bf16.msrb.mxu3 %v12017_v5  ;;  %v12057_v42 = vld [vmem:[#allocation14 + $0x7a0] sm:$0xff]  ;;  %v12042_v41 = vld [vmem:[#allocation14 + $0x728] sm:$0xff] }
0x1829   :  { %v12065_v5 = vld [vmem:[#allocation14 + $0x7e0] sm:$0xff]  ;;  %v12050_v14 = vld [vmem:[#allocation14 + $0x768] sm:$0xff] }
0x182a   :  { %6730 = vmatpush.bf16.msra.mxu0 %v12023_v62  ;;  %6743 = vmatpush.bf16.msra.mxu1 %v12031_v15  ;;  %v12056_v62 = vld [vmem:[#allocation14 + $0x798] sm:$0xff] }
0x182b   :  { %6655 = vmatmul.bf16.vlgmr.msra.gmra.mxu2 %v5812_v26  ;;  %6668 = vmatmul.bf16.vlgmr.msra.gmra.mxu3 %v5813_v25  ;;  %v5647_v18 = vpop.f32.mrf.mxu2  ;;  %v5660_v9 = vpop.f32.mrf.mxu3  ;;  %v12064_v15 = vld [vmem:[#allocation14 + $0x7d8] sm:$0xff]  ;;  %v12041_v26 = vld [vmem:[#allocation14 + $0x720] sm:$0xff] }
0x182c   :  { %6703 = vmatpush.bf16.msrb.mxu2 %v12008_v36  ;;  %6716 = vmatpush.bf16.msrb.mxu3 %v12016_v52  ;;  %v12049_v25 = vld [vmem:[#allocation14 + $0x760] sm:$0xff]  ;;  %v5403_v18 = vperm.slane %v13844_v43, 6  ;;  %v5404_v9 = vperm.slane %v13844_v43, 7 }
0x182e   :  { %6731 = vmatpush.bf16.msra.mxu0 %v12022_v47  ;;  %6744 = vmatpush.bf16.msra.mxu1 %v12030_v54  ;;  %v5723_v33 = vpop.f32.mrf.mxu0  ;;  %v5736_v24 = vpop.f32.mrf.mxu1  ;;  %v12055_v47 = vld [vmem:[#allocation14 + $0x790] sm:$0xff] }
0x182f   :  { %v5724_v63 = vadd.f32 %v5723_v33, %v5399_v56  ;;  %v5737_v51 = vadd.f32 %v5736_v24, %v5400_v48  ;;  %v12063_v54 = vld [vmem:[#allocation14 + $0x7d0] sm:$0xff]  ;;  %v12040_v56 = vld [vmem:[#allocation14 + $0x718] sm:$0xff]  ;;  %v12054_v33 = vld [vmem:[#allocation14 + $0x788] sm:$0xff] }
0x1830   :  { %6704 = vmatpush.bf16.msrb.mxu2 %v12007_v57  ;;  %6717 = vmatpush.bf16.msrb.mxu3 %v12015_v58  ;;  %v12048_v48 = vld [vmem:[#allocation14 + $0x758] sm:$0xff]  ;;  %v12062_v24 = vld [vmem:[#allocation14 + $0x7c8] sm:$0xff] }
0x1831   :  { %v5802_v37 = vmax.f32 %v5724_v63, 0.0  ;;  %v5803_v10 = vmax.f32 %v5737_v51, 0.0  ;;  %v12039_v63 = vld [vmem:[#allocation14 + $0x710] sm:$0xff] }
0x1832   :  { %6732 = vmatpush.bf16.msra.mxu0 %v12021_v44  ;;  %6745 = vmatpush.bf16.msra.mxu1 %v12029_v40  ;;  %v12047_v51 = vld [vmem:[#allocation14 + $0x750] sm:$0xff] }
0x1833   :  { %v5818_v16 = vpack.c.bf16 %v5802_v37, %v5802_v37  ;;  %v5819_v19 = vpack.c.bf16 %v5803_v10, %v5803_v10  ;;  %v5697_v38 = vpop.f32.mrf.mxu2  ;;  %v5710_v59 = vpop.f32.mrf.mxu3 }
0x1834   :  { %6705 = vmatpush.bf16.msrb.mxu2 %v12006_v50  ;;  %6718 = vmatpush.bf16.msrb.mxu3 %v12014_v46  ;;  %v5698_v55 = vadd.f32 %v5697_v38, %v5397_v60  ;;  %v5711_v8 = vadd.f32 %v5710_v59, %v5398_v1  ;;  %v12053_v60 = vld [vmem:[#allocation14 + $0x780] sm:$0xff] }
0x1835   :  { %6733 = vmatmul.bf16.vlgmr.msra.gmra.mxu0 %v5818_v16  ;;  %6746 = vmatmul.bf16.vlgmr.msra.gmra.mxu1 %v5819_v19  ;;  %v12061_v1 = vld [vmem:[#allocation14 + $0x7c0] sm:$0xff]  ;;  %v12038_v16 = vld [vmem:[#allocation14 + $0x708] sm:$0xff] }
0x1836   :  { %6777 = vmatpush.bf16.msrb.mxu0 %v12060_v0  ;;  %6790 = vmatpush.bf16.msrb.mxu1 %v12068_v53  ;;  %v5800_v11 = vmax.f32 %v5698_v55, 0.0  ;;  %v5801_v27 = vmax.f32 %v5711_v8, 0.0  ;;  %v5725_v45 = vpop.f32.mrf.mxu0  ;;  %v5738_v13 = vpop.f32.mrf.mxu1  ;;  %v5401_v0 = vperm.slane %v13844_v43, 4  ;;  %v5402_v53 = vperm.slane %v13844_v43, 5  ;;  %v12046_v19 = vld [vmem:[#allocation14 + $0x748] sm:$0xff]  ;;  %v12037_v43 = vld [vmem:[#allocation14 + $0x700] sm:$0xff] }
0x1837   :  { %v12045_v55 = vld [vmem:[#allocation14 + $0x740] sm:$0xff] }
0x1838   :  { %v5816_v12 = vpack.c.bf16 %v5800_v11, %v5800_v11  ;;  %v5817_v21 = vpack.c.bf16 %v5801_v27, %v5801_v27  ;;  %6706 = vmatpush.bf16.msrb.mxu2 %v12005_v31  ;;  %6719 = vmatpush.bf16.msrb.mxu3 %v12013_v22 }
0x183a   :  { %6778 = vmatpush.bf16.msrb.mxu0 %v12059_v39  ;;  %6791 = vmatpush.bf16.msrb.mxu1 %v12067_v29 }
0x183b   :  { %v5699_v2 = vpop.f32.mrf.mxu2  ;;  %v5712_v61 = vpop.f32.mrf.mxu3  ;;  %6707 = vmatmul.bf16.vlgmr.msrb.gmra.mxu2 %v5816_v12  ;;  %6720 = vmatmul.bf16.vlgmr.msrb.gmra.mxu3 %v5817_v21 }
0x183c   :  { %6751 = vmatpush.bf16.msra.mxu2 %v12044_v34  ;;  %6764 = vmatpush.bf16.msra.mxu3 %v12052_v7  ;;  %v12275_v61 = vld [vmem:[%s14150_s21 + $0x1] ss:$0 sm:$0xff] }
0x183e   :  { %6779 = vmatpush.bf16.msrb.mxu0 %v12058_v28  ;;  %6792 = vmatpush.bf16.msrb.mxu1 %v12066_v23  ;;  %v5775_v32 = vpop.f32.mrf.mxu0  ;;  %v5788_v6 = vpop.f32.mrf.mxu1 }
0x183f   :  { %v5776_v44 = vadd.f32 %v5775_v32, %v5403_v18  ;;  %v5789_v40 = vadd.f32 %v5788_v6, %v5404_v9 }
0x1840   :  { %6752 = vmatpush.bf16.msra.mxu2 %v12043_v30  ;;  %6765 = vmatpush.bf16.msra.mxu3 %v12051_v4 }
0x1841   :  { %v5806_v37 = vmax.f32 %v5776_v44, 0.0  ;;  %v5807_v10 = vmax.f32 %v5789_v40, 0.0 }
0x1842   :  { %6780 = vmatpush.bf16.msrb.mxu0 %v12057_v42  ;;  %6793 = vmatpush.bf16.msrb.mxu1 %v12065_v5 }
0x1843   :  { %v5749_v36 = vpop.f32.mrf.mxu2  ;;  %v5762_v52 = vpop.f32.mrf.mxu3  ;;  %v5822_v39 = vpack.c.bf16 %v5806_v37, %v5806_v37  ;;  %v5823_v29 = vpack.c.bf16 %v5807_v10, %v5807_v10 }
0x1844   :  { %6753 = vmatpush.bf16.msra.mxu2 %v12042_v41  ;;  %6766 = vmatpush.bf16.msra.mxu3 %v12050_v14  ;;  %v5750_v38 = vadd.f32 %v5749_v36, %v5401_v0  ;;  %v5763_v59 = vadd.f32 %v5762_v52, %v5402_v53 }
0x1846   :  { %6781 = vmatpush.bf16.msrb.mxu0 %v12056_v62  ;;  %6794 = vmatpush.bf16.msrb.mxu1 %v12064_v15  ;;  %v5777_v57 = vpop.f32.mrf.mxu0  ;;  %v5790_v58 = vpop.f32.mrf.mxu1  ;;  %v5804_v8 = vmax.f32 %v5750_v38, 0.0  ;;  %v5805_v31 = vmax.f32 %v5763_v59, 0.0 }
0x1848   :  { %6754 = vmatpush.bf16.msra.mxu2 %v12041_v26  ;;  %6767 = vmatpush.bf16.msra.mxu3 %v12049_v25  ;;  %v5820_v22 = vpack.c.bf16 %v5804_v8, %v5804_v8  ;;  %v5821_v34 = vpack.c.bf16 %v5805_v31, %v5805_v31 }
0x184a   :  { %6782 = vmatpush.bf16.msrb.mxu0 %v12055_v47  ;;  %6795 = vmatpush.bf16.msrb.mxu1 %v12063_v54 }
0x184b   :  { %v5751_v50 = vpop.f32.mrf.mxu2  ;;  %v5764_v46 = vpop.f32.mrf.mxu3 }
0x184c   :  { %6755 = vmatpush.bf16.msra.mxu2 %v12040_v56  ;;  %6768 = vmatpush.bf16.msra.mxu3 %v12048_v48 }
0x184e   :  { %6783 = vmatpush.bf16.msrb.mxu0 %v12054_v33  ;;  %6796 = vmatpush.bf16.msrb.mxu1 %v12062_v24 }
0x1850   :  { %6756 = vmatpush.bf16.msra.mxu2 %v12039_v63  ;;  %6769 = vmatpush.bf16.msra.mxu3 %v12047_v51 }
0x1852   :  { %6784 = vmatpush.bf16.msrb.mxu0 %v12053_v60  ;;  %6797 = vmatpush.bf16.msrb.mxu1 %v12061_v1 }
0x1854   :  { %6757 = vmatpush.bf16.msra.mxu2 %v12038_v16  ;;  %6770 = vmatpush.bf16.msra.mxu3 %v12046_v19 }
0x1855   :  { %6785 = vmatmul.bf16.vlgmr.msrb.gmra.mxu0 %v5822_v39  ;;  %6798 = vmatmul.bf16.vlgmr.msrb.gmra.mxu1 %v5823_v29 }
0x1858   :  { %6758 = vmatpush.bf16.msra.mxu2 %v12037_v43  ;;  %6771 = vmatpush.bf16.msra.mxu3 %v12045_v55 }
0x185b   :  { %6759 = vmatmul.bf16.vlgmr.msra.gmra.mxu2 %v5820_v22  ;;  %6772 = vmatmul.bf16.vlgmr.msra.gmra.mxu3 %v5821_v34 }
0x1892   :  { %v6630_v7 = vpop.f32.mrf.mxu0  ;;  %v6643_v11 = vpop.f32.mrf.mxu1 }
0x189a   :  { %v6632_v27 = vpop.f32.mrf.mxu0  ;;  %v6645_v45 = vpop.f32.mrf.mxu1 }
0x189e   :  { %v6604_v13 = vpop.f32.mrf.mxu2  ;;  %v6617_v28 = vpop.f32.mrf.mxu3 }
0x189f   :  { %v6605_v41 = vadd.f32 %v12275_v61, %v6604_v13  ;;  %v12070_v13 = vld [vmem:[#allocation10 + $0x28] sm:$0xff] }
0x18a0   :  { %7232 = vmatpush.bf16.msrb.mxu2 %v12070_v13 }
0x18a1   :  { %v6618_v6 = vadd.f32 %v6617_v28, %v6605_v41  ;;  %v12277_v41 = vld [vmem:[%s14154_s25 + $0x1] ss:$0 sm:$0xff] }
0x18a2   :  { %v6682_v23 = vpop.f32.mrf.mxu0  ;;  %v6695_v12 = vpop.f32.mrf.mxu1 }
0x18a3   :  { %v6631_v26 = vadd.f32 %v6630_v7, %v6618_v6 }
0x18a5   :  { %v6644_v52 = vadd.f32 %v6643_v11, %v6631_v26 }
0x18a6   :  { %v6606_v21 = vpop.f32.mrf.mxu2  ;;  %v6619_v30 = vpop.f32.mrf.mxu3 }
0x18aa   :  { %v6684_v4 = vpop.f32.mrf.mxu0  ;;  %v6697_v2 = vpop.f32.mrf.mxu1 }
0x18ae   :  { %v6656_v42 = vpop.f32.mrf.mxu2  ;;  %v6669_v5 = vpop.f32.mrf.mxu3 }
0x18af   :  { %v6657_v18 = vadd.f32 %v6656_v42, %v6644_v52  ;;  %v12276_v42 = vld [vmem:[%s14153_s24 + $0x1] ss:$0 sm:$0xff] }
0x18b1   :  { %v6670_v9 = vadd.f32 %v6669_v5, %v6657_v18 }
0x18b2   :  { %v6734_v14 = vpop.f32.mrf.mxu0  ;;  %v6747_v32 = vpop.f32.mrf.mxu1 }
0x18b3   :  { %v6683_v57 = vadd.f32 %v6682_v23, %v6670_v9  ;;  %v12069_v23 = vld [vmem:[#allocation10 + $0x20] sm:$0xff] }
0x18b4   :  { %7233 = vmatpush.bf16.msrb.mxu2 %v12069_v23 }
0x18b5   :  { %v6696_v58 = vadd.f32 %v6695_v12, %v6683_v57 }
0x18b6   :  { %v6658_v62 = vpop.f32.mrf.mxu2  ;;  %v6671_v15 = vpop.f32.mrf.mxu3 }
0x18b7   :  { %v6879_v15 = vrot.slane %v12277_v41, 4 }
0x18ba   :  { %v6736_v25 = vpop.f32.mrf.mxu0  ;;  %v6749_v36 = vpop.f32.mrf.mxu1 }
0x18be   :  { %v6708_v47 = vpop.f32.mrf.mxu2  ;;  %v6721_v54 = vpop.f32.mrf.mxu3 }
0x18bf   :  { %v6709_v33 = vadd.f32 %v6708_v47, %v6696_v58 }
0x18c1   :  { %v6722_v40 = vadd.f32 %v6721_v54, %v6709_v33 }
0x18c3   :  { %v6735_v63 = vadd.f32 %v6734_v14, %v6722_v40 }
0x18c5   :  { %v6748_v53 = vadd.f32 %v6747_v32, %v6735_v63  ;;  %v6872_v32 = vrot.slane %v12276_v42, 4 }
0x18c6   :  { %v6710_v56 = vpop.f32.mrf.mxu2  ;;  %v6723_v48 = vpop.f32.mrf.mxu3 }
0x18c7   :  { %v12278_v56 = vld [vmem:[%s14144_s15 + $0x2] ss:$0 sm:$0xff] }
0x18d2   :  { %v6786_v24 = vpop.f32.mrf.mxu0  ;;  %v6799_v44 = vpop.f32.mrf.mxu1 }
0x18da   :  { %v6788_v51 = vpop.f32.mrf.mxu0  ;;  %v6801_v0 = vpop.f32.mrf.mxu1 }
0x18de   :  { %v6760_v50 = vpop.f32.mrf.mxu2  ;;  %v6773_v46 = vpop.f32.mrf.mxu3 }
0x18df   :  { %v6761_v60 = vadd.f32 %v6760_v50, %v6748_v53 }
0x18e1   :  { %v6774_v1 = vadd.f32 %v6773_v46, %v6761_v60 }
0x18e3   :  { %v6787_v37 = vadd.f32 %v6786_v24, %v6774_v1 }
0x18e5   :  { %v6800_v10 = vadd.f32 %v6799_v44, %v6787_v37 }
0x18e6   :  { %v6762_v16 = vpop.f32.mrf.mxu2  ;;  %v6775_v19 = vpop.f32.mrf.mxu3 }
0x18e7   :  { %v6804_v38 = vrot.slane %v6800_v10, 4  ;;  %v6806_v59 = vadd.f32 %v6800_v10, %v13788_v17 }
0x18e9   :  { %v6807_v39 = vadd.f32 %v6804_v38, %v13790_v35  ;;  %6810 = vst [vmem:[#allocation1] ss:$2 sm:$0xff] %v6806_v59 }
0x18eb   :  { %6812 = vst [vmem:[#allocation1 + $0x1] ss:$2 sm:$0xff] %v6807_v39 }
0x18f2   :  { %v6813_v29 = vld.sshfl [vmem:[#allocation1] sm:$0xff pattern:$0x75316420] }
0x18f3   :  { %v6815_v43 = vsel %vm339_vm0, %v6813_v29, 0.0 }
0x18f4   :  { %6816 = vadd.xlane.f32.xlu2 %v6815_v43 }
0x1967   :  { %v6817_v55 = vpop.xlane.xlu2 %6816 }
0x1968   :  { %v6818_v8 = vmul.f32 %v6817_v55, %v13255_v3 }
0x196a   :  { %v6823_v31 = vperm.slane %v6818_v8, %v13510_v20  ;;  %v6827_v22 = vperm.slane %v6818_v8, %v13512_v49 }
0x196c   :  { %v6830_v34 = vsub.f32 %v6806_v59, %v6823_v31  ;;  %v6831_v7 = vsub.f32 %v6807_v39, %v6827_v22 }
0x196e   :  { %v6832_v11 = vmul.f32 %v6830_v34, %v6830_v34  ;;  %v6833_v27 = vmul.f32 %v6831_v7, %v6831_v7 }
0x1970   :  { %6836 = vst [vmem:[#allocation1] ss:$2 sm:$0xff] %v6832_v11 }
0x1971   :  { %6838 = vst [vmem:[#allocation1 + $0x1] ss:$2 sm:$0xff] %v6833_v27 }
0x1978   :  { %v6839_v17 = vld.sshfl [vmem:[#allocation1] sm:$0xff pattern:$0x75316420] }
0x1979   :  { %v6841_v35 = vsel %vm339_vm0, %v6839_v17, 0.0 }
0x197a   :  { %6842 = vadd.xlane.f32.xlu0 %v6841_v35 }
0x19ed   :  { %v6843_v45 = vpop.xlane.xlu0 %6842 }
0x19ee   :  { %v6844_v28 = vmul.f32 %v6843_v45, %v13255_v3 }
0x19f0   :  { %v6845_v12 = vadd.f32 1e-05, %v6844_v28 }
0x19f2   :  { %12393 = vrsqrt.f32 %v6845_v12  ;;  %vm6852_vm10 = vweird.f32 %v6845_v12 }
0x19f8   :  { %v12394_v21 = vpop.eup %12393 }
0x19f9   :  { %v6847_v30 = vmul.f32 %v12394_v21, %v6845_v12  ;;  %vm6853_vm9 = vweird.f32 %v12394_v21 }
0x19fa   :  { %vm6854_vm11 = vmor %vm6852_vm10, %vm6853_vm9 }
0x19fb   :  { %v6848_v4 = vmul.f32 %v12394_v21, %v6847_v30 }
0x19fd   :  { %v6849_v2 = vmul.f32 0.5, %v6848_v4 }
0x19ff   :  { %v6850_v61 = vsub.f32 1.5, %v6849_v2 }
0x1a01   :  { %v6851_v5 = vmul.f32 %v12394_v21, %v6850_v61 }
0x1a03   :  { %v6855_v14 = vsel %vm6854_vm11, %v12394_v21, %v6851_v5 }
0x1a04   :  { %v6860_v6 = vperm.slane %v6855_v14, %v13510_v20  ;;  %v6864_v62 = vperm.slane %v6855_v14, %v13512_v49 }
0x1a06   :  { %v6867_v26 = vmul.f32 %v6860_v6, %v6830_v34  ;;  %v6868_v25 = vmul.f32 %v6864_v62, %v6831_v7 }
0x1a08   :  { %v6874_v36 = vmul.f32 %v12276_v42, %v6867_v26  ;;  %v6875_v52 = vmul.f32 %v6872_v32, %v6868_v25 }
0x1a0a   :  { %v13873_v47 = vadd.f32 %v12277_v41, %v6874_v36  ;;  %v13875_v54 = vadd.f32 %v6879_v15, %v6875_v52 }
0x1a0c   :  { %7202 = vst [vmem:[#allocation1] ss:$2 sm:$0xff] %v13873_v47 }
0x1a0d   :  { %7204 = vst [vmem:[#allocation1 + $0x1] ss:$2 sm:$0xff] %v13875_v54 }
0x1a14   :  { %v7205_v18 = vld.sshfl [vmem:[#allocation1] sm:$0xff pattern:$0x75316420] }
0x1a15   :  { %v7207_v9 = vpack.c.bf16 %v7205_v18, %v7205_v18 }
0x1a17   :  { %11015 = vmatmul.msk.bf16.vlgmr.msrb.gmra.mxu2 %vm339_vm0, %v7207_v9 }
0x1a9a   :  { %v7235_v48 = vpop.f32.mrf.mxu2 }
0x1a9b   :  { %v7236_v57 = vadd.f32 %v12278_v56, %v7235_v48 }
0x1a9d   :  { %7242 = vrot.lane.b32.xlu0 %v7236_v57, %s12672_s1  ;;  %7248 = vrot.lane.b32.xlu2 %v7236_v57, %s12673_s0  ;;  %v7240_v58 = vrot.slane %v7236_v57, 4  ;;  %v7260_v44 = vpack.c.bf16 %v7236_v57, %v7236_v57 }
0x1a9f   :  { %7244 = vrot.lane.b32.xlu1 %v7240_v58, %s12672_s1  ;;  %v7261_v24 = vpack.c.bf16 %v7240_v58, %v7240_v58  ;;  %v7269_v63 = vunpack.c.l.b16 %v7260_v44 }
0x1aa1   :  { %v7293_v40 = vunpack.c.l.b16 %v7261_v24  ;;  %v13893_v0 = vpack.c.b16 %v7269_v63, %v7269_v63 }
0x1aa2   :  { %v7237_v33 = vpop.f32.mrf.mxu2 }
0x1aa3   :  { %v13889_v51 = vpack.c.b16 %v7293_v40, %v7293_v40 }
0x1aa5   :  { %7254 = vrot.lane.b32.xlu2 %v7236_v57, %s12674_s16  ;;  %7250 = vrot.lane.b32.xlu0 %v7240_v58, %s12673_s0 }
0x1aa7   :  { %7256 = vrot.lane.b32.xlu1 %v7240_v58, %s12674_s16 }
0x1aad   :  { %7295 = vrot.lane.b32.xlu2 %v13889_v51, %s12675_s14 }
0x1aaf   :  { %7271 = vrot.lane.b32.xlu1 %v13893_v0, %s12675_s14 }
0x1af7   :  { %v7249_v53 = vpop.permute.xlu2 %7248 }
0x1af8   :  { %v7264_v50 = vpack.c.bf16 %v7249_v53, %v7249_v53 }
0x1afa   :  { %v7365_v46 = vunpack.c.l.b16 %v7264_v50 }
0x1afc   :  { %v13897_v60 = vpack.c.b16 %v7365_v46, %v7365_v46 }
0x1afe   :  { %7367 = vrot.lane.b32.xlu1 %v13897_v60, %s12675_s14 }
0x1aff   :  { %v7255_v1 = vpop.permute.xlu2 %7254 }
0x1b00   :  { %v7266_v27 = vpack.c.bf16 %v7255_v1, %v7255_v1 }
0x1b02   :  { %v7413_v13 = vunpack.c.l.b16 %v7266_v27 }
0x1b04   :  { %v13920_v23 = vpack.c.b16 %v7413_v13, %v7413_v13 }
0x1b07   :  { %v7296_v37 = vpop.permute.xlu2 %7295 }
0x1b08   :  { %v7301_v10 = vsel %vm503_vm1, %v7296_v37, 0 }
0x1b09   :  { %7310 = vmatpush.bf16.xpose.msra.mxu0 %v7301_v10 }
0x1b0f   :  { %v7243_v16 = vpop.permute.xlu0 %7242 }
0x1b10   :  { %11017 = vmatmul.msk.bf16.vlgmr.msra.gmra.mxu0 %vm503_vm1, %v7261_v24  ;;  %v7262_v39 = vpack.c.bf16 %v7243_v16, %v7243_v16 }
0x1b11   :  { %v7245_v19 = vpop.permute.xlu1 %7244 }
0x1b12   :  { %v7263_v38 = vpack.c.bf16 %v7245_v19, %v7245_v19  ;;  %v7317_v31 = vunpack.c.l.b16 %v7262_v39 }
0x1b14   :  { %v7341_v59 = vunpack.c.l.b16 %v7263_v38  ;;  %v13909_v17 = vpack.c.b16 %v7317_v31, %v7317_v31 }
0x1b16   :  { %v13903_v29 = vpack.c.b16 %v7341_v59, %v7341_v59 }
0x1b17   :  { %v7251_v43 = vpop.permute.xlu0 %7250 }
0x1b18   :  { %v7265_v55 = vpack.c.bf16 %v7251_v43, %v7251_v43  ;;  %7343 = vrot.lane.b32.xlu0 %v13903_v29, %s12675_s14 }
0x1b19   :  { %v7257_v8 = vpop.permute.xlu1 %7256 }
0x1b1a   :  { %v7389_v22 = vunpack.c.l.b16 %v7265_v55  ;;  %v7267_v34 = vpack.c.bf16 %v7257_v8, %v7257_v8 }
0x1b1c   :  { %v13907_v7 = vpack.c.b16 %v7389_v22, %v7389_v22  ;;  %v7437_v11 = vunpack.c.l.b16 %v7267_v34 }
0x1b1e   :  { %v13911_v35 = vpack.c.b16 %v7437_v11, %v7437_v11  ;;  %7391 = vrot.lane.b32.xlu1 %v13907_v7, %s12675_s14 }
0x1b20   :  { %7319 = vrot.lane.b32.xlu0 %v13909_v17, %s12675_s14  ;;  %7439 = vrot.lane.b32.xlu2 %v13911_v35, %s12675_s14 }
0x1b21   :  { %v7272_v45 = vpop.permute.xlu1 %7271 }
0x1b22   :  { %v7277_v28 = vsel %vm503_vm1, %v7272_v45, 0 }
0x1b23   :  { %7286 = vmatpush.bf16.xpose.msrb.mxu3 %v7277_v28 }
0x1b28   :  { %7415 = vrot.lane.b32.xlu0 %v13920_v23, %s12675_s14 }
0x1b2a   :  { %11016 = vmatmul.msk.bf16.vlgmr.msrb.gmra.mxu3 %vm503_vm1, %v7260_v44 }
0x1b70   :  { %v7368_v12 = vpop.permute.xlu1 %7367 }
0x1b71   :  { %v7373_v21 = vsel %vm503_vm1, %v7368_v12, 0 }
0x1b72   :  { %7382 = vmatpush.bf16.xpose.msra.mxu3 %v7373_v21 }
0x1b79   :  { %11020 = vmatmul.msk.bf16.vlgmr.msra.gmra.mxu3 %vm503_vm1, %v7264_v50 }
0x1b7a   :  { %v7440_v30 = vpop.permute.xlu2 %7439 }
0x1b7b   :  { %v7445_v61 = vsel %vm503_vm1, %v7440_v30, 0 }
0x1b8a   :  { %v7344_v4 = vpop.permute.xlu0 %7343 }
0x1b8b   :  { %v7349_v2 = vsel %vm503_vm1, %v7344_v4, 0 }
0x1b8c   :  { %7358 = vmatpush.bf16.xpose.msra.mxu2 %v7349_v2 }
0x1b8d   :  { %v7312_v42 = vpop.f32.mrf.mxu0 }
0x1b8e   :  { %v7461_v5 = vmul.f32 0.35355338, %v7312_v42 }
0x1b90   :  { %v7392_v41 = vpop.permute.xlu1 %7391  ;;  %v7471_v14 = vsel %vm2462_vm5, %v7461_v5, -inf }
0x1b91   :  { %v7397_v32 = vsel %vm503_vm1, %v7392_v41, 0  ;;  %7472 = vmax.xlane.f32.xlu1 %v7471_v14 }
0x1b92   :  { %v7320_v6 = vpop.permute.xlu0 %7319  ;;  %7406 = vmatpush.bf16.xpose.msrb.mxu0 %v7397_v32 }
0x1b93   :  { %v7325_v62 = vsel %vm503_vm1, %v7320_v6, 0  ;;  %11019 = vmatmul.msk.bf16.vlgmr.msra.gmra.mxu2 %vm503_vm1, %v7263_v38 }
0x1b94   :  { %7454 = vmatpush.bf16.xpose.msrb.mxu2 %v7445_v61  ;;  %7334 = vmatpush.bf16.xpose.msra.mxu1 %v7325_v62 }
0x1b95   :  { %v7314_v15 = vpop.f32.mrf.mxu0 }
0x1b99   :  { %11021 = vmatmul.msk.bf16.vlgmr.msrb.gmra.mxu0 %vm503_vm1, %v7265_v55 }
0x1b9a   :  { %v7416_v26 = vpop.permute.xlu0 %7415 }
0x1b9b   :  { %v7421_v25 = vsel %vm503_vm1, %v7416_v26, 0  ;;  %11018 = vmatmul.msk.bf16.vlgmr.msra.gmra.mxu1 %vm503_vm1, %v7262_v39 }
0x1b9c   :  { %7430 = vmatpush.bf16.xpose.msrb.mxu1 %v7421_v25 }
0x1ba3   :  { %11023 = vmatmul.msk.bf16.vlgmr.msrb.gmra.mxu2 %vm503_vm1, %v7267_v34 }
0x1bab   :  { %11022 = vmatmul.msk.bf16.vlgmr.msrb.gmra.mxu1 %vm503_vm1, %v7266_v27 }
0x1bad   :  { %v7288_v36 = vpop.f32.mrf.mxu3 }
0x1bae   :  { %v7460_v52 = vmul.f32 0.35355338, %v7288_v36 }
0x1bb0   :  { %v7468_v18 = vsel %vm2462_vm5, %v7460_v52, -inf }
0x1bb1   :  { %7469 = vmax.xlane.f32.xlu2 %v7468_v18 }
0x1bb5   :  { %v7290_v9 = vpop.f32.mrf.mxu3 }
0x1bfc   :  { %v7384_v56 = vpop.f32.mrf.mxu3 }
0x1bfd   :  { %v7464_v48 = vmul.f32 0.35355338, %v7384_v56 }
0x1bff   :  { %v7480_v57 = vsel %vm2462_vm5, %v7464_v48, -inf }
0x1c00   :  { %7481 = vmax.xlane.f32.xlu1 %v7480_v57 }
0x1c04   :  { %v7386_v58 = vpop.f32.mrf.mxu3  ;;  %v7473_v43 = vpop.xlane.xlu1 %7472 }
0x1c05   :  { %v7493_v8 = vsub.f32 %v7461_v5, %v7473_v43 }
0x1c07   :  { %v7502_v34 = vmul.f32 1.442695, %v7493_v8 }
0x1c09   :  { %12395 = vpow2.f32 %v7502_v34 }
0x1c0f   :  { %v12396_v27 = vpop.eup %12395 }
0x1c16   :  { %v7360_v33 = vpop.f32.mrf.mxu2  ;;  %v7408_v24 = vpop.f32.mrf.mxu0 }
0x1c17   :  { %v7465_v44 = vmul.f32 0.35355338, %v7408_v24  ;;  %v7463_v46 = vmul.f32 0.35355338, %v7360_v33 }
0x1c18   :  { %v7336_v40 = vpop.f32.mrf.mxu1 }
0x1c19   :  { %v7462_v63 = vmul.f32 0.35355338, %v7336_v40  ;;  %7585 = vrot.lane.b32.xlu1 %v13889_v51, %s12660_s2  ;;  %v7483_v53 = vsel %vm2462_vm5, %v7465_v44, -inf  ;;  %v7477_v16 = vsel %vm2462_vm5, %v7463_v46, -inf }
0x1c1a   :  { %7484 = vmax.xlane.f32.xlu0 %v7483_v53 }
0x1c1b   :  { %v7474_v50 = vsel %vm2462_vm5, %v7462_v63, -inf }
0x1c1c   :  { %7475 = vmax.xlane.f32.xlu2 %v7474_v50 }
0x1c1e   :  { %v7362_v1 = vpop.f32.mrf.mxu2  ;;  %v7410_v37 = vpop.f32.mrf.mxu0 }
0x1c20   :  { %v7338_v10 = vpop.f32.mrf.mxu1 }
0x1c21   :  { %7606 = vrot.lane.b32.xlu1 %v13909_v17, %s12660_s2 }
0x1c22   :  { %7478 = vmax.xlane.f32.xlu0 %v7477_v16 }
0x1c24   :  { %v7470_v31 = vpop.xlane.xlu2 %7469 }
0x1c25   :  { %v7492_v22 = vsub.f32 %v7460_v52, %v7470_v31 }
0x1c26   :  { %v7456_v19 = vpop.f32.mrf.mxu2 }
0x1c27   :  { %v7500_v11 = vmul.f32 1.442695, %v7492_v22  ;;  %v7467_v45 = vmul.f32 0.35355338, %v7456_v19 }
0x1c28   :  { %v7432_v38 = vpop.f32.mrf.mxu1 }
0x1c29   :  { %v13951_v39 = vmul.f32 0.35355338, %v7432_v38  ;;  %12397 = vpow2.f32 %v7500_v11  ;;  %v7489_v13 = vsel %vm2462_vm5, %v7467_v45, -inf }
0x1c2b   :  { %v7486_v55 = vsel %vm2462_vm5, %v13951_v39, -inf }
0x1c2e   :  { %v7458_v59 = vpop.f32.mrf.mxu2 }
0x1c2f   :  { %v13955_v17 = vpop.eup %12397 }
0x1c30   :  { %v7434_v51 = vpop.f32.mrf.mxu1 }
0x1c34   :  { %7627 = vrot.lane.b32.xlu2 %v13903_v29, %s12660_s2  ;;  %v7519_v29 = vsel %vm2462_vm5, %v12396_v27, 0.0 }
0x1c36   :  { %7564 = vrot.lane.b32.xlu0 %v13893_v0, %s12660_s2  ;;  %v7516_v0 = vsel %vm2462_vm5, %v13955_v17, 0.0 }
0x1c4b   :  { %7487 = vmax.xlane.f32.xlu1 %v7486_v55 }
0x1c5d   :  { %7520 = vadd.xlane.f32.xlu2 %v7519_v29 }
0x1c60   :  { %7517 = vadd.xlane.f32.xlu0 %v7516_v0 }
0x1c65   :  { %7490 = vmax.xlane.f32.xlu2 %v7489_v13 }
0x1c73   :  { %v7482_v28 = vpop.xlane.xlu1 %7481 }
0x1c74   :  { %v7496_v5 = vsub.f32 %v7464_v48, %v7482_v28 }
0x1c76   :  { %v7508_v6 = vmul.f32 1.442695, %v7496_v5 }
0x1c8b   :  { %v7586_v12 = vpop.permute.xlu1 %7585 }
0x1c8c   :  { %v7591_v21 = vsel %vm856_vm4, %v7586_v12, 0 }
0x1c8d   :  { %7600 = vmatpush.bf16.msra.mxu0 %v7591_v21  ;;  %v7485_v30 = vpop.xlane.xlu0 %7484 }
0x1c8e   :  { %v7497_v4 = vsub.f32 %v7465_v44, %v7485_v30 }
0x1c8f   :  { %v7476_v2 = vpop.xlane.xlu2 %7475 }
0x1c90   :  { %v7510_v61 = vmul.f32 1.442695, %v7497_v4  ;;  %v7494_v42 = vsub.f32 %v7462_v63, %v7476_v2 }
0x1c92   :  { %12399 = vpow2.f32 %v7510_v61  ;;  %v7504_v41 = vmul.f32 1.442695, %v7494_v42 }
0x1c93   :  { %v7607_v14 = vpop.permute.xlu1 %7606 }
0x1c94   :  { %12401 = vpow2.f32 %v7504_v41  ;;  %v7612_v32 = vsel %vm856_vm4, %v7607_v14, 0 }
0x1c95   :  { %7621 = vmatpush.bf16.msra.mxu1 %v7612_v32  ;;  %v7479_v62 = vpop.xlane.xlu0 %7478  ;;  %12403 = vpow2.f32 %v7508_v6 }
0x1c96   :  { %v7495_v15 = vsub.f32 %v7463_v46, %v7479_v62 }
0x1c97   :  { %v7628_v26 = vpop.permute.xlu2 %7627 }
0x1c98   :  { %v13963_v25 = vpop.eup %12399  ;;  %v7506_v36 = vmul.f32 1.442695, %v7495_v15  ;;  %v7633_v52 = vsel %vm856_vm4, %v7628_v26, 0 }
0x1c99   :  { %7642 = vmatpush.bf16.msra.mxu2 %v7633_v52  ;;  %v7531_v18 = vsel %vm2462_vm5, %v13963_v25, 0.0 }
0x1c9a   :  { %v12402_v9 = vpop.eup %12401  ;;  %12405 = vpow2.f32 %v7506_v36  ;;  %7532 = vadd.xlane.f32.xlu0 %v7531_v18 }
0x1c9b   :  { %v7522_v56 = vsel %vm2462_vm5, %v12402_v9, 0.0  ;;  %v12404_v48 = vpop.eup %12403 }
0x1c9c   :  { %7523 = vadd.xlane.f32.xlu2 %v7522_v56  ;;  %v7528_v33 = vsel %vm2462_vm5, %v12404_v48, 0.0 }
0x1ca0   :  { %v12406_v57 = vpop.eup %12405 }
0x1ca1   :  { %v7525_v58 = vsel %vm2462_vm5, %v12406_v57, 0.0 }
0x1ca2   :  { %7526 = vadd.xlane.f32.xlu1 %v7525_v58 }
0x1ca4   :  { %7529 = vadd.xlane.f32.xlu2 %v7528_v33 }
0x1ca8   :  { %v7565_v24 = vpop.permute.xlu0 %7564 }
0x1ca9   :  { %v7570_v44 = vsel %vm856_vm4, %v7565_v24, 0 }
0x1caa   :  { %7579 = vmatpush.bf16.msrb.mxu3 %v7570_v44 }
0x1cae   :  { %7669 = vrot.lane.b32.xlu0 %v13907_v7, %s12660_s2 }
0x1cb6   :  { %7690 = vrot.lane.b32.xlu0 %v13920_v23, %s12660_s2 }
0x1cbc   :  { %7648 = vrot.lane.b32.xlu2 %v13897_v60, %s12660_s2 }
0x1cbe   :  { %v7488_v40 = vpop.xlane.xlu1 %7487 }
0x1cbf   :  { %v7498_v53 = vsub.f32 %v13951_v39, %v7488_v40 }
0x1cc1   :  { %v7512_v1 = vmul.f32 1.442695, %v7498_v53 }
0x1cd0   :  { %v7521_v63 = vpop.xlane.xlu2 %7520 }
0x1cd1   :  { %12407 = vrcp.f32 %v7521_v63 }
0x1cd3   :  { %v7518_v50 = vpop.xlane.xlu0 %7517 }
0x1cd4   :  { %12409 = vrcp.f32 %v7518_v50 }
0x1cd5   :  { %12411 = vpow2.f32 %v7512_v1 }
0x1cd7   :  { %v12408_v46 = vpop.eup %12407 }
0x1cd8   :  { %v7549_v37 = vmul.f32 %v12408_v46, %v12396_v27  ;;  %v7491_v10 = vpop.xlane.xlu2 %7490 }
0x1cd9   :  { %v7499_v16 = vsub.f32 %v7467_v45, %v7491_v10 }
0x1cda   :  { %v12410_v19 = vpop.eup %12409  ;;  %v7557_v7 = vpack.c.bf16 %v7549_v37, %v7549_v37 }
0x1cdb   :  { %v7548_v23 = vmul.f32 %v12410_v19, %v13955_v17  ;;  %v7514_v38 = vmul.f32 1.442695, %v7499_v16  ;;  %v12412_v59 = vpop.eup %12411 }
0x1cdc   :  { %11025 = vmatmul.msk.bf16.vlgmr.msra.gmra.mxu0 %vm2561_vm8, %v7557_v7  ;;  %v7534_v39 = vsel %vm2462_vm5, %v12412_v59, 0.0 }
0x1cdd   :  { %v7556_v60 = vpack.c.bf16 %v7548_v23, %v7548_v23  ;;  %12413 = vpow2.f32 %v7514_v38  ;;  %v12072_v23 = vld [vmem:[#allocation11 + $0x28] sm:$0xff]  ;;  %v12071_v38 = vld [vmem:[#allocation11 + $0x20] sm:$0xff] }
0x1cdf   :  { %11024 = vmatmul.msk.bf16.vlgmr.msrb.gmra.mxu3 %vm2561_vm8, %v7556_v60 }
0x1ce3   :  { %v12414_v51 = vpop.eup %12413 }
0x1ce4   :  { %v7537_v43 = vsel %vm2462_vm5, %v12414_v51, 0.0 }
0x1ce5   :  { %7535 = vadd.xlane.f32.xlu2 %v7534_v39  ;;  %7538 = vadd.xlane.f32.xlu1 %v7537_v43 }
0x1cfe   :  { %7711 = vrot.lane.b32.xlu1 %v13911_v35, %s12660_s2 }
0x1d0d   :  { %v7533_v8 = vpop.xlane.xlu0 %7532 }
0x1d0f   :  { %v7524_v55 = vpop.xlane.xlu2 %7523 }
0x1d10   :  { %12415 = vrcp.f32 %v7524_v55 }
0x1d11   :  { %12417 = vrcp.f32 %v7533_v8 }
0x1d15   :  { %v7527_v31 = vpop.xlane.xlu1 %7526 }
0x1d16   :  { %v12416_v22 = vpop.eup %12415  ;;  %12419 = vrcp.f32 %v7527_v31  ;;  %v12279_v31 = vld [vmem:[%s14146_s17 + $0x2] ss:$0 sm:$0xff] }
0x1d17   :  { %v7550_v34 = vmul.f32 %v12416_v22, %v12402_v9  ;;  %v7530_v11 = vpop.xlane.xlu2 %7529  ;;  %v12418_v17 = vpop.eup %12417 }
0x1d18   :  { %12421 = vrcp.f32 %v7530_v11  ;;  %v7553_v13 = vmul.f32 %v12418_v17, %v13963_v25 }
0x1d19   :  { %v7558_v27 = vpack.c.bf16 %v7550_v34, %v7550_v34 }
0x1d1a   :  { %v7561_v61 = vpack.c.bf16 %v7553_v13, %v7553_v13 }
0x1d1b   :  { %11026 = vmatmul.msk.bf16.vlgmr.msra.gmra.mxu1 %vm2561_vm8, %v7558_v27 }
0x1d1c   :  { %v12420_v29 = vpop.eup %12419 }
0x1d1d   :  { %v7551_v0 = vmul.f32 %v12420_v29, %v12406_v57 }
0x1d1e   :  { %v12422_v45 = vpop.eup %12421 }
0x1d1f   :  { %v7559_v35 = vpack.c.bf16 %v7551_v0, %v7551_v0  ;;  %v7552_v28 = vmul.f32 %v12422_v45, %v12404_v48  ;;  %v7649_v12 = vpop.permute.xlu2 %7648 }
0x1d20   :  { %v7654_v21 = vsel %vm856_vm4, %v7649_v12, 0  ;;  %v7670_v30 = vpop.permute.xlu0 %7669 }
0x1d21   :  { %v7560_v4 = vpack.c.bf16 %v7552_v28, %v7552_v28  ;;  %v7675_v2 = vsel %vm856_vm4, %v7670_v30, 0  ;;  %11027 = vmatmul.msk.bf16.vlgmr.msra.gmra.mxu2 %vm2561_vm8, %v7559_v35  ;;  %7663 = vmatpush.bf16.msra.mxu3 %v7654_v21 }
0x1d22   :  { %7684 = vmatpush.bf16.msrb.mxu0 %v7675_v2 }
0x1d24   :  { %11028 = vmatmul.msk.bf16.vlgmr.msra.gmra.mxu3 %vm2561_vm8, %v7560_v4 }
0x1d25   :  { %11029 = vmatmul.msk.bf16.vlgmr.msrb.gmra.mxu0 %vm2561_vm8, %v7561_v61  ;;  %7794 = vmatpush.bf16.msrb.mxu3 %v12072_v23  ;;  %v11125_v23 = vld [vmem:[#allocation13 + $0x2d0] sm:$0xf0] }
0x1d28   :  { %v7691_v42 = vpop.permute.xlu0 %7690 }
0x1d29   :  { %v7696_v5 = vsel %vm856_vm4, %v7691_v42, 0  ;;  %7795 = vmatpush.bf16.msrb.mxu3 %v12071_v38  ;;  %v11107_v42 = vld [vmem:[#allocation13 + $0x280] sm:$0xf]  ;;  %v11131_v38 = vld [vmem:[#allocation13 + $0x298] sm:$0xf] }
0x1d2a   :  { %7705 = vmatpush.bf16.msrb.mxu1 %v7696_v5  ;;  %v12097_v5 = vld [vmem:[#allocation13 + $0x2bc] sm:$0xf0] }
0x1d58   :  { %v7536_v41 = vpop.xlane.xlu2 %7535  ;;  %v7539_v26 = vpop.xlane.xlu1 %7538 }
0x1d59   :  { %v7602_v14 = vpop.f32.mrf.mxu0  ;;  %12423 = vrcp.f32 %v7536_v41  ;;  %v12089_v41 = vld [vmem:[#allocation13 + $0x284] sm:$0xf] }
0x1d5a   :  { %7736 = vst [vmem:[#allocation1 + $0x1] ss:$2 sm:$0xff] %v7602_v14  ;;  %12425 = vrcp.f32 %v7539_v26 }
0x1d5f   :  { %v12424_v32 = vpop.eup %12423 }
0x1d60   :  { %v7554_v6 = vmul.f32 %v12424_v32, %v12412_v59  ;;  %v12426_v52 = vpop.eup %12425  ;;  %v11108_v32 = vor.u32 %v12097_v5, %v11107_v42 }
0x1d61   :  { %v7604_v62 = vpop.f32.mrf.mxu0  ;;  %v7555_v18 = vmul.f32 %v12426_v52, %v12414_v51  ;;  %v11117_v52 = vld [vmem:[#allocation13 + $0x2c8] sm:$0xf0] }
0x1d62   :  { %v7581_v15 = vpop.f32.mrf.mxu3  ;;  %v7562_v25 = vpack.c.bf16 %v7554_v6, %v7554_v6  ;;  %v11109_v6 = vld [vmem:[#allocation13 + $0x2c0] sm:$0xf0]  ;;  %v11115_v62 = vld [vmem:[#allocation13 + $0x288] sm:$0xf]  ;;  %8092 = vmatpush.bf16.msra.mxu0 %v11108_v32 }
0x1d63   :  { %7734 = vst [vmem:[#allocation1] ss:$2 sm:$0xff] %v7581_v15  ;;  %v7563_v48 = vpack.c.bf16 %v7555_v18, %v7555_v18  ;;  %v12098_v15 = vld [vmem:[#allocation13 + $0x2c4] sm:$0xf0]  ;;  %v11112_v26 = vor.u32 %v12089_v41, %v11109_v6  ;;  %v11043_v18 = vld [vmem:[#allocation13 + $0x200] sm:$0xf] }
0x1d64   :  { %11030 = vmatmul.msk.bf16.vlgmr.msrb.gmra.mxu1 %vm2561_vm8, %v7562_v25  ;;  %v11116_v25 = vor.u32 %v12098_v15, %v11115_v62 }
0x1d65   :  { %8105 = vmatpush.bf16.msra.mxu1 %v11112_v26 }
0x1d6a   :  { %v7583_v36 = vpop.f32.mrf.mxu3  ;;  %v7737_v57 = vld.sshfl [vmem:[#allocation1] sm:$0xff pattern:$0x75316420] }
0x1d6b   :  { %v12090_v36 = vld [vmem:[#allocation13 + $0x28c] sm:$0xf] }
0x1d70   :  { %v7712_v9 = vpop.permute.xlu1 %7711 }
0x1d71   :  { %v7717_v56 = vsel %vm856_vm4, %v7712_v9, 0 }
0x1d72   :  { %7726 = vmatpush.bf16.msrb.mxu2 %v7717_v56  ;;  %v11120_v56 = vor.u32 %v12090_v36, %v11117_v52  ;;  %v11139_v36 = vld [vmem:[#allocation13 + $0x2a0] sm:$0xf] }
0x1d73   :  { %v12101_v52 = vld [vmem:[#allocation13 + $0x2dc] sm:$0xf0] }
0x1d74   :  { %8131 = vmatpush.bf16.msra.mxu3 %v11120_v56  ;;  %v11147_v56 = vld [vmem:[#allocation13 + $0x2a8] sm:$0xf] }
0x1d75   :  { %11031 = vmatmul.msk.bf16.vlgmr.msrb.gmra.mxu2 %vm2561_vm8, %v7563_v48  ;;  %v12081_v48 = vld [vmem:[#allocation13 + $0x23c] sm:$0xf0]  ;;  %vm9385_vm8 = vcmask 257024  }
0x1d76   :  { %8118 = vmatpush.bf16.msra.mxu2 %v11116_v25 }
0x1d98   :  { %v7623_v58 = vpop.f32.mrf.mxu1 }
0x1d99   :  { %7741 = vst [vmem:[#allocation1] ss:$2 sm:$0xff] %v7623_v58  ;;  %v11044_v58 = vor.u32 %v12081_v48, %v11043_v18  ;;  %v12093_v18 = vld [vmem:[#allocation13 + $0x2a4] sm:$0xf]  ;;  %v12102_v48 = vld [vmem:[#allocation13 + $0x2e4] sm:$0xf0] }
0x1d9b   :  { %8093 = vmatpush.bf16.msra.mxu0 %v11044_v58 }
0x1da0   :  { %v7625_v33 = vpop.f32.mrf.mxu1 }
0x1da1   :  { %v11045_v33 = vld [vmem:[#allocation13 + $0x240] sm:$0xf0] }
0x1da2   :  { %v7686_v24 = vpop.f32.mrf.mxu0 }
0x1da4   :  { %v7644_v44 = vpop.f32.mrf.mxu2 }
0x1da5   :  { %7743 = vst [vmem:[#allocation1 + $0x1] ss:$2 sm:$0xff] %v7644_v44  ;;  %v12082_v44 = vld [vmem:[#allocation13 + $0x244] sm:$0xf0] }
0x1da7   :  { %v7665_v40 = vpop.f32.mrf.mxu3 }
0x1daa   :  { %v7688_v63 = vpop.f32.mrf.mxu0 }
0x1dac   :  { %v7646_v53 = vpop.f32.mrf.mxu2  ;;  %v7744_v50 = vld.sshfl [vmem:[#allocation1] sm:$0xff pattern:$0x75316420] }
0x1dad   :  { %7745 = vrot.lane.b32.xlu0 %v7744_v50, %s12677_s30  ;;  %7750 = vst [vmem:[#allocation1] ss:$2 sm:$0xff] %v7665_v40  ;;  %v12074_v53 = vld [vmem:[#allocation13 + $0x20c] sm:$0xf] }
0x1dae   :  { %7752 = vst [vmem:[#allocation1 + $0x1] ss:$2 sm:$0xff] %v7686_v24  ;;  %v11051_v24 = vld [vmem:[#allocation13 + $0x208] sm:$0xf]  ;;  %v11053_v50 = vld [vmem:[#allocation13 + $0x248] sm:$0xf0] }
0x1daf   :  { %v7667_v46 = vpop.f32.mrf.mxu3  ;;  %v11052_v63 = vor.u32 %v12082_v44, %v11051_v24  ;;  %v11075_v44 = vld [vmem:[#allocation13 + $0x220] sm:$0xf] }
0x1db0   :  { %v11056_v46 = vor.u32 %v12074_v53, %v11053_v50  ;;  %v12077_v50 = vld [vmem:[#allocation13 + $0x224] sm:$0xf] }
0x1db1   :  { %8119 = vmatpush.bf16.msra.mxu2 %v11052_v63  ;;  %v11148_v63 = vor.u32 %v12102_v48, %v11147_v56  ;;  %v12117_v56 = vld [vmem:[#allocation14 + $0x860] sm:$0xff] }
0x1db2   :  { %8132 = vmatpush.bf16.msra.mxu3 %v11056_v46  ;;  %v11077_v46 = vld [vmem:[#allocation13 + $0x260] sm:$0xf0] }
0x1db3   :  { %v12125_v48 = vld [vmem:[#allocation14 + $0x8a0] sm:$0xff] }
0x1db5   :  { %v7753_v1 = vld.sshfl [vmem:[#allocation1] sm:$0xff pattern:$0x75316420] }
0x1db6   :  { %7754 = vrot.lane.b32.xlu2 %v7753_v1, %s12667_s3 }
0x1de1   :  { %v7707_v37 = vpop.f32.mrf.mxu1 }
0x1de2   :  { %7759 = vst [vmem:[#allocation1] ss:$2 sm:$0xff] %v7707_v37  ;;  %v11123_v37 = vld [vmem:[#allocation13 + $0x290] sm:$0xf] }
0x1de9   :  { %v7709_v10 = vpop.f32.mrf.mxu1 }
0x1dea   :  { %v12099_v10 = vld [vmem:[#allocation13 + $0x2cc] sm:$0xf0] }
0x1df8   :  { %v7728_v16 = vpop.f32.mrf.mxu2 }
0x1df9   :  { %7761 = vst [vmem:[#allocation1 + $0x1] ss:$2 sm:$0xff] %v7728_v16  ;;  %v12091_v16 = vld [vmem:[#allocation13 + $0x294] sm:$0xf] }
0x1e00   :  { %v7730_v19 = vpop.f32.mrf.mxu2  ;;  %v7762_v7 = vld.sshfl [vmem:[#allocation1] sm:$0xff pattern:$0x75316420] }
0x1e01   :  { %7763 = vrot.lane.b32.xlu0 %v7762_v7, %s12678_s7  ;;  %v11124_v7 = vor.u32 %v12099_v10, %v11123_v37  ;;  %v12086_v37 = vld [vmem:[#allocation13 + $0x264] sm:$0xf0]  ;;  %v12078_v10 = vld [vmem:[#allocation13 + $0x22c] sm:$0xf] }
0x1e03   :  { %8144 = vmatpush.bf16.msrb.mxu0 %v11124_v7  ;;  %v11080_v7 = vor.u32 %v12077_v50, %v11077_v46  ;;  %v12106_v50 = vld [vmem:[#allocation14 + $0x808] sm:$0xff] }
0x1e04   :  { %v12114_v46 = vld [vmem:[#allocation14 + $0x848] sm:$0xff] }
0x1e10   :  { %v7755_v51 = vpop.permute.xlu2 %7754 }
0x1e1f   :  { %v7746_v60 = vpop.permute.xlu0 %7745 }
0x1e20   :  { %v7766_v59 = vsel %vm503_vm1, %v7737_v57, %v7746_v60  ;;  %v12073_v57 = vld [vmem:[#allocation13 + $0x204] sm:$0xf]  ;;  %v12100_v60 = vld [vmem:[#allocation13 + $0x2d4] sm:$0xf0] }
0x1e21   :  { %v7767_v43 = vsel %vm1126_vm6, %v7766_v59, %v7755_v51  ;;  %v11048_v40 = vor.u32 %v12073_v57, %v11045_v33  ;;  %v11128_v59 = vor.u32 %v12091_v16, %v11125_v23  ;;  %v11132_v51 = vor.u32 %v12100_v60, %v11131_v38  ;;  %v12094_v57 = vld [vmem:[#allocation13 + $0x2ac] sm:$0xf]  ;;  %v11155_v60 = vld [vmem:[#allocation13 + $0x2b0] sm:$0xf] }
0x1e22   :  { %v11140_v33 = vor.u32 %v12101_v52, %v11139_v36  ;;  %v11085_v16 = vld [vmem:[#allocation13 + $0x268] sm:$0xf0] }
0x1e23   :  { %8106 = vmatpush.bf16.msra.mxu1 %v11048_v40  ;;  %8170 = vmatpush.bf16.msrb.mxu2 %v11132_v51  ;;  %v12085_v40 = vld [vmem:[#allocation13 + $0x25c] sm:$0xf0]  ;;  %v11088_v38 = vor.u32 %v12078_v10, %v11085_v16  ;;  %v12095_v51 = vld [vmem:[#allocation13 + $0x2b4] sm:$0xf]  ;;  %v12118_v36 = vld [vmem:[#allocation14 + $0x868] sm:$0xff] }
0x1e24   :  { %v12126_v52 = vld [vmem:[#allocation14 + $0x8a8] sm:$0xff]  ;;  %v12105_v10 = vld [vmem:[#allocation14 + $0x800] sm:$0xff]  ;;  %v12144_v16 = vld [vmem:[#allocation14 + $0x938] sm:$0xff] }
0x1e27   :  { %8157 = vmatpush.bf16.msrb.mxu1 %v11128_v59  ;;  %v12103_v59 = vld [vmem:[#allocation13 + $0x2ec] sm:$0xf0] }
0x1e73   :  { %v7764_v39 = vpop.permute.xlu0 %7763 }
0x1e74   :  { %v7768_v55 = vsel %vm1128_vm7, %v7767_v43, %v7764_v39  ;;  %v12092_v39 = vld [vmem:[#allocation13 + $0x29c] sm:$0xf] }
0x1e75   :  { %v7769_v8 = vpack.c.bf16 %v7768_v55, %v7768_v55  ;;  %v11133_v43 = vld [vmem:[#allocation13 + $0x2d8] sm:$0xf0] }
0x1e77   :  { %11040 = vmatmul.msk.bf16.vlgmr.msrb.gmra.mxu3 %vm339_vm0, %v7769_v8  ;;  %v11136_v8 = vor.u32 %v12092_v39, %v11133_v43  ;;  %v11157_v39 = vld [vmem:[#allocation13 + $0x2f0] sm:$0xf0]  ;;  %v11163_v43 = vld [vmem:[#allocation13 + $0x2b8] sm:$0xf] }
0x1e79   :  { %8183 = vmatpush.bf16.msrb.mxu3 %v11136_v8  ;;  %v12096_v8 = vld [vmem:[#allocation13 + $0x2bc] sm:$0xf] }
0x1efa   :  { %v7797_v22 = vpop.f32.mrf.mxu3 }
0x1efb   :  { %v7798_v34 = vadd.f32 %v12279_v31, %v7797_v22  ;;  %v11059_v31 = vld [vmem:[#allocation13 + $0x210] sm:$0xf] }
0x1efc   :  { %v12083_v22 = vld [vmem:[#allocation13 + $0x24c] sm:$0xf0] }
0x1efd   :  { %v7802_v11 = vrot.slane %v7798_v34, 4  ;;  %v7804_v27 = vadd.f32 %v7798_v34, %v13873_v47  ;;  %v12075_v34 = vld [vmem:[#allocation13 + $0x214] sm:$0xf] }
0x1eff   :  { %v7805_v17 = vadd.f32 %v7802_v11, %v13875_v54  ;;  %7808 = vst [vmem:[#allocation1] ss:$2 sm:$0xff] %v7804_v27  ;;  %v11060_v11 = vor.u32 %v12083_v22, %v11059_v31  ;;  %v11165_v31 = vld [vmem:[#allocation13 + $0x2f8] sm:$0xf0]  ;;  %v11156_v22 = vor.u32 %v12103_v59, %v11155_v60  ;;  %v12143_v59 = vld [vmem:[#allocation14 + $0x930] sm:$0xff] }
0x1f00   :  { %v12168_v60 = vld [vmem:[#allocation14 + $0x9f8] sm:$0xff] }
0x1f01   :  { %7810 = vst [vmem:[#allocation1 + $0x1] ss:$2 sm:$0xff] %v7805_v17  ;;  %8145 = vmatpush.bf16.msrb.mxu0 %v11060_v11  ;;  %v11091_v11 = vld [vmem:[#allocation13 + $0x230] sm:$0xf] }
0x1f02   :  { %v7799_v29 = vpop.f32.mrf.mxu3 }
0x1f03   :  { %v12084_v29 = vld [vmem:[#allocation13 + $0x254] sm:$0xf0] }
0x1f08   :  { %v7811_v0 = vld.sshfl [vmem:[#allocation1] sm:$0xff pattern:$0x75316420] }
0x1f09   :  { %v7813_v45 = vsel %vm339_vm0, %v7811_v0, 0.0 }
0x1f0a   :  { %7814 = vadd.xlane.f32.xlu1 %v7813_v45 }
0x1f7d   :  { %v7815_v13 = vpop.xlane.xlu1 %7814 }
0x1f7e   :  { %v7816_v35 = vmul.f32 %v7815_v13, %v13255_v3 }
0x1f80   :  { %v7821_v28 = vperm.slane %v7816_v35, %v13510_v20  ;;  %v7825_v12 = vperm.slane %v7816_v35, %v13512_v49  ;;  %v12076_v35 = vld [vmem:[#allocation13 + $0x21c] sm:$0xf] }
0x1f82   :  { %v14013_v21 = vsub.f32 %v7804_v27, %v7821_v28  ;;  %v14015_v30 = vsub.f32 %v7805_v17, %v7825_v12  ;;  %v11061_v27 = vld [vmem:[#allocation13 + $0x250] sm:$0xf0]  ;;  %v11067_v17 = vld [vmem:[#allocation13 + $0x218] sm:$0xf]  ;;  %v11069_v28 = vld [vmem:[#allocation13 + $0x258] sm:$0xf0] }
0x1f83   :  { %v11064_v45 = vor.u32 %v12075_v34, %v11061_v27  ;;  %v11068_v13 = vor.u32 %v12084_v29, %v11067_v17  ;;  %v11072_v12 = vor.u32 %v12076_v35, %v11069_v28  ;;  %v11160_v34 = vor.u32 %v12095_v51, %v11157_v39  ;;  %v12087_v27 = vld [vmem:[#allocation13 + $0x26c] sm:$0xf0]  ;;  %v12088_v35 = vld [vmem:[#allocation13 + $0x274] sm:$0xf0]  ;;  %v12080_v28 = vld [vmem:[#allocation13 + $0x23c] sm:$0xf] }
0x1f84   :  { %v7830_v47 = vmul.f32 %v14013_v21, %v14013_v21  ;;  %v7831_v54 = vmul.f32 %v14015_v30, %v14015_v30  ;;  %v11168_v29 = vor.u32 %v12096_v8, %v11165_v31  ;;  %v12151_v51 = vld [vmem:[#allocation14 + $0x970] sm:$0xff]  ;;  %v12150_v8 = vld [vmem:[#allocation14 + $0x968] sm:$0xff] }
0x1f85   :  { %8158 = vmatpush.bf16.msrb.mxu1 %v11064_v45  ;;  %8171 = vmatpush.bf16.msrb.mxu2 %v11068_v13  ;;  %v11093_v45 = vld [vmem:[#allocation13 + $0x270] sm:$0xf0]  ;;  %v11099_v13 = vld [vmem:[#allocation13 + $0x238] sm:$0xf]  ;;  %v12158_v31 = vld [vmem:[#allocation14 + $0x9a8] sm:$0xff] }
0x1f86   :  { %7834 = vst [vmem:[#allocation1] ss:$2 sm:$0xff] %v7830_v47  ;;  %8184 = vmatpush.bf16.msrb.mxu3 %v11072_v12  ;;  %v11101_v12 = vld [vmem:[#allocation13 + $0x278] sm:$0xf0]  ;;  %v12159_v39 = vld [vmem:[#allocation14 + $0x9b0] sm:$0xff] }
0x1f87   :  { %7836 = vst [vmem:[#allocation1 + $0x1] ss:$2 sm:$0xff] %v7831_v54  ;;  %v12280_v54 = vld [vmem:[%s14151_s22 + $0x2] ss:$0 sm:$0xff] }
0x1f88   :  { %v7870_v42 = vrot.slane %v12280_v54, 4 }
0x1f8e   :  { %v7837_v4 = vld.sshfl [vmem:[#allocation1] sm:$0xff pattern:$0x75316420] }
0x1f8f   :  { %v7839_v2 = vsel %vm339_vm0, %v7837_v4, 0.0 }
0x1f90   :  { %7840 = vadd.xlane.f32.xlu0 %v7839_v2  ;;  %v12281_v2 = vld [vmem:[%s14152_s23 + $0x2] ss:$0 sm:$0xff] }
0x2003   :  { %v7841_v61 = vpop.xlane.xlu0 %7840 }
0x2004   :  { %v7842_v14 = vmul.f32 %v7841_v61, %v13255_v3 }
0x2006   :  { %v14023_v9 = vadd.f32 1e-05, %v7842_v14  ;;  %v7877_v14 = vrot.slane %v12281_v2, 4 }
0x2008   :  { %12427 = vrsqrt.f32 %v14023_v9  ;;  %vm7850_vm4 = vweird.f32 %v14023_v9 }
0x200e   :  { %v12428_v1 = vpop.eup %12427 }
0x200f   :  { %v7845_v19 = vmul.f32 %v12428_v1, %v14023_v9  ;;  %vm7851_vm1 = vweird.f32 %v12428_v1  ;;  %v11141_v9 = vld [vmem:[#allocation13 + $0x2e0] sm:$0xf0] }
0x2010   :  { %vm7852_vm6 = vmor %vm7850_vm4, %vm7851_vm1  ;;  %v11144_v24 = vor.u32 %v12093_v18, %v11141_v9  ;;  %v12134_v18 = vld [vmem:[#allocation14 + $0x8e8] sm:$0xff]  ;;  %v12109_v9 = vld [vmem:[#allocation14 + $0x820] sm:$0xff] }
0x2011   :  { %v7846_v55 = vmul.f32 %v12428_v1, %v7845_v19  ;;  %v11076_v19 = vor.u32 %v12085_v40, %v11075_v44  ;;  %v12107_v44 = vld [vmem:[#allocation14 + $0x810] sm:$0xff] }
0x2012   :  { %v12115_v40 = vld [vmem:[#allocation14 + $0x850] sm:$0xff] }
0x2013   :  { %v7847_v0 = vmul.f32 0.5, %v7846_v55  ;;  %v12104_v55 = vld [vmem:[#allocation13 + $0x2f4] sm:$0xf0] }
0x2014   :  { %v11164_v17 = vor.u32 %v12104_v55, %v11163_v43  ;;  %v12167_v43 = vld [vmem:[#allocation14 + $0x9f0] sm:$0xff]  ;;  %v12142_v55 = vld [vmem:[#allocation14 + $0x928] sm:$0xff] }
0x2015   :  { %v7848_v47 = vsub.f32 1.5, %v7847_v0  ;;  %v12079_v0 = vld [vmem:[#allocation13 + $0x234] sm:$0xf] }
0x2017   :  { %v7849_v4 = vmul.f32 %v12428_v1, %v7848_v47  ;;  %v11092_v47 = vor.u32 %v12087_v27, %v11091_v11  ;;  %v12149_v11 = vld [vmem:[#allocation14 + $0x960] sm:$0xff] }
0x2018   :  { %v12157_v27 = vld [vmem:[#allocation14 + $0x9a0] sm:$0xff] }
0x2019   :  { %v7853_v61 = vsel %vm7852_vm6, %v12428_v1, %v7849_v4  ;;  %v11083_v1 = vld [vmem:[#allocation13 + $0x228] sm:$0xf]  ;;  %v11100_v4 = vor.u32 %v12088_v35, %v11099_v13  ;;  %v12147_v13 = vld [vmem:[#allocation14 + $0x950] sm:$0xff]  ;;  %v12156_v35 = vld [vmem:[#allocation14 + $0x998] sm:$0xff] }
0x201a   :  { %v7858_v5 = vperm.slane %v7853_v61, %v13510_v20  ;;  %v7862_v41 = vperm.slane %v7853_v61, %v13512_v49  ;;  %v11084_v23 = vor.u32 %v12086_v37, %v11083_v1  ;;  %v12112_v61 = vld [vmem:[#allocation14 + $0x838] sm:$0xff]  ;;  %v12122_v1 = vld [vmem:[#allocation14 + $0x888] sm:$0xff] }
0x201b   :  { %v12130_v37 = vld [vmem:[#allocation14 + $0x8c8] sm:$0xff] }
0x201c   :  { %v7865_v32 = vmul.f32 %v7858_v5, %v14013_v21  ;;  %v7866_v6 = vmul.f32 %v7862_v41, %v14015_v30  ;;  %v11149_v21 = vld [vmem:[#allocation13 + $0x2e8] sm:$0xf0]  ;;  %v12128_v5 = vld [vmem:[#allocation14 + $0x8b8] sm:$0xff] }
0x201d   :  { %v11152_v53 = vor.u32 %v12094_v57, %v11149_v21  ;;  %v12136_v41 = vld [vmem:[#allocation14 + $0x8f8] sm:$0xff]  ;;  %v12133_v57 = vld [vmem:[#allocation14 + $0x8e0] sm:$0xff] }
0x201e   :  { %v7872_v62 = vmul.f32 %v12280_v54, %v7865_v32  ;;  %v7873_v15 = vmul.f32 %v7870_v42, %v7866_v6  ;;  %v11096_v54 = vor.u32 %v12079_v0, %v11093_v45  ;;  %v12120_v42 = vld [vmem:[#allocation14 + $0x878] sm:$0xff]  ;;  %v12119_v32 = vld [vmem:[#allocation14 + $0x870] sm:$0xff] }
0x201f   :  { %v12127_v6 = vld [vmem:[#allocation14 + $0x8b0] sm:$0xff]  ;;  %v12108_v21 = vld [vmem:[#allocation14 + $0x818] sm:$0xff] }
0x2020   :  { %v14038_v26 = vadd.f32 %v12281_v2, %v7872_v62  ;;  %v14040_v25 = vadd.f32 %v7877_v14, %v7873_v15  ;;  %v11104_v2 = vor.u32 %v12080_v28, %v11101_v12  ;;  %v12111_v14 = vld [vmem:[#allocation14 + $0x830] sm:$0xff]  ;;  %v12110_v15 = vld [vmem:[#allocation14 + $0x828] sm:$0xff]  ;;  %v12148_v0 = vld [vmem:[#allocation14 + $0x958] sm:$0xff] }
0x2021   :  { %v12135_v62 = vld [vmem:[#allocation14 + $0x8f0] sm:$0xff]  ;;  %v12164_v28 = vld [vmem:[#allocation14 + $0x9d8] sm:$0xff]  ;;  %v12138_v12 = vld [vmem:[#allocation14 + $0x908] sm:$0xff] }
0x2022   :  { %7883 = vst [vmem:[#allocation1] ss:$2 sm:$0xff] %v14038_v26  ;;  %v12139_v45 = vld [vmem:[#allocation14 + $0x910] sm:$0xff] }
0x2023   :  { %7885 = vst [vmem:[#allocation1 + $0x1] ss:$2 sm:$0xff] %v14040_v25 }
0x202a   :  { %v7886_v58 = vld.sshfl [vmem:[#allocation1] sm:$0xff pattern:$0x75316420] }
0x202b   :  { %v14044_v30 = vpack.c.bf16 %v7886_v58, %v7886_v58  ;;  %v12116_v58 = vld [vmem:[#allocation14 + $0x858] sm:$0xff] }
0x202d   :  { %11169 = vmatmul.msk.bf16.vlgmr.msra.gmra.mxu0 %vm339_vm0, %v14044_v30  ;;  %11170 = vmatmul.msk.bf16.vlgmr.msra.gmra.mxu1 %vm339_vm0, %v14044_v30 }
0x202e   :  { %11171 = vmatmul.msk.bf16.vlgmr.msra.gmra.mxu2 %vm339_vm0, %v14044_v30  ;;  %11172 = vmatmul.msk.bf16.vlgmr.msra.gmra.mxu3 %vm339_vm0, %v14044_v30 }
0x202f   :  { %8196 = vmatpush.bf16.msra.mxu0 %v11140_v33  ;;  %8209 = vmatpush.bf16.msra.mxu1 %v11144_v24  ;;  %v12124_v33 = vld [vmem:[#allocation14 + $0x898] sm:$0xff] }
0x2030   :  { %8222 = vmatpush.bf16.msra.mxu2 %v11148_v63  ;;  %8235 = vmatpush.bf16.msra.mxu3 %v11152_v53  ;;  %v12132_v24 = vld [vmem:[#allocation14 + $0x8d8] sm:$0xff]  ;;  %v12123_v63 = vld [vmem:[#allocation14 + $0x890] sm:$0xff] }
0x2031   :  { %v12131_v53 = vld [vmem:[#allocation14 + $0x8d0] sm:$0xff] }
0x2033   :  { %8197 = vmatpush.bf16.msra.mxu0 %v11076_v19  ;;  %8210 = vmatpush.bf16.msra.mxu1 %v11080_v7  ;;  %v12152_v19 = vld [vmem:[#allocation14 + $0x978] sm:$0xff]  ;;  %v12121_v7 = vld [vmem:[#allocation14 + $0x880] sm:$0xff] }
0x2034   :  { %8223 = vmatpush.bf16.msra.mxu2 %v11084_v23  ;;  %8236 = vmatpush.bf16.msra.mxu3 %v11088_v38  ;;  %v12129_v23 = vld [vmem:[#allocation14 + $0x8c0] sm:$0xff]  ;;  %v12160_v38 = vld [vmem:[#allocation14 + $0x9b8] sm:$0xff] }
0x203d   :  { %11173 = vmatmul.msk.bf16.vlgmr.msrb.gmra.mxu0 %vm339_vm0, %v14044_v30  ;;  %11174 = vmatmul.msk.bf16.vlgmr.msrb.gmra.mxu1 %vm339_vm0, %v14044_v30 }
0x203e   :  { %11175 = vmatmul.msk.bf16.vlgmr.msrb.gmra.mxu2 %vm339_vm0, %v14044_v30  ;;  %11176 = vmatmul.msk.bf16.vlgmr.msrb.gmra.mxu3 %vm339_vm0, %v14044_v30 }
0x203f   :  { %8248 = vmatpush.bf16.msrb.mxu0 %v11156_v22  ;;  %8261 = vmatpush.bf16.msrb.mxu1 %v11160_v34  ;;  %v12166_v22 = vld [vmem:[#allocation14 + $0x9e8] sm:$0xff]  ;;  %v12141_v34 = vld [vmem:[#allocation14 + $0x920] sm:$0xff] }
0x2040   :  { %8274 = vmatpush.bf16.msrb.mxu2 %v11164_v17  ;;  %8287 = vmatpush.bf16.msrb.mxu3 %v11168_v29  ;;  %v12165_v17 = vld [vmem:[#allocation14 + $0x9e0] sm:$0xff]  ;;  %v12140_v29 = vld [vmem:[#allocation14 + $0x918] sm:$0xff] }
0x2043   :  { %8249 = vmatpush.bf16.msrb.mxu0 %v11092_v47  ;;  %8262 = vmatpush.bf16.msrb.mxu1 %v11096_v54  ;;  %v12146_v47 = vld [vmem:[#allocation14 + $0x948] sm:$0xff]  ;;  %v12155_v54 = vld [vmem:[#allocation14 + $0x990] sm:$0xff] }
0x2044   :  { %8275 = vmatpush.bf16.msrb.mxu2 %v11100_v4  ;;  %8288 = vmatpush.bf16.msrb.mxu3 %v11104_v2  ;;  %v12163_v4 = vld [vmem:[#allocation14 + $0x9d0] sm:$0xff]  ;;  %v12137_v2 = vld [vmem:[#allocation14 + $0x900] sm:$0xff] }
0x204d   :  { %11177 = vmatmul.msk.bf16.vlgmr.msra.gmra.mxu0 %vm339_vm0, %v14044_v30  ;;  %11178 = vmatmul.msk.bf16.vlgmr.msra.gmra.mxu1 %vm339_vm0, %v14044_v30 }
0x204e   :  { %11179 = vmatmul.msk.bf16.vlgmr.msra.gmra.mxu2 %vm339_vm0, %v14044_v30  ;;  %11180 = vmatmul.msk.bf16.vlgmr.msra.gmra.mxu3 %vm339_vm0, %v14044_v30 }
0x204f   :  { %9097 = vmatpush.bf16.msra.mxu0 %v12112_v61  ;;  %9110 = vmatpush.bf16.msra.mxu1 %v12120_v42  ;;  %v12145_v61 = vld [vmem:[#allocation14 + $0x940] sm:$0xff]  ;;  %v12154_v42 = vld [vmem:[#allocation14 + $0x988] sm:$0xff] }
0x2050   :  { %9123 = vmatpush.bf16.msra.mxu2 %v12128_v5  ;;  %9136 = vmatpush.bf16.msra.mxu3 %v12136_v41  ;;  %v12162_v5 = vld [vmem:[#allocation14 + $0x9c8] sm:$0xff]  ;;  %v12153_v41 = vld [vmem:[#allocation14 + $0x980] sm:$0xff] }
0x2053   :  { %9098 = vmatpush.bf16.msra.mxu0 %v12111_v14  ;;  %9111 = vmatpush.bf16.msra.mxu1 %v12119_v32  ;;  %v12161_v14 = vld [vmem:[#allocation14 + $0x9c0] sm:$0xff]  ;;  %v14081_v32 = vld [vmem:[%s14148_s19 + $0x20] sm:$0xff] }
0x2054   :  { %9124 = vmatpush.bf16.msra.mxu2 %v12127_v6  ;;  %9137 = vmatpush.bf16.msra.mxu3 %v12135_v62  ;;  %v7891_v6 = vperm.slane %v14081_v32, 0  ;;  %v7892_v62 = vperm.slane %v14081_v32, 1 }
0x2057   :  { %9099 = vmatpush.bf16.msra.mxu0 %v12110_v15  ;;  %9112 = vmatpush.bf16.msra.mxu1 %v12118_v36 }
0x2058   :  { %9125 = vmatpush.bf16.msra.mxu2 %v12126_v52  ;;  %9138 = vmatpush.bf16.msra.mxu3 %v12134_v18 }
0x205b   :  { %9100 = vmatpush.bf16.msra.mxu0 %v12109_v9  ;;  %9113 = vmatpush.bf16.msra.mxu1 %v12117_v56 }
0x205c   :  { %9126 = vmatpush.bf16.msra.mxu2 %v12125_v48  ;;  %9139 = vmatpush.bf16.msra.mxu3 %v12133_v57  ;;  %v7893_v48 = vperm.slane %v14081_v32, 2  ;;  %v7894_v57 = vperm.slane %v14081_v32, 3 }
0x205d   :  { %11181 = vmatmul.msk.bf16.vlgmr.msrb.gmra.mxu0 %vm339_vm0, %v14044_v30  ;;  %11182 = vmatmul.msk.bf16.vlgmr.msrb.gmra.mxu1 %vm339_vm0, %v14044_v30 }
0x205e   :  { %11183 = vmatmul.msk.bf16.vlgmr.msrb.gmra.mxu2 %vm339_vm0, %v14044_v30  ;;  %11184 = vmatmul.msk.bf16.vlgmr.msrb.gmra.mxu3 %vm339_vm0, %v14044_v30  ;;  %v12113_v30 = vld [vmem:[#allocation14 + $0x840] sm:$0xff] }
0x205f   :  { %9101 = vmatpush.bf16.msra.mxu0 %v12108_v21  ;;  %9114 = vmatpush.bf16.msra.mxu1 %v12116_v58  ;;  %v12176_v21 = vld [vmem:[#allocation14 + $0xa38] sm:$0xff] }
0x2060   :  { %9127 = vmatpush.bf16.msra.mxu2 %v12124_v33  ;;  %9140 = vmatpush.bf16.msra.mxu3 %v12132_v24  ;;  %v12184_v58 = vld [vmem:[#allocation14 + $0xa78] sm:$0xff] }
0x2063   :  { %9102 = vmatpush.bf16.msra.mxu0 %v12107_v44  ;;  %9115 = vmatpush.bf16.msra.mxu1 %v12115_v40 }
0x2064   :  { %9128 = vmatpush.bf16.msra.mxu2 %v12123_v63  ;;  %9141 = vmatpush.bf16.msra.mxu3 %v12131_v53 }
0x2067   :  { %9103 = vmatpush.bf16.msra.mxu0 %v12106_v50  ;;  %9116 = vmatpush.bf16.msra.mxu1 %v12114_v46 }
0x2068   :  { %9129 = vmatpush.bf16.msra.mxu2 %v12122_v1  ;;  %9142 = vmatpush.bf16.msra.mxu3 %v12130_v37  ;;  %v12175_v1 = vld [vmem:[#allocation14 + $0xa30] sm:$0xff] }
0x2069   :  { %v12183_v37 = vld [vmem:[#allocation14 + $0xa70] sm:$0xff] }
0x206b   :  { %9104 = vmatpush.bf16.msra.mxu0 %v12105_v10  ;;  %9117 = vmatpush.bf16.msra.mxu1 %v12113_v30 }
0x206c   :  { %9130 = vmatpush.bf16.msra.mxu2 %v12121_v7  ;;  %9143 = vmatpush.bf16.msra.mxu3 %v12129_v23 }
0x206f   :  { %9149 = vmatpush.bf16.msrb.mxu0 %v12144_v16  ;;  %9162 = vmatpush.bf16.msrb.mxu1 %v12152_v19  ;;  %v12192_v16 = vld [vmem:[#allocation14 + $0xab8] sm:$0xff] }
0x2070   :  { %9175 = vmatpush.bf16.msrb.mxu2 %v12160_v38  ;;  %9188 = vmatpush.bf16.msrb.mxu3 %v12168_v60  ;;  %v12200_v19 = vld [vmem:[#allocation14 + $0xaf8] sm:$0xff]  ;;  %v12174_v38 = vld [vmem:[#allocation14 + $0xa28] sm:$0xff] }
0x2071   :  { %v12182_v60 = vld [vmem:[#allocation14 + $0xa68] sm:$0xff] }
0x2073   :  { %9150 = vmatpush.bf16.msrb.mxu0 %v12143_v59  ;;  %9163 = vmatpush.bf16.msrb.mxu1 %v12151_v51  ;;  %v7895_v59 = vperm.slane %v14081_v32, 4  ;;  %v7896_v51 = vperm.slane %v14081_v32, 5 }
0x2074   :  { %9176 = vmatpush.bf16.msrb.mxu2 %v12159_v39  ;;  %9189 = vmatpush.bf16.msrb.mxu3 %v12167_v43 }
0x2077   :  { %9151 = vmatpush.bf16.msrb.mxu0 %v12142_v55  ;;  %9164 = vmatpush.bf16.msrb.mxu1 %v12150_v8  ;;  %v12191_v55 = vld [vmem:[#allocation14 + $0xab0] sm:$0xff] }
0x2078   :  { %9177 = vmatpush.bf16.msrb.mxu2 %v12158_v31  ;;  %9190 = vmatpush.bf16.msrb.mxu3 %v12166_v22  ;;  %v12199_v8 = vld [vmem:[#allocation14 + $0xaf0] sm:$0xff] }
0x207b   :  { %9152 = vmatpush.bf16.msrb.mxu0 %v12141_v34  ;;  %9165 = vmatpush.bf16.msrb.mxu1 %v12149_v11  ;;  %v12173_v34 = vld [vmem:[#allocation14 + $0xa20] sm:$0xff] }
0x207c   :  { %9178 = vmatpush.bf16.msrb.mxu2 %v12157_v27  ;;  %9191 = vmatpush.bf16.msrb.mxu3 %v12165_v17  ;;  %v12181_v11 = vld [vmem:[#allocation14 + $0xa60] sm:$0xff] }
0x207f   :  { %9153 = vmatpush.bf16.msrb.mxu0 %v12140_v29  ;;  %9166 = vmatpush.bf16.msrb.mxu1 %v12148_v0 }
0x2080   :  { %9179 = vmatpush.bf16.msrb.mxu2 %v12156_v35  ;;  %9192 = vmatpush.bf16.msrb.mxu3 %v12164_v28  ;;  %v7897_v35 = vperm.slane %v14081_v32, 6  ;;  %v7898_v28 = vperm.slane %v14081_v32, 7  ;;  %v12179_v32 = vld [vmem:[#allocation14 + $0xa50] sm:$0xff] }
0x2083   :  { %9154 = vmatpush.bf16.msrb.mxu0 %v12139_v45  ;;  %9167 = vmatpush.bf16.msrb.mxu1 %v12147_v13  ;;  %v12190_v45 = vld [vmem:[#allocation14 + $0xaa8] sm:$0xff] }
0x2084   :  { %9180 = vmatpush.bf16.msrb.mxu2 %v12155_v54  ;;  %9193 = vmatpush.bf16.msrb.mxu3 %v12163_v4  ;;  %v12198_v13 = vld [vmem:[#allocation14 + $0xae8] sm:$0xff]  ;;  %v12172_v54 = vld [vmem:[#allocation14 + $0xa18] sm:$0xff] }
0x2085   :  { %v12180_v4 = vld [vmem:[#allocation14 + $0xa58] sm:$0xff] }
0x2087   :  { %9155 = vmatpush.bf16.msrb.mxu0 %v12138_v12  ;;  %9168 = vmatpush.bf16.msrb.mxu1 %v12146_v47 }
0x2088   :  { %9181 = vmatpush.bf16.msrb.mxu2 %v12154_v42  ;;  %9194 = vmatpush.bf16.msrb.mxu3 %v12162_v5  ;;  %v12189_v42 = vld [vmem:[#allocation14 + $0xaa0] sm:$0xff] }
0x2089   :  { %v12197_v5 = vld [vmem:[#allocation14 + $0xae0] sm:$0xff] }
0x208b   :  { %9156 = vmatpush.bf16.msrb.mxu0 %v12137_v2  ;;  %9169 = vmatpush.bf16.msrb.mxu1 %v12145_v61 }
0x208c   :  { %9182 = vmatpush.bf16.msrb.mxu2 %v12153_v41  ;;  %9195 = vmatpush.bf16.msrb.mxu3 %v12161_v14 }
0x20aa   :  { %v8095_v15 = vpop.f32.mrf.mxu0  ;;  %v8108_v36 = vpop.f32.mrf.mxu1 }
0x20ab   :  { %v8096_v52 = vadd.f32 %v8095_v15, %v7891_v6  ;;  %v8109_v18 = vadd.f32 %v8108_v36, %v7892_v62  ;;  %v12171_v15 = vld [vmem:[#allocation14 + $0xa10] sm:$0xff] }
0x20ad   :  { %v8294_v9 = vmax.f32 %v8096_v52, 0.0  ;;  %v8295_v56 = vmax.f32 %v8109_v18, 0.0  ;;  %v14094_v18 = vld [vmem:[%s14148_s19 + $0x28] sm:$0xff] }
0x20af   :  { %v8310_v33 = vpack.c.bf16 %v8294_v9, %v8294_v9  ;;  %v8311_v24 = vpack.c.bf16 %v8295_v56, %v8295_v56  ;;  %v12188_v9 = vld [vmem:[#allocation14 + $0xa98] sm:$0xff] }
0x20b0   :  { %v12196_v56 = vld [vmem:[#allocation14 + $0xad8] sm:$0xff] }
0x20b1   :  { %v8121_v44 = vpop.f32.mrf.mxu2  ;;  %v8134_v40 = vpop.f32.mrf.mxu3  ;;  %9105 = vmatmul.bf16.vlgmr.msra.gmra.mxu0 %v8310_v33  ;;  %9118 = vmatmul.bf16.vlgmr.msra.gmra.mxu1 %v8311_v24  ;;  %v7899_v33 = vperm.slane %v14094_v18, 0  ;;  %v7900_v24 = vperm.slane %v14094_v18, 1 }
0x20b2   :  { %v8122_v63 = vadd.f32 %v8121_v44, %v7893_v48  ;;  %v8135_v53 = vadd.f32 %v8134_v40, %v7894_v57  ;;  %9201 = vmatpush.bf16.msra.mxu0 %v12176_v21  ;;  %9214 = vmatpush.bf16.msra.mxu1 %v12184_v58  ;;  %v8097_v50 = vpop.f32.mrf.mxu0  ;;  %v8110_v46 = vpop.f32.mrf.mxu1  ;;  %v12170_v21 = vld [vmem:[#allocation14 + $0xa08] sm:$0xff] }
0x20b3   :  { %v12178_v58 = vld [vmem:[#allocation14 + $0xa48] sm:$0xff] }
0x20b4   :  { %v8296_v10 = vmax.f32 %v8122_v63, 0.0  ;;  %v8297_v30 = vmax.f32 %v8135_v53, 0.0  ;;  %v12187_v63 = vld [vmem:[#allocation14 + $0xa90] sm:$0xff] }
0x20b5   :  { %v12195_v53 = vld [vmem:[#allocation14 + $0xad0] sm:$0xff] }
0x20b6   :  { %v8312_v7 = vpack.c.bf16 %v8296_v10, %v8296_v10  ;;  %v8313_v23 = vpack.c.bf16 %v8297_v30, %v8297_v30  ;;  %9202 = vmatpush.bf16.msra.mxu0 %v12175_v1  ;;  %9215 = vmatpush.bf16.msra.mxu1 %v12183_v37  ;;  %v12169_v10 = vld [vmem:[#allocation14 + $0xa00] sm:$0xff] }
0x20b7   :  { %v12177_v30 = vld [vmem:[#allocation14 + $0xa40] sm:$0xff] }
0x20b8   :  { %9131 = vmatmul.bf16.vlgmr.msra.gmra.mxu2 %v8312_v7  ;;  %9144 = vmatmul.bf16.vlgmr.msra.gmra.mxu3 %v8313_v23 }
0x20b9   :  { %9227 = vmatpush.bf16.msra.mxu2 %v12192_v16  ;;  %9240 = vmatpush.bf16.msra.mxu3 %v12200_v19  ;;  %v8123_v39 = vpop.f32.mrf.mxu2  ;;  %v8136_v43 = vpop.f32.mrf.mxu3  ;;  %v12208_v16 = vld [vmem:[#allocation14 + $0xb38] sm:$0xff] }
0x20ba   :  { %9203 = vmatpush.bf16.msra.mxu0 %v12174_v38  ;;  %9216 = vmatpush.bf16.msra.mxu1 %v12182_v60  ;;  %v8147_v31 = vpop.f32.mrf.mxu0  ;;  %v8160_v22 = vpop.f32.mrf.mxu1  ;;  %v12216_v19 = vld [vmem:[#allocation14 + $0xb78] sm:$0xff]  ;;  %v12186_v38 = vld [vmem:[#allocation14 + $0xa88] sm:$0xff] }
0x20bb   :  { %v8148_v27 = vadd.f32 %v8147_v31, %v7895_v59  ;;  %v8161_v17 = vadd.f32 %v8160_v22, %v7896_v51  ;;  %v12194_v60 = vld [vmem:[#allocation14 + $0xac8] sm:$0xff]  ;;  %v7901_v59 = vperm.slane %v14094_v18, 2  ;;  %v7902_v51 = vperm.slane %v14094_v18, 3 }
0x20bd   :  { %v8298_v29 = vmax.f32 %v8148_v27, 0.0  ;;  %v8299_v0 = vmax.f32 %v8161_v17, 0.0  ;;  %9228 = vmatpush.bf16.msra.mxu2 %v12191_v55  ;;  %9241 = vmatpush.bf16.msra.mxu3 %v12199_v8  ;;  %v12207_v55 = vld [vmem:[#allocation14 + $0xb30] sm:$0xff] }
0x20be   :  { %9204 = vmatpush.bf16.msra.mxu0 %v12173_v34  ;;  %9217 = vmatpush.bf16.msra.mxu1 %v12181_v11  ;;  %v12215_v8 = vld [vmem:[#allocation14 + $0xb70] sm:$0xff]  ;;  %v12185_v34 = vld [vmem:[#allocation14 + $0xa80] sm:$0xff] }
0x20bf   :  { %v8314_v12 = vpack.c.bf16 %v8298_v29, %v8298_v29  ;;  %v8315_v47 = vpack.c.bf16 %v8299_v0, %v8299_v0  ;;  %v12193_v11 = vld [vmem:[#allocation14 + $0xac0] sm:$0xff] }
0x20c1   :  { %9229 = vmatpush.bf16.msra.mxu2 %v12190_v45  ;;  %9242 = vmatpush.bf16.msra.mxu3 %v12198_v13  ;;  %v8173_v2 = vpop.f32.mrf.mxu2  ;;  %v8186_v61 = vpop.f32.mrf.mxu3  ;;  %v12224_v45 = vld [vmem:[#allocation14 + $0xbb8] sm:$0xff] }
0x20c2   :  { %v8174_v41 = vadd.f32 %v8173_v2, %v7897_v35  ;;  %v8187_v14 = vadd.f32 %v8186_v61, %v7898_v28  ;;  %9157 = vmatmul.bf16.vlgmr.msrb.gmra.mxu0 %v8314_v12  ;;  %9170 = vmatmul.bf16.vlgmr.msrb.gmra.mxu1 %v8315_v47  ;;  %v8149_v6 = vpop.f32.mrf.mxu0  ;;  %v8162_v62 = vpop.f32.mrf.mxu1  ;;  %v12232_v13 = vld [vmem:[#allocation14 + $0xbf8] sm:$0xff]  ;;  %v12206_v12 = vld [vmem:[#allocation14 + $0xb28] sm:$0xff]  ;;  %v12223_v2 = vld [vmem:[#allocation14 + $0xbb0] sm:$0xff] }
0x20c3   :  { %9205 = vmatpush.bf16.msra.mxu0 %v12172_v54  ;;  %9218 = vmatpush.bf16.msra.mxu1 %v12180_v4  ;;  %v12214_v47 = vld [vmem:[#allocation14 + $0xb68] sm:$0xff]  ;;  %v12231_v61 = vld [vmem:[#allocation14 + $0xbf0] sm:$0xff] }
0x20c4   :  { %v8300_v36 = vmax.f32 %v8174_v41, 0.0  ;;  %v8301_v52 = vmax.f32 %v8187_v14, 0.0 }
0x20c5   :  { %9230 = vmatpush.bf16.msra.mxu2 %v12189_v42  ;;  %9243 = vmatpush.bf16.msra.mxu3 %v12197_v5  ;;  %v12205_v42 = vld [vmem:[#allocation14 + $0xb20] sm:$0xff] }
0x20c6   :  { %v8316_v48 = vpack.c.bf16 %v8300_v36, %v8300_v36  ;;  %v8317_v57 = vpack.c.bf16 %v8301_v52, %v8301_v52  ;;  %v12213_v5 = vld [vmem:[#allocation14 + $0xb60] sm:$0xff]  ;;  %v12204_v36 = vld [vmem:[#allocation14 + $0xb18] sm:$0xff] }
0x20c7   :  { %9206 = vmatpush.bf16.msra.mxu0 %v12171_v15  ;;  %9219 = vmatpush.bf16.msra.mxu1 %v12179_v32  ;;  %v12222_v15 = vld [vmem:[#allocation14 + $0xba8] sm:$0xff]  ;;  %v12212_v52 = vld [vmem:[#allocation14 + $0xb58] sm:$0xff] }
0x20c8   :  { %9183 = vmatmul.bf16.vlgmr.msrb.gmra.mxu2 %v8316_v48  ;;  %9196 = vmatmul.bf16.vlgmr.msrb.gmra.mxu3 %v8317_v57  ;;  %v12230_v32 = vld [vmem:[#allocation14 + $0xbe8] sm:$0xff]  ;;  %v12203_v48 = vld [vmem:[#allocation14 + $0xb10] sm:$0xff] }
0x20c9   :  { %9231 = vmatpush.bf16.msra.mxu2 %v12188_v9  ;;  %9244 = vmatpush.bf16.msra.mxu3 %v12196_v56  ;;  %v8175_v44 = vpop.f32.mrf.mxu2  ;;  %v8188_v40 = vpop.f32.mrf.mxu3  ;;  %v12221_v9 = vld [vmem:[#allocation14 + $0xba0] sm:$0xff]  ;;  %v12211_v57 = vld [vmem:[#allocation14 + $0xb50] sm:$0xff] }
0x20ca   :  { %v8199_v50 = vpop.f32.mrf.mxu0  ;;  %v8212_v46 = vpop.f32.mrf.mxu1  ;;  %v12229_v56 = vld [vmem:[#allocation14 + $0xbe0] sm:$0xff] }
0x20cb   :  { %9207 = vmatpush.bf16.msra.mxu0 %v12170_v21  ;;  %9220 = vmatpush.bf16.msra.mxu1 %v12178_v58  ;;  %v8200_v1 = vadd.f32 %v8199_v50, %v7899_v33  ;;  %v8213_v37 = vadd.f32 %v8212_v46, %v7900_v24  ;;  %v7903_v21 = vperm.slane %v14094_v18, 4  ;;  %v7904_v58 = vperm.slane %v14094_v18, 5  ;;  %v12202_v50 = vld [vmem:[#allocation14 + $0xb08] sm:$0xff] }
0x20cc   :  { %v12210_v46 = vld [vmem:[#allocation14 + $0xb48] sm:$0xff] }
0x20cd   :  { %v8302_v7 = vmax.f32 %v8200_v1, 0.0  ;;  %v8303_v23 = vmax.f32 %v8213_v37, 0.0  ;;  %9232 = vmatpush.bf16.msra.mxu2 %v12187_v63  ;;  %9245 = vmatpush.bf16.msra.mxu3 %v12195_v53  ;;  %v12220_v63 = vld [vmem:[#allocation14 + $0xb98] sm:$0xff] }
0x20ce   :  { %v12228_v53 = vld [vmem:[#allocation14 + $0xbd8] sm:$0xff] }
0x20cf   :  { %v8318_v39 = vpack.c.bf16 %v8302_v7, %v8302_v7  ;;  %v8319_v43 = vpack.c.bf16 %v8303_v23, %v8303_v23  ;;  %9208 = vmatpush.bf16.msra.mxu0 %v12169_v10  ;;  %9221 = vmatpush.bf16.msra.mxu1 %v12177_v30  ;;  %v12219_v10 = vld [vmem:[#allocation14 + $0xb90] sm:$0xff]  ;;  %v12201_v7 = vld [vmem:[#allocation14 + $0xb00] sm:$0xff] }
0x20d0   :  { %v12227_v30 = vld [vmem:[#allocation14 + $0xbd0] sm:$0xff]  ;;  %v12209_v23 = vld [vmem:[#allocation14 + $0xb40] sm:$0xff] }
0x20d1   :  { %9233 = vmatpush.bf16.msra.mxu2 %v12186_v38  ;;  %9246 = vmatpush.bf16.msra.mxu3 %v12194_v60  ;;  %v8225_v31 = vpop.f32.mrf.mxu2  ;;  %v8238_v22 = vpop.f32.mrf.mxu3 }
0x20d2   :  { %v8226_v27 = vadd.f32 %v8225_v31, %v7901_v59  ;;  %v8239_v17 = vadd.f32 %v8238_v22, %v7902_v51  ;;  %9209 = vmatmul.bf16.vlgmr.msra.gmra.mxu0 %v8318_v39  ;;  %9222 = vmatmul.bf16.vlgmr.msra.gmra.mxu1 %v8319_v43  ;;  %v8201_v29 = vpop.f32.mrf.mxu0  ;;  %v8214_v0 = vpop.f32.mrf.mxu1  ;;  %v12218_v39 = vld [vmem:[#allocation14 + $0xb88] sm:$0xff] }
0x20d3   :  { %9253 = vmatpush.bf16.msrb.mxu0 %v12208_v16  ;;  %9266 = vmatpush.bf16.msrb.mxu1 %v12216_v19  ;;  %v7905_v16 = vperm.slane %v14094_v18, 6  ;;  %v7906_v19 = vperm.slane %v14094_v18, 7  ;;  %v12226_v43 = vld [vmem:[#allocation14 + $0xbc8] sm:$0xff]  ;;  %v12217_v18 = vld [vmem:[#allocation14 + $0xb80] sm:$0xff] }
0x20d4   :  { %v8304_v35 = vmax.f32 %v8226_v27, 0.0  ;;  %v8305_v28 = vmax.f32 %v8239_v17, 0.0 }
0x20d5   :  { %9234 = vmatpush.bf16.msra.mxu2 %v12185_v34  ;;  %9247 = vmatpush.bf16.msra.mxu3 %v12193_v11  ;;  %v12225_v34 = vld [vmem:[#allocation14 + $0xbc0] sm:$0xff] }
0x20d6   :  { %v8320_v54 = vpack.c.bf16 %v8304_v35, %v8304_v35  ;;  %v8321_v4 = vpack.c.bf16 %v8305_v28, %v8305_v28 }
0x20d7   :  { %9254 = vmatpush.bf16.msrb.mxu0 %v12207_v55  ;;  %9267 = vmatpush.bf16.msrb.mxu1 %v12215_v8 }
0x20d8   :  { %9235 = vmatmul.bf16.vlgmr.msra.gmra.mxu2 %v8320_v54  ;;  %9248 = vmatmul.bf16.vlgmr.msra.gmra.mxu3 %v8321_v4 }
0x20d9   :  { %9279 = vmatpush.bf16.msrb.mxu2 %v12224_v45  ;;  %9292 = vmatpush.bf16.msrb.mxu3 %v12232_v13  ;;  %v8227_v41 = vpop.f32.mrf.mxu2  ;;  %v8240_v14 = vpop.f32.mrf.mxu3 }
0x20da   :  { %v8251_v6 = vpop.f32.mrf.mxu0  ;;  %v8264_v62 = vpop.f32.mrf.mxu1 }
0x20db   :  { %9255 = vmatpush.bf16.msrb.mxu0 %v12206_v12  ;;  %9268 = vmatpush.bf16.msrb.mxu1 %v12214_v47  ;;  %v8252_v1 = vadd.f32 %v8251_v6, %v7903_v21  ;;  %v8265_v37 = vadd.f32 %v8264_v62, %v7904_v58 }
0x20dd   :  { %9280 = vmatpush.bf16.msrb.mxu2 %v12223_v2  ;;  %9293 = vmatpush.bf16.msrb.mxu3 %v12231_v61  ;;  %v8306_v38 = vmax.f32 %v8252_v1, 0.0  ;;  %v8307_v60 = vmax.f32 %v8265_v37, 0.0  ;;  %v12282_v61 = vld [vmem:[%s14150_s21 + $0x2] ss:$0 sm:$0xff] }
0x20df   :  { %9256 = vmatpush.bf16.msrb.mxu0 %v12205_v42  ;;  %9269 = vmatpush.bf16.msrb.mxu1 %v12213_v5  ;;  %v8322_v31 = vpack.c.bf16 %v8306_v38, %v8306_v38  ;;  %v8323_v22 = vpack.c.bf16 %v8307_v60, %v8307_v60 }
0x20e1   :  { %9281 = vmatpush.bf16.msrb.mxu2 %v12222_v15  ;;  %9294 = vmatpush.bf16.msrb.mxu3 %v12230_v32  ;;  %v8277_v33 = vpop.f32.mrf.mxu2  ;;  %v8290_v24 = vpop.f32.mrf.mxu3 }
0x20e2   :  { %v8253_v44 = vpop.f32.mrf.mxu0  ;;  %v8266_v40 = vpop.f32.mrf.mxu1  ;;  %v8278_v55 = vadd.f32 %v8277_v33, %v7905_v16  ;;  %v8291_v8 = vadd.f32 %v8290_v24, %v7906_v19 }
0x20e3   :  { %9257 = vmatpush.bf16.msrb.mxu0 %v12204_v36  ;;  %9270 = vmatpush.bf16.msrb.mxu1 %v12212_v52 }
0x20e4   :  { %v8308_v11 = vmax.f32 %v8278_v55, 0.0  ;;  %v8309_v27 = vmax.f32 %v8291_v8, 0.0 }
0x20e5   :  { %9282 = vmatpush.bf16.msrb.mxu2 %v12221_v9  ;;  %9295 = vmatpush.bf16.msrb.mxu3 %v12229_v56 }
0x20e6   :  { %v8324_v17 = vpack.c.bf16 %v8308_v11, %v8308_v11  ;;  %v8325_v29 = vpack.c.bf16 %v8309_v27, %v8309_v27 }
0x20e7   :  { %9258 = vmatpush.bf16.msrb.mxu0 %v12203_v48  ;;  %9271 = vmatpush.bf16.msrb.mxu1 %v12211_v57 }
0x20e9   :  { %9283 = vmatpush.bf16.msrb.mxu2 %v12220_v63  ;;  %9296 = vmatpush.bf16.msrb.mxu3 %v12228_v53  ;;  %v8279_v59 = vpop.f32.mrf.mxu2  ;;  %v8292_v51 = vpop.f32.mrf.mxu3 }
0x20eb   :  { %9259 = vmatpush.bf16.msrb.mxu0 %v12202_v50  ;;  %9272 = vmatpush.bf16.msrb.mxu1 %v12210_v46 }
0x20ed   :  { %9284 = vmatpush.bf16.msrb.mxu2 %v12219_v10  ;;  %9297 = vmatpush.bf16.msrb.mxu3 %v12227_v30 }
0x20ef   :  { %9260 = vmatpush.bf16.msrb.mxu0 %v12201_v7  ;;  %9273 = vmatpush.bf16.msrb.mxu1 %v12209_v23 }
0x20f1   :  { %9285 = vmatpush.bf16.msrb.mxu2 %v12218_v39  ;;  %9298 = vmatpush.bf16.msrb.mxu3 %v12226_v43 }
0x20f2   :  { %9261 = vmatmul.bf16.vlgmr.msrb.gmra.mxu0 %v8322_v31  ;;  %9274 = vmatmul.bf16.vlgmr.msrb.gmra.mxu1 %v8323_v22 }
0x20f5   :  { %9286 = vmatpush.bf16.msrb.mxu2 %v12217_v18  ;;  %9299 = vmatpush.bf16.msrb.mxu3 %v12225_v34 }
0x20f8   :  { %9287 = vmatmul.bf16.vlgmr.msrb.gmra.mxu2 %v8324_v17  ;;  %9300 = vmatmul.bf16.vlgmr.msrb.gmra.mxu3 %v8325_v29 }
0x212e   :  { %v9106_v0 = vpop.f32.mrf.mxu0  ;;  %v9119_v45 = vpop.f32.mrf.mxu1 }
0x212f   :  { %v9107_v41 = vadd.f32 %v12282_v61, %v9106_v0 }
0x2131   :  { %v9120_v62 = vadd.f32 %v9119_v45, %v9107_v41  ;;  %v12284_v41 = vld [vmem:[%s14154_s25 + $0x2] ss:$0 sm:$0xff] }
0x2136   :  { %v9108_v13 = vpop.f32.mrf.mxu0  ;;  %v9121_v35 = vpop.f32.mrf.mxu1 }
0x213b   :  { %v9132_v28 = vpop.f32.mrf.mxu2  ;;  %v9145_v12 = vpop.f32.mrf.mxu3 }
0x213c   :  { %v9133_v36 = vadd.f32 %v9132_v28, %v9120_v62 }
0x213e   :  { %v9146_v56 = vadd.f32 %v9145_v12, %v9133_v36 }
0x213f   :  { %v9158_v47 = vpop.f32.mrf.mxu0  ;;  %v9171_v54 = vpop.f32.mrf.mxu1 }
0x2140   :  { %v9159_v21 = vadd.f32 %v9158_v47, %v9146_v56 }
0x2142   :  { %v9172_v24 = vadd.f32 %v9171_v54, %v9159_v21 }
0x2143   :  { %v9134_v4 = vpop.f32.mrf.mxu2  ;;  %v9147_v2 = vpop.f32.mrf.mxu3 }
0x2147   :  { %v9160_v42 = vpop.f32.mrf.mxu0  ;;  %v9173_v5 = vpop.f32.mrf.mxu1 }
0x2148   :  { %v12283_v42 = vld [vmem:[%s14153_s24 + $0x2] ss:$0 sm:$0xff]  ;;  %s9392_s24 = sshll.u32 %s12682_s4, 4  ;;  %s9393_s24 = int_to_ptr.vmem [resolvable:$true] %s9392_s24 }
0x214b   :  { %v9184_v14 = vpop.f32.mrf.mxu2  ;;  %v9197_v6 = vpop.f32.mrf.mxu3 }
0x214c   :  { %v9185_v44 = vadd.f32 %v9184_v14, %v9172_v24  ;;  %v9374_v14 = vrot.slane %v12283_v42, 4 }
0x214e   :  { %v9198_v40 = vadd.f32 %v9197_v6, %v9185_v44 }
0x214f   :  { %v9210_v15 = vpop.f32.mrf.mxu0  ;;  %v9223_v32 = vpop.f32.mrf.mxu1 }
0x2150   :  { %v9211_v50 = vadd.f32 %v9210_v15, %v9198_v40  ;;  %v9381_v15 = vrot.slane %v12284_v41, 4 }
0x2152   :  { %v9224_v46 = vadd.f32 %v9223_v32, %v9211_v50 }
0x2153   :  { %v9186_v52 = vpop.f32.mrf.mxu2  ;;  %v9199_v9 = vpop.f32.mrf.mxu3 }
0x2157   :  { %v9212_v48 = vpop.f32.mrf.mxu0  ;;  %v9225_v57 = vpop.f32.mrf.mxu1 }
0x215b   :  { %v9236_v58 = vpop.f32.mrf.mxu2  ;;  %v9249_v33 = vpop.f32.mrf.mxu3 }
0x215c   :  { %v9237_v10 = vadd.f32 %v9236_v58, %v9224_v46 }
0x215e   :  { %v9250_v30 = vadd.f32 %v9249_v33, %v9237_v10 }
0x2163   :  { %v9238_v63 = vpop.f32.mrf.mxu2  ;;  %v9251_v53 = vpop.f32.mrf.mxu3 }
0x216f   :  { %v9262_v1 = vpop.f32.mrf.mxu0  ;;  %v9275_v37 = vpop.f32.mrf.mxu1 }
0x2170   :  { %v9263_v16 = vadd.f32 %v9262_v1, %v9250_v30 }
0x2172   :  { %v9276_v23 = vadd.f32 %v9275_v37, %v9263_v16 }
0x2177   :  { %v9264_v19 = vpop.f32.mrf.mxu0  ;;  %v9277_v7 = vpop.f32.mrf.mxu1 }
0x217b   :  { %v9288_v38 = vpop.f32.mrf.mxu2  ;;  %v9301_v60 = vpop.f32.mrf.mxu3 }
0x217c   :  { %v9289_v59 = vadd.f32 %v9288_v38, %v9276_v23 }
0x217e   :  { %v9302_v51 = vadd.f32 %v9301_v60, %v9289_v59 }
0x2180   :  { %v9306_v39 = vrot.slane %v9302_v51, 4  ;;  %v9308_v43 = vadd.f32 %v9302_v51, %v14038_v26 }
0x2182   :  { %v9309_v55 = vadd.f32 %v9306_v39, %v14040_v25  ;;  %9312 = vst [vmem:[#allocation1] ss:$2 sm:$0xff] %v9308_v43 }
0x2183   :  { %v9290_v8 = vpop.f32.mrf.mxu2  ;;  %v9303_v31 = vpop.f32.mrf.mxu3 }
0x2184   :  { %9314 = vst [vmem:[#allocation1 + $0x1] ss:$2 sm:$0xff] %v9309_v55 }
0x218b   :  { %v9315_v22 = vld.sshfl [vmem:[#allocation1] sm:$0xff pattern:$0x75316420] }
0x218c   :  { %v9317_v18 = vsel %vm339_vm0, %v9315_v22, 0.0 }
0x218d   :  { %9318 = vadd.xlane.f32.xlu2 %v9317_v18 }
0x2200   :  { %v9319_v34 = vpop.xlane.xlu2 %9318 }
0x2201   :  { %v9320_v11 = vmul.f32 %v9319_v34, %v13255_v3 }
0x2203   :  { %v9325_v27 = vperm.slane %v9320_v11, %v13510_v20  ;;  %v9329_v17 = vperm.slane %v9320_v11, %v13512_v49 }
0x2205   :  { %v9332_v29 = vsub.f32 %v9308_v43, %v9325_v27  ;;  %v9333_v0 = vsub.f32 %v9309_v55, %v9329_v17 }
0x2207   :  { %v9334_v26 = vmul.f32 %v9332_v29, %v9332_v29  ;;  %v9335_v45 = vmul.f32 %v9333_v0, %v9333_v0 }
0x2209   :  { %9338 = vst [vmem:[#allocation1] ss:$2 sm:$0xff] %v9334_v26 }
0x220a   :  { %9340 = vst [vmem:[#allocation1 + $0x1] ss:$2 sm:$0xff] %v9335_v45 }
0x2211   :  { %v9341_v25 = vld.sshfl [vmem:[#allocation1] sm:$0xff pattern:$0x75316420] }
0x2212   :  { %v9343_v13 = vsel %vm339_vm0, %v9341_v25, 0.0 }
0x2213   :  { %9344 = vadd.xlane.f32.xlu1 %v9343_v13 }
0x2286   :  { %v9345_v35 = vpop.xlane.xlu1 %9344 }
0x2287   :  { %v9346_v28 = vmul.f32 %v9345_v35, %v13255_v3 }
0x2289   :  { %v9347_v12 = vadd.f32 1e-05, %v9346_v28 }
0x228b   :  { %12429 = vrsqrt.f32 %v9347_v12  ;;  %vm9354_vm5 = vweird.f32 %v9347_v12 }
0x2291   :  { %v12430_v47 = vpop.eup %12429 }
0x2292   :  { %v9349_v54 = vmul.f32 %v12430_v47, %v9347_v12  ;;  %vm9355_vm7 = vweird.f32 %v12430_v47 }
0x2293   :  { %vm9356_vm0 = vmor %vm9354_vm5, %vm9355_vm7 }
0x2294   :  { %v9350_v4 = vmul.f32 %v12430_v47, %v9349_v54 }
0x2296   :  { %v9351_v2 = vmul.f32 0.5, %v9350_v4 }
0x2298   :  { %v9352_v61 = vsub.f32 1.5, %v9351_v2 }
0x229a   :  { %v9353_v5 = vmul.f32 %v12430_v47, %v9352_v61 }
0x229c   :  { %v9357_v3 = vsel %vm9356_vm0, %v12430_v47, %v9353_v5 }
0x229d   :  { %v9362_v6 = vperm.slane %v9357_v3, %v13510_v20  ;;  %v9366_v62 = vperm.slane %v9357_v3, %v13512_v49 }
0x229f   :  { %v9369_v32 = vmul.f32 %v9362_v6, %v9332_v29  ;;  %v9370_v36 = vmul.f32 %v9366_v62, %v9333_v0 }
0x22a1   :  { %v9376_v52 = vmul.f32 %v12283_v42, %v9369_v32  ;;  %v9377_v9 = vmul.f32 %v9374_v14, %v9370_v36 }
0x22a3   :  { %v9383_v56 = vadd.f32 %v12284_v41, %v9376_v52  ;;  %v9384_v48 = vadd.f32 %v9381_v15, %v9377_v9 }
0x22a5   :  { %9386 = vst.msk [vmem:[#allocation16] sm:$0xf] %vm9385_vm8, %v9383_v56 }
0x22a6   :  { %9387 = vst.msk [vmem:[#allocation16 + $0x4] sm:$0xf] %vm9385_vm8, %v9384_v48 }
0x22a7   :  { %9400 = dma.vmem_to_hbm [thread:$0]  %s9393_s24, 128, %s9395_s27, [#allocation4], %s12660_s2, %s12660_s2, %s12661_s5  }
0x22a8   :  { %12657 = dma.done.wait [#allocation4], 128  }
0x22a9   :  { %12658 = vsyncadd [#allocation4], 4294967168 }
0x22aa   :  { %9405 = vsyncpa [#allocation3], 1 }
0x22ab   :  { %9406 = vsyncpa [#allocation6], 1 }
0x22ac   :  { %9407 = vsyncpa [#allocation9], 1 }
0x22ad   :  { %9408 = vsyncpa [#allocation12], 1 }
0x22ae   :  { %9409 = vsyncpa [#allocation15], 1 }
0x22af   :  { %9410 = vsyncpa [#allocation4], 1 }

</bundles_post_ra>
